<compile_context>
chip_gen: v6e
topology: v6e:2x2x1
jax: 0.10.0
libtpu: 0.0.40
codegen_flags: <defaults>
</compile_context>

<pallas_src>
import jax
import jax.numpy as jnp
import numpy as np
from jax import lax
from jax.experimental import pallas as pl
from jax.experimental.pallas import tpu as pltpu


def make_attention_kernel(num_heads: int, head_dim: int, seq_len: int,
                          batches_per_step: int, compute_dtype):
    C = num_heads * head_dim
    N = seq_len
    dt = compute_dtype

    def kernel(x_ref, wqkv_ref, wp_ref, bp_ref, o_ref, qkv_scr, attn_scr):
        # x_ref/o_ref: (rows, C) with rows = batches_per_step * N (batch folded into M)
        # wqkv_ref: (C, 3C) bf16, Q columns pre-scaled; wp_ref: (C, C) bf16; bp_ref: (1, C) f32
        # qkv_scr: (rows, 3C) f32 VMEM; attn_scr: (rows, C) compute-dtype VMEM

        # Fused QKV projection: one wide MXU pass over all folded-batch rows,
        # f32 accumulation, result parked in VMEM scratch (ref-sliced below).
        qkv_scr[...] = jnp.dot(x_ref[...], wqkv_ref[...],
                               preferred_element_type=jnp.float32)

        # Attention is batch-separated: per (batch-in-step, head), softmax over N keys.
        for b in range(batches_per_step):
            r0 = b * N
            for h in range(num_heads):
                lo = h * head_dim
                # Static ref slices -> plain vld, nothing held live across the loop.
                qh = qkv_scr[r0:r0 + N, lo:lo + head_dim].astype(dt)              # (N, Dh), pre-scaled
                kh = qkv_scr[r0:r0 + N, C + lo:C + lo + head_dim].astype(dt)      # (N, Dh)
                vh = qkv_scr[r0:r0 + N, 2 * C + lo:2 * C + lo + head_dim].astype(dt)

                # q @ k^T via dot_general contracting last axes -> no XLU transpose.
                s = lax.dot_general(qh, kh, (((1,), (1,)), ((), ())),
                                    preferred_element_type=jnp.float32)           # (N, N) f32

                # Row-stable softmax in f32; normalization deferred to PV result.
                s = s - jnp.max(s, axis=-1, keepdims=True)
                p = jnp.exp(s)
                l = jnp.sum(p, axis=-1, keepdims=True)                            # (N, 1)

                head_out = jnp.dot(p.astype(dt), vh,
                                   preferred_element_type=jnp.float32)            # (N, Dh) f32
                head_out = head_out * pl.reciprocal(l, approx=True)               # EUP vrcp

                # Drop the head output into its 16-lane column of the concat scratch.
                attn_scr[r0:r0 + N, lo:lo + head_dim] = head_out.astype(attn_scr.dtype)

        # Single K=C output projection over all rows/heads (Wproj read once,
        # full systolic depth), f32 accumulation, bias added in f32.
        proj = jnp.dot(attn_scr[...], wp_ref[...], preferred_element_type=jnp.float32)
        o_ref[...] = (proj + bp_ref[...]).astype(o_ref.dtype)

    return kernel


def attention_pallas(x, w_qkv, w_proj, b_proj, num_heads,
                     qk_scale=None, compute_dtype=jnp.bfloat16):
    """x: (B, N, C); w_qkv: (3C, C) PyTorch layout; w_proj: (C, C); b_proj: (C,).

    compute_dtype: dtype fed to the MXU (bf16 by default). Softmax math, all
    accumulations and the bias add stay f32; output dtype matches x.dtype.
    """
    B, N, C = x.shape
    head_dim = C // num_heads
    scale = qk_scale if qk_scale is not None else head_dim ** (-0.5)
    dt = compute_dtype if compute_dtype is not None else x.dtype

    # PyTorch Linear is y = x @ W^T: pre-transpose once, fuse the three projections
    # into a single (C, 3C) operand, and bake the softmax scale into the Q columns.
    wq_t = w_qkv[0 * C:1 * C, :].T * scale
    wk_t = w_qkv[1 * C:2 * C, :].T
    wv_t = w_qkv[2 * C:3 * C, :].T
    wqkv_t = jnp.concatenate([wq_t, wk_t, wv_t], axis=1).astype(dt)   # (C, 3C)
    wp_t = w_proj.T.astype(dt)                                        # (C, C)
    bp = b_proj.reshape(1, C).astype(jnp.float32)                     # bias stays f32

    # Fold batch into the M dimension so the dense matmuls see >=128 rows when the
    # sequence is short (fills the MXU sublanes); attention stays batch-separated
    # inside the kernel.  bps must divide B.
    target_rows = 128
    if N >= target_rows:
        bps = 1
    else:
        bps = max(1, min(B, target_rows // N))
        while B % bps != 0:
            bps -= 1
    rows = bps * N
    grid = (B // bps,)

    x_rows = x.reshape(B * N, C).astype(dt)
    kernel = make_attention_kernel(num_heads, head_dim, N, bps, dt)

    itemsize = jnp.dtype(dt).itemsize
    flops = (2 * B * N * C * 3 * C                 # QKV projection
             + 4 * B * num_heads * N * N * head_dim  # scores + PV
             + 2 * B * N * C * C)                  # output projection
    transcendentals = B * num_heads * N * N        # softmax exp
    bytes_accessed = (B * N * C * itemsize         # x in
                      + C * 3 * C * itemsize       # Wqkv
                      + C * C * itemsize           # Wproj
                      + C * 4                      # bias
                      + B * N * C * x.dtype.itemsize)  # out

    # TODO(synk): for real t2t-vit sequence lengths (N ~ 3136) this must become a
    # flash-style grid=(B, N//tq, N//tk) kernel ("parallel","parallel","arbitrary")
    # with online-softmax m/l/acc scratch -- a single head's (N, N) f32 score matrix
    # (~39 MiB) cannot fit v7x's 64 MiB VMEM; the extra query-tile parallel axis also
    # keeps both v7x TensorCores busy (here the folded-batch grid collapses to 1 step,
    # trading v7x core parallelism for full MXU rows at this tiny shape).
    out = pl.pallas_call(
        kernel,
        out_shape=jax.ShapeDtypeStruct((B * N, C), x.dtype),
        grid_spec=pltpu.PrefetchScalarGridSpec(
            num_scalar_prefetch=0,
            grid=grid,
            in_specs=[
                pl.BlockSpec((rows, C), lambda i: (i, 0)),     # folded-batch x rows
                pl.BlockSpec((C, 3 * C), lambda i: (0, 0)),    # Wqkv^T (Q pre-scaled)
                pl.BlockSpec((C, C), lambda i: (0, 0)),        # Wproj^T
                pl.BlockSpec((1, C), lambda i: (0, 0)),        # proj bias
            ],
            out_specs=pl.BlockSpec((rows, C), lambda i: (i, 0)),
            scratch_shapes=[
                pltpu.VMEM((rows, 3 * C), jnp.float32),        # qkv scratch (f32 acc)
                pltpu.VMEM((rows, C), dt),                     # per-head concat scratch
            ],
        ),
        compiler_params=pltpu.CompilerParams(
            dimension_semantics=("parallel",),
            vmem_limit_bytes=32 * 1024 * 1024,   # explicit budget; safe on v5e/v6e/v7x
        ),
        cost_estimate=pl.CostEstimate(flops=flops,
                                      transcendentals=transcendentals,
                                      bytes_accessed=bytes_accessed),
    )(x_rows, wqkv_t, wp_t, bp)

    return out.reshape(B, N, C)


def attention_reference(x, w_qkv, w_proj, b_proj, num_heads):
    """Pure-JAX f32 reference mirroring the PyTorch forward."""
    B, N, C = x.shape
    Dh = C // num_heads
    scale = Dh ** (-0.5)
    qkv = jnp.einsum("bnc,oc->bno", x, w_qkv)                       # (B, N, 3C)
    qkv = qkv.reshape(B, N, 3, num_heads, Dh).transpose(2, 0, 3, 1, 4)
    q, k, v = qkv[0], qkv[1], qkv[2]                                # (B, H, N, Dh)
    attn = jnp.einsum("bhnd,bhmd->bhnm", q, k) * scale
    attn = jax.nn.softmax(attn, axis=-1)
    out = jnp.einsum("bhnm,bhmd->bhnd", attn, v)                    # (B, H, N, Dh)
    out = out.transpose(0, 2, 1, 3).reshape(B, N, C)
    return jnp.einsum("bnc,oc->bno", out, w_proj) + b_proj


if __name__ == "__main__":
    B, N, C = 2, 64, 128
    num_heads = 8   # head_dim = 16; C=128 keeps the output lane-dense

    key = jax.random.PRNGKey(0)
    k_x, k_qkv, k_proj, k_bias = jax.random.split(key, 4)

    x = jax.random.normal(k_x, (B, N, C), dtype=jnp.float32)
    w_qkv = jax.random.normal(k_qkv, (3 * C, C), dtype=jnp.float32) * 0.02
    w_proj = jax.random.normal(k_proj, (C, C), dtype=jnp.float32) * 0.02
    b_proj = jax.random.normal(k_bias, (C,), dtype=jnp.float32) * 0.02

    out = attention_pallas(x, w_qkv, w_proj, b_proj, num_heads)   # bf16 compute path
    out = jax.block_until_ready(out)

    ref = attention_reference(x, w_qkv, w_proj, b_proj, num_heads)
    # Tolerance vs the f32 reference: bf16 MXU inputs (x / weights / softmax probs)
    # plus the EUP approx reciprocal give ~1e-4 absolute error at this output
    # magnitude (~0.02); bounds below leave >10x margin while still catching
    # head-mapping / transpose bugs.
    np.testing.assert_allclose(np.asarray(out), np.asarray(ref), atol=5e-3, rtol=2e-2)

    print("KERNEL_OK")
</pallas_src>

<mosaic_0001>
module attributes {stable_mosaic.version = 11 : i64} {
  func.func @kernel(%arg0: i32, %arg1: memref<128x128xbf16, #tpu.memory_space<vmem>>, %arg2: memref<128x384xbf16, #tpu.memory_space<vmem>>, %arg3: memref<128x128xbf16, #tpu.memory_space<vmem>>, %arg4: memref<1x128xf32, #tpu.memory_space<vmem>>, %arg5: memref<128x128xf32, #tpu.memory_space<vmem>>, %arg6: memref<128x384xf32, #tpu.memory_space<vmem>>, %arg7: memref<128x128xbf16, #tpu.memory_space<vmem>>) attributes {dimension_semantics = [#tpu.dimension_semantics<parallel>], iteration_bounds = array<i64: 1>, scalar_prefetch = 0 : i64, scratch_operands = 2 : i64, tpu.core_type = #tpu.core_type<tc>, window_params = [{transform_indices = @transform_0, window_bounds = array<i64: 128, 128>}, {pipeline_mode = #tpu.pipeline_mode<synchronous>, transform_indices = @transform_1, window_bounds = array<i64: 128, 384>}, {pipeline_mode = #tpu.pipeline_mode<synchronous>, transform_indices = @transform_2, window_bounds = array<i64: 128, 128>}, {pipeline_mode = #tpu.pipeline_mode<synchronous>, transform_indices = @transform_3, window_bounds = array<i64: 1, 128>}, {transform_indices = @transform_4, window_bounds = array<i64: 128, 128>}]} {
    %c0 = arith.constant 0 : index
    %c0_0 = arith.constant 0 : index
    %0 = vector.load %arg1[%c0, %c0_0] : memref<128x128xbf16, #tpu.memory_space<vmem>>, vector<128x128xbf16>
    %c0_1 = arith.constant 0 : index
    %c0_2 = arith.constant 0 : index
    %1 = vector.load %arg2[%c0_1, %c0_2] : memref<128x384xbf16, #tpu.memory_space<vmem>>, vector<128x384xbf16>
    %cst = arith.constant dense<0.000000e+00> : vector<128x384xf32>
    %2 = tpu.matmul %0, %1, %cst {dimension_numbers = #tpu.dot_dimension_numbers<[1], [0], [0], [1], [0, 0, 1, 1], [], []>} : vector<128x128xbf16>, vector<128x384xbf16>, vector<128x384xf32> -> vector<128x384xf32>
    %c0_3 = arith.constant 0 : index
    %c0_4 = arith.constant 0 : index
    %3 = vector.load %arg6[%c0_3, %c0_4] : memref<128x384xf32, #tpu.memory_space<vmem>>, vector<128x384xf32>
    tpu.vector_store %arg6[%c0_3, %c0_4], %2 {strides = array<i32>} : memref<128x384xf32, #tpu.memory_space<vmem>>, vector<128x384xf32>,
    %c0_5 = arith.constant 0 : index
    %c0_6 = arith.constant 0 : index
    %4 = vector.load %arg6[%c0_5, %c0_6] : memref<128x384xf32, #tpu.memory_space<vmem>>, vector<64x16xf32>
    %5 = arith.truncf %4 : vector<64x16xf32> to vector<64x16xbf16>
    %c0_7 = arith.constant 0 : index
    %c128 = arith.constant 128 : index
    %6 = vector.load %arg6[%c0_7, %c128] : memref<128x384xf32, #tpu.memory_space<vmem>>, vector<64x16xf32>
    %7 = arith.truncf %6 : vector<64x16xf32> to vector<64x16xbf16>
    %c0_8 = arith.constant 0 : index
    %c256 = arith.constant 256 : index
    %8 = vector.load %arg6[%c0_8, %c256] : memref<128x384xf32, #tpu.memory_space<vmem>>, vector<64x16xf32>
    %9 = arith.truncf %8 : vector<64x16xf32> to vector<64x16xbf16>
    %cst_9 = arith.constant dense<0.000000e+00> : vector<64x64xf32>
    %10 = tpu.matmul %5, %7, %cst_9 {dimension_numbers = #tpu.dot_dimension_numbers<[1], [1], [0], [0], [0, 0, 1, 0], [], []>} : vector<64x16xbf16>, vector<64x16xbf16>, vector<64x64xf32> -> vector<64x64xf32>
    %cst_10 = arith.constant dense<0xFF800000> : vector<64xf32>
    %11 = vector.multi_reduction <maximumf>, %10, %cst_10 [1] : vector<64x64xf32> to vector<64xf32>
    %12 = vector.shape_cast %11 : vector<64xf32> to vector<64x1xf32>
    %13 = vector.broadcast %12 : vector<64x1xf32> to vector<64x64xf32>
    %14 = arith.subf %10, %13 : vector<64x64xf32>
    %15 = math.exp %14 : vector<64x64xf32>
    %cst_11 = arith.constant dense<0.000000e+00> : vector<64xf32>
    %16 = vector.multi_reduction <add>, %15, %cst_11 [1] : vector<64x64xf32> to vector<64xf32>
    %17 = vector.shape_cast %16 : vector<64xf32> to vector<64x1xf32>
    %18 = arith.truncf %15 : vector<64x64xf32> to vector<64x64xbf16>
    %cst_12 = arith.constant dense<0.000000e+00> : vector<64x16xf32>
    %19 = tpu.matmul %18, %9, %cst_12 {dimension_numbers = #tpu.dot_dimension_numbers<[1], [0], [0], [1], [0, 0, 1, 1], [], []>} : vector<64x64xbf16>, vector<64x16xbf16>, vector<64x16xf32> -> vector<64x16xf32>
    %20 = tpu.reciprocal %17 {approx = true} : vector<64x1xf32> -> vector<64x1xf32>
    %21 = vector.broadcast %20 : vector<64x1xf32> to vector<64x16xf32>
    %22 = arith.mulf %19, %21 : vector<64x16xf32>
    %23 = arith.truncf %22 : vector<64x16xf32> to vector<64x16xbf16>
    %c0_13 = arith.constant 0 : index
    %c0_14 = arith.constant 0 : index
    %24 = vector.load %arg7[%c0_13, %c0_14] : memref<128x128xbf16, #tpu.memory_space<vmem>>, vector<64x16xbf16>
    tpu.vector_store %arg7[%c0_13, %c0_14], %23 {strides = array<i32>} : memref<128x128xbf16, #tpu.memory_space<vmem>>, vector<64x16xbf16>,
    %c0_15 = arith.constant 0 : index
    %c16 = arith.constant 16 : index
    %25 = vector.load %arg6[%c0_15, %c16] : memref<128x384xf32, #tpu.memory_space<vmem>>, vector<64x16xf32>
    %26 = arith.truncf %25 : vector<64x16xf32> to vector<64x16xbf16>
    %c0_16 = arith.constant 0 : index
    %c144 = arith.constant 144 : index
    %27 = vector.load %arg6[%c0_16, %c144] : memref<128x384xf32, #tpu.memory_space<vmem>>, vector<64x16xf32>
    %28 = arith.truncf %27 : vector<64x16xf32> to vector<64x16xbf16>
    %c0_17 = arith.constant 0 : index
    %c272 = arith.constant 272 : index
    %29 = vector.load %arg6[%c0_17, %c272] : memref<128x384xf32, #tpu.memory_space<vmem>>, vector<64x16xf32>
    %30 = arith.truncf %29 : vector<64x16xf32> to vector<64x16xbf16>
    %cst_18 = arith.constant dense<0.000000e+00> : vector<64x64xf32>
    %31 = tpu.matmul %26, %28, %cst_18 {dimension_numbers = #tpu.dot_dimension_numbers<[1], [1], [0], [0], [0, 0, 1, 0], [], []>} : vector<64x16xbf16>, vector<64x16xbf16>, vector<64x64xf32> -> vector<64x64xf32>
    %cst_19 = arith.constant dense<0xFF800000> : vector<64xf32>
    %32 = vector.multi_reduction <maximumf>, %31, %cst_19 [1] : vector<64x64xf32> to vector<64xf32>
    %33 = vector.shape_cast %32 : vector<64xf32> to vector<64x1xf32>
    %34 = vector.broadcast %33 : vector<64x1xf32> to vector<64x64xf32>
    %35 = arith.subf %31, %34 : vector<64x64xf32>
    %36 = math.exp %35 : vector<64x64xf32>
    %cst_20 = arith.constant dense<0.000000e+00> : vector<64xf32>
    %37 = vector.multi_reduction <add>, %36, %cst_20 [1] : vector<64x64xf32> to vector<64xf32>
    %38 = vector.shape_cast %37 : vector<64xf32> to vector<64x1xf32>
    %39 = arith.truncf %36 : vector<64x64xf32> to vector<64x64xbf16>
    %cst_21 = arith.constant dense<0.000000e+00> : vector<64x16xf32>
    %40 = tpu.matmul %39, %30, %cst_21 {dimension_numbers = #tpu.dot_dimension_numbers<[1], [0], [0], [1], [0, 0, 1, 1], [], []>} : vector<64x64xbf16>, vector<64x16xbf16>, vector<64x16xf32> -> vector<64x16xf32>
    %41 = tpu.reciprocal %38 {approx = true} : vector<64x1xf32> -> vector<64x1xf32>
    %42 = vector.broadcast %41 : vector<64x1xf32> to vector<64x16xf32>
    %43 = arith.mulf %40, %42 : vector<64x16xf32>
    %44 = arith.truncf %43 : vector<64x16xf32> to vector<64x16xbf16>
    %c0_22 = arith.constant 0 : index
    %c16_23 = arith.constant 16 : index
    %45 = vector.load %arg7[%c0_22, %c16_23] : memref<128x128xbf16, #tpu.memory_space<vmem>>, vector<64x16xbf16>
    tpu.vector_store %arg7[%c0_22, %c16_23], %44 {strides = array<i32>} : memref<128x128xbf16, #tpu.memory_space<vmem>>, vector<64x16xbf16>,
    %c0_24 = arith.constant 0 : index
    %c32 = arith.constant 32 : index
    %46 = vector.load %arg6[%c0_24, %c32] : memref<128x384xf32, #tpu.memory_space<vmem>>, vector<64x16xf32>
    %47 = arith.truncf %46 : vector<64x16xf32> to vector<64x16xbf16>
    %c0_25 = arith.constant 0 : index
    %c160 = arith.constant 160 : index
    %48 = vector.load %arg6[%c0_25, %c160] : memref<128x384xf32, #tpu.memory_space<vmem>>, vector<64x16xf32>
    %49 = arith.truncf %48 : vector<64x16xf32> to vector<64x16xbf16>
    %c0_26 = arith.constant 0 : index
    %c288 = arith.constant 288 : index
    %50 = vector.load %arg6[%c0_26, %c288] : memref<128x384xf32, #tpu.memory_space<vmem>>, vector<64x16xf32>
    %51 = arith.truncf %50 : vector<64x16xf32> to vector<64x16xbf16>
    %cst_27 = arith.constant dense<0.000000e+00> : vector<64x64xf32>
    %52 = tpu.matmul %47, %49, %cst_27 {dimension_numbers = #tpu.dot_dimension_numbers<[1], [1], [0], [0], [0, 0, 1, 0], [], []>} : vector<64x16xbf16>, vector<64x16xbf16>, vector<64x64xf32> -> vector<64x64xf32>
    %cst_28 = arith.constant dense<0xFF800000> : vector<64xf32>
    %53 = vector.multi_reduction <maximumf>, %52, %cst_28 [1] : vector<64x64xf32> to vector<64xf32>
    %54 = vector.shape_cast %53 : vector<64xf32> to vector<64x1xf32>
    %55 = vector.broadcast %54 : vector<64x1xf32> to vector<64x64xf32>
    %56 = arith.subf %52, %55 : vector<64x64xf32>
    %57 = math.exp %56 : vector<64x64xf32>
    %cst_29 = arith.constant dense<0.000000e+00> : vector<64xf32>
    %58 = vector.multi_reduction <add>, %57, %cst_29 [1] : vector<64x64xf32> to vector<64xf32>
    %59 = vector.shape_cast %58 : vector<64xf32> to vector<64x1xf32>
    %60 = arith.truncf %57 : vector<64x64xf32> to vector<64x64xbf16>
    %cst_30 = arith.constant dense<0.000000e+00> : vector<64x16xf32>
    %61 = tpu.matmul %60, %51, %cst_30 {dimension_numbers = #tpu.dot_dimension_numbers<[1], [0], [0], [1], [0, 0, 1, 1], [], []>} : vector<64x64xbf16>, vector<64x16xbf16>, vector<64x16xf32> -> vector<64x16xf32>
    %62 = tpu.reciprocal %59 {approx = true} : vector<64x1xf32> -> vector<64x1xf32>
    %63 = vector.broadcast %62 : vector<64x1xf32> to vector<64x16xf32>
    %64 = arith.mulf %61, %63 : vector<64x16xf32>
    %65 = arith.truncf %64 : vector<64x16xf32> to vector<64x16xbf16>
    %c0_31 = arith.constant 0 : index
    %c32_32 = arith.constant 32 : index
    %66 = vector.load %arg7[%c0_31, %c32_32] : memref<128x128xbf16, #tpu.memory_space<vmem>>, vector<64x16xbf16>
    tpu.vector_store %arg7[%c0_31, %c32_32], %65 {strides = array<i32>} : memref<128x128xbf16, #tpu.memory_space<vmem>>, vector<64x16xbf16>,
    %c0_33 = arith.constant 0 : index
    %c48 = arith.constant 48 : index
    %67 = vector.load %arg6[%c0_33, %c48] : memref<128x384xf32, #tpu.memory_space<vmem>>, vector<64x16xf32>
    %68 = arith.truncf %67 : vector<64x16xf32> to vector<64x16xbf16>
    %c0_34 = arith.constant 0 : index
    %c176 = arith.constant 176 : index
    %69 = vector.load %arg6[%c0_34, %c176] : memref<128x384xf32, #tpu.memory_space<vmem>>, vector<64x16xf32>
    %70 = arith.truncf %69 : vector<64x16xf32> to vector<64x16xbf16>
    %c0_35 = arith.constant 0 : index
    %c304 = arith.constant 304 : index
    %71 = vector.load %arg6[%c0_35, %c304] : memref<128x384xf32, #tpu.memory_space<vmem>>, vector<64x16xf32>
    %72 = arith.truncf %71 : vector<64x16xf32> to vector<64x16xbf16>
    %cst_36 = arith.constant dense<0.000000e+00> : vector<64x64xf32>
    %73 = tpu.matmul %68, %70, %cst_36 {dimension_numbers = #tpu.dot_dimension_numbers<[1], [1], [0], [0], [0, 0, 1, 0], [], []>} : vector<64x16xbf16>, vector<64x16xbf16>, vector<64x64xf32> -> vector<64x64xf32>
    %cst_37 = arith.constant dense<0xFF800000> : vector<64xf32>
    %74 = vector.multi_reduction <maximumf>, %73, %cst_37 [1] : vector<64x64xf32> to vector<64xf32>
    %75 = vector.shape_cast %74 : vector<64xf32> to vector<64x1xf32>
    %76 = vector.broadcast %75 : vector<64x1xf32> to vector<64x64xf32>
    %77 = arith.subf %73, %76 : vector<64x64xf32>
    %78 = math.exp %77 : vector<64x64xf32>
    %cst_38 = arith.constant dense<0.000000e+00> : vector<64xf32>
    %79 = vector.multi_reduction <add>, %78, %cst_38 [1] : vector<64x64xf32> to vector<64xf32>
    %80 = vector.shape_cast %79 : vector<64xf32> to vector<64x1xf32>
    %81 = arith.truncf %78 : vector<64x64xf32> to vector<64x64xbf16>
    %cst_39 = arith.constant dense<0.000000e+00> : vector<64x16xf32>
    %82 = tpu.matmul %81, %72, %cst_39 {dimension_numbers = #tpu.dot_dimension_numbers<[1], [0], [0], [1], [0, 0, 1, 1], [], []>} : vector<64x64xbf16>, vector<64x16xbf16>, vector<64x16xf32> -> vector<64x16xf32>
    %83 = tpu.reciprocal %80 {approx = true} : vector<64x1xf32> -> vector<64x1xf32>
    %84 = vector.broadcast %83 : vector<64x1xf32> to vector<64x16xf32>
    %85 = arith.mulf %82, %84 : vector<64x16xf32>
    %86 = arith.truncf %85 : vector<64x16xf32> to vector<64x16xbf16>
    %c0_40 = arith.constant 0 : index
    %c48_41 = arith.constant 48 : index
    %87 = vector.load %arg7[%c0_40, %c48_41] : memref<128x128xbf16, #tpu.memory_space<vmem>>, vector<64x16xbf16>
    tpu.vector_store %arg7[%c0_40, %c48_41], %86 {strides = array<i32>} : memref<128x128xbf16, #tpu.memory_space<vmem>>, vector<64x16xbf16>,
    %c0_42 = arith.constant 0 : index
    %c64 = arith.constant 64 : index
    %88 = vector.load %arg6[%c0_42, %c64] : memref<128x384xf32, #tpu.memory_space<vmem>>, vector<64x16xf32>
    %89 = arith.truncf %88 : vector<64x16xf32> to vector<64x16xbf16>
    %c0_43 = arith.constant 0 : index
    %c192 = arith.constant 192 : index
    %90 = vector.load %arg6[%c0_43, %c192] : memref<128x384xf32, #tpu.memory_space<vmem>>, vector<64x16xf32>
    %91 = arith.truncf %90 : vector<64x16xf32> to vector<64x16xbf16>
    %c0_44 = arith.constant 0 : index
    %c320 = arith.constant 320 : index
    %92 = vector.load %arg6[%c0_44, %c320] : memref<128x384xf32, #tpu.memory_space<vmem>>, vector<64x16xf32>
    %93 = arith.truncf %92 : vector<64x16xf32> to vector<64x16xbf16>
    %cst_45 = arith.constant dense<0.000000e+00> : vector<64x64xf32>
    %94 = tpu.matmul %89, %91, %cst_45 {dimension_numbers = #tpu.dot_dimension_numbers<[1], [1], [0], [0], [0, 0, 1, 0], [], []>} : vector<64x16xbf16>, vector<64x16xbf16>, vector<64x64xf32> -> vector<64x64xf32>
    %cst_46 = arith.constant dense<0xFF800000> : vector<64xf32>
    %95 = vector.multi_reduction <maximumf>, %94, %cst_46 [1] : vector<64x64xf32> to vector<64xf32>
    %96 = vector.shape_cast %95 : vector<64xf32> to vector<64x1xf32>
    %97 = vector.broadcast %96 : vector<64x1xf32> to vector<64x64xf32>
    %98 = arith.subf %94, %97 : vector<64x64xf32>
    %99 = math.exp %98 : vector<64x64xf32>
    %cst_47 = arith.constant dense<0.000000e+00> : vector<64xf32>
    %100 = vector.multi_reduction <add>, %99, %cst_47 [1] : vector<64x64xf32> to vector<64xf32>
    %101 = vector.shape_cast %100 : vector<64xf32> to vector<64x1xf32>
    %102 = arith.truncf %99 : vector<64x64xf32> to vector<64x64xbf16>
    %cst_48 = arith.constant dense<0.000000e+00> : vector<64x16xf32>
    %103 = tpu.matmul %102, %93, %cst_48 {dimension_numbers = #tpu.dot_dimension_numbers<[1], [0], [0], [1], [0, 0, 1, 1], [], []>} : vector<64x64xbf16>, vector<64x16xbf16>, vector<64x16xf32> -> vector<64x16xf32>
    %104 = tpu.reciprocal %101 {approx = true} : vector<64x1xf32> -> vector<64x1xf32>
    %105 = vector.broadcast %104 : vector<64x1xf32> to vector<64x16xf32>
    %106 = arith.mulf %103, %105 : vector<64x16xf32>
    %107 = arith.truncf %106 : vector<64x16xf32> to vector<64x16xbf16>
    %c0_49 = arith.constant 0 : index
    %c64_50 = arith.constant 64 : index
    %108 = vector.load %arg7[%c0_49, %c64_50] : memref<128x128xbf16, #tpu.memory_space<vmem>>, vector<64x16xbf16>
    tpu.vector_store %arg7[%c0_49, %c64_50], %107 {strides = array<i32>} : memref<128x128xbf16, #tpu.memory_space<vmem>>, vector<64x16xbf16>,
    %c0_51 = arith.constant 0 : index
    %c80 = arith.constant 80 : index
    %109 = vector.load %arg6[%c0_51, %c80] : memref<128x384xf32, #tpu.memory_space<vmem>>, vector<64x16xf32>
    %110 = arith.truncf %109 : vector<64x16xf32> to vector<64x16xbf16>
    %c0_52 = arith.constant 0 : index
    %c208 = arith.constant 208 : index
    %111 = vector.load %arg6[%c0_52, %c208] : memref<128x384xf32, #tpu.memory_space<vmem>>, vector<64x16xf32>
    %112 = arith.truncf %111 : vector<64x16xf32> to vector<64x16xbf16>
    %c0_53 = arith.constant 0 : index
    %c336 = arith.constant 336 : index
    %113 = vector.load %arg6[%c0_53, %c336] : memref<128x384xf32, #tpu.memory_space<vmem>>, vector<64x16xf32>
    %114 = arith.truncf %113 : vector<64x16xf32> to vector<64x16xbf16>
    %cst_54 = arith.constant dense<0.000000e+00> : vector<64x64xf32>
    %115 = tpu.matmul %110, %112, %cst_54 {dimension_numbers = #tpu.dot_dimension_numbers<[1], [1], [0], [0], [0, 0, 1, 0], [], []>} : vector<64x16xbf16>, vector<64x16xbf16>, vector<64x64xf32> -> vector<64x64xf32>
    %cst_55 = arith.constant dense<0xFF800000> : vector<64xf32>
    %116 = vector.multi_reduction <maximumf>, %115, %cst_55 [1] : vector<64x64xf32> to vector<64xf32>
    %117 = vector.shape_cast %116 : vector<64xf32> to vector<64x1xf32>
    %118 = vector.broadcast %117 : vector<64x1xf32> to vector<64x64xf32>
    %119 = arith.subf %115, %118 : vector<64x64xf32>
    %120 = math.exp %119 : vector<64x64xf32>
    %cst_56 = arith.constant dense<0.000000e+00> : vector<64xf32>
    %121 = vector.multi_reduction <add>, %120, %cst_56 [1] : vector<64x64xf32> to vector<64xf32>
    %122 = vector.shape_cast %121 : vector<64xf32> to vector<64x1xf32>
    %123 = arith.truncf %120 : vector<64x64xf32> to vector<64x64xbf16>
    %cst_57 = arith.constant dense<0.000000e+00> : vector<64x16xf32>
    %124 = tpu.matmul %123, %114, %cst_57 {dimension_numbers = #tpu.dot_dimension_numbers<[1], [0], [0], [1], [0, 0, 1, 1], [], []>} : vector<64x64xbf16>, vector<64x16xbf16>, vector<64x16xf32> -> vector<64x16xf32>
    %125 = tpu.reciprocal %122 {approx = true} : vector<64x1xf32> -> vector<64x1xf32>
    %126 = vector.broadcast %125 : vector<64x1xf32> to vector<64x16xf32>
    %127 = arith.mulf %124, %126 : vector<64x16xf32>
    %128 = arith.truncf %127 : vector<64x16xf32> to vector<64x16xbf16>
    %c0_58 = arith.constant 0 : index
    %c80_59 = arith.constant 80 : index
    %129 = vector.load %arg7[%c0_58, %c80_59] : memref<128x128xbf16, #tpu.memory_space<vmem>>, vector<64x16xbf16>
    tpu.vector_store %arg7[%c0_58, %c80_59], %128 {strides = array<i32>} : memref<128x128xbf16, #tpu.memory_space<vmem>>, vector<64x16xbf16>,
    %c0_60 = arith.constant 0 : index
    %c96 = arith.constant 96 : index
    %130 = vector.load %arg6[%c0_60, %c96] : memref<128x384xf32, #tpu.memory_space<vmem>>, vector<64x16xf32>
    %131 = arith.truncf %130 : vector<64x16xf32> to vector<64x16xbf16>
    %c0_61 = arith.constant 0 : index
    %c224 = arith.constant 224 : index
    %132 = vector.load %arg6[%c0_61, %c224] : memref<128x384xf32, #tpu.memory_space<vmem>>, vector<64x16xf32>
    %133 = arith.truncf %132 : vector<64x16xf32> to vector<64x16xbf16>
    %c0_62 = arith.constant 0 : index
    %c352 = arith.constant 352 : index
    %134 = vector.load %arg6[%c0_62, %c352] : memref<128x384xf32, #tpu.memory_space<vmem>>, vector<64x16xf32>
    %135 = arith.truncf %134 : vector<64x16xf32> to vector<64x16xbf16>
    %cst_63 = arith.constant dense<0.000000e+00> : vector<64x64xf32>
    %136 = tpu.matmul %131, %133, %cst_63 {dimension_numbers = #tpu.dot_dimension_numbers<[1], [1], [0], [0], [0, 0, 1, 0], [], []>} : vector<64x16xbf16>, vector<64x16xbf16>, vector<64x64xf32> -> vector<64x64xf32>
    %cst_64 = arith.constant dense<0xFF800000> : vector<64xf32>
    %137 = vector.multi_reduction <maximumf>, %136, %cst_64 [1] : vector<64x64xf32> to vector<64xf32>
    %138 = vector.shape_cast %137 : vector<64xf32> to vector<64x1xf32>
    %139 = vector.broadcast %138 : vector<64x1xf32> to vector<64x64xf32>
    %140 = arith.subf %136, %139 : vector<64x64xf32>
    %141 = math.exp %140 : vector<64x64xf32>
    %cst_65 = arith.constant dense<0.000000e+00> : vector<64xf32>
    %142 = vector.multi_reduction <add>, %141, %cst_65 [1] : vector<64x64xf32> to vector<64xf32>
    %143 = vector.shape_cast %142 : vector<64xf32> to vector<64x1xf32>
    %144 = arith.truncf %141 : vector<64x64xf32> to vector<64x64xbf16>
    %cst_66 = arith.constant dense<0.000000e+00> : vector<64x16xf32>
    %145 = tpu.matmul %144, %135, %cst_66 {dimension_numbers = #tpu.dot_dimension_numbers<[1], [0], [0], [1], [0, 0, 1, 1], [], []>} : vector<64x64xbf16>, vector<64x16xbf16>, vector<64x16xf32> -> vector<64x16xf32>
    %146 = tpu.reciprocal %143 {approx = true} : vector<64x1xf32> -> vector<64x1xf32>
    %147 = vector.broadcast %146 : vector<64x1xf32> to vector<64x16xf32>
    %148 = arith.mulf %145, %147 : vector<64x16xf32>
    %149 = arith.truncf %148 : vector<64x16xf32> to vector<64x16xbf16>
    %c0_67 = arith.constant 0 : index
    %c96_68 = arith.constant 96 : index
    %150 = vector.load %arg7[%c0_67, %c96_68] : memref<128x128xbf16, #tpu.memory_space<vmem>>, vector<64x16xbf16>
    tpu.vector_store %arg7[%c0_67, %c96_68], %149 {strides = array<i32>} : memref<128x128xbf16, #tpu.memory_space<vmem>>, vector<64x16xbf16>,
    %c0_69 = arith.constant 0 : index
    %c112 = arith.constant 112 : index
    %151 = vector.load %arg6[%c0_69, %c112] : memref<128x384xf32, #tpu.memory_space<vmem>>, vector<64x16xf32>
    %152 = arith.truncf %151 : vector<64x16xf32> to vector<64x16xbf16>
    %c0_70 = arith.constant 0 : index
    %c240 = arith.constant 240 : index
    %153 = vector.load %arg6[%c0_70, %c240] : memref<128x384xf32, #tpu.memory_space<vmem>>, vector<64x16xf32>
    %154 = arith.truncf %153 : vector<64x16xf32> to vector<64x16xbf16>
    %c0_71 = arith.constant 0 : index
    %c368 = arith.constant 368 : index
    %155 = vector.load %arg6[%c0_71, %c368] : memref<128x384xf32, #tpu.memory_space<vmem>>, vector<64x16xf32>
    %156 = arith.truncf %155 : vector<64x16xf32> to vector<64x16xbf16>
    %cst_72 = arith.constant dense<0.000000e+00> : vector<64x64xf32>
    %157 = tpu.matmul %152, %154, %cst_72 {dimension_numbers = #tpu.dot_dimension_numbers<[1], [1], [0], [0], [0, 0, 1, 0], [], []>} : vector<64x16xbf16>, vector<64x16xbf16>, vector<64x64xf32> -> vector<64x64xf32>
    %cst_73 = arith.constant dense<0xFF800000> : vector<64xf32>
    %158 = vector.multi_reduction <maximumf>, %157, %cst_73 [1] : vector<64x64xf32> to vector<64xf32>
    %159 = vector.shape_cast %158 : vector<64xf32> to vector<64x1xf32>
    %160 = vector.broadcast %159 : vector<64x1xf32> to vector<64x64xf32>
    %161 = arith.subf %157, %160 : vector<64x64xf32>
    %162 = math.exp %161 : vector<64x64xf32>
    %cst_74 = arith.constant dense<0.000000e+00> : vector<64xf32>
    %163 = vector.multi_reduction <add>, %162, %cst_74 [1] : vector<64x64xf32> to vector<64xf32>
    %164 = vector.shape_cast %163 : vector<64xf32> to vector<64x1xf32>
    %165 = arith.truncf %162 : vector<64x64xf32> to vector<64x64xbf16>
    %cst_75 = arith.constant dense<0.000000e+00> : vector<64x16xf32>
    %166 = tpu.matmul %165, %156, %cst_75 {dimension_numbers = #tpu.dot_dimension_numbers<[1], [0], [0], [1], [0, 0, 1, 1], [], []>} : vector<64x64xbf16>, vector<64x16xbf16>, vector<64x16xf32> -> vector<64x16xf32>
    %167 = tpu.reciprocal %164 {approx = true} : vector<64x1xf32> -> vector<64x1xf32>
    %168 = vector.broadcast %167 : vector<64x1xf32> to vector<64x16xf32>
    %169 = arith.mulf %166, %168 : vector<64x16xf32>
    %170 = arith.truncf %169 : vector<64x16xf32> to vector<64x16xbf16>
    %c0_76 = arith.constant 0 : index
    %c112_77 = arith.constant 112 : index
    %171 = vector.load %arg7[%c0_76, %c112_77] : memref<128x128xbf16, #tpu.memory_space<vmem>>, vector<64x16xbf16>
    tpu.vector_store %arg7[%c0_76, %c112_77], %170 {strides = array<i32>} : memref<128x128xbf16, #tpu.memory_space<vmem>>, vector<64x16xbf16>,
    %c64_78 = arith.constant 64 : index
    %c0_79 = arith.constant 0 : index
    %172 = vector.load %arg6[%c64_78, %c0_79] : memref<128x384xf32, #tpu.memory_space<vmem>>, vector<64x16xf32>
    %173 = arith.truncf %172 : vector<64x16xf32> to vector<64x16xbf16>
    %c64_80 = arith.constant 64 : index
    %c128_81 = arith.constant 128 : index
    %174 = vector.load %arg6[%c64_80, %c128_81] : memref<128x384xf32, #tpu.memory_space<vmem>>, vector<64x16xf32>
    %175 = arith.truncf %174 : vector<64x16xf32> to vector<64x16xbf16>
    %c64_82 = arith.constant 64 : index
    %c256_83 = arith.constant 256 : index
    %176 = vector.load %arg6[%c64_82, %c256_83] : memref<128x384xf32, #tpu.memory_space<vmem>>, vector<64x16xf32>
    %177 = arith.truncf %176 : vector<64x16xf32> to vector<64x16xbf16>
    %cst_84 = arith.constant dense<0.000000e+00> : vector<64x64xf32>
    %178 = tpu.matmul %173, %175, %cst_84 {dimension_numbers = #tpu.dot_dimension_numbers<[1], [1], [0], [0], [0, 0, 1, 0], [], []>} : vector<64x16xbf16>, vector<64x16xbf16>, vector<64x64xf32> -> vector<64x64xf32>
    %cst_85 = arith.constant dense<0xFF800000> : vector<64xf32>
    %179 = vector.multi_reduction <maximumf>, %178, %cst_85 [1] : vector<64x64xf32> to vector<64xf32>
    %180 = vector.shape_cast %179 : vector<64xf32> to vector<64x1xf32>
    %181 = vector.broadcast %180 : vector<64x1xf32> to vector<64x64xf32>
    %182 = arith.subf %178, %181 : vector<64x64xf32>
    %183 = math.exp %182 : vector<64x64xf32>
    %cst_86 = arith.constant dense<0.000000e+00> : vector<64xf32>
    %184 = vector.multi_reduction <add>, %183, %cst_86 [1] : vector<64x64xf32> to vector<64xf32>
    %185 = vector.shape_cast %184 : vector<64xf32> to vector<64x1xf32>
    %186 = arith.truncf %183 : vector<64x64xf32> to vector<64x64xbf16>
    %cst_87 = arith.constant dense<0.000000e+00> : vector<64x16xf32>
    %187 = tpu.matmul %186, %177, %cst_87 {dimension_numbers = #tpu.dot_dimension_numbers<[1], [0], [0], [1], [0, 0, 1, 1], [], []>} : vector<64x64xbf16>, vector<64x16xbf16>, vector<64x16xf32> -> vector<64x16xf32>
    %188 = tpu.reciprocal %185 {approx = true} : vector<64x1xf32> -> vector<64x1xf32>
    %189 = vector.broadcast %188 : vector<64x1xf32> to vector<64x16xf32>
    %190 = arith.mulf %187, %189 : vector<64x16xf32>
    %191 = arith.truncf %190 : vector<64x16xf32> to vector<64x16xbf16>
    %c64_88 = arith.constant 64 : index
    %c0_89 = arith.constant 0 : index
    %192 = vector.load %arg7[%c64_88, %c0_89] : memref<128x128xbf16, #tpu.memory_space<vmem>>, vector<64x16xbf16>
    tpu.vector_store %arg7[%c64_88, %c0_89], %191 {strides = array<i32>} : memref<128x128xbf16, #tpu.memory_space<vmem>>, vector<64x16xbf16>,
    %c64_90 = arith.constant 64 : index
    %c16_91 = arith.constant 16 : index
    %193 = vector.load %arg6[%c64_90, %c16_91] : memref<128x384xf32, #tpu.memory_space<vmem>>, vector<64x16xf32>
    %194 = arith.truncf %193 : vector<64x16xf32> to vector<64x16xbf16>
    %c64_92 = arith.constant 64 : index
    %c144_93 = arith.constant 144 : index
    %195 = vector.load %arg6[%c64_92, %c144_93] : memref<128x384xf32, #tpu.memory_space<vmem>>, vector<64x16xf32>
    %196 = arith.truncf %195 : vector<64x16xf32> to vector<64x16xbf16>
    %c64_94 = arith.constant 64 : index
    %c272_95 = arith.constant 272 : index
    %197 = vector.load %arg6[%c64_94, %c272_95] : memref<128x384xf32, #tpu.memory_space<vmem>>, vector<64x16xf32>
    %198 = arith.truncf %197 : vector<64x16xf32> to vector<64x16xbf16>
    %cst_96 = arith.constant dense<0.000000e+00> : vector<64x64xf32>
    %199 = tpu.matmul %194, %196, %cst_96 {dimension_numbers = #tpu.dot_dimension_numbers<[1], [1], [0], [0], [0, 0, 1, 0], [], []>} : vector<64x16xbf16>, vector<64x16xbf16>, vector<64x64xf32> -> vector<64x64xf32>
    %cst_97 = arith.constant dense<0xFF800000> : vector<64xf32>
    %200 = vector.multi_reduction <maximumf>, %199, %cst_97 [1] : vector<64x64xf32> to vector<64xf32>
    %201 = vector.shape_cast %200 : vector<64xf32> to vector<64x1xf32>
    %202 = vector.broadcast %201 : vector<64x1xf32> to vector<64x64xf32>
    %203 = arith.subf %199, %202 : vector<64x64xf32>
    %204 = math.exp %203 : vector<64x64xf32>
    %cst_98 = arith.constant dense<0.000000e+00> : vector<64xf32>
    %205 = vector.multi_reduction <add>, %204, %cst_98 [1] : vector<64x64xf32> to vector<64xf32>
    %206 = vector.shape_cast %205 : vector<64xf32> to vector<64x1xf32>
    %207 = arith.truncf %204 : vector<64x64xf32> to vector<64x64xbf16>
    %cst_99 = arith.constant dense<0.000000e+00> : vector<64x16xf32>
    %208 = tpu.matmul %207, %198, %cst_99 {dimension_numbers = #tpu.dot_dimension_numbers<[1], [0], [0], [1], [0, 0, 1, 1], [], []>} : vector<64x64xbf16>, vector<64x16xbf16>, vector<64x16xf32> -> vector<64x16xf32>
    %209 = tpu.reciprocal %206 {approx = true} : vector<64x1xf32> -> vector<64x1xf32>
    %210 = vector.broadcast %209 : vector<64x1xf32> to vector<64x16xf32>
    %211 = arith.mulf %208, %210 : vector<64x16xf32>
    %212 = arith.truncf %211 : vector<64x16xf32> to vector<64x16xbf16>
    %c64_100 = arith.constant 64 : index
    %c16_101 = arith.constant 16 : index
    %213 = vector.load %arg7[%c64_100, %c16_101] : memref<128x128xbf16, #tpu.memory_space<vmem>>, vector<64x16xbf16>
    tpu.vector_store %arg7[%c64_100, %c16_101], %212 {strides = array<i32>} : memref<128x128xbf16, #tpu.memory_space<vmem>>, vector<64x16xbf16>,
    %c64_102 = arith.constant 64 : index
    %c32_103 = arith.constant 32 : index
    %214 = vector.load %arg6[%c64_102, %c32_103] : memref<128x384xf32, #tpu.memory_space<vmem>>, vector<64x16xf32>
    %215 = arith.truncf %214 : vector<64x16xf32> to vector<64x16xbf16>
    %c64_104 = arith.constant 64 : index
    %c160_105 = arith.constant 160 : index
    %216 = vector.load %arg6[%c64_104, %c160_105] : memref<128x384xf32, #tpu.memory_space<vmem>>, vector<64x16xf32>
    %217 = arith.truncf %216 : vector<64x16xf32> to vector<64x16xbf16>
    %c64_106 = arith.constant 64 : index
    %c288_107 = arith.constant 288 : index
    %218 = vector.load %arg6[%c64_106, %c288_107] : memref<128x384xf32, #tpu.memory_space<vmem>>, vector<64x16xf32>
    %219 = arith.truncf %218 : vector<64x16xf32> to vector<64x16xbf16>
    %cst_108 = arith.constant dense<0.000000e+00> : vector<64x64xf32>
    %220 = tpu.matmul %215, %217, %cst_108 {dimension_numbers = #tpu.dot_dimension_numbers<[1], [1], [0], [0], [0, 0, 1, 0], [], []>} : vector<64x16xbf16>, vector<64x16xbf16>, vector<64x64xf32> -> vector<64x64xf32>
    %cst_109 = arith.constant dense<0xFF800000> : vector<64xf32>
    %221 = vector.multi_reduction <maximumf>, %220, %cst_109 [1] : vector<64x64xf32> to vector<64xf32>
    %222 = vector.shape_cast %221 : vector<64xf32> to vector<64x1xf32>
    %223 = vector.broadcast %222 : vector<64x1xf32> to vector<64x64xf32>
    %224 = arith.subf %220, %223 : vector<64x64xf32>
    %225 = math.exp %224 : vector<64x64xf32>
    %cst_110 = arith.constant dense<0.000000e+00> : vector<64xf32>
    %226 = vector.multi_reduction <add>, %225, %cst_110 [1] : vector<64x64xf32> to vector<64xf32>
    %227 = vector.shape_cast %226 : vector<64xf32> to vector<64x1xf32>
    %228 = arith.truncf %225 : vector<64x64xf32> to vector<64x64xbf16>
    %cst_111 = arith.constant dense<0.000000e+00> : vector<64x16xf32>
    %229 = tpu.matmul %228, %219, %cst_111 {dimension_numbers = #tpu.dot_dimension_numbers<[1], [0], [0], [1], [0, 0, 1, 1], [], []>} : vector<64x64xbf16>, vector<64x16xbf16>, vector<64x16xf32> -> vector<64x16xf32>
    %230 = tpu.reciprocal %227 {approx = true} : vector<64x1xf32> -> vector<64x1xf32>
    %231 = vector.broadcast %230 : vector<64x1xf32> to vector<64x16xf32>
    %232 = arith.mulf %229, %231 : vector<64x16xf32>
    %233 = arith.truncf %232 : vector<64x16xf32> to vector<64x16xbf16>
    %c64_112 = arith.constant 64 : index
    %c32_113 = arith.constant 32 : index
    %234 = vector.load %arg7[%c64_112, %c32_113] : memref<128x128xbf16, #tpu.memory_space<vmem>>, vector<64x16xbf16>
    tpu.vector_store %arg7[%c64_112, %c32_113], %233 {strides = array<i32>} : memref<128x128xbf16, #tpu.memory_space<vmem>>, vector<64x16xbf16>,
    %c64_114 = arith.constant 64 : index
    %c48_115 = arith.constant 48 : index
    %235 = vector.load %arg6[%c64_114, %c48_115] : memref<128x384xf32, #tpu.memory_space<vmem>>, vector<64x16xf32>
    %236 = arith.truncf %235 : vector<64x16xf32> to vector<64x16xbf16>
    %c64_116 = arith.constant 64 : index
    %c176_117 = arith.constant 176 : index
    %237 = vector.load %arg6[%c64_116, %c176_117] : memref<128x384xf32, #tpu.memory_space<vmem>>, vector<64x16xf32>
    %238 = arith.truncf %237 : vector<64x16xf32> to vector<64x16xbf16>
    %c64_118 = arith.constant 64 : index
    %c304_119 = arith.constant 304 : index
    %239 = vector.load %arg6[%c64_118, %c304_119] : memref<128x384xf32, #tpu.memory_space<vmem>>, vector<64x16xf32>
    %240 = arith.truncf %239 : vector<64x16xf32> to vector<64x16xbf16>
    %cst_120 = arith.constant dense<0.000000e+00> : vector<64x64xf32>
    %241 = tpu.matmul %236, %238, %cst_120 {dimension_numbers = #tpu.dot_dimension_numbers<[1], [1], [0], [0], [0, 0, 1, 0], [], []>} : vector<64x16xbf16>, vector<64x16xbf16>, vector<64x64xf32> -> vector<64x64xf32>
    %cst_121 = arith.constant dense<0xFF800000> : vector<64xf32>
    %242 = vector.multi_reduction <maximumf>, %241, %cst_121 [1] : vector<64x64xf32> to vector<64xf32>
    %243 = vector.shape_cast %242 : vector<64xf32> to vector<64x1xf32>
    %244 = vector.broadcast %243 : vector<64x1xf32> to vector<64x64xf32>
    %245 = arith.subf %241, %244 : vector<64x64xf32>
    %246 = math.exp %245 : vector<64x64xf32>
    %cst_122 = arith.constant dense<0.000000e+00> : vector<64xf32>
    %247 = vector.multi_reduction <add>, %246, %cst_122 [1] : vector<64x64xf32> to vector<64xf32>
    %248 = vector.shape_cast %247 : vector<64xf32> to vector<64x1xf32>
    %249 = arith.truncf %246 : vector<64x64xf32> to vector<64x64xbf16>
    %cst_123 = arith.constant dense<0.000000e+00> : vector<64x16xf32>
    %250 = tpu.matmul %249, %240, %cst_123 {dimension_numbers = #tpu.dot_dimension_numbers<[1], [0], [0], [1], [0, 0, 1, 1], [], []>} : vector<64x64xbf16>, vector<64x16xbf16>, vector<64x16xf32> -> vector<64x16xf32>
    %251 = tpu.reciprocal %248 {approx = true} : vector<64x1xf32> -> vector<64x1xf32>
    %252 = vector.broadcast %251 : vector<64x1xf32> to vector<64x16xf32>
    %253 = arith.mulf %250, %252 : vector<64x16xf32>
    %254 = arith.truncf %253 : vector<64x16xf32> to vector<64x16xbf16>
    %c64_124 = arith.constant 64 : index
    %c48_125 = arith.constant 48 : index
    %255 = vector.load %arg7[%c64_124, %c48_125] : memref<128x128xbf16, #tpu.memory_space<vmem>>, vector<64x16xbf16>
    tpu.vector_store %arg7[%c64_124, %c48_125], %254 {strides = array<i32>} : memref<128x128xbf16, #tpu.memory_space<vmem>>, vector<64x16xbf16>,
    %c64_126 = arith.constant 64 : index
    %c64_127 = arith.constant 64 : index
    %256 = vector.load %arg6[%c64_126, %c64_127] : memref<128x384xf32, #tpu.memory_space<vmem>>, vector<64x16xf32>
    %257 = arith.truncf %256 : vector<64x16xf32> to vector<64x16xbf16>
    %c64_128 = arith.constant 64 : index
    %c192_129 = arith.constant 192 : index
    %258 = vector.load %arg6[%c64_128, %c192_129] : memref<128x384xf32, #tpu.memory_space<vmem>>, vector<64x16xf32>
    %259 = arith.truncf %258 : vector<64x16xf32> to vector<64x16xbf16>
    %c64_130 = arith.constant 64 : index
    %c320_131 = arith.constant 320 : index
    %260 = vector.load %arg6[%c64_130, %c320_131] : memref<128x384xf32, #tpu.memory_space<vmem>>, vector<64x16xf32>
    %261 = arith.truncf %260 : vector<64x16xf32> to vector<64x16xbf16>
    %cst_132 = arith.constant dense<0.000000e+00> : vector<64x64xf32>
    %262 = tpu.matmul %257, %259, %cst_132 {dimension_numbers = #tpu.dot_dimension_numbers<[1], [1], [0], [0], [0, 0, 1, 0], [], []>} : vector<64x16xbf16>, vector<64x16xbf16>, vector<64x64xf32> -> vector<64x64xf32>
    %cst_133 = arith.constant dense<0xFF800000> : vector<64xf32>
    %263 = vector.multi_reduction <maximumf>, %262, %cst_133 [1] : vector<64x64xf32> to vector<64xf32>
    %264 = vector.shape_cast %263 : vector<64xf32> to vector<64x1xf32>
    %265 = vector.broadcast %264 : vector<64x1xf32> to vector<64x64xf32>
    %266 = arith.subf %262, %265 : vector<64x64xf32>
    %267 = math.exp %266 : vector<64x64xf32>
    %cst_134 = arith.constant dense<0.000000e+00> : vector<64xf32>
    %268 = vector.multi_reduction <add>, %267, %cst_134 [1] : vector<64x64xf32> to vector<64xf32>
    %269 = vector.shape_cast %268 : vector<64xf32> to vector<64x1xf32>
    %270 = arith.truncf %267 : vector<64x64xf32> to vector<64x64xbf16>
    %cst_135 = arith.constant dense<0.000000e+00> : vector<64x16xf32>
    %271 = tpu.matmul %270, %261, %cst_135 {dimension_numbers = #tpu.dot_dimension_numbers<[1], [0], [0], [1], [0, 0, 1, 1], [], []>} : vector<64x64xbf16>, vector<64x16xbf16>, vector<64x16xf32> -> vector<64x16xf32>
    %272 = tpu.reciprocal %269 {approx = true} : vector<64x1xf32> -> vector<64x1xf32>
    %273 = vector.broadcast %272 : vector<64x1xf32> to vector<64x16xf32>
    %274 = arith.mulf %271, %273 : vector<64x16xf32>
    %275 = arith.truncf %274 : vector<64x16xf32> to vector<64x16xbf16>
    %c64_136 = arith.constant 64 : index
    %c64_137 = arith.constant 64 : index
    %276 = vector.load %arg7[%c64_136, %c64_137] : memref<128x128xbf16, #tpu.memory_space<vmem>>, vector<64x16xbf16>
    tpu.vector_store %arg7[%c64_136, %c64_137], %275 {strides = array<i32>} : memref<128x128xbf16, #tpu.memory_space<vmem>>, vector<64x16xbf16>,
    %c64_138 = arith.constant 64 : index
    %c80_139 = arith.constant 80 : index
    %277 = vector.load %arg6[%c64_138, %c80_139] : memref<128x384xf32, #tpu.memory_space<vmem>>, vector<64x16xf32>
    %278 = arith.truncf %277 : vector<64x16xf32> to vector<64x16xbf16>
    %c64_140 = arith.constant 64 : index
    %c208_141 = arith.constant 208 : index
    %279 = vector.load %arg6[%c64_140, %c208_141] : memref<128x384xf32, #tpu.memory_space<vmem>>, vector<64x16xf32>
    %280 = arith.truncf %279 : vector<64x16xf32> to vector<64x16xbf16>
    %c64_142 = arith.constant 64 : index
    %c336_143 = arith.constant 336 : index
    %281 = vector.load %arg6[%c64_142, %c336_143] : memref<128x384xf32, #tpu.memory_space<vmem>>, vector<64x16xf32>
    %282 = arith.truncf %281 : vector<64x16xf32> to vector<64x16xbf16>
    %cst_144 = arith.constant dense<0.000000e+00> : vector<64x64xf32>
    %283 = tpu.matmul %278, %280, %cst_144 {dimension_numbers = #tpu.dot_dimension_numbers<[1], [1], [0], [0], [0, 0, 1, 0], [], []>} : vector<64x16xbf16>, vector<64x16xbf16>, vector<64x64xf32> -> vector<64x64xf32>
    %cst_145 = arith.constant dense<0xFF800000> : vector<64xf32>
    %284 = vector.multi_reduction <maximumf>, %283, %cst_145 [1] : vector<64x64xf32> to vector<64xf32>
    %285 = vector.shape_cast %284 : vector<64xf32> to vector<64x1xf32>
    %286 = vector.broadcast %285 : vector<64x1xf32> to vector<64x64xf32>
    %287 = arith.subf %283, %286 : vector<64x64xf32>
    %288 = math.exp %287 : vector<64x64xf32>
    %cst_146 = arith.constant dense<0.000000e+00> : vector<64xf32>
    %289 = vector.multi_reduction <add>, %288, %cst_146 [1] : vector<64x64xf32> to vector<64xf32>
    %290 = vector.shape_cast %289 : vector<64xf32> to vector<64x1xf32>
    %291 = arith.truncf %288 : vector<64x64xf32> to vector<64x64xbf16>
    %cst_147 = arith.constant dense<0.000000e+00> : vector<64x16xf32>
    %292 = tpu.matmul %291, %282, %cst_147 {dimension_numbers = #tpu.dot_dimension_numbers<[1], [0], [0], [1], [0, 0, 1, 1], [], []>} : vector<64x64xbf16>, vector<64x16xbf16>, vector<64x16xf32> -> vector<64x16xf32>
    %293 = tpu.reciprocal %290 {approx = true} : vector<64x1xf32> -> vector<64x1xf32>
    %294 = vector.broadcast %293 : vector<64x1xf32> to vector<64x16xf32>
    %295 = arith.mulf %292, %294 : vector<64x16xf32>
    %296 = arith.truncf %295 : vector<64x16xf32> to vector<64x16xbf16>
    %c64_148 = arith.constant 64 : index
    %c80_149 = arith.constant 80 : index
    %297 = vector.load %arg7[%c64_148, %c80_149] : memref<128x128xbf16, #tpu.memory_space<vmem>>, vector<64x16xbf16>
    tpu.vector_store %arg7[%c64_148, %c80_149], %296 {strides = array<i32>} : memref<128x128xbf16, #tpu.memory_space<vmem>>, vector<64x16xbf16>,
    %c64_150 = arith.constant 64 : index
    %c96_151 = arith.constant 96 : index
    %298 = vector.load %arg6[%c64_150, %c96_151] : memref<128x384xf32, #tpu.memory_space<vmem>>, vector<64x16xf32>
    %299 = arith.truncf %298 : vector<64x16xf32> to vector<64x16xbf16>
    %c64_152 = arith.constant 64 : index
    %c224_153 = arith.constant 224 : index
    %300 = vector.load %arg6[%c64_152, %c224_153] : memref<128x384xf32, #tpu.memory_space<vmem>>, vector<64x16xf32>
    %301 = arith.truncf %300 : vector<64x16xf32> to vector<64x16xbf16>
    %c64_154 = arith.constant 64 : index
    %c352_155 = arith.constant 352 : index
    %302 = vector.load %arg6[%c64_154, %c352_155] : memref<128x384xf32, #tpu.memory_space<vmem>>, vector<64x16xf32>
    %303 = arith.truncf %302 : vector<64x16xf32> to vector<64x16xbf16>
    %cst_156 = arith.constant dense<0.000000e+00> : vector<64x64xf32>
    %304 = tpu.matmul %299, %301, %cst_156 {dimension_numbers = #tpu.dot_dimension_numbers<[1], [1], [0], [0], [0, 0, 1, 0], [], []>} : vector<64x16xbf16>, vector<64x16xbf16>, vector<64x64xf32> -> vector<64x64xf32>
    %cst_157 = arith.constant dense<0xFF800000> : vector<64xf32>
    %305 = vector.multi_reduction <maximumf>, %304, %cst_157 [1] : vector<64x64xf32> to vector<64xf32>
    %306 = vector.shape_cast %305 : vector<64xf32> to vector<64x1xf32>
    %307 = vector.broadcast %306 : vector<64x1xf32> to vector<64x64xf32>
    %308 = arith.subf %304, %307 : vector<64x64xf32>
    %309 = math.exp %308 : vector<64x64xf32>
    %cst_158 = arith.constant dense<0.000000e+00> : vector<64xf32>
    %310 = vector.multi_reduction <add>, %309, %cst_158 [1] : vector<64x64xf32> to vector<64xf32>
    %311 = vector.shape_cast %310 : vector<64xf32> to vector<64x1xf32>
    %312 = arith.truncf %309 : vector<64x64xf32> to vector<64x64xbf16>
    %cst_159 = arith.constant dense<0.000000e+00> : vector<64x16xf32>
    %313 = tpu.matmul %312, %303, %cst_159 {dimension_numbers = #tpu.dot_dimension_numbers<[1], [0], [0], [1], [0, 0, 1, 1], [], []>} : vector<64x64xbf16>, vector<64x16xbf16>, vector<64x16xf32> -> vector<64x16xf32>
    %314 = tpu.reciprocal %311 {approx = true} : vector<64x1xf32> -> vector<64x1xf32>
    %315 = vector.broadcast %314 : vector<64x1xf32> to vector<64x16xf32>
    %316 = arith.mulf %313, %315 : vector<64x16xf32>
    %317 = arith.truncf %316 : vector<64x16xf32> to vector<64x16xbf16>
    %c64_160 = arith.constant 64 : index
    %c96_161 = arith.constant 96 : index
    %318 = vector.load %arg7[%c64_160, %c96_161] : memref<128x128xbf16, #tpu.memory_space<vmem>>, vector<64x16xbf16>
    tpu.vector_store %arg7[%c64_160, %c96_161], %317 {strides = array<i32>} : memref<128x128xbf16, #tpu.memory_space<vmem>>, vector<64x16xbf16>,
    %c64_162 = arith.constant 64 : index
    %c112_163 = arith.constant 112 : index
    %319 = vector.load %arg6[%c64_162, %c112_163] : memref<128x384xf32, #tpu.memory_space<vmem>>, vector<64x16xf32>
    %320 = arith.truncf %319 : vector<64x16xf32> to vector<64x16xbf16>
    %c64_164 = arith.constant 64 : index
    %c240_165 = arith.constant 240 : index
    %321 = vector.load %arg6[%c64_164, %c240_165] : memref<128x384xf32, #tpu.memory_space<vmem>>, vector<64x16xf32>
    %322 = arith.truncf %321 : vector<64x16xf32> to vector<64x16xbf16>
    %c64_166 = arith.constant 64 : index
    %c368_167 = arith.constant 368 : index
    %323 = vector.load %arg6[%c64_166, %c368_167] : memref<128x384xf32, #tpu.memory_space<vmem>>, vector<64x16xf32>
    %324 = arith.truncf %323 : vector<64x16xf32> to vector<64x16xbf16>
    %cst_168 = arith.constant dense<0.000000e+00> : vector<64x64xf32>
    %325 = tpu.matmul %320, %322, %cst_168 {dimension_numbers = #tpu.dot_dimension_numbers<[1], [1], [0], [0], [0, 0, 1, 0], [], []>} : vector<64x16xbf16>, vector<64x16xbf16>, vector<64x64xf32> -> vector<64x64xf32>
    %cst_169 = arith.constant dense<0xFF800000> : vector<64xf32>
    %326 = vector.multi_reduction <maximumf>, %325, %cst_169 [1] : vector<64x64xf32> to vector<64xf32>
    %327 = vector.shape_cast %326 : vector<64xf32> to vector<64x1xf32>
    %328 = vector.broadcast %327 : vector<64x1xf32> to vector<64x64xf32>
    %329 = arith.subf %325, %328 : vector<64x64xf32>
    %330 = math.exp %329 : vector<64x64xf32>
    %cst_170 = arith.constant dense<0.000000e+00> : vector<64xf32>
    %331 = vector.multi_reduction <add>, %330, %cst_170 [1] : vector<64x64xf32> to vector<64xf32>
    %332 = vector.shape_cast %331 : vector<64xf32> to vector<64x1xf32>
    %333 = arith.truncf %330 : vector<64x64xf32> to vector<64x64xbf16>
    %cst_171 = arith.constant dense<0.000000e+00> : vector<64x16xf32>
    %334 = tpu.matmul %333, %324, %cst_171 {dimension_numbers = #tpu.dot_dimension_numbers<[1], [0], [0], [1], [0, 0, 1, 1], [], []>} : vector<64x64xbf16>, vector<64x16xbf16>, vector<64x16xf32> -> vector<64x16xf32>
    %335 = tpu.reciprocal %332 {approx = true} : vector<64x1xf32> -> vector<64x1xf32>
    %336 = vector.broadcast %335 : vector<64x1xf32> to vector<64x16xf32>
    %337 = arith.mulf %334, %336 : vector<64x16xf32>
    %338 = arith.truncf %337 : vector<64x16xf32> to vector<64x16xbf16>
    %c64_172 = arith.constant 64 : index
    %c112_173 = arith.constant 112 : index
    %339 = vector.load %arg7[%c64_172, %c112_173] : memref<128x128xbf16, #tpu.memory_space<vmem>>, vector<64x16xbf16>
    tpu.vector_store %arg7[%c64_172, %c112_173], %338 {strides = array<i32>} : memref<128x128xbf16, #tpu.memory_space<vmem>>, vector<64x16xbf16>,
    %c0_174 = arith.constant 0 : index
    %c0_175 = arith.constant 0 : index
    %340 = vector.load %arg7[%c0_174, %c0_175] : memref<128x128xbf16, #tpu.memory_space<vmem>>, vector<128x128xbf16>
    %c0_176 = arith.constant 0 : index
    %c0_177 = arith.constant 0 : index
    %341 = vector.load %arg3[%c0_176, %c0_177] : memref<128x128xbf16, #tpu.memory_space<vmem>>, vector<128x128xbf16>
    %cst_178 = arith.constant dense<0.000000e+00> : vector<128x128xf32>
    %342 = tpu.matmul %340, %341, %cst_178 {dimension_numbers = #tpu.dot_dimension_numbers<[1], [0], [0], [1], [0, 0, 1, 1], [], []>} : vector<128x128xbf16>, vector<128x128xbf16>, vector<128x128xf32> -> vector<128x128xf32>
    %c0_179 = arith.constant 0 : index
    %c0_180 = arith.constant 0 : index
    %343 = vector.load %arg4[%c0_179, %c0_180] : memref<1x128xf32, #tpu.memory_space<vmem>>, vector<1x128xf32>
    %344 = vector.broadcast %343 : vector<1x128xf32> to vector<128x128xf32>
    %345 = arith.addf %342, %344 : vector<128x128xf32>
    %c0_181 = arith.constant 0 : index
    %c0_182 = arith.constant 0 : index
    %346 = vector.load %arg5[%c0_181, %c0_182] : memref<128x128xf32, #tpu.memory_space<vmem>>, vector<128x128xf32>
    tpu.vector_store %arg5[%c0_181, %c0_182], %345 {strides = array<i32>} : memref<128x128xf32, #tpu.memory_space<vmem>>, vector<128x128xf32>,
    return
  }
  func.func @transform_0(%arg0: i32) -> (i32, i32) {
    %c0_i32 = arith.constant 0 : i32
    %c0_i32_0 = arith.constant 0 : i32
    return %arg0, %c0_i32 : i32, i32
  }
  func.func @transform_1(%arg0: i32) -> (i32, i32) {
    %c0_i32 = arith.constant 0 : i32
    %c0_i32_0 = arith.constant 0 : i32
    %c0_i32_1 = arith.constant 0 : i32
    return %c0_i32, %c0_i32_0 : i32, i32
  }
  func.func @transform_2(%arg0: i32) -> (i32, i32) {
    %c0_i32 = arith.constant 0 : i32
    %c0_i32_0 = arith.constant 0 : i32
    %c0_i32_1 = arith.constant 0 : i32
    return %c0_i32, %c0_i32_0 : i32, i32
  }
  func.func @transform_3(%arg0: i32) -> (i32, i32) {
    %c0_i32 = arith.constant 0 : i32
    %c0_i32_0 = arith.constant 0 : i32
    %c0_i32_1 = arith.constant 0 : i32
    return %c0_i32, %c0_i32_0 : i32, i32
  }
  func.func @transform_4(%arg0: i32) -> (i32, i32) {
    %c0_i32 = arith.constant 0 : i32
    %c0_i32_0 = arith.constant 0 : i32
    return %arg0, %c0_i32 : i32, i32
  }
}

</mosaic_0001>

<bundles_post_ra>
// kernel: tpu_custom_call.1
= control target key start
LH: loop header
LB: loop body
LE: loop exit
PB: predicated region body
PF: predicated region fallthrough
CT: control target
= control target key end

     0   :  { %9 = vsyncpa [#allocation5], 0  ;;  %s11803_s0 = inlined_call_operand.hbm [shape: bf16[128,128], index: 0, kind: input, shape index: {}]   ;;  %s11804_s1 = inlined_call_operand.hbm [shape: bf16[128,384], index: 1, kind: input, shape index: {}]   ;;  %s11805_s2 = inlined_call_operand.hbm [shape: bf16[128,128], index: 2, kind: input, shape index: {}]   ;;  %s11806_s3 = inlined_call_operand.vmem [shape: f32[1,128], index: 3, kind: input, shape index: {}]   ;;  %s11807_s4 = inlined_call_operand.hbm [shape: f32[128,128], index: 4, kind: output, shape index: {}]  }
   0x1   :  { %10 = vsyncpa [#allocation8], 0 }
   0x2   :  { %11 = vsyncpa [#allocation6], 0  ;;  %s8994_s15 = smov [#allocation7]  }
   0x3   :  { %s29_s16 = sshll.u32 %s8994_s15, 4  ;;  %s30_s16 = int_to_ptr.vmem [resolvable:$true] %s29_s16 }
   0x4   :  { %s8916_s17 = scalar_lea.vmem %s30_s16, 3072  ;;  %p8921_p1 = scmp.lt.s32.totalorder %s30_s16, %s30_s16 }
   0x5   :  { %p8917_p0 = scmp.ne.s32.totalorder %s30_s16, %s8916_s17  ;;  %p8922_p2 = scmp.lt.s32.totalorder %s8916_s17, %s8916_s17 }
   0x7   :  { %p8923_p3 = por %p8922_p2, %p8921_p1 }
   0x9   :  { %p8924_p4 = pnand %p8923_p3, %p8917_p0 }
   0xb   :  { %8927 = shalt.err (!%p8924_p4)
}
   0xc   :  { %s8995_s18 = smov 192   ;;  %s8996_s19 = smov 12  }
   0xd   :  { %35 = dma.hbm_to_vmem [thread:$0]  %s11804_s1, 3072, %s30_s16, [#allocation8], %s8995_s18, %s8995_s18, %s8996_s19  }
   0xe   :  { %s8997_s22 = smov [#allocation4]  }
   0xf   :  { %s17_s23 = sshll.u32 %s8997_s22, 4  ;;  %s18_s23 = int_to_ptr.vmem [resolvable:$true] %s17_s23 }
  0x10   :  { %s8936_s24 = scalar_lea.vmem %s18_s23, 1024  ;;  %p8941_p6 = scmp.lt.s32.totalorder %s18_s23, %s18_s23 }
  0x11   :  { %p8937_p5 = scmp.ne.s32.totalorder %s18_s23, %s8936_s24  ;;  %p8942_p7 = scmp.lt.s32.totalorder %s8936_s24, %s8936_s24 }
  0x13   :  { %p8943_p8 = por %p8942_p7, %p8941_p6 }
  0x15   :  { %p8944_p9 = pnand %p8943_p8, %p8937_p5 }
  0x17   :  { %8947 = shalt.err (!%p8944_p9)
}
  0x18   :  { %s8998_s25 = smov 64   ;;  %s8999_s26 = smov 4  }
  0x19   :  { %23 = dma.hbm_to_vmem [thread:$0]  %s11803_s0, 1024, %s18_s23, [#allocation5], %s8998_s25, %s8998_s25, %s8999_s26  }
  0x1a   :  { %s9000_s29 = smov [#allocation9]  }
  0x1b   :  { %s41_s1 = sshll.u32 %s9000_s29, 4  ;;  %s42_s1 = int_to_ptr.vmem [resolvable:$true] %s41_s1 }
  0x1c   :  { %s8956_s30 = scalar_lea.vmem %s42_s1, 1024  ;;  %p8961_p11 = scmp.lt.s32.totalorder %s42_s1, %s42_s1 }
  0x1d   :  { %p8957_p10 = scmp.ne.s32.totalorder %s42_s1, %s8956_s30  ;;  %p8962_p12 = scmp.lt.s32.totalorder %s8956_s30, %s8956_s30 }
  0x1f   :  { %p8963_p13 = por %p8962_p12, %p8961_p11 }
  0x21   :  { %p8964_p0 = pnand %p8963_p13, %p8957_p10 }
  0x23   :  { %8967 = shalt.err (!%p8964_p0)
}
  0x24   :  { %47 = dma.hbm_to_vmem [thread:$0]  %s11805_s2, 1024, %s42_s1, [#allocation8], %s8998_s25, %s8998_s25, %s8999_s26  }
  0x25   :  { %8988 = dma.done.wait [#allocation5], 1024  }
  0x26   :  { %8989 = vsyncadd [#allocation5], 4294966272 }
  0x27   :  { %8990 = dma.done.wait [#allocation8], 4096  }
  0x28   :  { %8991 = vsyncadd [#allocation8], 4294963200  ;;  %v9001_v0 = vmov 0   ;;  %v8340_v1 = vld [vmem:[#allocation7 + $0xac] ss:$12 sps:$4 sm:$0xff]   ;;  %v8364_v18 = vld [vmem:[#allocation4] sm:$0xff]  }
  0x29   :  { %316 = vmatprep.mubr.bf16.mxu0 %v9001_v0  ;;  %356 = vmatprep.mubr.bf16.mxu1 %v9001_v0  ;;  %v8342_v2 = vld [vmem:[#allocation7 + $0xa8] ss:$12 sps:$4 sm:$0xff]   ;;  %v8345_v4 = vld [vmem:[#allocation7 + $0x90] ss:$12 sps:$4 sm:$0xff]   ;;  %v8348_v6 = vld [vmem:[#allocation7 + $0x78] ss:$12 sps:$4 sm:$0xff]  }
  0x2a   :  { %284 = vmatprep.subr.bf16.mxu0 %v8340_v1  ;;  %v8343_v3 = vld [vmem:[#allocation7 + $0x94] ss:$12 sps:$4 sm:$0xff]   ;;  %8243 = vmatprep.subr.bf16.mxu1 %v8340_v1  ;;  %v8346_v5 = vld [vmem:[#allocation7 + $0x7c] ss:$12 sps:$4 sm:$0xff]   ;;  %v8349_v7 = vld [vmem:[#allocation7 + $0x64] ss:$12 sps:$4 sm:$0xff]  }
  0x2b   :  { %285 = vmatpush1.bf16.msra.mxu0 %v8342_v2  ;;  %8251 = vmatpush1.bf16.msra.mxu1 %v8342_v2  ;;  %v8351_v8 = vld [vmem:[#allocation7 + $0x60] ss:$12 sps:$4 sm:$0xff]   ;;  %v8354_v10 = vld [vmem:[#allocation7 + $0x48] ss:$12 sps:$4 sm:$0xff]   ;;  %v8357_v12 = vld [vmem:[#allocation7 + $0x30] ss:$12 sps:$4 sm:$0xff]  }
  0x2c   :  { %286 = vmatprep.subr.bf16.mxu0 %v8343_v3  ;;  %8244 = vmatprep.subr.bf16.mxu1 %v8343_v3  ;;  %v8352_v9 = vld [vmem:[#allocation7 + $0x4c] ss:$12 sps:$4 sm:$0xff]   ;;  %v8355_v11 = vld [vmem:[#allocation7 + $0x34] ss:$12 sps:$4 sm:$0xff]   ;;  %v8358_v13 = vld [vmem:[#allocation7 + $0x1c] ss:$12 sps:$4 sm:$0xff]  }
  0x2d   :  { %v8360_v14 = vld [vmem:[#allocation7 + $0x18] ss:$12 sps:$4 sm:$0xff]   ;;  %v8363_v16 = vld [vmem:[#allocation7] ss:$12 sps:$4 sm:$0xff]   ;;  %v8369_v17 = vld [vmem:[#allocation7 + $0xb0] ss:$12 sps:$4 sm:$0xff]  }
  0x2e   :  { %v8361_v15 = vld [vmem:[#allocation7 + $0x4] ss:$12 sps:$4 sm:$0xff]   ;;  %v8372_v21 = vld [vmem:[#allocation7 + $0x80] ss:$12 sps:$4 sm:$0xff]   ;;  %v8373_v24 = vld [vmem:[#allocation7 + $0x68] ss:$12 sps:$4 sm:$0xff]  }
  0x2f   :  { %287 = vmatpush1.bf16.msra.mxu0 %v8345_v4  ;;  %8252 = vmatpush1.bf16.msra.mxu1 %v8345_v4  ;;  %v8368_v19 = vld [vmem:[#allocation4 + $0x20] sm:$0xff]   ;;  %v8365_v22 = vld [vmem:[#allocation4 + $0x8] sm:$0xff]   ;;  %v8375_v25 = vld [vmem:[#allocation7 + $0x50] ss:$12 sps:$4 sm:$0xff]   ;;  %vm578_vm0 = vcmask 130048   ;;  %s9002_s0 = smov 112  }
  0x30   :  { %288 = vmatprep.subr.bf16.mxu0 %v8346_v5  ;;  %8245 = vmatprep.subr.bf16.mxu1 %v8346_v5  ;;  %v8370_v20 = vld [vmem:[#allocation7 + $0x98] ss:$12 sps:$4 sm:$0xff]   ;;  %v8371_v23 = vld [vmem:[#allocation4 + $0x28] sm:$0xff]   ;;  %v8366_v26 = vld [vmem:[#allocation4 + $0x10] sm:$0xff]   ;;  %s9003_s2 = smov 96   ;;  %vm668_vm1 = vcmask 523264  }
  0x31   :  { %v8374_v27 = vld [vmem:[#allocation4 + $0x30] sm:$0xff]   ;;  %v8376_v28 = vld [vmem:[#allocation7 + $0x38] ss:$12 sps:$4 sm:$0xff]   ;;  %v8378_v29 = vld [vmem:[#allocation7 + $0x20] ss:$12 sps:$4 sm:$0xff]   ;;  %s9004_s7 = smov 80  }
  0x32   :  { %v8367_v30 = vld [vmem:[#allocation4 + $0x18] sm:$0xff]   ;;  %v8379_v32 = vld [vmem:[#allocation7 + $0x8] ss:$12 sps:$4 sm:$0xff]   ;;  %s9005_s8 = smov 48   ;;  %s9006_s9 = smov 32   ;;  %vm870_vm2 = vcmask 125952  }
  0x33   :  { %289 = vmatpush1.bf16.msra.mxu0 %v8348_v6  ;;  %8253 = vmatpush1.bf16.msra.mxu1 %v8348_v6  ;;  %v8377_v31 = vld [vmem:[#allocation4 + $0x38] sm:$0xff]   ;;  %s9007_s10 = smov 16   ;;  %vm1261_vm3 = vcmask 257152   ;;  %vm1652_vm4 = vcmask 388352   ;;  %vm2043_vm5 = vcmask 519552   ;;  %vm2434_vm6 = vcmask 650752  }
  0x34   :  { %290 = vmatprep.subr.bf16.mxu0 %v8349_v7  ;;  %8246 = vmatprep.subr.bf16.mxu1 %v8349_v7  ;;  %vm2825_vm7 = vcmask 781952   ;;  %vm3216_vm8 = vcmask 913152   ;;  %vm3607_vm9 = vcmask 1044352  }
  0x37   :  { %291 = vmatpush1.bf16.msra.mxu0 %v8351_v8  ;;  %8254 = vmatpush1.bf16.msra.mxu1 %v8351_v8 }
  0x38   :  { %292 = vmatprep.subr.bf16.mxu0 %v8352_v9  ;;  %8247 = vmatprep.subr.bf16.mxu1 %v8352_v9 }
  0x3b   :  { %293 = vmatpush1.bf16.msra.mxu0 %v8354_v10  ;;  %8255 = vmatpush1.bf16.msra.mxu1 %v8354_v10 }
  0x3c   :  { %294 = vmatprep.subr.bf16.mxu0 %v8355_v11  ;;  %8248 = vmatprep.subr.bf16.mxu1 %v8355_v11 }
  0x3f   :  { %295 = vmatpush1.bf16.msra.mxu0 %v8357_v12  ;;  %8256 = vmatpush1.bf16.msra.mxu1 %v8357_v12 }
  0x40   :  { %296 = vmatprep.subr.bf16.mxu0 %v8358_v13  ;;  %8249 = vmatprep.subr.bf16.mxu1 %v8358_v13 }
  0x43   :  { %297 = vmatpush1.bf16.msra.mxu0 %v8360_v14  ;;  %8257 = vmatpush1.bf16.msra.mxu1 %v8360_v14 }
  0x44   :  { %298 = vmatprep.subr.bf16.mxu0 %v8361_v15  ;;  %8250 = vmatprep.subr.bf16.mxu1 %v8361_v15 }
  0x47   :  { %299 = vmatpush1.bf16.msra.mxu0 %v8363_v16  ;;  %8258 = vmatpush1.bf16.msra.mxu1 %v8363_v16 }
  0x48   :  { %7667 = vmatprep.subr.bf16.mxu1 %v8369_v17 }
  0x4a   :  { %317 = vmatmul.mubr.bf16.vlgmr.msra.gmra.mxu0 %v8364_v18  ;;  %357 = vmatmul.mubr.bf16.vlgmr.msra.gmra.mxu1 %v8368_v19 }
  0x4b   :  { %326 = vmatprep.mubr.bf16.mxu0 %v9001_v0  ;;  %7668 = vmatpush3.bf16.msra.mxu1 %v8369_v17 }
  0x4c   :  { %7669 = vmatprep.subr.bf16.mxu1 %v8370_v20  ;;  %366 = vmatprep.mubr.bf16.mxu1 %v9001_v0 }
  0x4f   :  { %7670 = vmatpush3.bf16.msra.mxu1 %v8370_v20 }
  0x50   :  { %7671 = vmatprep.subr.bf16.mxu1 %v8372_v21 }
  0x52   :  { %327 = vmatmul.mubr.bf16.gmra.mxu0 %v8365_v22  ;;  %367 = vmatmul.mubr.bf16.gmra.mxu1 %v8371_v23 }
  0x53   :  { %336 = vmatprep.mubr.bf16.mxu0 %v9001_v0  ;;  %7672 = vmatpush3.bf16.msra.mxu1 %v8372_v21 }
  0x54   :  { %7673 = vmatprep.subr.bf16.mxu1 %v8373_v24  ;;  %376 = vmatprep.mubr.bf16.mxu1 %v9001_v0 }
  0x57   :  { %7674 = vmatpush3.bf16.msra.mxu1 %v8373_v24 }
  0x58   :  { %7675 = vmatprep.subr.bf16.mxu1 %v8375_v25 }
  0x5a   :  { %337 = vmatmul.mubr.bf16.gmra.mxu0 %v8366_v26  ;;  %377 = vmatmul.mubr.bf16.gmra.mxu1 %v8374_v27 }
  0x5b   :  { %346 = vmatprep.mubr.bf16.mxu0 %v9001_v0  ;;  %7676 = vmatpush3.bf16.msra.mxu1 %v8375_v25 }
  0x5c   :  { %7677 = vmatprep.subr.bf16.mxu1 %v8376_v28  ;;  %386 = vmatprep.mubr.bf16.mxu1 %v9001_v0 }
  0x5f   :  { %7678 = vmatpush3.bf16.msra.mxu1 %v8376_v28 }
  0x60   :  { %7679 = vmatprep.subr.bf16.mxu1 %v8378_v29 }
  0x62   :  { %347 = vmatmul.mubr.bf16.gmra.mxu0 %v8367_v30  ;;  %387 = vmatmul.mubr.bf16.gmra.mxu1 %v8377_v31 }
  0x63   :  { %7680 = vmatpush3.bf16.msra.mxu1 %v8378_v29  ;;  %7683 = vmatprep.mubr.bf16.mxu1 %v8364_v18 }
  0x64   :  { %7681 = vmatprep.subr.bf16.mxu1 %v8379_v32 }
  0x67   :  { %7682 = vmatpush3.bf16.msra.mxu1 %v8379_v32 }
  0x6a   :  { %7684 = vmatmul.mubr.bf16.vlgmr.msra.gmra.mxu1 %v8365_v22 }
  0x6b   :  { %7687 = vmatprep.mubr.bf16.mxu1 %v8366_v26 }
  0x72   :  { %7688 = vmatmul.mubr.bf16.gmra.mxu1 %v8367_v30 }
  0x73   :  { %7691 = vmatprep.mubr.bf16.mxu1 %v8368_v19 }
  0x7a   :  { %7692 = vmatmul.mubr.bf16.gmra.mxu1 %v8371_v23 }
  0x7b   :  { %7695 = vmatprep.mubr.bf16.mxu1 %v8374_v27 }
  0x82   :  { %7696 = vmatmul.mubr.bf16.gmra.mxu1 %v8377_v31 }
 0x10a   :  { %v318_v33 = vpop.f32.mrf.mxu0  ;;  %v358_v56 = vpop.f32.mrf.mxu1 }
 0x10c   :  { %v320_v34 = vpop.f32.mrf.mxu0  ;;  %v9097_v59 = vpop.f32.mrf.mxu1 }
 0x10e   :  { %v322_v35 = vpop.f32.mrf.mxu0  ;;  %v362_v60 = vpop.f32.mrf.mxu1 }
 0x10f   :  { %v9057_v36 = vpack.c.bf16 %v322_v35, %v318_v33  ;;  %v9105_v61 = vpack.c.bf16 %v362_v60, %v358_v56 }
 0x110   :  { %v324_v37 = vpop.f32.mrf.mxu0  ;;  %v9107_v62 = vpop.f32.mrf.mxu1 }
 0x111   :  { %7707 = vmatprep.mubr.msk.bf16.mxu1 %vm578_vm0, %v9057_v36  ;;  %v9065_v45 = vpack.c.bf16 %v324_v37, %v320_v34 }
 0x112   :  { %v328_v38 = vpop.f32.mrf.mxu0  ;;  %v368_v63 = vpop.f32.mrf.mxu1 }
 0x113   :  { %v592_v7 = vsel %vm578_vm0, %v9065_v45, 0 }
 0x114   :  { %v330_v39 = vpop.f32.mrf.mxu0  ;;  %v9117_v2 = vpop.f32.mrf.mxu1 }
 0x116   :  { %v332_v40 = vpop.f32.mrf.mxu0  ;;  %v372_v3 = vpop.f32.mrf.mxu1 }
 0x117   :  { %v9095_v58 = vpack.c.bf16 %v332_v40, %v328_v38  ;;  %v9125_v4 = vpack.c.bf16 %v372_v3, %v368_v63 }
 0x118   :  { %v334_v41 = vpop.f32.mrf.mxu0  ;;  %v9127_v5 = vpop.f32.mrf.mxu1 }
 0x119   :  { %v9061_v42 = vpack.c.bf16 %v334_v41, %v330_v39 }
 0x11a   :  { %v338_v43 = vpop.f32.mrf.mxu0  ;;  %v378_v6 = vpop.f32.mrf.mxu1 }
 0x11b   :  { %933 = vrot.lane.b32.xlu1 %v9061_v42, %s9002_s0  ;;  %v595_v0 = vsel %vm578_vm0, %v9061_v42, 0 }
 0x11c   :  { %v340_v44 = vpop.f32.mrf.mxu0  ;;  %v9133_v8 = vpop.f32.mrf.mxu1 }
 0x11e   :  { %v342_v46 = vpop.f32.mrf.mxu0  ;;  %v382_v9 = vpop.f32.mrf.mxu1 }
 0x11f   :  { %931 = vrot.lane.b32.xlu1 %v9065_v45, %s9002_s0  ;;  %v9087_v55 = vpack.c.bf16 %v342_v46, %v338_v43  ;;  %v9137_v10 = vpack.c.bf16 %v382_v9, %v378_v6 }
 0x120   :  { %v344_v47 = vpop.f32.mrf.mxu0  ;;  %v9139_v11 = vpop.f32.mrf.mxu1 }
 0x121   :  { %v9077_v54 = vpack.c.bf16 %v344_v47, %v340_v44  ;;  %11878 = vst [vmem:[#allocation14_spill] sm:$0xff] %v9137_v10 }
 0x122   :  { %v348_v48 = vpop.f32.mrf.mxu0  ;;  %v388_v12 = vpop.f32.mrf.mxu1 }
 0x123   :  { %v598_v57 = vsel %vm578_vm0, %v9077_v54, 0 }
 0x124   :  { %v350_v49 = vpop.f32.mrf.mxu0  ;;  %v9145_v13 = vpop.f32.mrf.mxu1 }
 0x126   :  { %v352_v50 = vpop.f32.mrf.mxu0  ;;  %v392_v14 = vpop.f32.mrf.mxu1 }
 0x127   :  { %v9115_v1 = vpack.c.bf16 %v352_v50, %v348_v48  ;;  %v9147_v15 = vpack.c.bf16 %v392_v14, %v388_v12 }
 0x128   :  { %v354_v51 = vpop.f32.mrf.mxu0  ;;  %v9149_v16 = vpop.f32.mrf.mxu1 }
 0x129   :  { %v9069_v52 = vpack.c.bf16 %v354_v51, %v350_v49  ;;  %11879 = vst [vmem:[#allocation15_spill] sm:$0xff] %v9147_v15 }
 0x12a   :  { %v7685_v17 = vpop.f32.mrf.mxu1 }
 0x12b   :  { %1328 = vrot.lane.b32.xlu1 %v9069_v52, %s9003_s2  ;;  %937 = vrot.lane.b32.xlu0 %v9069_v52, %s9002_s0  ;;  %v601_v53 = vsel %vm578_vm0, %v9069_v52, 0 }
 0x12c   :  { %8259 = vmatprep.subr.msk.bf16.mxu1 %vm578_vm0, %v9069_v52  ;;  %v431_v18 = vpop.f32.mrf.mxu1 }
 0x12d   :  { %7700 = vmatpush3.bf16.xpose.msra.mxu1 %v601_v53 }
 0x12e   :  { %8260 = vmatprep.subr.msk.bf16.mxu1 %vm578_vm0, %v9077_v54  ;;  %v7686_v19 = vpop.f32.mrf.mxu1 }
 0x12f   :  { %1326 = vrot.lane.b32.xlu1 %v9077_v54, %s9003_s2  ;;  %935 = vrot.lane.b32.xlu0 %v9077_v54, %s9002_s0  ;;  %v9153_v20 = vpack.c.bf16 %v7686_v19, %v7685_v17 }
 0x130   :  { %v434_v21 = vpop.f32.mrf.mxu1 }
 0x131   :  { %v9155_v22 = vpack.c.bf16 %v434_v21, %v431_v18 }
 0x132   :  { %v7689_v23 = vpop.f32.mrf.mxu1 }
 0x133   :  { %923 = vrot.lane.b32.xlu1 %v9087_v55, %s9002_s0  ;;  %919 = vrot.lane.b32.xlu0 %v9057_v36, %s9002_s0 }
 0x134   :  { %v447_v24 = vpop.f32.mrf.mxu1 }
 0x135   :  { %7702 = vmatpush3.bf16.xpose.msra.mxu1 %v598_v57 }
 0x136   :  { %8261 = vmatprep.subr.msk.bf16.mxu1 %vm578_vm0, %v9061_v42  ;;  %v7690_v25 = vpop.f32.mrf.mxu1 }
 0x137   :  { %1322 = vrot.lane.b32.xlu1 %v9065_v45, %s9003_s2  ;;  %921 = vrot.lane.b32.xlu0 %v9095_v58, %s9002_s0  ;;  %v9163_v26 = vpack.c.bf16 %v7690_v25, %v7689_v23 }
 0x138   :  { %v450_v27 = vpop.f32.mrf.mxu1 }
 0x139   :  { %v9171_v28 = vpack.c.bf16 %v450_v27, %v447_v24 }
 0x13a   :  { %v7693_v29 = vpop.f32.mrf.mxu1 }
 0x13b   :  { %1312 = vrot.lane.b32.xlu1 %v9095_v58, %s9003_s2  ;;  %1324 = vrot.lane.b32.xlu0 %v9061_v42, %s9003_s2 }
 0x13c   :  { %v9176_v30 = vpop.f32.mrf.mxu1 }
 0x13d   :  { %7704 = vmatpush3.bf16.xpose.msra.mxu1 %v595_v0 }
 0x13e   :  { %8262 = vmatprep.subr.msk.bf16.mxu1 %vm578_vm0, %v9065_v45  ;;  %v7694_v31 = vpop.f32.mrf.mxu1 }
 0x13f   :  { %1316 = vrot.lane.b32.xlu1 %v9115_v1, %s9003_s2  ;;  %925 = vrot.lane.b32.xlu0 %v9115_v1, %s9002_s0  ;;  %v9180_v32 = vpack.c.bf16 %v7694_v31, %v7693_v29 }
 0x140   :  { %v9184_v33 = vpop.f32.mrf.mxu1 }
 0x142   :  { %v7697_v34 = vpop.f32.mrf.mxu1 }
 0x143   :  { %1310 = vrot.lane.b32.xlu0 %v9057_v36, %s9003_s2  ;;  %1501 = vrot.lane.b32.xlu1 %v9153_v20, %s9003_s2 }
 0x144   :  { %v9188_v35 = vpop.f32.mrf.mxu1 }
 0x145   :  { %7706 = vmatpush3.bf16.xpose.msra.mxu1 %v592_v7 }
 0x146   :  { %7715 = vmatprep.subr.bf16.mxu1 %v9163_v26  ;;  %v7698_v37 = vpop.f32.mrf.mxu1 }
 0x147   :  { %1314 = vrot.lane.b32.xlu0 %v9087_v55, %s9003_s2  ;;  %1108 = vrot.lane.b32.xlu1 %v9155_v22, %s9002_s0  ;;  %v9191_v38 = vpack.c.bf16 %v7698_v37, %v7697_v34 }
 0x148   :  { %v9221_v21 = vpop.f32.mrf.mxu1 }
 0x14b   :  { %1110 = vrot.lane.b32.xlu0 %v9153_v20, %s9002_s0  ;;  %1114 = vrot.lane.b32.xlu1 %v9163_v26, %s9002_s0 }
 0x14c   :  { %7708 = vmatmul.mubr.msk.bf16.vlgmr.msra.gmra.mxu1 %vm578_vm0, %v9095_v58 }
 0x14d   :  { %7711 = vmatprep.mubr.msk.bf16.mxu1 %vm578_vm0, %v9087_v55  ;;  %7716 = vmatpush3.bf16.msra.mxu1 %v9163_v26 }
 0x14e   :  { %7717 = vmatprep.subr.bf16.mxu1 %v9171_v28 }
 0x14f   :  { %1505 = vrot.lane.b32.xlu1 %v9163_v26, %s9003_s2 }
 0x151   :  { %7718 = vmatpush3.bf16.msra.mxu1 %v9171_v28 }
 0x152   :  { %7719 = vmatprep.subr.bf16.mxu1 %v9153_v20 }
 0x153   :  { %1112 = vrot.lane.b32.xlu1 %v9171_v28, %s9002_s0 }
 0x154   :  { %7712 = vmatmul.mubr.msk.bf16.gmra.mxu1 %vm578_vm0, %v9115_v1 }
 0x155   :  { %7720 = vmatpush3.bf16.msra.mxu1 %v9153_v20 }
 0x156   :  { %7721 = vmatprep.subr.bf16.mxu1 %v9155_v22 }
 0x157   :  { %1503 = vrot.lane.b32.xlu1 %v9171_v28, %s9003_s2 }
 0x159   :  { %7722 = vmatpush3.bf16.msra.mxu1 %v9155_v22 }
 0x18d   :  { %v934_v46 = vpop.permute.xlu1 %933 }
 0x18e   :  { %v955_v48 = vsel %vm578_vm0, %v934_v46, 0 }
 0x191   :  { %v932_v47 = vpop.permute.xlu1 %931 }
 0x192   :  { %v952_v51 = vsel %vm578_vm0, %v932_v47, 0 }
 0x19d   :  { %v938_v39 = vpop.permute.xlu0 %937  ;;  %v1329_v49 = vpop.permute.xlu1 %1328 }
 0x19e   :  { %8263 = vmatprep.subr.msk.bf16.mxu0 %vm578_vm0, %v938_v39  ;;  %v961_v40 = vsel %vm578_vm0, %v938_v39, 0  ;;  %v1352_v60 = vsel %vm578_vm0, %v1329_v49, 0 }
 0x19f   :  { %7732 = vmatpush3.bf16.xpose.msra.mxu0 %v961_v40 }
 0x1a1   :  { %v936_v41 = vpop.permute.xlu0 %935  ;;  %v1327_v53 = vpop.permute.xlu1 %1326 }
 0x1a2   :  { %8264 = vmatprep.subr.msk.bf16.mxu0 %vm578_vm0, %v936_v41  ;;  %v958_v44 = vsel %vm578_vm0, %v936_v41, 0  ;;  %v1349_v3 = vsel %vm578_vm0, %v1327_v53, 0 }
 0x1a5   :  { %v920_v43 = vpop.permute.xlu0 %919  ;;  %v924_v57 = vpop.permute.xlu1 %923 }
 0x1a6   :  { %7739 = vmatprep.mubr.msk.bf16.mxu0 %vm578_vm0, %v920_v43 }
 0x1a7   :  { %7734 = vmatpush3.bf16.xpose.msra.mxu0 %v958_v44 }
 0x1a8   :  { %8265 = vmatprep.subr.msk.bf16.mxu0 %vm578_vm0, %v934_v46 }
 0x1a9   :  { %v922_v50 = vpop.permute.xlu0 %921  ;;  %v1323_v7 = vpop.permute.xlu1 %1322 }
 0x1aa   :  { %v1343_v9 = vsel %vm578_vm0, %v1323_v7, 0 }
 0x1ad   :  { %v1325_v56 = vpop.permute.xlu0 %1324  ;;  %v1313_v12 = vpop.permute.xlu1 %1312 }
 0x1ae   :  { %v1346_v6 = vsel %vm578_vm0, %v1325_v56, 0 }
 0x1af   :  { %7736 = vmatpush3.bf16.xpose.msra.mxu0 %v955_v48 }
 0x1b0   :  { %8266 = vmatprep.subr.msk.bf16.mxu0 %vm578_vm0, %v932_v47 }
 0x1b1   :  { %v926_v63 = vpop.permute.xlu0 %925  ;;  %v1317_v17 = vpop.permute.xlu1 %1316 }
 0x1b5   :  { %v1311_v0 = vpop.permute.xlu0 %1310  ;;  %v9217_v18 = vpop.permute.xlu1 %1501 }
 0x1b7   :  { %7738 = vmatpush3.bf16.xpose.msra.mxu0 %v952_v51 }
 0x1b8   :  { %8267 = vmatprep.subr.msk.bf16.mxu0 %vm578_vm0, %v1329_v49 }
 0x1b9   :  { %v1315_v14 = vpop.permute.xlu0 %1314  ;;  %v9219_v19 = vpop.permute.xlu1 %1108 }
 0x1bd   :  { %v9223_v23 = vpop.permute.xlu1 %1114 }
 0x1be   :  { %7740 = vmatmul.mubr.msk.bf16.vlgmr.msra.gmra.mxu0 %vm578_vm0, %v922_v50  ;;  %7747 = vmatprep.subr.bf16.mxu1 %v9223_v23 }
 0x1bf   :  { %7743 = vmatprep.mubr.msk.bf16.mxu0 %vm578_vm0, %v924_v57  ;;  %7764 = vmatpush3.bf16.xpose.msra.mxu0 %v1352_v60 }
 0x1c0   :  { %8268 = vmatprep.subr.msk.bf16.mxu0 %vm578_vm0, %v1327_v53 }
 0x1c6   :  { %7744 = vmatmul.mubr.msk.bf16.gmra.mxu0 %vm578_vm0, %v926_v63 }
 0x1c7   :  { %7766 = vmatpush3.bf16.xpose.msra.mxu0 %v1349_v3  ;;  %7771 = vmatprep.mubr.msk.bf16.mxu0 %vm578_vm0, %v1311_v0 }
 0x1c8   :  { %8269 = vmatprep.subr.msk.bf16.mxu0 %vm578_vm0, %v1325_v56 }
 0x1cf   :  { %7768 = vmatpush3.bf16.xpose.msra.mxu0 %v1346_v6 }
 0x1d0   :  { %8270 = vmatprep.subr.msk.bf16.mxu0 %vm578_vm0, %v1323_v7 }
 0x1d7   :  { %7770 = vmatpush3.bf16.xpose.msra.mxu0 %v1343_v9 }
 0x1de   :  { %7772 = vmatmul.mubr.msk.bf16.vlgmr.msra.gmra.mxu0 %vm578_vm0, %v1313_v12 }
 0x1df   :  { %7775 = vmatprep.mubr.msk.bf16.mxu0 %vm578_vm0, %v1315_v14 }
 0x1e6   :  { %7776 = vmatmul.mubr.msk.bf16.gmra.mxu0 %vm578_vm0, %v1317_v17  ;;  %v9277_v17 = vpop.permute.xlu1 %1505 }
 0x20c   :  { %v7709_v24 = vpop.f32.mrf.mxu1 }
 0x20d   :  { %v675_v25 = vsel %vm668_vm1, %v7709_v24, -inf }
 0x20e   :  { %676 = vmax.xlane.f32.xlu0 %v675_v25  ;;  %v637_v27 = vpop.f32.mrf.mxu1 }
 0x20f   :  { %v669_v31 = vsel %vm668_vm1, %v637_v27, -inf }
 0x210   :  { %v9227_v29 = vpop.f32.mrf.mxu1 }
 0x211   :  { %v678_v40 = vsel %vm668_vm1, %v9227_v29, -inf }
 0x212   :  { %670 = vmax.xlane.f32.xlu0 %v669_v31  ;;  %v640_v34 = vpop.f32.mrf.mxu1 }
 0x213   :  { %v672_v37 = vsel %vm668_vm1, %v640_v34, -inf }
 0x214   :  { %673 = vmax.xlane.f32.xlu1 %v672_v37  ;;  %v9231_v39 = vpop.f32.mrf.mxu1  ;;  %v9283_v37 = vpop.permute.xlu0 %1110 }
 0x215   :  { %v687_v43 = vsel %vm668_vm1, %v9231_v39, -inf }
 0x216   :  { %679 = vmax.xlane.f32.xlu0 %v678_v40  ;;  %v9235_v41 = vpop.f32.mrf.mxu1  ;;  %v1113_v40 = vpop.permute.xlu1 %1112 }
 0x217   :  { %v681_v48 = vsel %vm668_vm1, %v9235_v41, -inf }
 0x218   :  { %688 = vmax.xlane.f32.xlu1 %v687_v43  ;;  %v9239_v44 = vpop.f32.mrf.mxu1 }
 0x219   :  { %v690_v46 = vsel %vm668_vm1, %v9239_v44, -inf }
 0x21a   :  { %691 = vmax.xlane.f32.xlu0 %v690_v46  ;;  %v9243_v47 = vpop.f32.mrf.mxu1  ;;  %v9285_v46 = vpop.permute.xlu1 %1503 }
 0x21b   :  { %v684_v49 = vsel %vm668_vm1, %v9243_v47, -inf }
 0x21c   :  { %682 = vmax.xlane.f32.xlu1 %v681_v48 }
 0x21e   :  { %685 = vmax.xlane.f32.xlu0 %v684_v49 }
 0x27e   :  { %v9249_v50 = vpop.f32.mrf.mxu0 }
 0x27f   :  { %v1034_v51 = vsel %vm668_vm1, %v9249_v50, -inf }
 0x280   :  { %v9253_v53 = vpop.f32.mrf.mxu0  ;;  %1035 = vmax.xlane.f32.xlu1 %v1034_v51 }
 0x281   :  { %v1028_v57 = vsel %vm668_vm1, %v9253_v53, -inf }
 0x282   :  { %v9255_v56 = vpop.f32.mrf.mxu0 }
 0x283   :  { %v1037_v60 = vsel %vm668_vm1, %v9255_v56, -inf }
 0x284   :  { %v9261_v63 = vpop.f32.mrf.mxu0  ;;  %1029 = vmax.xlane.f32.xlu1 %v1028_v57  ;;  %1038 = vmax.xlane.f32.xlu0 %v1037_v60 }
 0x285   :  { %v1031_v6 = vsel %vm668_vm1, %v9261_v63, -inf }
 0x286   :  { %v9263_v0 = vpop.f32.mrf.mxu0 }
 0x287   :  { %v1046_v3 = vsel %vm668_vm1, %v9263_v0, -inf }
 0x288   :  { %v9269_v7 = vpop.f32.mrf.mxu0  ;;  %1047 = vmax.xlane.f32.xlu1 %v1046_v3  ;;  %1032 = vmax.xlane.f32.xlu0 %v1031_v6 }
 0x289   :  { %v1040_v12 = vsel %vm668_vm1, %v9269_v7, -inf }
 0x28a   :  { %v9271_v9 = vpop.f32.mrf.mxu0 }
 0x28b   :  { %v1049_v14 = vsel %vm668_vm1, %v9271_v9, -inf }
 0x28c   :  { %v9279_v25 = vpop.f32.mrf.mxu0  ;;  %1041 = vmax.xlane.f32.xlu1 %v1040_v12  ;;  %1050 = vmax.xlane.f32.xlu0 %v1049_v14 }
 0x28d   :  { %v1043_v31 = vsel %vm668_vm1, %v9279_v25, -inf }
 0x290   :  { %1044 = vmax.xlane.f32.xlu0 %v1043_v31 }
 0x297   :  { %v677_v43 = vpop.xlane.xlu0 %676 }
 0x298   :  { %v695_v48 = vsub.f32 %v7709_v24, %v677_v43 }
 0x29a   :  { %v705_v12 = vmul.f32 1.442695, %v695_v48 }
 0x29b   :  { %v671_v49 = vpop.xlane.xlu0 %670 }
 0x29c   :  { %v693_v51 = vsub.f32 %v637_v27, %v671_v49 }
 0x29d   :  { %v674_v57 = vpop.xlane.xlu1 %673  ;;  %1719 = vrot.lane.b32.xlu1 %v9069_v52, %s9004_s7 }
 0x29e   :  { %v701_v60 = vmul.f32 1.442695, %v693_v51  ;;  %v694_v3 = vsub.f32 %v640_v34, %v674_v57  ;;  %v9289_v6 = vpop.f32.mrf.mxu0 }
 0x29f   :  { %v680_v14 = vpop.xlane.xlu0 %679  ;;  %v1425_v31 = vsel %vm668_vm1, %v9289_v6, -inf }
 0x2a0   :  { %v703_v15 = vmul.f32 1.442695, %v694_v3  ;;  %v696_v10 = vsub.f32 %v9227_v29, %v680_v14  ;;  %v9294_v24 = vpop.f32.mrf.mxu0  ;;  %1426 = vmax.xlane.f32.xlu0 %v1425_v31  ;;  %8396 = vpow2.f32 %v701_v60 }
 0x2a1   :  { %v689_v27 = vpop.xlane.xlu1 %688  ;;  %1717 = vrot.lane.b32.xlu1 %v9077_v54, %s9004_s7  ;;  %v1419_v48 = vsel %vm668_vm1, %v9294_v24, -inf }
 0x2a2   :  { %8398 = vpow2.f32 %v703_v15  ;;  %v707_v34 = vmul.f32 1.442695, %v696_v10  ;;  %v9300_v49 = vpop.f32.mrf.mxu0  ;;  %v699_v51 = vsub.f32 %v9231_v39, %v689_v27 }
 0x2a3   :  { %8400 = vpow2.f32 %v705_v12  ;;  %v692_v43 = vpop.xlane.xlu0 %691  ;;  %v1428_v10 = vsel %vm668_vm1, %v9300_v49, -inf }
 0x2a4   :  { %8402 = vpow2.f32 %v707_v34  ;;  %v700_v29 = vsub.f32 %v9239_v44, %v692_v43  ;;  %1420 = vmax.xlane.f32.xlu0 %v1419_v48  ;;  %v9307_v15 = vpop.f32.mrf.mxu0  ;;  %v713_v34 = vmul.f32 1.442695, %v699_v51 }
 0x2a5   :  { %v683_v57 = vpop.xlane.xlu1 %682  ;;  %v1422_v39 = vsel %vm668_vm1, %v9307_v15, -inf }
 0x2a6   :  { %v715_v60 = vmul.f32 1.442695, %v700_v29  ;;  %v697_v3 = vsub.f32 %v9235_v41, %v683_v57 }
 0x2a7   :  { %v686_v14 = vpop.xlane.xlu0 %685 }
 0x2a8   :  { %v709_v12 = vmul.f32 1.442695, %v697_v3  ;;  %v698_v31 = vsub.f32 %v9243_v47, %v686_v14  ;;  %1429 = vmax.xlane.f32.xlu0 %v1428_v10  ;;  %8404 = vpow2.f32 %v715_v60 }
 0x2aa   :  { %v711_v44 = vmul.f32 1.442695, %v698_v31  ;;  %8406 = vpow2.f32 %v709_v12 }
 0x2ac   :  { %8408 = vpow2.f32 %v711_v44  ;;  %1423 = vmax.xlane.f32.xlu0 %v1422_v39 }
 0x2ad   :  { %8410 = vpow2.f32 %v713_v34  ;;  %v9312_v41 = vpop.eup %8396 }
 0x2ae   :  { %11880 = vst [vmem:[#allocation16_spill] sm:$0xff] %v9312_v41 }
 0x2af   :  { %v9314_v27 = vpop.eup %8398 }
 0x2b0   :  { %11881 = vst [vmem:[#allocation17_spill] sm:$0xff] %v9314_v27  ;;  %v9316_v43 = vpop.eup %8400  ;;  %v741_v47 = vpack.c.bf16 %v9314_v27, %v9312_v41 }
 0x2b1   :  { %11882 = vst [vmem:[#allocation18_spill] sm:$0xff] %v9316_v43  ;;  %v9320_v48 = vpop.eup %8402 }
 0x2b2   :  { %11883 = vst [vmem:[#allocation19_spill] sm:$0xff] %v9320_v48  ;;  %v742_v29 = vpack.c.bf16 %v9320_v48, %v9316_v43  ;;  %7723 = vmatprep.mubr.msk.bf16.mxu1 %vm668_vm1, %v741_v47 }
 0x2b4   :  { %7724 = vmatmul.mubr.msk.bf16.vlgmr.msra.gmra.mxu1 %vm668_vm1, %v742_v29 }
 0x2b5   :  { %7748 = vmatpush3.bf16.msra.mxu1 %v9223_v23  ;;  %v9327_v51 = vpop.eup %8404  ;;  %v9344_v23 = vpop.f32.mrf.mxu0 }
 0x2b6   :  { %7749 = vmatprep.subr.bf16.mxu1 %v1113_v40  ;;  %11884 = vst [vmem:[#allocation20_spill] sm:$0xff] %v9327_v51 }
 0x2b7   :  { %v9329_v57 = vpop.eup %8406  ;;  %v9352_v12 = vpop.f32.mrf.mxu0 }
 0x2b8   :  { %11885 = vst [vmem:[#allocation21_spill] sm:$0xff] %v9329_v57 }
 0x2b9   :  { %v9331_v60 = vpop.eup %8408  ;;  %7750 = vmatpush3.bf16.msra.mxu1 %v1113_v40  ;;  %v1437_v40 = vsel %vm668_vm1, %v9344_v23, -inf  ;;  %v9358_v31 = vpop.f32.mrf.mxu0 }
 0x2ba   :  { %11886 = vst [vmem:[#allocation22_spill] sm:$0xff] %v9331_v60  ;;  %v9333_v3 = vpop.eup %8410  ;;  %v743_v14 = vpack.c.bf16 %v9331_v60, %v9329_v57  ;;  %7751 = vmatprep.subr.bf16.mxu1 %v9283_v37 }
 0x2bb   :  { %11887 = vst [vmem:[#allocation23_spill] sm:$0xff] %v9333_v3  ;;  %v744_v10 = vpack.c.bf16 %v9327_v51, %v9333_v3  ;;  %v9364_v34 = vpop.f32.mrf.mxu0 }
 0x2bc   :  { %7727 = vmatprep.mubr.msk.bf16.mxu1 %vm668_vm1, %v743_v14  ;;  %v1434_v44 = vsel %vm668_vm1, %v9364_v34, -inf }
 0x2bd   :  { %7728 = vmatmul.mubr.msk.bf16.gmra.mxu1 %vm668_vm1, %v744_v10 }
 0x2be   :  { %7752 = vmatpush3.bf16.msra.mxu1 %v9283_v37  ;;  %v1431_v37 = vsel %vm668_vm1, %v9352_v12, -inf }
 0x2bf   :  { %7753 = vmatprep.subr.bf16.mxu1 %v9219_v19 }
 0x2c2   :  { %1499 = vrot.lane.b32.xlu0 %v9155_v22, %s9003_s2  ;;  %7754 = vmatpush3.bf16.msra.mxu1 %v9219_v19  ;;  %v1440_v19 = vsel %vm668_vm1, %v9358_v31, -inf }
 0x2c3   :  { %7779 = vmatprep.subr.bf16.mxu1 %v9277_v17 }
 0x2c5   :  { %1438 = vmax.xlane.f32.xlu1 %v1437_v40 }
 0x2c9   :  { %1432 = vmax.xlane.f32.xlu1 %v1431_v37 }
 0x2da   :  { %1713 = vrot.lane.b32.xlu1 %v9065_v45, %s9004_s7 }
 0x2de   :  { %1703 = vrot.lane.b32.xlu1 %v9095_v58, %s9004_s7 }
 0x2e1   :  { %1441 = vmax.xlane.f32.xlu0 %v1440_v19 }
 0x2e2   :  { %1707 = vrot.lane.b32.xlu1 %v9115_v1, %s9004_s7 }
 0x2e5   :  { %1435 = vmax.xlane.f32.xlu0 %v1434_v44 }
 0x2e6   :  { %1896 = vrot.lane.b32.xlu1 %v9163_v26, %s9004_s7 }
 0x2ea   :  { %1892 = vrot.lane.b32.xlu1 %v9153_v20, %s9004_s7 }
 0x2ee   :  { %2110 = vrot.lane.b32.xlu1 %v9069_v52, %s8998_s25 }
 0x2fb   :  { %1715 = vrot.lane.b32.xlu0 %v9061_v42, %s9004_s7 }
 0x2ff   :  { %1701 = vrot.lane.b32.xlu0 %v9057_v36, %s9004_s7 }
 0x303   :  { %1705 = vrot.lane.b32.xlu0 %v9087_v55, %s9004_s7 }
 0x307   :  { %1894 = vrot.lane.b32.xlu0 %v9171_v28, %s9004_s7 }
 0x309   :  { %v1036_v39 = vpop.xlane.xlu1 %1035 }
 0x30a   :  { %v1054_v40 = vsub.f32 %v9249_v50, %v1036_v39 }
 0x30c   :  { %v1064_v43 = vmul.f32 1.442695, %v1054_v40 }
 0x30d   :  { %v1030_v47 = vpop.xlane.xlu1 %1029  ;;  %v1039_v29 = vpop.xlane.xlu0 %1038 }
 0x30e   :  { %v1052_v14 = vsub.f32 %v9253_v53, %v1030_v47  ;;  %v1055_v10 = vsub.f32 %v9255_v56, %v1039_v29 }
 0x310   :  { %v1060_v37 = vmul.f32 1.442695, %v1052_v14  ;;  %v1066_v3 = vmul.f32 1.442695, %v1055_v10 }
 0x311   :  { %v1048_v19 = vpop.xlane.xlu1 %1047  ;;  %v1033_v44 = vpop.xlane.xlu0 %1032 }
 0x312   :  { %v1053_v57 = vsub.f32 %v9261_v63, %v1033_v44  ;;  %8412 = vpow2.f32 %v1060_v37  ;;  %v1058_v50 = vsub.f32 %v9263_v0, %v1048_v19 }
 0x313   :  { %8414 = vpow2.f32 %v1066_v3 }
 0x314   :  { %v1062_v41 = vmul.f32 1.442695, %v1053_v57  ;;  %v1072_v63 = vmul.f32 1.442695, %v1058_v50 }
 0x315   :  { %v1042_v51 = vpop.xlane.xlu1 %1041  ;;  %v1051_v60 = vpop.xlane.xlu0 %1050 }
 0x316   :  { %v1056_v48 = vsub.f32 %v9269_v7, %v1042_v51  ;;  %v1059_v53 = vsub.f32 %v9271_v9, %v1051_v60  ;;  %8416 = vpow2.f32 %v1062_v41 }
 0x317   :  { %8418 = vpow2.f32 %v1064_v43 }
 0x318   :  { %v1068_v56 = vmul.f32 1.442695, %v1056_v48  ;;  %v1074_v39 = vmul.f32 1.442695, %v1059_v53 }
 0x319   :  { %v1045_v47 = vpop.xlane.xlu0 %1044 }
 0x31a   :  { %v1057_v29 = vsub.f32 %v9279_v25, %v1045_v47  ;;  %8420 = vpow2.f32 %v1068_v56 }
 0x31b   :  { %8422 = vpow2.f32 %v1074_v39 }
 0x31c   :  { %v1070_v57 = vmul.f32 1.442695, %v1057_v29 }
 0x31e   :  { %8424 = vpow2.f32 %v1070_v57 }
 0x31f   :  { %8426 = vpow2.f32 %v1072_v63  ;;  %v9392_v3 = vpop.eup %8412 }
 0x320   :  { %v9394_v7 = vpop.eup %8414 }
 0x323   :  { %v9396_v9 = vpop.eup %8416 }
 0x324   :  { %v9398_v41 = vpop.eup %8418  ;;  %v1100_v0 = vpack.c.bf16 %v9396_v9, %v9392_v3 }
 0x325   :  { %v1101_v25 = vpack.c.bf16 %v9394_v7, %v9398_v41 }
 0x326   :  { %7755 = vmatprep.mubr.msk.bf16.mxu1 %vm668_vm1, %v1100_v0 }
 0x327   :  { %7756 = vmatmul.mubr.msk.bf16.vlgmr.msra.gmra.mxu1 %vm668_vm1, %v1101_v25  ;;  %v9406_v43 = vpop.eup %8420 }
 0x328   :  { %11888 = vst [vmem:[#allocation24_spill] sm:$0xff] %v9406_v43  ;;  %7780 = vmatpush3.bf16.msra.mxu1 %v9277_v17  ;;  %v9409_v51 = vpop.eup %8422 }
 0x329   :  { %v1427_v48 = vpop.xlane.xlu0 %1426  ;;  %11889 = vst [vmem:[#allocation25_spill] sm:$0xff] %v9409_v51  ;;  %7781 = vmatprep.subr.bf16.mxu1 %v9285_v46 }
 0x32a   :  { %v1445_v53 = vsub.f32 %v9289_v6, %v1427_v48 }
 0x32b   :  { %v9412_v60 = vpop.eup %8424 }
 0x32c   :  { %v1102_v14 = vpack.c.bf16 %v9412_v60, %v9406_v43  ;;  %v9416_v10 = vpop.eup %8426  ;;  %7782 = vmatpush3.bf16.msra.mxu1 %v9285_v46  ;;  %v1455_v47 = vmul.f32 1.442695, %v1445_v53 }
 0x32d   :  { %11890 = vst [vmem:[#allocation26_spill] sm:$0xff] %v9416_v10  ;;  %v1421_v40 = vpop.xlane.xlu0 %1420  ;;  %7783 = vmatprep.subr.bf16.mxu1 %v9217_v18  ;;  %v1103_v17 = vpack.c.bf16 %v9409_v51, %v9416_v10 }
 0x32e   :  { %7759 = vmatprep.mubr.msk.bf16.mxu1 %vm668_vm1, %v1102_v14  ;;  %v1443_v37 = vsub.f32 %v9294_v24, %v1421_v40  ;;  %v1720_v24 = vpop.permute.xlu1 %1719 }
 0x32f   :  { %7760 = vmatmul.mubr.msk.bf16.gmra.mxu1 %vm668_vm1, %v1103_v17  ;;  %v1743_v48 = vsel %vm578_vm0, %v1720_v24, 0 }
 0x330   :  { %7784 = vmatpush3.bf16.msra.mxu1 %v9217_v18  ;;  %v1451_v46 = vmul.f32 1.442695, %v1443_v37 }
 0x331   :  { %v1430_v19 = vpop.xlane.xlu0 %1429 }
 0x332   :  { %v1446_v44 = vsub.f32 %v9300_v49, %v1430_v19  ;;  %8428 = vpow2.f32 %v1451_v46  ;;  %v1718_v25 = vpop.permute.xlu1 %1717 }
 0x333   :  { %v1740_v17 = vsel %vm578_vm0, %v1718_v25, 0 }
 0x334   :  { %v1457_v50 = vmul.f32 1.442695, %v1446_v44 }
 0x335   :  { %v1424_v56 = vpop.xlane.xlu0 %1423 }
 0x336   :  { %v1444_v39 = vsub.f32 %v9307_v15, %v1424_v56  ;;  %8430 = vpow2.f32 %v1457_v50 }
 0x338   :  { %v1453_v29 = vmul.f32 1.442695, %v1444_v39 }
 0x339   :  { %v1500_v63 = vpop.permute.xlu0 %1499 }
 0x33a   :  { %8432 = vpow2.f32 %v1453_v29  ;;  %7785 = vmatprep.subr.bf16.mxu1 %v1500_v63 }
 0x33b   :  { %8434 = vpow2.f32 %v1455_v47  ;;  %7786 = vmatpush3.bf16.msra.mxu1 %v1500_v63 }
 0x33c   :  { %8271 = vmatprep.subr.msk.bf16.mxu1 %vm578_vm0, %v1720_v24 }
 0x33f   :  { %v9430_v18 = vpop.eup %8428 }
 0x343   :  { %v9432_v6 = vpop.eup %8430 }
 0x347   :  { %v9434_v49 = vpop.eup %8432 }
 0x348   :  { %v9436_v57 = vpop.eup %8434  ;;  %v1491_v15 = vpack.c.bf16 %v9434_v49, %v9430_v18 }
 0x349   :  { %v1492_v0 = vpack.c.bf16 %v9432_v6, %v9436_v57 }
 0x34a   :  { %7787 = vmatprep.mubr.msk.bf16.mxu1 %vm668_vm1, %v1491_v15 }
 0x34b   :  { %7788 = vmatmul.mubr.msk.bf16.vlgmr.msra.gmra.mxu1 %vm668_vm1, %v1492_v0 }
 0x34c   :  { %7796 = vmatpush3.bf16.xpose.msra.mxu1 %v1743_v48 }
 0x34d   :  { %8272 = vmatprep.subr.msk.bf16.mxu1 %vm578_vm0, %v1718_v25 }
 0x34e   :  { %v1439_v14 = vpop.xlane.xlu1 %1438 }
 0x34f   :  { %v1449_v39 = vsub.f32 %v9344_v23, %v1439_v14 }
 0x351   :  { %v1463_v15 = vmul.f32 1.442695, %v1449_v39 }
 0x352   :  { %v1433_v40 = vpop.xlane.xlu1 %1432 }
 0x353   :  { %v1447_v46 = vsub.f32 %v9352_v12, %v1433_v40 }
 0x354   :  { %7798 = vmatpush3.bf16.xpose.msra.mxu1 %v1740_v17 }
 0x355   :  { %v1459_v47 = vmul.f32 1.442695, %v1447_v46 }
 0x356   :  { %v1714_v37 = vpop.permute.xlu1 %1713 }
 0x357   :  { %8436 = vpow2.f32 %v1459_v47  ;;  %v1734_v48 = vsel %vm578_vm0, %v1714_v37, 0 }
 0x35a   :  { %v1704_v19 = vpop.permute.xlu1 %1703 }
 0x35e   :  { %v1708_v44 = vpop.permute.xlu1 %1707 }
 0x362   :  { %v1897_v53 = vpop.permute.xlu1 %1896 }
 0x363   :  { %7811 = vmatprep.subr.bf16.mxu0 %v1897_v53 }
 0x364   :  { %7812 = vmatpush3.bf16.msra.mxu0 %v1897_v53 }
 0x366   :  { %v1893_v53 = vpop.permute.xlu1 %1892 }
 0x36a   :  { %v1442_v50 = vpop.xlane.xlu0 %1441 }
 0x36b   :  { %v1450_v56 = vsub.f32 %v9358_v31, %v1442_v50 }
 0x36d   :  { %v1465_v29 = vmul.f32 1.442695, %v1450_v56 }
 0x36e   :  { %v1436_v63 = vpop.xlane.xlu0 %1435 }
 0x36f   :  { %v1448_v24 = vsub.f32 %v9364_v34, %v1436_v63  ;;  %8438 = vpow2.f32 %v1465_v29  ;;  %v9455_v34 = vpop.eup %8436 }
 0x370   :  { %11891 = vst [vmem:[#allocation27_spill] sm:$0xff] %v9455_v34 }
 0x371   :  { %v1461_v0 = vmul.f32 1.442695, %v1448_v24 }
 0x372   :  { %v1716_v25 = vpop.permute.xlu0 %1715 }
 0x373   :  { %8440 = vpow2.f32 %v1461_v0  ;;  %8273 = vmatprep.subr.msk.bf16.mxu1 %vm578_vm0, %v1716_v25  ;;  %v1737_v12 = vsel %vm578_vm0, %v1716_v25, 0 }
 0x374   :  { %8442 = vpow2.f32 %v1463_v15  ;;  %7800 = vmatpush3.bf16.xpose.msra.mxu1 %v1737_v12  ;;  %v9473_v56 = vpop.f32.mrf.mxu1 }
 0x375   :  { %8274 = vmatprep.subr.msk.bf16.mxu1 %vm578_vm0, %v1714_v37  ;;  %11895 = vst [vmem:[#allocation31_spill] sm:$0xff] %v9473_v56 }
 0x376   :  { %v1702_v23 = vpop.permute.xlu0 %1701  ;;  %v9475_v39 = vpop.f32.mrf.mxu1 }
 0x377   :  { %11896 = vst [vmem:[#allocation32_spill] sm:$0xff] %v9475_v39 }
 0x378   :  { %v9477_v47 = vpop.f32.mrf.mxu1 }
 0x379   :  { %11897 = vst [vmem:[#allocation33_spill] sm:$0xff] %v9477_v47 }
 0x37a   :  { %v1706_v31 = vpop.permute.xlu0 %1705  ;;  %v9479_v29 = vpop.f32.mrf.mxu1 }
 0x37b   :  { %11898 = vst [vmem:[#allocation34_spill] sm:$0xff] %v9479_v29 }
 0x37c   :  { %7802 = vmatpush3.bf16.xpose.msra.mxu1 %v1734_v48  ;;  %v9457_v40 = vpop.eup %8438 }
 0x37d   :  { %11892 = vst [vmem:[#allocation28_spill] sm:$0xff] %v9457_v40  ;;  %v9481_v63 = vpop.f32.mrf.mxu1 }
 0x37e   :  { %v1895_v14 = vpop.permute.xlu0 %1894  ;;  %11899 = vst [vmem:[#allocation35_spill] sm:$0xff] %v9481_v63 }
 0x37f   :  { %7813 = vmatprep.subr.bf16.mxu0 %v1895_v14  ;;  %v9483_v24 = vpop.f32.mrf.mxu1 }
 0x380   :  { %v9459_v17 = vpop.eup %8440  ;;  %7814 = vmatpush3.bf16.msra.mxu0 %v1895_v14  ;;  %11900 = vst [vmem:[#allocation36_spill] sm:$0xff] %v9483_v24 }
 0x381   :  { %11893 = vst [vmem:[#allocation29_spill] sm:$0xff] %v9459_v17  ;;  %v9461_v46 = vpop.eup %8442  ;;  %7815 = vmatprep.subr.bf16.mxu0 %v1893_v53  ;;  %v1493_v50 = vpack.c.bf16 %v9459_v17, %v9455_v34  ;;  %v9485_v15 = vpop.f32.mrf.mxu1 }
 0x382   :  { %11894 = vst [vmem:[#allocation30_spill] sm:$0xff] %v9461_v46  ;;  %v1494_v37 = vpack.c.bf16 %v9457_v40, %v9461_v46  ;;  %11901 = vst [vmem:[#allocation37_spill] sm:$0xff] %v9485_v15 }
 0x383   :  { %7791 = vmatprep.mubr.msk.bf16.mxu1 %vm668_vm1, %v1493_v50  ;;  %v9487_v0 = vpop.f32.mrf.mxu1 }
 0x384   :  { %7792 = vmatmul.mubr.msk.bf16.gmra.mxu1 %vm668_vm1, %v1494_v37  ;;  %7816 = vmatpush3.bf16.msra.mxu0 %v1893_v53  ;;  %11902 = vst [vmem:[#allocation38_spill] sm:$0xff] %v9487_v0 }
 0x385   :  { %7803 = vmatprep.mubr.msk.bf16.mxu1 %vm578_vm0, %v1702_v23 }
 0x38c   :  { %7804 = vmatmul.mubr.msk.bf16.vlgmr.msra.gmra.mxu1 %vm578_vm0, %v1704_v19 }
 0x38d   :  { %7807 = vmatprep.mubr.msk.bf16.mxu1 %vm578_vm0, %v1706_v31 }
 0x394   :  { %7808 = vmatmul.mubr.msk.bf16.gmra.mxu1 %vm578_vm0, %v1708_v44 }
 0x3e7   :  { %v9489_v19 = vpop.f32.mrf.mxu1 }
 0x3e8   :  { %11903 = vst [vmem:[#allocation39_spill] sm:$0xff] %v9489_v19 }
 0x3e9   :  { %v9491_v25 = vpop.f32.mrf.mxu1 }
 0x3ea   :  { %11904 = vst [vmem:[#allocation40_spill] sm:$0xff] %v9491_v25 }
 0x3eb   :  { %v9493_v44 = vpop.f32.mrf.mxu1 }
 0x3ec   :  { %11905 = vst [vmem:[#allocation41_spill] sm:$0xff] %v9493_v44 }
 0x3ed   :  { %v9495_v12 = vpop.f32.mrf.mxu1 }
 0x3ee   :  { %11906 = vst [vmem:[#allocation42_spill] sm:$0xff] %v9495_v12 }
 0x3ef   :  { %v9497_v23 = vpop.f32.mrf.mxu1 }
 0x3f0   :  { %11907 = vst [vmem:[#allocation43_spill] sm:$0xff] %v9497_v23 }
 0x3f1   :  { %v9499_v31 = vpop.f32.mrf.mxu1 }
 0x3f2   :  { %11908 = vst [vmem:[#allocation44_spill] sm:$0xff] %v9499_v31 }
 0x3f3   :  { %v9501_v48 = vpop.f32.mrf.mxu1 }
 0x3f4   :  { %11909 = vst [vmem:[#allocation45_spill] sm:$0xff] %v9501_v48 }
 0x3f5   :  { %v9503_v14 = vpop.f32.mrf.mxu1 }
 0x3f6   :  { %11910 = vst [vmem:[#allocation46_spill] sm:$0xff] %v9503_v14 }
 0x40b   :  { %v9505_v53 = vpop.f32.mrf.mxu1 }
 0x40c   :  { %11911 = vst [vmem:[#allocation47_spill] sm:$0xff] %v9505_v53 }
 0x40d   :  { %v9507_v50 = vpop.f32.mrf.mxu1 }
 0x40e   :  { %11912 = vst [vmem:[#allocation48_spill] sm:$0xff] %v9507_v50 }
 0x40f   :  { %v9509_v37 = vpop.f32.mrf.mxu1 }
 0x410   :  { %11913 = vst [vmem:[#allocation49_spill] sm:$0xff] %v9509_v37 }
 0x411   :  { %v9511_v63 = vpop.f32.mrf.mxu1 }
 0x412   :  { %11914 = vst [vmem:[#allocation50_spill] sm:$0xff] %v9511_v63 }
 0x444   :  { %v9513_v24 = vpop.f32.mrf.mxu1 }
 0x445   :  { %11915 = vst [vmem:[#allocation51_spill] sm:$0xff] %v9513_v24 }
 0x446   :  { %v9515_v56 = vpop.f32.mrf.mxu1 }
 0x447   :  { %11916 = vst [vmem:[#allocation52_spill] sm:$0xff] %v9515_v56 }
 0x448   :  { %v9517_v39 = vpop.f32.mrf.mxu1 }
 0x449   :  { %11917 = vst [vmem:[#allocation53_spill] sm:$0xff] %v9517_v39 }
 0x44a   :  { %v9519_v23 = vpop.f32.mrf.mxu1 }
 0x44b   :  { %11918 = vst [vmem:[#allocation54_spill] sm:$0xff] %v9519_v23 }
 0x44c   :  { %v7805_v31 = vpop.f32.mrf.mxu1 }
 0x44d   :  { %v1816_v48 = vsel %vm668_vm1, %v7805_v31, -inf }
 0x44e   :  { %1817 = vmax.xlane.f32.xlu0 %v1816_v48  ;;  %v1779_v14 = vpop.f32.mrf.mxu1 }
 0x44f   :  { %v1810_v0 = vsel %vm668_vm1, %v1779_v14, -inf }
 0x450   :  { %v7806_v15 = vpop.f32.mrf.mxu1 }
 0x451   :  { %v1819_v24 = vsel %vm668_vm1, %v7806_v15, -inf }
 0x452   :  { %1811 = vmax.xlane.f32.xlu0 %v1810_v0  ;;  %v1782_v47 = vpop.f32.mrf.mxu1 }
 0x453   :  { %v1813_v29 = vsel %vm668_vm1, %v1782_v47, -inf }
 0x454   :  { %1814 = vmax.xlane.f32.xlu1 %v1813_v29  ;;  %v9529_v56 = vpop.f32.mrf.mxu1 }
 0x455   :  { %v1828_v0 = vsel %vm668_vm1, %v9529_v56, -inf }
 0x456   :  { %1820 = vmax.xlane.f32.xlu0 %v1819_v24  ;;  %v9531_v48 = vpop.f32.mrf.mxu1 }
 0x457   :  { %v1822_v24 = vsel %vm668_vm1, %v9531_v48, -inf }
 0x458   :  { %v7810_v39 = vpop.f32.mrf.mxu1 }
 0x459   :  { %v1831_v29 = vsel %vm668_vm1, %v7810_v39, -inf }
 0x45a   :  { %v9536_v23 = vpop.f32.mrf.mxu1 }
 0x45b   :  { %v1825_v37 = vsel %vm668_vm1, %v9536_v23, -inf }
 0x465   :  { %2108 = vrot.lane.b32.xlu1 %v9077_v54, %s8998_s25 }
 0x46c   :  { %1890 = vrot.lane.b32.xlu0 %v9155_v22, %s9004_s7 }
 0x489   :  { %1829 = vmax.xlane.f32.xlu1 %v1828_v0  ;;  %v2111_v0 = vpop.permute.xlu1 %2110 }
 0x48b   :  { %1832 = vmax.xlane.f32.xlu0 %v1831_v29 }
 0x48d   :  { %1823 = vmax.xlane.f32.xlu1 %v1822_v24 }
 0x48f   :  { %1826 = vmax.xlane.f32.xlu0 %v1825_v37 }
 0x49e   :  { %2104 = vrot.lane.b32.xlu1 %v9065_v45, %s8998_s25 }
 0x4a2   :  { %2094 = vrot.lane.b32.xlu1 %v9095_v58, %s8998_s25 }
 0x4a5   :  { %2106 = vrot.lane.b32.xlu0 %v9061_v42, %s8998_s25 }
 0x4a6   :  { %2098 = vrot.lane.b32.xlu1 %v9115_v1, %s8998_s25 }
 0x4a9   :  { %2092 = vrot.lane.b32.xlu0 %v9057_v36, %s8998_s25 }
 0x4aa   :  { %2287 = vrot.lane.b32.xlu1 %v9163_v26, %s8998_s25 }
 0x4ad   :  { %2096 = vrot.lane.b32.xlu0 %v9087_v55, %s8998_s25 }
 0x4ae   :  { %2283 = vrot.lane.b32.xlu1 %v9153_v20, %s8998_s25 }
 0x4b1   :  { %2285 = vrot.lane.b32.xlu0 %v9171_v28, %s8998_s25 }
 0x4b2   :  { %2501 = vrot.lane.b32.xlu1 %v9069_v52, %s9005_s8 }
 0x4d7   :  { %v1818_v37 = vpop.xlane.xlu0 %1817 }
 0x4d8   :  { %v1836_v29 = vsub.f32 %v7805_v31, %v1818_v37 }
 0x4da   :  { %v1846_v53 = vmul.f32 1.442695, %v1836_v29 }
 0x4db   :  { %v1812_v24 = vpop.xlane.xlu0 %1811 }
 0x4dc   :  { %v1834_v63 = vsub.f32 %v1779_v14, %v1812_v24 }
 0x4dd   :  { %v1815_v44 = vpop.xlane.xlu1 %1814 }
 0x4de   :  { %v1842_v19 = vmul.f32 1.442695, %v1834_v63  ;;  %v1835_v25 = vsub.f32 %v1782_v47, %v1815_v44 }
 0x4df   :  { %v1821_v50 = vpop.xlane.xlu0 %1820 }
 0x4e0   :  { %v1844_v12 = vmul.f32 1.442695, %v1835_v25  ;;  %v1837_v27 = vsub.f32 %v7806_v15, %v1821_v50  ;;  %8444 = vpow2.f32 %v1842_v19 }
 0x4e2   :  { %8446 = vpow2.f32 %v1844_v12  ;;  %v1848_v46 = vmul.f32 1.442695, %v1837_v27 }
 0x4e3   :  { %8448 = vpow2.f32 %v1846_v53  ;;  %v1891_v34 = vpop.permute.xlu0 %1890 }
 0x4e4   :  { %8450 = vpow2.f32 %v1848_v46  ;;  %7817 = vmatprep.subr.bf16.mxu0 %v1891_v34  ;;  %v2109_v46 = vpop.permute.xlu1 %2108 }
 0x4e5   :  { %7818 = vmatpush3.bf16.msra.mxu0 %v1891_v34  ;;  %v2134_v34 = vsel %vm578_vm0, %v2111_v0, 0  ;;  %v2131_v19 = vsel %vm578_vm0, %v2109_v46, 0 }
 0x4e6   :  { %8275 = vmatprep.subr.msk.bf16.mxu0 %vm578_vm0, %v2111_v0 }
 0x4ed   :  { %v9563_v31 = vpop.eup %8444 }
 0x4ef   :  { %v9565_v14 = vpop.eup %8446 }
 0x4f0   :  { %v9567_v63 = vpop.eup %8448  ;;  %v1882_v47 = vpack.c.bf16 %v9565_v14, %v9563_v31 }
 0x4f1   :  { %11919 = vst [vmem:[#allocation55_spill] sm:$0xff] %v9567_v63  ;;  %v9571_v15 = vpop.eup %8450 }
 0x4f2   :  { %v1883_v27 = vpack.c.bf16 %v9571_v15, %v9567_v63  ;;  %7819 = vmatprep.mubr.msk.bf16.mxu0 %vm668_vm1, %v1882_v47 }
 0x4f4   :  { %7820 = vmatmul.mubr.msk.bf16.vlgmr.msra.gmra.mxu0 %vm668_vm1, %v1883_v27 }
 0x4f5   :  { %7828 = vmatpush3.bf16.xpose.msra.mxu0 %v2134_v34 }
 0x4f6   :  { %8276 = vmatprep.subr.msk.bf16.mxu0 %vm578_vm0, %v2109_v46 }
 0x4fd   :  { %7830 = vmatpush3.bf16.xpose.msra.mxu0 %v2131_v19 }
 0x512   :  { %v1830_v25 = vpop.xlane.xlu1 %1829 }
 0x513   :  { %v1840_v53 = vsub.f32 %v9529_v56, %v1830_v25 }
 0x514   :  { %v1833_v44 = vpop.xlane.xlu0 %1832 }
 0x515   :  { %v1841_v12 = vsub.f32 %v7810_v39, %v1833_v44  ;;  %v1854_v27 = vmul.f32 1.442695, %v1840_v53 }
 0x516   :  { %v1824_v50 = vpop.xlane.xlu1 %1823 }
 0x517   :  { %v1856_v37 = vmul.f32 1.442695, %v1841_v12  ;;  %v1838_v29 = vsub.f32 %v9531_v48, %v1824_v50 }
 0x518   :  { %v1827_v24 = vpop.xlane.xlu0 %1826 }
 0x519   :  { %v1850_v47 = vmul.f32 1.442695, %v1838_v29  ;;  %v1839_v0 = vsub.f32 %v9536_v23, %v1827_v24  ;;  %8452 = vpow2.f32 %v1856_v37 }
 0x51a   :  { %v2105_v34 = vpop.permute.xlu1 %2104 }
 0x51b   :  { %v1852_v10 = vmul.f32 1.442695, %v1839_v0  ;;  %8454 = vpow2.f32 %v1850_v47  ;;  %v2125_v23 = vsel %vm578_vm0, %v2105_v34, 0 }
 0x51c   :  { %v2107_v46 = vpop.permute.xlu0 %2106 }
 0x51d   :  { %8456 = vpow2.f32 %v1852_v10  ;;  %8277 = vmatprep.subr.msk.bf16.mxu0 %vm578_vm0, %v2107_v46  ;;  %v2128_v39 = vsel %vm578_vm0, %v2107_v46, 0 }
 0x51e   :  { %8458 = vpow2.f32 %v1854_v27  ;;  %v2095_v56 = vpop.permute.xlu1 %2094  ;;  %7832 = vmatpush3.bf16.xpose.msra.mxu0 %v2128_v39 }
 0x51f   :  { %8278 = vmatprep.subr.msk.bf16.mxu0 %vm578_vm0, %v2105_v34 }
 0x520   :  { %v2093_v48 = vpop.permute.xlu0 %2092 }
 0x522   :  { %v2099_v19 = vpop.permute.xlu1 %2098 }
 0x524   :  { %v2097_v25 = vpop.permute.xlu0 %2096 }
 0x526   :  { %v2288_v44 = vpop.permute.xlu1 %2287  ;;  %7834 = vmatpush3.bf16.xpose.msra.mxu0 %v2125_v23  ;;  %v9587_v12 = vpop.eup %8452 }
 0x527   :  { %7843 = vmatprep.subr.bf16.mxu1 %v2288_v44  ;;  %11920 = vst [vmem:[#allocation56_spill] sm:$0xff] %v9587_v12 }
 0x528   :  { %7844 = vmatpush3.bf16.msra.mxu1 %v2288_v44  ;;  %v2286_v10 = vpop.permute.xlu0 %2285  ;;  %v9589_v53 = vpop.eup %8454 }
 0x529   :  { %11921 = vst [vmem:[#allocation57_spill] sm:$0xff] %v9589_v53  ;;  %7845 = vmatprep.subr.bf16.mxu1 %v2286_v10 }
 0x52a   :  { %v9591_v50 = vpop.eup %8456  ;;  %v2284_v24 = vpop.permute.xlu1 %2283 }
 0x52b   :  { %11922 = vst [vmem:[#allocation58_spill] sm:$0xff] %v9591_v50  ;;  %v9593_v37 = vpop.eup %8458  ;;  %v1884_v29 = vpack.c.bf16 %v9591_v50, %v9589_v53 }
 0x52c   :  { %11923 = vst [vmem:[#allocation59_spill] sm:$0xff] %v9593_v37  ;;  %7846 = vmatpush3.bf16.msra.mxu1 %v2286_v10  ;;  %v1885_v47 = vpack.c.bf16 %v9587_v12, %v9593_v37 }
 0x52d   :  { %7823 = vmatprep.mubr.msk.bf16.mxu0 %vm668_vm1, %v1884_v29  ;;  %7847 = vmatprep.subr.bf16.mxu1 %v2284_v24 }
 0x52e   :  { %7824 = vmatmul.mubr.msk.bf16.gmra.mxu0 %vm668_vm1, %v1885_v47 }
 0x52f   :  { %7835 = vmatprep.mubr.msk.bf16.mxu0 %vm578_vm0, %v2093_v48 }
 0x530   :  { %7848 = vmatpush3.bf16.msra.mxu1 %v2284_v24 }
 0x536   :  { %7836 = vmatmul.mubr.msk.bf16.vlgmr.msra.gmra.mxu0 %vm578_vm0, %v2095_v56 }
 0x537   :  { %7839 = vmatprep.mubr.msk.bf16.mxu0 %vm578_vm0, %v2097_v25 }
 0x53e   :  { %7840 = vmatmul.mubr.msk.bf16.gmra.mxu0 %vm578_vm0, %v2099_v19 }
 0x5b4   :  { %v9605_v0 = vpop.f32.mrf.mxu0 }
 0x5b5   :  { %11924 = vst [vmem:[#allocation60_spill] sm:$0xff] %v9605_v0 }
 0x5b6   :  { %v9607_v27 = vpop.f32.mrf.mxu0 }
 0x5b7   :  { %11925 = vst [vmem:[#allocation61_spill] sm:$0xff] %v9607_v27 }
 0x5b8   :  { %v9609_v34 = vpop.f32.mrf.mxu0 }
 0x5b9   :  { %11926 = vst [vmem:[#allocation62_spill] sm:$0xff] %v9609_v34 }
 0x5ba   :  { %v9611_v46 = vpop.f32.mrf.mxu0 }
 0x5bb   :  { %11927 = vst [vmem:[#allocation63_spill] sm:$0xff] %v9611_v46 }
 0x5ee   :  { %v9613_v39 = vpop.f32.mrf.mxu0 }
 0x5ef   :  { %11928 = vst [vmem:[#allocation64_spill] sm:$0xff] %v9613_v39 }
 0x5f0   :  { %v9615_v23 = vpop.f32.mrf.mxu0 }
 0x5f1   :  { %11929 = vst [vmem:[#allocation65_spill] sm:$0xff] %v9615_v23 }
 0x5f2   :  { %v9617_v48 = vpop.f32.mrf.mxu0 }
 0x5f3   :  { %11930 = vst [vmem:[#allocation66_spill] sm:$0xff] %v9617_v48 }
 0x5f4   :  { %v9619_v44 = vpop.f32.mrf.mxu0 }
 0x5f5   :  { %11931 = vst [vmem:[#allocation67_spill] sm:$0xff] %v9619_v44 }
 0x5f6   :  { %v7837_v56 = vpop.f32.mrf.mxu0 }
 0x5f7   :  { %v2207_v25 = vsel %vm668_vm1, %v7837_v56, -inf }
 0x5f8   :  { %2208 = vmax.xlane.f32.xlu0 %v2207_v25  ;;  %v2170_v19 = vpop.f32.mrf.mxu0 }
 0x5f9   :  { %v2201_v29 = vsel %vm668_vm1, %v2170_v19, -inf }
 0x5fa   :  { %v7838_v10 = vpop.f32.mrf.mxu0 }
 0x5fb   :  { %v2210_v39 = vsel %vm668_vm1, %v7838_v10, -inf }
 0x5fc   :  { %2202 = vmax.xlane.f32.xlu0 %v2201_v29  ;;  %v2173_v24 = vpop.f32.mrf.mxu0 }
 0x5fd   :  { %v2204_v47 = vsel %vm668_vm1, %v2173_v24, -inf }
 0x5fe   :  { %2205 = vmax.xlane.f32.xlu1 %v2204_v47  ;;  %v9629_v23 = vpop.f32.mrf.mxu0 }
 0x5ff   :  { %v2219_v29 = vsel %vm668_vm1, %v9629_v23, -inf }
 0x600   :  { %2211 = vmax.xlane.f32.xlu0 %v2210_v39  ;;  %v9631_v25 = vpop.f32.mrf.mxu0 }
 0x601   :  { %v2213_v39 = vsel %vm668_vm1, %v9631_v25, -inf }
 0x602   :  { %v7842_v48 = vpop.f32.mrf.mxu0 }
 0x603   :  { %v2222_v47 = vsel %vm668_vm1, %v7842_v48, -inf }
 0x604   :  { %v9636_v44 = vpop.f32.mrf.mxu0 }
 0x605   :  { %v2216_v0 = vsel %vm668_vm1, %v9636_v44, -inf }
 0x60f   :  { %2499 = vrot.lane.b32.xlu1 %v9077_v54, %s9005_s8 }
 0x616   :  { %2281 = vrot.lane.b32.xlu0 %v9155_v22, %s8998_s25 }
 0x633   :  { %2220 = vmax.xlane.f32.xlu1 %v2219_v29  ;;  %v2502_v29 = vpop.permute.xlu1 %2501 }
 0x635   :  { %2223 = vmax.xlane.f32.xlu0 %v2222_v47 }
 0x637   :  { %2214 = vmax.xlane.f32.xlu1 %v2213_v39 }
 0x639   :  { %2217 = vmax.xlane.f32.xlu0 %v2216_v0 }
 0x648   :  { %2495 = vrot.lane.b32.xlu1 %v9065_v45, %s9005_s8 }
 0x64c   :  { %2485 = vrot.lane.b32.xlu1 %v9095_v58, %s9005_s8 }
 0x64f   :  { %2497 = vrot.lane.b32.xlu0 %v9061_v42, %s9005_s8 }
 0x650   :  { %2489 = vrot.lane.b32.xlu1 %v9115_v1, %s9005_s8 }
 0x653   :  { %2483 = vrot.lane.b32.xlu0 %v9057_v36, %s9005_s8 }
 0x654   :  { %2678 = vrot.lane.b32.xlu1 %v9163_v26, %s9005_s8 }
 0x657   :  { %2487 = vrot.lane.b32.xlu0 %v9087_v55, %s9005_s8 }
 0x658   :  { %2674 = vrot.lane.b32.xlu1 %v9153_v20, %s9005_s8 }
 0x65b   :  { %2676 = vrot.lane.b32.xlu0 %v9171_v28, %s9005_s8 }
 0x65c   :  { %2892 = vrot.lane.b32.xlu1 %v9069_v52, %s9006_s9 }
 0x681   :  { %v2209_v0 = vpop.xlane.xlu0 %2208 }
 0x682   :  { %v2227_v47 = vsub.f32 %v7837_v56, %v2209_v0 }
 0x684   :  { %v2237_v53 = vmul.f32 1.442695, %v2227_v47 }
 0x685   :  { %v2203_v39 = vpop.xlane.xlu0 %2202 }
 0x686   :  { %v2225_v27 = vsub.f32 %v2170_v19, %v2203_v39 }
 0x687   :  { %v2206_v34 = vpop.xlane.xlu1 %2205 }
 0x688   :  { %v2233_v46 = vmul.f32 1.442695, %v2225_v27  ;;  %v2226_v37 = vsub.f32 %v2173_v24, %v2206_v34 }
 0x689   :  { %v2212_v43 = vpop.xlane.xlu0 %2211 }
 0x68a   :  { %v2235_v12 = vmul.f32 1.442695, %v2226_v37  ;;  %v2228_v50 = vsub.f32 %v7838_v10, %v2212_v43  ;;  %8460 = vpow2.f32 %v2233_v46 }
 0x68c   :  { %8462 = vpow2.f32 %v2235_v12  ;;  %v2239_v40 = vmul.f32 1.442695, %v2228_v50 }
 0x68d   :  { %8464 = vpow2.f32 %v2237_v53  ;;  %v2282_v17 = vpop.permute.xlu0 %2281 }
 0x68e   :  { %8466 = vpow2.f32 %v2239_v40  ;;  %7849 = vmatprep.subr.bf16.mxu1 %v2282_v17  ;;  %v2525_v40 = vsel %vm578_vm0, %v2502_v29, 0 }
 0x68f   :  { %7850 = vmatpush3.bf16.msra.mxu1 %v2282_v17  ;;  %v2500_v17 = vpop.permute.xlu1 %2499 }
 0x690   :  { %8279 = vmatprep.subr.msk.bf16.mxu1 %vm578_vm0, %v2502_v29  ;;  %v2522_v53 = vsel %vm578_vm0, %v2500_v17, 0 }
 0x697   :  { %v9663_v56 = vpop.eup %8460 }
 0x698   :  { %11932 = vst [vmem:[#allocation68_spill] sm:$0xff] %v9663_v56 }
 0x699   :  { %v9665_v19 = vpop.eup %8462 }
 0x69a   :  { %v9667_v27 = vpop.eup %8464  ;;  %v2273_v37 = vpack.c.bf16 %v9665_v19, %v9663_v56 }
 0x69b   :  { %11933 = vst [vmem:[#allocation69_spill] sm:$0xff] %v9667_v27  ;;  %v9671_v43 = vpop.eup %8466 }
 0x69c   :  { %v2274_v12 = vpack.c.bf16 %v9671_v43, %v9667_v27  ;;  %7851 = vmatprep.mubr.msk.bf16.mxu1 %vm668_vm1, %v2273_v37 }
 0x69e   :  { %7852 = vmatmul.mubr.msk.bf16.vlgmr.msra.gmra.mxu1 %vm668_vm1, %v2274_v12 }
 0x69f   :  { %7860 = vmatpush3.bf16.xpose.msra.mxu1 %v2525_v40 }
 0x6a0   :  { %8280 = vmatprep.subr.msk.bf16.mxu1 %vm578_vm0, %v2500_v17 }
 0x6a7   :  { %7862 = vmatpush3.bf16.xpose.msra.mxu1 %v2522_v53 }
 0x6bc   :  { %v2221_v50 = vpop.xlane.xlu1 %2220 }
 0x6bd   :  { %v2231_v10 = vsub.f32 %v9629_v23, %v2221_v50 }
 0x6be   :  { %v2224_v34 = vpop.xlane.xlu0 %2223 }
 0x6bf   :  { %v2232_v46 = vsub.f32 %v7842_v48, %v2224_v34  ;;  %v2245_v12 = vmul.f32 1.442695, %v2231_v10 }
 0x6c0   :  { %v2215_v24 = vpop.xlane.xlu1 %2214 }
 0x6c1   :  { %v2247_v0 = vmul.f32 1.442695, %v2232_v46  ;;  %v2229_v47 = vsub.f32 %v9631_v25, %v2215_v24 }
 0x6c2   :  { %v2218_v39 = vpop.xlane.xlu0 %2217 }
 0x6c3   :  { %v2241_v37 = vmul.f32 1.442695, %v2229_v47  ;;  %v2230_v29 = vsub.f32 %v9636_v44, %v2218_v39  ;;  %8468 = vpow2.f32 %v2247_v0 }
 0x6c4   :  { %v2496_v40 = vpop.permute.xlu1 %2495 }
 0x6c5   :  { %v2243_v27 = vmul.f32 1.442695, %v2230_v29  ;;  %8470 = vpow2.f32 %v2241_v37  ;;  %v2516_v44 = vsel %vm578_vm0, %v2496_v40, 0 }
 0x6c6   :  { %v2498_v17 = vpop.permute.xlu0 %2497 }
 0x6c7   :  { %8472 = vpow2.f32 %v2243_v27  ;;  %8281 = vmatprep.subr.msk.bf16.mxu1 %vm578_vm0, %v2498_v17  ;;  %v2519_v48 = vsel %vm578_vm0, %v2498_v17, 0 }
 0x6c8   :  { %8474 = vpow2.f32 %v2245_v12  ;;  %v2486_v23 = vpop.permute.xlu1 %2485  ;;  %7864 = vmatpush3.bf16.xpose.msra.mxu1 %v2519_v48 }
 0x6c9   :  { %8282 = vmatprep.subr.msk.bf16.mxu1 %vm578_vm0, %v2496_v40 }
 0x6ca   :  { %v2484_v25 = vpop.permute.xlu0 %2483 }
 0x6cc   :  { %v2490_v53 = vpop.permute.xlu1 %2489 }
 0x6ce   :  { %v2488_v50 = vpop.permute.xlu0 %2487 }
 0x6d0   :  { %v2679_v34 = vpop.permute.xlu1 %2678  ;;  %7866 = vmatpush3.bf16.xpose.msra.mxu1 %v2516_v44  ;;  %v9687_v46 = vpop.eup %8468 }
 0x6d1   :  { %7875 = vmatprep.subr.bf16.mxu0 %v2679_v34  ;;  %11934 = vst [vmem:[#allocation70_spill] sm:$0xff] %v9687_v46 }
 0x6d2   :  { %7876 = vmatpush3.bf16.msra.mxu0 %v2679_v34  ;;  %v2677_v27 = vpop.permute.xlu0 %2676  ;;  %v9689_v10 = vpop.eup %8470 }
 0x6d3   :  { %11935 = vst [vmem:[#allocation71_spill] sm:$0xff] %v9689_v10  ;;  %7877 = vmatprep.subr.bf16.mxu0 %v2677_v27 }
 0x6d4   :  { %v9691_v24 = vpop.eup %8472  ;;  %v2675_v39 = vpop.permute.xlu1 %2674 }
 0x6d5   :  { %11936 = vst [vmem:[#allocation72_spill] sm:$0xff] %v9691_v24  ;;  %v9693_v0 = vpop.eup %8474  ;;  %v2275_v47 = vpack.c.bf16 %v9691_v24, %v9689_v10 }
 0x6d6   :  { %11937 = vst [vmem:[#allocation73_spill] sm:$0xff] %v9693_v0  ;;  %7878 = vmatpush3.bf16.msra.mxu0 %v2677_v27  ;;  %v2276_v37 = vpack.c.bf16 %v9687_v46, %v9693_v0 }
 0x6d7   :  { %7855 = vmatprep.mubr.msk.bf16.mxu1 %vm668_vm1, %v2275_v47  ;;  %7879 = vmatprep.subr.bf16.mxu0 %v2675_v39 }
 0x6d8   :  { %7856 = vmatmul.mubr.msk.bf16.gmra.mxu1 %vm668_vm1, %v2276_v37 }
 0x6d9   :  { %7867 = vmatprep.mubr.msk.bf16.mxu1 %vm578_vm0, %v2484_v25 }
 0x6da   :  { %7880 = vmatpush3.bf16.msra.mxu0 %v2675_v39 }
 0x6e0   :  { %7868 = vmatmul.mubr.msk.bf16.vlgmr.msra.gmra.mxu1 %vm578_vm0, %v2486_v23 }
 0x6e1   :  { %7871 = vmatprep.mubr.msk.bf16.mxu1 %vm578_vm0, %v2488_v50 }
 0x6e8   :  { %7872 = vmatmul.mubr.msk.bf16.gmra.mxu1 %vm578_vm0, %v2490_v53 }
 0x75e   :  { %v9705_v29 = vpop.f32.mrf.mxu1 }
 0x75f   :  { %11938 = vst [vmem:[#allocation74_spill] sm:$0xff] %v9705_v29 }
 0x760   :  { %v9707_v12 = vpop.f32.mrf.mxu1 }
 0x761   :  { %11939 = vst [vmem:[#allocation75_spill] sm:$0xff] %v9707_v12 }
 0x762   :  { %v9709_v40 = vpop.f32.mrf.mxu1 }
 0x763   :  { %11940 = vst [vmem:[#allocation76_spill] sm:$0xff] %v9709_v40 }
 0x764   :  { %v9711_v17 = vpop.f32.mrf.mxu1 }
 0x765   :  { %11941 = vst [vmem:[#allocation77_spill] sm:$0xff] %v9711_v17 }
 0x798   :  { %v9713_v48 = vpop.f32.mrf.mxu1 }
 0x799   :  { %11942 = vst [vmem:[#allocation78_spill] sm:$0xff] %v9713_v48 }
 0x79a   :  { %v9715_v44 = vpop.f32.mrf.mxu1 }
 0x79b   :  { %11943 = vst [vmem:[#allocation79_spill] sm:$0xff] %v9715_v44 }
 0x79c   :  { %v9717_v25 = vpop.f32.mrf.mxu1 }
 0x79d   :  { %11944 = vst [vmem:[#allocation80_spill] sm:$0xff] %v9717_v25 }
 0x79e   :  { %v9719_v34 = vpop.f32.mrf.mxu1 }
 0x79f   :  { %11945 = vst [vmem:[#allocation81_spill] sm:$0xff] %v9719_v34 }
 0x7a0   :  { %v7869_v23 = vpop.f32.mrf.mxu1 }
 0x7a1   :  { %v2598_v50 = vsel %vm668_vm1, %v7869_v23, -inf }
 0x7a2   :  { %2599 = vmax.xlane.f32.xlu0 %v2598_v50  ;;  %v2561_v53 = vpop.f32.mrf.mxu1 }
 0x7a3   :  { %v2592_v47 = vsel %vm668_vm1, %v2561_v53, -inf }
 0x7a4   :  { %v7870_v27 = vpop.f32.mrf.mxu1 }
 0x7a5   :  { %v2601_v48 = vsel %vm668_vm1, %v7870_v27, -inf }
 0x7a6   :  { %2593 = vmax.xlane.f32.xlu0 %v2592_v47  ;;  %v2564_v39 = vpop.f32.mrf.mxu1 }
 0x7a7   :  { %v2595_v37 = vsel %vm668_vm1, %v2564_v39, -inf }
 0x7a8   :  { %2596 = vmax.xlane.f32.xlu1 %v2595_v37  ;;  %v9729_v44 = vpop.f32.mrf.mxu1 }
 0x7a9   :  { %v2610_v47 = vsel %vm668_vm1, %v9729_v44, -inf }
 0x7aa   :  { %2602 = vmax.xlane.f32.xlu0 %v2601_v48  ;;  %v9731_v50 = vpop.f32.mrf.mxu1 }
 0x7ab   :  { %v2604_v48 = vsel %vm668_vm1, %v9731_v50, -inf }
 0x7ac   :  { %v7874_v25 = vpop.f32.mrf.mxu1 }
 0x7ad   :  { %v2613_v37 = vsel %vm668_vm1, %v7874_v25, -inf }
 0x7ae   :  { %v9736_v34 = vpop.f32.mrf.mxu1 }
 0x7af   :  { %v2607_v29 = vsel %vm668_vm1, %v9736_v34, -inf }
 0x7b9   :  { %2890 = vrot.lane.b32.xlu1 %v9077_v54, %s9006_s9 }
 0x7c0   :  { %2672 = vrot.lane.b32.xlu0 %v9155_v22, %s9005_s8 }
 0x7dd   :  { %2611 = vmax.xlane.f32.xlu1 %v2610_v47  ;;  %v2893_v47 = vpop.permute.xlu1 %2892 }
 0x7df   :  { %2614 = vmax.xlane.f32.xlu0 %v2613_v37 }
 0x7e1   :  { %2605 = vmax.xlane.f32.xlu1 %v2604_v48 }
 0x7e3   :  { %2608 = vmax.xlane.f32.xlu0 %v2607_v29 }
 0x7f2   :  { %2886 = vrot.lane.b32.xlu1 %v9065_v45, %s9006_s9 }
 0x7f6   :  { %2876 = vrot.lane.b32.xlu1 %v9095_v58, %s9006_s9 }
 0x7f9   :  { %2888 = vrot.lane.b32.xlu0 %v9061_v42, %s9006_s9 }
 0x7fa   :  { %2880 = vrot.lane.b32.xlu1 %v9115_v1, %s9006_s9 }
 0x7fd   :  { %2874 = vrot.lane.b32.xlu0 %v9057_v36, %s9006_s9 }
 0x7fe   :  { %3069 = vrot.lane.b32.xlu1 %v9163_v26, %s9006_s9 }
 0x801   :  { %2878 = vrot.lane.b32.xlu0 %v9087_v55, %s9006_s9 }
 0x802   :  { %3065 = vrot.lane.b32.xlu1 %v9153_v20, %s9006_s9 }
 0x805   :  { %3067 = vrot.lane.b32.xlu0 %v9171_v28, %s9006_s9 }
 0x806   :  { %3283 = vrot.lane.b32.xlu1 %v9069_v52, %s9007_s10 }
 0x82b   :  { %v2600_v29 = vpop.xlane.xlu0 %2599 }
 0x82c   :  { %v2618_v37 = vsub.f32 %v7869_v23, %v2600_v29 }
 0x82e   :  { %v2628_v10 = vmul.f32 1.442695, %v2618_v37 }
 0x82f   :  { %v2594_v48 = vpop.xlane.xlu0 %2593 }
 0x830   :  { %v2616_v12 = vsub.f32 %v2561_v53, %v2594_v48 }
 0x831   :  { %v2597_v40 = vpop.xlane.xlu1 %2596 }
 0x832   :  { %v2624_v17 = vmul.f32 1.442695, %v2616_v12  ;;  %v2617_v0 = vsub.f32 %v2564_v39, %v2597_v40 }
 0x833   :  { %v2603_v46 = vpop.xlane.xlu0 %2602 }
 0x834   :  { %v2626_v24 = vmul.f32 1.442695, %v2617_v0  ;;  %v2619_v56 = vsub.f32 %v7870_v27, %v2603_v46  ;;  %8476 = vpow2.f32 %v2624_v17 }
 0x836   :  { %8478 = vpow2.f32 %v2626_v24  ;;  %v2630_v51 = vmul.f32 1.442695, %v2619_v56 }
 0x837   :  { %8480 = vpow2.f32 %v2628_v10  ;;  %v2673_v63 = vpop.permute.xlu0 %2672 }
 0x838   :  { %8482 = vpow2.f32 %v2630_v51  ;;  %7881 = vmatprep.subr.bf16.mxu0 %v2673_v63  ;;  %v2916_v51 = vsel %vm578_vm0, %v2893_v47, 0 }
 0x839   :  { %7882 = vmatpush3.bf16.msra.mxu0 %v2673_v63  ;;  %v2891_v63 = vpop.permute.xlu1 %2890 }
 0x83a   :  { %8283 = vmatprep.subr.msk.bf16.mxu0 %vm578_vm0, %v2893_v47  ;;  %v2913_v10 = vsel %vm578_vm0, %v2891_v63, 0 }
 0x841   :  { %v9763_v52 = vpop.eup %8476 }
 0x843   :  { %v9765_v23 = vpop.eup %8478 }
 0x844   :  { %v9767_v12 = vpop.eup %8480  ;;  %v2664_v0 = vpack.c.bf16 %v9765_v23, %v9763_v52 }
 0x845   :  { %v9771_v46 = vpop.eup %8482 }
 0x846   :  { %v2665_v56 = vpack.c.bf16 %v9771_v46, %v9767_v12  ;;  %7883 = vmatprep.mubr.msk.bf16.mxu0 %vm668_vm1, %v2664_v0 }
 0x848   :  { %7884 = vmatmul.mubr.msk.bf16.vlgmr.msra.gmra.mxu0 %vm668_vm1, %v2665_v56 }
 0x849   :  { %7892 = vmatpush3.bf16.xpose.msra.mxu0 %v2916_v51 }
 0x84a   :  { %8284 = vmatprep.subr.msk.bf16.mxu0 %vm578_vm0, %v2891_v63 }
 0x851   :  { %7894 = vmatpush3.bf16.xpose.msra.mxu0 %v2913_v10 }
 0x866   :  { %v2612_v24 = vpop.xlane.xlu1 %2611 }
 0x867   :  { %v2622_v53 = vsub.f32 %v9729_v44, %v2612_v24 }
 0x868   :  { %v2615_v40 = vpop.xlane.xlu0 %2614 }
 0x869   :  { %v2623_v17 = vsub.f32 %v7874_v25, %v2615_v40  ;;  %v2636_v0 = vmul.f32 1.442695, %v2622_v53 }
 0x86a   :  { %v2606_v27 = vpop.xlane.xlu1 %2605 }
 0x86b   :  { %v2638_v39 = vmul.f32 1.442695, %v2623_v17  ;;  %v2620_v29 = vsub.f32 %v9731_v50, %v2606_v27 }
 0x86c   :  { %v2609_v37 = vpop.xlane.xlu0 %2608 }
 0x86d   :  { %v2632_v48 = vmul.f32 1.442695, %v2620_v29  ;;  %v2621_v47 = vsub.f32 %v9736_v34, %v2609_v37  ;;  %8484 = vpow2.f32 %v2638_v39 }
 0x86e   :  { %v2887_v56 = vpop.permute.xlu1 %2886 }
 0x86f   :  { %v2634_v51 = vmul.f32 1.442695, %v2621_v47  ;;  %8486 = vpow2.f32 %v2632_v48  ;;  %v2907_v34 = vsel %vm578_vm0, %v2887_v56, 0 }
 0x870   :  { %v2889_v63 = vpop.permute.xlu0 %2888 }
 0x871   :  { %8488 = vpow2.f32 %v2634_v51  ;;  %8285 = vmatprep.subr.msk.bf16.mxu0 %vm578_vm0, %v2889_v63  ;;  %v2910_v25 = vsel %vm578_vm0, %v2889_v63, 0 }
 0x872   :  { %8490 = vpow2.f32 %v2636_v0  ;;  %v2877_v44 = vpop.permute.xlu1 %2876  ;;  %7896 = vmatpush3.bf16.xpose.msra.mxu0 %v2910_v25 }
 0x873   :  { %8286 = vmatprep.subr.msk.bf16.mxu0 %vm578_vm0, %v2887_v56 }
 0x874   :  { %v2875_v50 = vpop.permute.xlu0 %2874 }
 0x876   :  { %v2881_v10 = vpop.permute.xlu1 %2880 }
 0x878   :  { %v2879_v24 = vpop.permute.xlu0 %2878 }
 0x87a   :  { %v3070_v40 = vpop.permute.xlu1 %3069  ;;  %7898 = vmatpush3.bf16.xpose.msra.mxu0 %v2907_v34  ;;  %v9787_v17 = vpop.eup %8484 }
 0x87b   :  { %7907 = vmatprep.subr.bf16.mxu1 %v3070_v40 }
 0x87c   :  { %7908 = vmatpush3.bf16.msra.mxu1 %v3070_v40  ;;  %v3068_v53 = vpop.permute.xlu0 %3067  ;;  %v9789_v27 = vpop.eup %8486 }
 0x87d   :  { %11946 = vst [vmem:[#allocation82_spill] sm:$0xff] %v9789_v27  ;;  %7909 = vmatprep.subr.bf16.mxu1 %v3068_v53 }
 0x87e   :  { %v9791_v39 = vpop.eup %8488  ;;  %v3066_v48 = vpop.permute.xlu1 %3065 }
 0x87f   :  { %v9793_v29 = vpop.eup %8490  ;;  %v2666_v37 = vpack.c.bf16 %v9791_v39, %v9789_v27 }
 0x880   :  { %11947 = vst [vmem:[#allocation83_spill] sm:$0xff] %v9793_v29  ;;  %7910 = vmatpush3.bf16.msra.mxu1 %v3068_v53  ;;  %v2667_v47 = vpack.c.bf16 %v9787_v17, %v9793_v29 }
 0x881   :  { %7887 = vmatprep.mubr.msk.bf16.mxu0 %vm668_vm1, %v2666_v37  ;;  %7911 = vmatprep.subr.bf16.mxu1 %v3066_v48 }
 0x882   :  { %7888 = vmatmul.mubr.msk.bf16.gmra.mxu0 %vm668_vm1, %v2667_v47 }
 0x883   :  { %7899 = vmatprep.mubr.msk.bf16.mxu0 %vm578_vm0, %v2875_v50 }
 0x884   :  { %7912 = vmatpush3.bf16.msra.mxu1 %v3066_v48 }
 0x88a   :  { %7900 = vmatmul.mubr.msk.bf16.vlgmr.msra.gmra.mxu0 %vm578_vm0, %v2877_v44 }
 0x88b   :  { %7903 = vmatprep.mubr.msk.bf16.mxu0 %vm578_vm0, %v2879_v24 }
 0x892   :  { %7904 = vmatmul.mubr.msk.bf16.gmra.mxu0 %vm578_vm0, %v2881_v10 }
 0x908   :  { %v9805_v0 = vpop.f32.mrf.mxu0 }
 0x909   :  { %11948 = vst [vmem:[#allocation84_spill] sm:$0xff] %v9805_v0 }
 0x90a   :  { %v9807_v56 = vpop.f32.mrf.mxu0 }
 0x90b   :  { %11949 = vst [vmem:[#allocation85_spill] sm:$0xff] %v9807_v56 }
 0x90c   :  { %v9809_v51 = vpop.f32.mrf.mxu0 }
 0x90d   :  { %11950 = vst [vmem:[#allocation86_spill] sm:$0xff] %v9809_v51 }
 0x90e   :  { %v9811_v63 = vpop.f32.mrf.mxu0 }
 0x90f   :  { %11951 = vst [vmem:[#allocation87_spill] sm:$0xff] %v9811_v63 }
 0x942   :  { %v9813_v25 = vpop.f32.mrf.mxu0 }
 0x943   :  { %11952 = vst [vmem:[#allocation88_spill] sm:$0xff] %v9813_v25 }
 0x944   :  { %v9815_v34 = vpop.f32.mrf.mxu0 }
 0x945   :  { %11953 = vst [vmem:[#allocation89_spill] sm:$0xff] %v9815_v34 }
 0x946   :  { %v9817_v50 = vpop.f32.mrf.mxu0 }
 0x947   :  { %11954 = vst [vmem:[#allocation90_spill] sm:$0xff] %v9817_v50 }
 0x948   :  { %v9819_v40 = vpop.f32.mrf.mxu0 }
 0x949   :  { %11955 = vst [vmem:[#allocation91_spill] sm:$0xff] %v9819_v40 }
 0x94a   :  { %v7901_v44 = vpop.f32.mrf.mxu0 }
 0x94b   :  { %v2989_v24 = vsel %vm668_vm1, %v7901_v44, -inf }
 0x94c   :  { %2990 = vmax.xlane.f32.xlu0 %v2989_v24  ;;  %v2952_v10 = vpop.f32.mrf.mxu0 }
 0x94d   :  { %v2983_v37 = vsel %vm668_vm1, %v2952_v10, -inf }
 0x94e   :  { %v7902_v53 = vpop.f32.mrf.mxu0 }
 0x94f   :  { %v2992_v25 = vsel %vm668_vm1, %v7902_v53, -inf }
 0x950   :  { %2984 = vmax.xlane.f32.xlu0 %v2983_v37  ;;  %v2955_v48 = vpop.f32.mrf.mxu0 }
 0x951   :  { %v2986_v47 = vsel %vm668_vm1, %v2955_v48, -inf }
 0x952   :  { %2987 = vmax.xlane.f32.xlu1 %v2986_v47  ;;  %v9829_v34 = vpop.f32.mrf.mxu0 }
 0x953   :  { %v3001_v37 = vsel %vm668_vm1, %v9829_v34, -inf }
 0x954   :  { %2993 = vmax.xlane.f32.xlu0 %v2992_v25  ;;  %v2968_v24 = vpop.f32.mrf.mxu0 }
 0x955   :  { %v2995_v25 = vsel %vm668_vm1, %v2968_v24, -inf }
 0x956   :  { %v7906_v50 = vpop.f32.mrf.mxu0 }
 0x957   :  { %v3004_v40 = vsel %vm668_vm1, %v7906_v50, -inf }
 0x958   :  { %v2971_v47 = vpop.f32.mrf.mxu0 }
 0x963   :  { %3281 = vrot.lane.b32.xlu1 %v9077_v54, %s9007_s10  ;;  %v2998_v54 = vsel %vm668_vm1, %v2971_v47, -inf }
 0x96a   :  { %3063 = vrot.lane.b32.xlu0 %v9155_v22, %s9006_s9 }
 0x987   :  { %3002 = vmax.xlane.f32.xlu1 %v3001_v37 }
 0x989   :  { %3005 = vmax.xlane.f32.xlu0 %v3004_v40 }
 0x98b   :  { %2996 = vmax.xlane.f32.xlu1 %v2995_v25 }
 0x98d   :  { %2999 = vmax.xlane.f32.xlu0 %v2998_v54 }
 0x99c   :  { %3277 = vrot.lane.b32.xlu1 %v9065_v45, %s9007_s10 }
 0x9a0   :  { %3267 = vrot.lane.b32.xlu1 %v9095_v58, %s9007_s10  ;;  %v3284_v58 = vpop.permute.xlu1 %3283 }
 0x9a3   :  { %3279 = vrot.lane.b32.xlu0 %v9061_v42, %s9007_s10 }
 0x9a4   :  { %3271 = vrot.lane.b32.xlu1 %v9115_v1, %s9007_s10 }
 0x9a7   :  { %3265 = vrot.lane.b32.xlu0 %v9057_v36, %s9007_s10 }
 0x9a8   :  { %3460 = vrot.lane.b32.xlu1 %v9163_v26, %s9007_s10 }
 0x9ab   :  { %3269 = vrot.lane.b32.xlu0 %v9087_v55, %s9007_s10 }
 0x9af   :  { %3458 = vrot.lane.b32.xlu0 %v9171_v28, %s9007_s10 }
 0x9d5   :  { %v2991_v45 = vpop.xlane.xlu0 %2990 }
 0x9d6   :  { %v3009_v40 = vsub.f32 %v7901_v44, %v2991_v45 }
 0x9d8   :  { %v3019_v0 = vmul.f32 1.442695, %v3009_v40 }
 0x9d9   :  { %v2985_v37 = vpop.xlane.xlu0 %2984 }
 0x9da   :  { %v3007_v42 = vsub.f32 %v2952_v10, %v2985_v37 }
 0x9db   :  { %v2988_v25 = vpop.xlane.xlu1 %2987 }
 0x9dc   :  { %v3015_v54 = vmul.f32 1.442695, %v3007_v42  ;;  %v3008_v1 = vsub.f32 %v2955_v48, %v2988_v25 }
 0x9dd   :  { %v2994_v56 = vpop.xlane.xlu0 %2993 }
 0x9de   :  { %v3017_v36 = vmul.f32 1.442695, %v3008_v1  ;;  %v3010_v51 = vsub.f32 %v7902_v53, %v2994_v56  ;;  %8492 = vpow2.f32 %v3015_v54 }
 0x9df   :  { %v3282_v53 = vpop.permute.xlu1 %3281 }
 0x9e0   :  { %8494 = vpow2.f32 %v3017_v36  ;;  %v3021_v26 = vmul.f32 1.442695, %v3010_v51  ;;  %v3307_v51 = vsel %vm578_vm0, %v3284_v58, 0  ;;  %v3304_v45 = vsel %vm578_vm0, %v3282_v53, 0 }
 0x9e1   :  { %8496 = vpow2.f32 %v3019_v0  ;;  %v3064_v55 = vpop.permute.xlu0 %3063 }
 0x9e2   :  { %8498 = vpow2.f32 %v3021_v26  ;;  %7913 = vmatprep.subr.bf16.mxu1 %v3064_v55 }
 0x9e3   :  { %7914 = vmatpush3.bf16.msra.mxu1 %v3064_v55 }
 0x9e4   :  { %8287 = vmatprep.subr.msk.bf16.mxu1 %vm578_vm0, %v3284_v58 }
 0x9eb   :  { %v9853_v28 = vpop.eup %8492 }
 0x9ed   :  { %v9855_v44 = vpop.eup %8494 }
 0x9ee   :  { %v9857_v10 = vpop.eup %8496  ;;  %v3055_v48 = vpack.c.bf16 %v9855_v44, %v9853_v28 }
 0x9ef   :  { %v9861_v56 = vpop.eup %8498 }
 0x9f0   :  { %v3056_v0 = vpack.c.bf16 %v9861_v56, %v9857_v10  ;;  %7915 = vmatprep.mubr.msk.bf16.mxu1 %vm668_vm1, %v3055_v48 }
 0x9f2   :  { %7916 = vmatmul.mubr.msk.bf16.vlgmr.msra.gmra.mxu1 %vm668_vm1, %v3056_v0 }
 0x9f3   :  { %7924 = vmatpush3.bf16.xpose.msra.mxu1 %v3307_v51 }
 0x9f4   :  { %8288 = vmatprep.subr.msk.bf16.mxu1 %vm578_vm0, %v3282_v53 }
 0x9fb   :  { %7926 = vmatpush3.bf16.xpose.msra.mxu1 %v3304_v45 }
 0xa10   :  { %v3003_v40 = vpop.xlane.xlu1 %3002 }
 0xa11   :  { %v3013_v25 = vsub.f32 %v9829_v34, %v3003_v40 }
 0xa12   :  { %v3006_v37 = vpop.xlane.xlu0 %3005 }
 0xa13   :  { %v3014_v42 = vsub.f32 %v7906_v50, %v3006_v37  ;;  %v3027_v0 = vmul.f32 1.442695, %v3013_v25 }
 0xa14   :  { %v2997_v54 = vpop.xlane.xlu1 %2996 }
 0xa15   :  { %v3029_v1 = vmul.f32 1.442695, %v3014_v42  ;;  %v3011_v36 = vsub.f32 %v2968_v24, %v2997_v54 }
 0xa16   :  { %v3000_v26 = vpop.xlane.xlu0 %2999 }
 0xa17   :  { %v3023_v55 = vmul.f32 1.442695, %v3011_v36  ;;  %v3012_v48 = vsub.f32 %v2971_v47, %v3000_v26  ;;  %8500 = vpow2.f32 %v3029_v1  ;;  %v9893_v26 = vpack.c.bf16 %v9221_v21, %v9188_v35 }
 0xa18   :  { %v3278_v58 = vpop.permute.xlu1 %3277 }
 0xa19   :  { %v3025_v51 = vmul.f32 1.442695, %v3012_v48  ;;  %8502 = vpow2.f32 %v3023_v55  ;;  %v3298_v47 = vsel %vm578_vm0, %v3278_v58, 0  ;;  %v9903_v55 = vpack.c.bf16 %v9184_v33, %v9176_v30 }
 0xa1a   :  { %v3280_v63 = vpop.permute.xlu0 %3279 }
 0xa1b   :  { %8504 = vpow2.f32 %v3025_v51  ;;  %8289 = vmatprep.subr.msk.bf16.mxu1 %vm578_vm0, %v3280_v63  ;;  %v3301_v53 = vsel %vm578_vm0, %v3280_v63, 0 }
 0xa1c   :  { %8506 = vpow2.f32 %v3027_v0  ;;  %v3268_v50 = vpop.permute.xlu1 %3267  ;;  %7928 = vmatpush3.bf16.xpose.msra.mxu1 %v3301_v53 }
 0xa1d   :  { %8290 = vmatprep.subr.msk.bf16.mxu1 %vm578_vm0, %v3278_v58 }
 0xa1e   :  { %v3266_v34 = vpop.permute.xlu0 %3265 }
 0xa20   :  { %v3272_v24 = vpop.permute.xlu1 %3271 }
 0xa22   :  { %v3270_v45 = vpop.permute.xlu0 %3269 }
 0xa24   :  { %v3461_v40 = vpop.permute.xlu1 %3460  ;;  %7930 = vmatpush3.bf16.xpose.msra.mxu1 %v3298_v47  ;;  %v9876_v37 = vpop.eup %8500 }
 0xa25   :  { %7939 = vmatprep.subr.bf16.mxu0 %v3461_v40  ;;  %7971 = vmatprep.subr.bf16.mxu1 %v9191_v38  ;;  %11956 = vst [vmem:[#allocation92_spill] sm:$0xff] %v9876_v37 }
 0xa26   :  { %7940 = vmatpush3.bf16.msra.mxu0 %v3461_v40  ;;  %v3459_v42 = vpop.permute.xlu0 %3458  ;;  %v9878_v63 = vpop.eup %8502 }
 0xa27   :  { %11957 = vst [vmem:[#allocation93_spill] sm:$0xff] %v9878_v63  ;;  %7941 = vmatprep.subr.bf16.mxu0 %v3459_v42 }
 0xa28   :  { %v9880_v25 = vpop.eup %8504 }
 0xa29   :  { %v9882_v54 = vpop.eup %8506  ;;  %v3057_v1 = vpack.c.bf16 %v9880_v25, %v9878_v63 }
 0xa2a   :  { %11958 = vst [vmem:[#allocation94_spill] sm:$0xff] %v9882_v54  ;;  %7942 = vmatpush3.bf16.msra.mxu0 %v3459_v42  ;;  %v3058_v36 = vpack.c.bf16 %v9876_v37, %v9882_v54 }
 0xa2b   :  { %7919 = vmatprep.mubr.msk.bf16.mxu1 %vm668_vm1, %v3057_v1 }
 0xa2c   :  { %7920 = vmatmul.mubr.msk.bf16.gmra.mxu1 %vm668_vm1, %v3058_v36 }
 0xa2d   :  { %7931 = vmatprep.mubr.msk.bf16.mxu1 %vm578_vm0, %v3266_v34 }
 0xa34   :  { %7932 = vmatmul.mubr.msk.bf16.vlgmr.msra.gmra.mxu1 %vm578_vm0, %v3268_v50 }
 0xa35   :  { %7972 = vmatpush3.bf16.msra.mxu1 %v9191_v38  ;;  %7935 = vmatprep.mubr.msk.bf16.mxu1 %vm578_vm0, %v3270_v45 }
 0xa36   :  { %7973 = vmatprep.subr.bf16.mxu1 %v9893_v26 }
 0xa39   :  { %7974 = vmatpush3.bf16.msra.mxu1 %v9893_v26 }
 0xa3a   :  { %7975 = vmatprep.subr.bf16.mxu1 %v9180_v32 }
 0xa3c   :  { %7936 = vmatmul.mubr.msk.bf16.gmra.mxu1 %vm578_vm0, %v3272_v24 }
 0xa3d   :  { %7976 = vmatpush3.bf16.msra.mxu1 %v9180_v32 }
 0xa3e   :  { %7977 = vmatprep.subr.bf16.mxu1 %v9903_v55 }
 0xa41   :  { %7978 = vmatpush3.bf16.msra.mxu1 %v9903_v55 }
 0xab2   :  { %v9909_v35 = vpop.f32.mrf.mxu1 }
 0xab3   :  { %11959 = vst [vmem:[#allocation95_spill] sm:$0xff] %v9909_v35 }
 0xab4   :  { %v9911_v21 = vpop.f32.mrf.mxu1 }
 0xab5   :  { %11960 = vst [vmem:[#allocation96_spill] sm:$0xff] %v9911_v21 }
 0xab6   :  { %v9913_v48 = vpop.f32.mrf.mxu1 }
 0xab7   :  { %11961 = vst [vmem:[#allocation97_spill] sm:$0xff] %v9913_v48 }
 0xab8   :  { %v9915_v0 = vpop.f32.mrf.mxu1 }
 0xab9   :  { %11962 = vst [vmem:[#allocation98_spill] sm:$0xff] %v9915_v0 }
 0xaec   :  { %v9917_v58 = vpop.f32.mrf.mxu1 }
 0xaed   :  { %11963 = vst [vmem:[#allocation99_spill] sm:$0xff] %v9917_v58 }
 0xaee   :  { %v9919_v30 = vpop.f32.mrf.mxu1 }
 0xaef   :  { %11964 = vst [vmem:[#allocation100_spill] sm:$0xff] %v9919_v30 }
 0xaf0   :  { %v9921_v33 = vpop.f32.mrf.mxu1 }
 0xaf1   :  { %11965 = vst [vmem:[#allocation101_spill] sm:$0xff] %v9921_v33 }
 0xaf2   :  { %v9923_v51 = vpop.f32.mrf.mxu1 }
 0xaf3   :  { %11966 = vst [vmem:[#allocation102_spill] sm:$0xff] %v9923_v51 }
 0xaf4   :  { %v7933_v53 = vpop.f32.mrf.mxu1 }
 0xaf5   :  { %v3380_v50 = vsel %vm668_vm1, %v7933_v53, -inf }
 0xaf6   :  { %3381 = vmax.xlane.f32.xlu0 %v3380_v50  ;;  %v3343_v34 = vpop.f32.mrf.mxu1 }
 0xaf7   :  { %v3374_v45 = vsel %vm668_vm1, %v3343_v34, -inf }
 0xaf8   :  { %v7934_v24 = vpop.f32.mrf.mxu1 }
 0xaf9   :  { %v3383_v1 = vsel %vm668_vm1, %v7934_v24, -inf }
 0xafa   :  { %3375 = vmax.xlane.f32.xlu0 %v3374_v45  ;;  %v3346_v47 = vpop.f32.mrf.mxu1 }
 0xafb   :  { %v3377_v40 = vsel %vm668_vm1, %v3346_v47, -inf }
 0xafc   :  { %3378 = vmax.xlane.f32.xlu1 %v3377_v40  ;;  %v7937_v42 = vpop.f32.mrf.mxu1 }
 0xafd   :  { %v3392_v58 = vsel %vm668_vm1, %v7937_v42, -inf }
 0xafe   :  { %3384 = vmax.xlane.f32.xlu0 %v3383_v1  ;;  %v3359_v36 = vpop.f32.mrf.mxu1 }
 0xaff   :  { %v3386_v51 = vsel %vm668_vm1, %v3359_v36, -inf }
 0xb00   :  { %3393 = vmax.xlane.f32.xlu1 %v3392_v58  ;;  %v7938_v30 = vpop.f32.mrf.mxu1 }
 0xb01   :  { %v3395_v50 = vsel %vm668_vm1, %v7938_v30, -inf }
 0xb02   :  { %3396 = vmax.xlane.f32.xlu0 %v3395_v50  ;;  %v3362_v33 = vpop.f32.mrf.mxu1 }
 0xb03   :  { %v3389_v45 = vsel %vm668_vm1, %v3362_v33, -inf }
 0xb04   :  { %3387 = vmax.xlane.f32.xlu1 %v3386_v51 }
 0xb06   :  { %3390 = vmax.xlane.f32.xlu0 %v3389_v45 }
 0xb15   :  { %3456 = vrot.lane.b32.xlu1 %v9153_v20, %s9007_s10 }
 0xb1c   :  { %3454 = vrot.lane.b32.xlu0 %v9155_v22, %s9007_s10 }
 0xb7f   :  { %v3382_v40 = vpop.xlane.xlu0 %3381 }
 0xb80   :  { %v3400_v1 = vsub.f32 %v7933_v53, %v3382_v40 }
 0xb82   :  { %v3410_v0 = vmul.f32 1.442695, %v3400_v1 }
 0xb83   :  { %v3376_v58 = vpop.xlane.xlu0 %3375 }
 0xb84   :  { %v3398_v35 = vsub.f32 %v3343_v34, %v3376_v58 }
 0xb85   :  { %v3379_v21 = vpop.xlane.xlu1 %3378 }
 0xb86   :  { %v3406_v48 = vmul.f32 1.442695, %v3398_v35  ;;  %v3399_v50 = vsub.f32 %v3346_v47, %v3379_v21 }
 0xb87   :  { %v3385_v54 = vpop.xlane.xlu0 %3384 }
 0xb88   :  { %v3408_v63 = vmul.f32 1.442695, %v3399_v50  ;;  %v3401_v51 = vsub.f32 %v7934_v24, %v3385_v54  ;;  %8508 = vpow2.f32 %v3406_v48 }
 0xb89   :  { %v3394_v29 = vpop.xlane.xlu1 %3393 }
 0xb8a   :  { %8510 = vpow2.f32 %v3408_v63  ;;  %v3412_v45 = vmul.f32 1.442695, %v3401_v51  ;;  %v3404_v37 = vsub.f32 %v7937_v42, %v3394_v29  ;;  %v9941_v29 = vpack.c.bf16 %v9149_v16, %v9145_v13 }
 0xb8b   :  { %8512 = vpow2.f32 %v3410_v0  ;;  %v3397_v20 = vpop.xlane.xlu0 %3396  ;;  %v9958_v13 = vpack.c.bf16 %v9139_v11, %v9133_v8  ;;  %v9977_v11 = vpack.c.bf16 %v9127_v5, %v9117_v2  ;;  %v9991_v2 = vpack.c.bf16 %v9107_v62, %v9097_v59 }
 0xb8c   :  { %8514 = vpow2.f32 %v3412_v45  ;;  %v3405_v27 = vsub.f32 %v7938_v30, %v3397_v20  ;;  %v3418_v47 = vmul.f32 1.442695, %v3404_v37  ;;  %v3674_v16 = vsel %vm578_vm0, %v9941_v29, 0  ;;  %v11971_v20 = vld [vmem:[#allocation14_spill] sm:$0xff] }
 0xb8d   :  { %v3388_v22 = vpop.xlane.xlu1 %3387  ;;  %v3671_v50 = vsel %vm578_vm0, %v9958_v13, 0  ;;  %v3668_v5 = vsel %vm578_vm0, %v9977_v11, 0  ;;  %v3665_v45 = vsel %vm578_vm0, %v9991_v2, 0 }
 0xb8e   :  { %v3420_v53 = vmul.f32 1.442695, %v3405_v27  ;;  %v3402_v40 = vsub.f32 %v3359_v36, %v3388_v22  ;;  %v11972_v22 = vld [vmem:[#allocation15_spill] sm:$0xff] }
 0xb8f   :  { %v3391_v34 = vpop.xlane.xlu0 %3390 }
 0xb90   :  { %v3414_v58 = vmul.f32 1.442695, %v3402_v40  ;;  %v3403_v35 = vsub.f32 %v3362_v33, %v3391_v34  ;;  %8516 = vpow2.f32 %v3420_v53 }
 0xb91   :  { %v3457_v21 = vpop.permute.xlu1 %3456 }
 0xb92   :  { %v3416_v1 = vmul.f32 1.442695, %v3403_v35  ;;  %7943 = vmatprep.subr.bf16.mxu0 %v3457_v21  ;;  %8518 = vpow2.f32 %v3414_v58 }
 0xb93   :  { %7944 = vmatpush3.bf16.msra.mxu0 %v3457_v21  ;;  %v3455_v63 = vpop.permute.xlu0 %3454 }
 0xb94   :  { %8520 = vpow2.f32 %v3416_v1  ;;  %7945 = vmatprep.subr.bf16.mxu0 %v3455_v63 }
 0xb95   :  { %v9937_v54 = vpop.eup %8508  ;;  %8522 = vpow2.f32 %v3418_v47 }
 0xb97   :  { %v9943_v27 = vpop.eup %8510  ;;  %7946 = vmatpush3.bf16.msra.mxu0 %v3455_v63 }
 0xb98   :  { %v9945_v48 = vpop.eup %8512  ;;  %8291 = vmatprep.subr.msk.bf16.mxu0 %vm578_vm0, %v9941_v29  ;;  %v3446_v37 = vpack.c.bf16 %v9943_v27, %v9937_v54 }
 0xb99   :  { %v9951_v0 = vpop.eup %8514 }
 0xb9a   :  { %v3447_v30 = vpack.c.bf16 %v9951_v0, %v9945_v48  ;;  %7947 = vmatprep.mubr.msk.bf16.mxu0 %vm668_vm1, %v3446_v37 }
 0xb9c   :  { %7948 = vmatmul.mubr.msk.bf16.vlgmr.msra.gmra.mxu0 %vm668_vm1, %v3447_v30 }
 0xb9d   :  { %7956 = vmatpush3.bf16.xpose.msra.mxu0 %v3674_v16  ;;  %v9965_v33 = vpop.eup %8516 }
 0xb9e   :  { %8292 = vmatprep.subr.msk.bf16.mxu0 %vm578_vm0, %v9958_v13  ;;  %11967 = vst [vmem:[#allocation103_spill] sm:$0xff] %v9965_v33 }
 0xb9f   :  { %v9967_v24 = vpop.eup %8518 }
 0xba0   :  { %11968 = vst [vmem:[#allocation104_spill] sm:$0xff] %v9967_v24 }
 0xba1   :  { %v9969_v42 = vpop.eup %8520 }
 0xba2   :  { %11969 = vst [vmem:[#allocation105_spill] sm:$0xff] %v9969_v42  ;;  %v3448_v36 = vpack.c.bf16 %v9969_v42, %v9967_v24  ;;  %v9973_v8 = vpop.eup %8522 }
 0xba3   :  { %11970 = vst [vmem:[#allocation106_spill] sm:$0xff] %v9973_v8  ;;  %v3449_v51 = vpack.c.bf16 %v9965_v33, %v9973_v8 }
 0xba4   :  { %7951 = vmatprep.mubr.msk.bf16.mxu0 %vm668_vm1, %v3448_v36 }
 0xba5   :  { %7958 = vmatpush3.bf16.xpose.msra.mxu0 %v3671_v50 }
 0xba6   :  { %7952 = vmatmul.mubr.msk.bf16.gmra.mxu0 %vm668_vm1, %v3449_v51  ;;  %8293 = vmatprep.subr.msk.bf16.mxu0 %vm578_vm0, %v9977_v11 }
 0xba7   :  { %7963 = vmatprep.mubr.msk.bf16.mxu0 %vm578_vm0, %v9105_v61 }
 0xbad   :  { %7960 = vmatpush3.bf16.xpose.msra.mxu0 %v3668_v5 }
 0xbae   :  { %8294 = vmatprep.subr.msk.bf16.mxu0 %vm578_vm0, %v9991_v2 }
 0xbb5   :  { %7962 = vmatpush3.bf16.xpose.msra.mxu0 %v3665_v45 }
 0xbbc   :  { %7964 = vmatmul.mubr.msk.bf16.vlgmr.msra.gmra.mxu0 %vm578_vm0, %v9125_v4 }
 0xbbd   :  { %7967 = vmatprep.mubr.msk.bf16.mxu0 %vm578_vm0, %v11971_v20 }
 0xbc4   :  { %7968 = vmatmul.mubr.msk.bf16.gmra.mxu0 %vm578_vm0, %v11972_v22 }
 0xc5c   :  { %v10005_v59 = vpop.f32.mrf.mxu0 }
 0xc5d   :  { %11973 = vst [vmem:[#allocation14_spill] sm:$0xff] %v10005_v59 }
 0xc5e   :  { %v10007_v62 = vpop.f32.mrf.mxu0 }
 0xc5f   :  { %11974 = vst [vmem:[#allocation15_spill] sm:$0xff] %v10007_v62 }
 0xc60   :  { %v10009_v53 = vpop.f32.mrf.mxu0 }
 0xc61   :  { %11975 = vst [vmem:[#allocation107_spill] sm:$0xff] %v10009_v53 }
 0xc62   :  { %v10011_v40 = vpop.f32.mrf.mxu0 }
 0xc63   :  { %11976 = vst [vmem:[#allocation108_spill] sm:$0xff] %v10011_v40 }
 0xc66   :  { %v10013_v34 = vpop.f32.mrf.mxu0 }
 0xc67   :  { %11977 = vst [vmem:[#allocation109_spill] sm:$0xff] %v10013_v34 }
 0xc68   :  { %v10015_v58 = vpop.f32.mrf.mxu0 }
 0xc69   :  { %11978 = vst [vmem:[#allocation110_spill] sm:$0xff] %v10015_v58 }
 0xc6a   :  { %v10017_v35 = vpop.f32.mrf.mxu0 }
 0xc6b   :  { %11979 = vst [vmem:[#allocation111_spill] sm:$0xff] %v10017_v35 }
 0xc6c   :  { %v10019_v21 = vpop.f32.mrf.mxu0 }
 0xc6d   :  { %11980 = vst [vmem:[#allocation112_spill] sm:$0xff] %v10019_v21 }
 0xc7c   :  { %v7965_v47 = vpop.f32.mrf.mxu0 }
 0xc7d   :  { %v3747_v1 = vsel %vm668_vm1, %v7965_v47, -inf }
 0xc7e   :  { %3748 = vmax.xlane.f32.xlu1 %v3747_v1  ;;  %v3710_v63 = vpop.f32.mrf.mxu0 }
 0xc7f   :  { %v3741_v30 = vsel %vm668_vm1, %v3710_v63, -inf }
 0xc80   :  { %v7966_v37 = vpop.f32.mrf.mxu0 }
 0xc81   :  { %v3750_v5 = vsel %vm668_vm1, %v7966_v37, -inf }
 0xc82   :  { %3742 = vmax.xlane.f32.xlu1 %v3741_v30  ;;  %v3713_v16 = vpop.f32.mrf.mxu0 }
 0xc83   :  { %v3744_v36 = vsel %vm668_vm1, %v3713_v16, -inf }
 0xc84   :  { %3745 = vmax.xlane.f32.xlu0 %v3744_v36  ;;  %v10024_v50 = vpop.f32.mrf.mxu0 }
 0xc85   :  { %v3759_v36 = vsel %vm668_vm1, %v10024_v50, -inf }
 0xc86   :  { %v10026_v51 = vpop.f32.mrf.mxu0 }
 0xc88   :  { %3751 = vmax.xlane.f32.xlu0 %v3750_v5  ;;  %v10029_v45 = vpop.f32.mrf.mxu0  ;;  %v3753_v5 = vsel %vm668_vm1, %v10026_v51, -inf }
 0xc89   :  { %v3762_v1 = vsel %vm668_vm1, %v10029_v45, -inf }
 0xc8a   :  { %v3729_v34 = vpop.f32.mrf.mxu0 }
 0xc8b   :  { %v3756_v30 = vsel %vm668_vm1, %v3729_v34, -inf }
 0xc8c   :  { %3763 = vmax.xlane.f32.xlu0 %v3762_v1 }
 0xc90   :  { %3757 = vmax.xlane.f32.xlu0 %v3756_v30 }
 0xc93   :  { %4008 = vrot.lane.b32.xlu1 %v9941_v29, %s9002_s0 }
 0xca6   :  { %4006 = vrot.lane.b32.xlu0 %v9958_v13, %s9002_s0 }
 0xcaa   :  { %3990 = vrot.lane.b32.xlu0 %v9105_v61, %s9002_s0 }
 0xcae   :  { %3994 = vrot.lane.b32.xlu0 %v11971_v20, %s9002_s0 }
 0xcb2   :  { %4183 = vrot.lane.b32.xlu0 %v9893_v26, %s9002_s0 }
 0xcb7   :  { %3760 = vmax.xlane.f32.xlu1 %v3759_v36 }
 0xcbb   :  { %3754 = vmax.xlane.f32.xlu1 %v3753_v5 }
 0xccc   :  { %4004 = vrot.lane.b32.xlu1 %v9977_v11, %s9002_s0 }
 0xcd0   :  { %4002 = vrot.lane.b32.xlu1 %v9991_v2, %s9002_s0 }
 0xcd4   :  { %3992 = vrot.lane.b32.xlu1 %v9125_v4, %s9002_s0 }
 0xcd8   :  { %3996 = vrot.lane.b32.xlu1 %v11972_v22, %s9002_s0 }
 0xcdc   :  { %4185 = vrot.lane.b32.xlu1 %v9191_v38, %s9002_s0 }
 0xce0   :  { %4181 = vrot.lane.b32.xlu1 %v9180_v32, %s9002_s0 }
 0xce4   :  { %4398 = vrot.lane.b32.xlu1 %v9941_v29, %s9003_s2 }
 0xd07   :  { %v3749_v1 = vpop.xlane.xlu1 %3748 }
 0xd08   :  { %v3767_v5 = vsub.f32 %v7965_v47, %v3749_v1 }
 0xd0a   :  { %v3777_v53 = vmul.f32 1.442695, %v3767_v5 }
 0xd0b   :  { %v3743_v30 = vpop.xlane.xlu1 %3742 }
 0xd0c   :  { %v3765_v36 = vsub.f32 %v3710_v63, %v3743_v30 }
 0xd0d   :  { %v3746_v58 = vpop.xlane.xlu0 %3745 }
 0xd0e   :  { %v3773_v35 = vmul.f32 1.442695, %v3765_v36  ;;  %v3766_v21 = vsub.f32 %v3713_v16, %v3746_v58 }
 0xd0f   :  { %v4009_v59 = vpop.permute.xlu1 %4008 }
 0xd10   :  { %v3775_v62 = vmul.f32 1.442695, %v3766_v21  ;;  %8295 = vmatprep.subr.msk.bf16.mxu1 %vm578_vm0, %v4009_v59  ;;  %8524 = vpow2.f32 %v3773_v35 }
 0xd11   :  { %v3752_v40 = vpop.xlane.xlu0 %3751 }
 0xd12   :  { %8526 = vpow2.f32 %v3775_v62  ;;  %v3768_v8 = vsub.f32 %v7966_v37, %v3752_v40 }
 0xd13   :  { %8528 = vpow2.f32 %v3777_v53 }
 0xd14   :  { %v3779_v24 = vmul.f32 1.442695, %v3768_v8 }
 0xd15   :  { %v3764_v33 = vpop.xlane.xlu0 %3763 }
 0xd16   :  { %8530 = vpow2.f32 %v3779_v24  ;;  %v4032_v24 = vsel %vm578_vm0, %v4009_v59, 0  ;;  %v3772_v1 = vsub.f32 %v10029_v45, %v3764_v33 }
 0xd19   :  { %v3758_v47 = vpop.xlane.xlu0 %3757 }
 0xd1a   :  { %v3770_v40 = vsub.f32 %v3729_v34, %v3758_v47 }
 0xd1c   :  { %v3783_v30 = vmul.f32 1.442695, %v3770_v40 }
 0xd1d   :  { %v10063_v42 = vpop.eup %8524  ;;  %v4007_v62 = vpop.permute.xlu0 %4006 }
 0xd1e   :  { %11981 = vst [vmem:[#allocation113_spill] sm:$0xff] %v10063_v42  ;;  %v4029_v53 = vsel %vm578_vm0, %v4007_v62, 0  ;;  %8532 = vpow2.f32 %v3783_v30 }
 0xd1f   :  { %v10065_v63 = vpop.eup %8526 }
 0xd20   :  { %11982 = vst [vmem:[#allocation114_spill] sm:$0xff] %v10065_v63  ;;  %v3813_v58 = vpack.c.bf16 %v10065_v63, %v10063_v42  ;;  %v10069_v21 = vpop.eup %8528 }
 0xd21   :  { %11983 = vst [vmem:[#allocation115_spill] sm:$0xff] %v10069_v21  ;;  %v3991_v33 = vpop.permute.xlu0 %3990 }
 0xd22   :  { %7979 = vmatprep.mubr.msk.bf16.mxu1 %vm668_vm1, %v3813_v58 }
 0xd23   :  { %v10072_v35 = vpop.eup %8530 }
 0xd24   :  { %11984 = vst [vmem:[#allocation116_spill] sm:$0xff] %v10072_v35  ;;  %v3814_v8 = vpack.c.bf16 %v10072_v35, %v10069_v21 }
 0xd26   :  { %7980 = vmatmul.mubr.msk.bf16.vlgmr.msra.gmra.mxu1 %vm668_vm1, %v3814_v8  ;;  %v3787_v8 = vmul.f32 1.442695, %v3772_v1 }
 0xd27   :  { %7988 = vmatpush3.bf16.xpose.msra.mxu1 %v4032_v24 }
 0xd28   :  { %8296 = vmatprep.subr.msk.bf16.mxu1 %vm578_vm0, %v4007_v62  ;;  %v3995_v62 = vpop.permute.xlu0 %3994 }
 0xd2f   :  { %7990 = vmatpush3.bf16.xpose.msra.mxu1 %v4029_v53 }
 0xd40   :  { %v3761_v37 = vpop.xlane.xlu1 %3760 }
 0xd41   :  { %v3771_v16 = vsub.f32 %v10024_v50, %v3761_v37 }
 0xd43   :  { %v3785_v36 = vmul.f32 1.442695, %v3771_v16 }
 0xd44   :  { %v3755_v5 = vpop.xlane.xlu1 %3754 }
 0xd45   :  { %v3769_v58 = vsub.f32 %v10026_v51, %v3755_v5  ;;  %8534 = vpow2.f32 %v3785_v36  ;;  %v10087_v51 = vpop.eup %8532  ;;  %v4184_v5 = vpop.permute.xlu0 %4183 }
 0xd46   :  { %11985 = vst [vmem:[#allocation117_spill] sm:$0xff] %v10087_v51 }
 0xd47   :  { %v3781_v59 = vmul.f32 1.442695, %v3769_v58 }
 0xd48   :  { %v4005_v24 = vpop.permute.xlu1 %4004 }
 0xd49   :  { %8536 = vpow2.f32 %v3781_v59  ;;  %8297 = vmatprep.subr.msk.bf16.mxu1 %vm578_vm0, %v4005_v24  ;;  %v4026_v34 = vsel %vm578_vm0, %v4005_v24, 0 }
 0xd4a   :  { %8538 = vpow2.f32 %v3787_v8  ;;  %7992 = vmatpush3.bf16.xpose.msra.mxu1 %v4026_v34 }
 0xd4c   :  { %v4003_v50 = vpop.permute.xlu1 %4002 }
 0xd4d   :  { %8298 = vmatprep.subr.msk.bf16.mxu1 %vm578_vm0, %v4003_v50  ;;  %v4023_v47 = vsel %vm578_vm0, %v4003_v50, 0 }
 0xd50   :  { %v3993_v45 = vpop.permute.xlu1 %3992 }
 0xd52   :  { %7994 = vmatpush3.bf16.xpose.msra.mxu1 %v4023_v47  ;;  %v10089_v40 = vpop.eup %8534 }
 0xd53   :  { %11986 = vst [vmem:[#allocation118_spill] sm:$0xff] %v10089_v40 }
 0xd54   :  { %v3997_v53 = vpop.permute.xlu1 %3996 }
 0xd56   :  { %v10091_v37 = vpop.eup %8536 }
 0xd57   :  { %11987 = vst [vmem:[#allocation119_spill] sm:$0xff] %v10091_v37  ;;  %v10093_v16 = vpop.eup %8538  ;;  %v3815_v1 = vpack.c.bf16 %v10087_v51, %v10091_v37 }
 0xd58   :  { %11988 = vst [vmem:[#allocation120_spill] sm:$0xff] %v10093_v16  ;;  %v4186_v30 = vpop.permute.xlu1 %4185  ;;  %v3816_v36 = vpack.c.bf16 %v10093_v16, %v10089_v40 }
 0xd59   :  { %7983 = vmatprep.mubr.msk.bf16.mxu1 %vm668_vm1, %v3815_v1  ;;  %8003 = vmatprep.subr.bf16.mxu0 %v4186_v30 }
 0xd5a   :  { %7984 = vmatmul.mubr.msk.bf16.gmra.mxu1 %vm668_vm1, %v3816_v36  ;;  %8004 = vmatpush3.bf16.msra.mxu0 %v4186_v30 }
 0xd5b   :  { %7995 = vmatprep.mubr.msk.bf16.mxu1 %vm578_vm0, %v3991_v33  ;;  %8005 = vmatprep.subr.bf16.mxu0 %v4184_v5 }
 0xd5c   :  { %v4182_v58 = vpop.permute.xlu1 %4181 }
 0xd5e   :  { %8006 = vmatpush3.bf16.msra.mxu0 %v4184_v5 }
 0xd5f   :  { %8007 = vmatprep.subr.bf16.mxu0 %v4182_v58 }
 0xd62   :  { %7996 = vmatmul.mubr.msk.bf16.vlgmr.msra.gmra.mxu1 %vm578_vm0, %v3993_v45  ;;  %8008 = vmatpush3.bf16.msra.mxu0 %v4182_v58 }
 0xd63   :  { %7999 = vmatprep.mubr.msk.bf16.mxu1 %vm578_vm0, %v3995_v62 }
 0xd6a   :  { %8000 = vmatmul.mubr.msk.bf16.gmra.mxu1 %vm578_vm0, %v3997_v53 }
 0xde6   :  { %v10105_v8 = vpop.f32.mrf.mxu1 }
 0xde7   :  { %11989 = vst [vmem:[#allocation121_spill] sm:$0xff] %v10105_v8 }
 0xde8   :  { %v10107_v59 = vpop.f32.mrf.mxu1 }
 0xde9   :  { %11990 = vst [vmem:[#allocation122_spill] sm:$0xff] %v10107_v59 }
 0xdea   :  { %v10109_v24 = vpop.f32.mrf.mxu1 }
 0xdeb   :  { %11991 = vst [vmem:[#allocation123_spill] sm:$0xff] %v10109_v24 }
 0xdec   :  { %v10111_v34 = vpop.f32.mrf.mxu1 }
 0xded   :  { %11992 = vst [vmem:[#allocation124_spill] sm:$0xff] %v10111_v34 }
 0xe1a   :  { %v10113_v50 = vpop.f32.mrf.mxu1 }
 0xe1b   :  { %11993 = vst [vmem:[#allocation125_spill] sm:$0xff] %v10113_v50 }
 0xe1c   :  { %v10115_v33 = vpop.f32.mrf.mxu1 }
 0xe1d   :  { %11994 = vst [vmem:[#allocation126_spill] sm:$0xff] %v10115_v33 }
 0xe1e   :  { %v10117_v47 = vpop.f32.mrf.mxu1 }
 0xe1f   :  { %11995 = vst [vmem:[#allocation127_spill] sm:$0xff] %v10117_v47 }
 0xe20   :  { %v10119_v45 = vpop.f32.mrf.mxu1 }
 0xe21   :  { %11996 = vst [vmem:[#allocation128_spill] sm:$0xff] %v10119_v45 }
 0xe22   :  { %v7997_v1 = vpop.f32.mrf.mxu1 }
 0xe23   :  { %v4105_v62 = vsel %vm668_vm1, %v7997_v1, -inf }
 0xe24   :  { %4106 = vmax.xlane.f32.xlu0 %v4105_v62  ;;  %v4068_v53 = vpop.f32.mrf.mxu1 }
 0xe25   :  { %v4099_v36 = vsel %vm668_vm1, %v4068_v53, -inf }
 0xe26   :  { %v7998_v30 = vpop.f32.mrf.mxu1 }
 0xe27   :  { %v4108_v50 = vsel %vm668_vm1, %v7998_v30, -inf }
 0xe28   :  { %4100 = vmax.xlane.f32.xlu0 %v4099_v36  ;;  %v4071_v5 = vpop.f32.mrf.mxu1 }
 0xe29   :  { %v4102_v58 = vsel %vm668_vm1, %v4071_v5, -inf }
 0xe2a   :  { %4103 = vmax.xlane.f32.xlu1 %v4102_v58  ;;  %v10129_v33 = vpop.f32.mrf.mxu1 }
 0xe2b   :  { %v4117_v36 = vsel %vm668_vm1, %v10129_v33, -inf }
 0xe2c   :  { %4109 = vmax.xlane.f32.xlu0 %v4108_v50  ;;  %v10131_v62 = vpop.f32.mrf.mxu1 }
 0xe2d   :  { %v4111_v50 = vsel %vm668_vm1, %v10131_v62, -inf }
 0xe2e   :  { %v8002_v8 = vpop.f32.mrf.mxu1 }
 0xe2f   :  { %v4120_v58 = vsel %vm668_vm1, %v8002_v8, -inf }
 0xe30   :  { %v10136_v59 = vpop.f32.mrf.mxu1 }
 0xe31   :  { %v4114_v47 = vsel %vm668_vm1, %v10136_v59, -inf }
 0xe3b   :  { %4396 = vrot.lane.b32.xlu1 %v9958_v13, %s9003_s2 }
 0xe42   :  { %4179 = vrot.lane.b32.xlu0 %v9903_v55, %s9002_s0 }
 0xe5f   :  { %4118 = vmax.xlane.f32.xlu1 %v4117_v36  ;;  %v4399_v36 = vpop.permute.xlu1 %4398 }
 0xe61   :  { %4121 = vmax.xlane.f32.xlu0 %v4120_v58 }
 0xe63   :  { %4112 = vmax.xlane.f32.xlu1 %v4111_v50 }
 0xe65   :  { %4115 = vmax.xlane.f32.xlu0 %v4114_v47 }
 0xe74   :  { %4392 = vrot.lane.b32.xlu1 %v9991_v2, %s9003_s2 }
 0xe78   :  { %4382 = vrot.lane.b32.xlu1 %v9125_v4, %s9003_s2 }
 0xe7b   :  { %4394 = vrot.lane.b32.xlu0 %v9977_v11, %s9003_s2 }
 0xe7c   :  { %4386 = vrot.lane.b32.xlu1 %v11972_v22, %s9003_s2 }
 0xe7f   :  { %4380 = vrot.lane.b32.xlu0 %v9105_v61, %s9003_s2 }
 0xe80   :  { %4575 = vrot.lane.b32.xlu1 %v9191_v38, %s9003_s2 }
 0xe83   :  { %4384 = vrot.lane.b32.xlu0 %v11971_v20, %s9003_s2 }
 0xe84   :  { %4571 = vrot.lane.b32.xlu1 %v9180_v32, %s9003_s2 }
 0xe87   :  { %4573 = vrot.lane.b32.xlu0 %v9893_v26, %s9003_s2 }
 0xe88   :  { %4788 = vrot.lane.b32.xlu1 %v9941_v29, %s9004_s7 }
 0xead   :  { %v4107_v47 = vpop.xlane.xlu0 %4106 }
 0xeae   :  { %v4125_v58 = vsub.f32 %v7997_v1, %v4107_v47 }
 0xeb0   :  { %v4135_v37 = vmul.f32 1.442695, %v4125_v58 }
 0xeb1   :  { %v4101_v50 = vpop.xlane.xlu0 %4100 }
 0xeb2   :  { %v4123_v45 = vsub.f32 %v4068_v53, %v4101_v50 }
 0xeb3   :  { %v4104_v24 = vpop.xlane.xlu1 %4103 }
 0xeb4   :  { %v4131_v34 = vmul.f32 1.442695, %v4123_v45  ;;  %v4124_v40 = vsub.f32 %v4071_v5, %v4104_v24 }
 0xeb5   :  { %v4110_v21 = vpop.xlane.xlu0 %4109 }
 0xeb6   :  { %v4133_v42 = vmul.f32 1.442695, %v4124_v40  ;;  %v4126_v16 = vsub.f32 %v7998_v30, %v4110_v21  ;;  %8540 = vpow2.f32 %v4131_v34 }
 0xeb8   :  { %8542 = vpow2.f32 %v4133_v42  ;;  %v4137_v51 = vmul.f32 1.442695, %v4126_v16 }
 0xeb9   :  { %8544 = vpow2.f32 %v4135_v37  ;;  %v4180_v35 = vpop.permute.xlu0 %4179 }
 0xeba   :  { %8546 = vpow2.f32 %v4137_v51  ;;  %8009 = vmatprep.subr.bf16.mxu0 %v4180_v35  ;;  %v4397_v51 = vpop.permute.xlu1 %4396 }
 0xebb   :  { %8010 = vmatpush3.bf16.msra.mxu0 %v4180_v35  ;;  %v4422_v35 = vsel %vm578_vm0, %v4399_v36, 0  ;;  %v4419_v37 = vsel %vm578_vm0, %v4397_v51, 0 }
 0xebc   :  { %8299 = vmatprep.subr.msk.bf16.mxu0 %vm578_vm0, %v4399_v36 }
 0xec3   :  { %v10163_v1 = vpop.eup %8540 }
 0xec4   :  { %11997 = vst [vmem:[#allocation129_spill] sm:$0xff] %v10163_v1 }
 0xec5   :  { %v10165_v53 = vpop.eup %8542 }
 0xec6   :  { %v10167_v45 = vpop.eup %8544  ;;  %v4171_v40 = vpack.c.bf16 %v10165_v53, %v10163_v1 }
 0xec7   :  { %11998 = vst [vmem:[#allocation130_spill] sm:$0xff] %v10167_v45  ;;  %v10171_v21 = vpop.eup %8546 }
 0xec8   :  { %11999 = vst [vmem:[#allocation131_spill] sm:$0xff] %v10171_v21  ;;  %v4172_v42 = vpack.c.bf16 %v10171_v21, %v10167_v45  ;;  %8011 = vmatprep.mubr.msk.bf16.mxu0 %vm668_vm1, %v4171_v40 }
 0xeca   :  { %8012 = vmatmul.mubr.msk.bf16.vlgmr.msra.gmra.mxu0 %vm668_vm1, %v4172_v42 }
 0xecb   :  { %8020 = vmatpush3.bf16.xpose.msra.mxu0 %v4422_v35 }
 0xecc   :  { %8300 = vmatprep.subr.msk.bf16.mxu0 %vm578_vm0, %v4397_v51 }
 0xed3   :  { %8022 = vmatpush3.bf16.xpose.msra.mxu0 %v4419_v37 }
 0xee8   :  { %v4119_v16 = vpop.xlane.xlu1 %4118 }
 0xee9   :  { %v4129_v30 = vsub.f32 %v10129_v33, %v4119_v16 }
 0xeea   :  { %v4122_v24 = vpop.xlane.xlu0 %4121 }
 0xeeb   :  { %v4130_v34 = vsub.f32 %v8002_v8, %v4122_v24  ;;  %v4143_v42 = vmul.f32 1.442695, %v4129_v30 }
 0xeec   :  { %v4113_v5 = vpop.xlane.xlu1 %4112 }
 0xeed   :  { %v4145_v47 = vmul.f32 1.442695, %v4130_v34  ;;  %v4127_v58 = vsub.f32 %v10131_v62, %v4113_v5 }
 0xeee   :  { %v4116_v50 = vpop.xlane.xlu0 %4115 }
 0xeef   :  { %v4139_v40 = vmul.f32 1.442695, %v4127_v58  ;;  %v4128_v36 = vsub.f32 %v10136_v59, %v4116_v50  ;;  %8548 = vpow2.f32 %v4145_v47 }
 0xef0   :  { %v4393_v35 = vpop.permute.xlu1 %4392 }
 0xef1   :  { %v4141_v63 = vmul.f32 1.442695, %v4128_v36  ;;  %8550 = vpow2.f32 %v4139_v40  ;;  %v4413_v59 = vsel %vm578_vm0, %v4393_v35, 0 }
 0xef2   :  { %v4395_v51 = vpop.permute.xlu0 %4394 }
 0xef3   :  { %8552 = vpow2.f32 %v4141_v63  ;;  %8301 = vmatprep.subr.msk.bf16.mxu0 %vm578_vm0, %v4395_v51  ;;  %v4416_v8 = vsel %vm578_vm0, %v4395_v51, 0 }
 0xef4   :  { %8554 = vpow2.f32 %v4143_v42  ;;  %v4383_v33 = vpop.permute.xlu1 %4382  ;;  %8024 = vmatpush3.bf16.xpose.msra.mxu0 %v4416_v8 }
 0xef5   :  { %8302 = vmatprep.subr.msk.bf16.mxu0 %vm578_vm0, %v4393_v35 }
 0xef6   :  { %v4381_v62 = vpop.permute.xlu0 %4380 }
 0xef8   :  { %v4387_v37 = vpop.permute.xlu1 %4386 }
 0xefa   :  { %v4385_v16 = vpop.permute.xlu0 %4384 }
 0xefc   :  { %v4576_v24 = vpop.permute.xlu1 %4575  ;;  %8026 = vmatpush3.bf16.xpose.msra.mxu0 %v4413_v59  ;;  %v10187_v34 = vpop.eup %8548 }
 0xefd   :  { %8035 = vmatprep.subr.bf16.mxu1 %v4576_v24  ;;  %12000 = vst [vmem:[#allocation132_spill] sm:$0xff] %v10187_v34 }
 0xefe   :  { %8036 = vmatpush3.bf16.msra.mxu1 %v4576_v24  ;;  %v4574_v63 = vpop.permute.xlu0 %4573  ;;  %v10189_v30 = vpop.eup %8550 }
 0xeff   :  { %12001 = vst [vmem:[#allocation133_spill] sm:$0xff] %v10189_v30  ;;  %8037 = vmatprep.subr.bf16.mxu1 %v4574_v63 }
 0xf00   :  { %v10191_v5 = vpop.eup %8552  ;;  %v4572_v50 = vpop.permute.xlu1 %4571 }
 0xf01   :  { %12002 = vst [vmem:[#allocation134_spill] sm:$0xff] %v10191_v5  ;;  %v10193_v47 = vpop.eup %8554  ;;  %v4173_v58 = vpack.c.bf16 %v10191_v5, %v10189_v30 }
 0xf02   :  { %12003 = vst [vmem:[#allocation135_spill] sm:$0xff] %v10193_v47  ;;  %8038 = vmatpush3.bf16.msra.mxu1 %v4574_v63  ;;  %v4174_v40 = vpack.c.bf16 %v10187_v34, %v10193_v47 }
 0xf03   :  { %8015 = vmatprep.mubr.msk.bf16.mxu0 %vm668_vm1, %v4173_v58  ;;  %8039 = vmatprep.subr.bf16.mxu1 %v4572_v50 }
 0xf04   :  { %8016 = vmatmul.mubr.msk.bf16.gmra.mxu0 %vm668_vm1, %v4174_v40 }
 0xf05   :  { %8027 = vmatprep.mubr.msk.bf16.mxu0 %vm578_vm0, %v4381_v62 }
 0xf06   :  { %8040 = vmatpush3.bf16.msra.mxu1 %v4572_v50 }
 0xf0c   :  { %8028 = vmatmul.mubr.msk.bf16.vlgmr.msra.gmra.mxu0 %vm578_vm0, %v4383_v33 }
 0xf0d   :  { %8031 = vmatprep.mubr.msk.bf16.mxu0 %vm578_vm0, %v4385_v16 }
 0xf14   :  { %8032 = vmatmul.mubr.msk.bf16.gmra.mxu0 %vm578_vm0, %v4387_v37 }
 0xf8a   :  { %v10205_v36 = vpop.f32.mrf.mxu0 }
 0xf8b   :  { %12004 = vst [vmem:[#allocation136_spill] sm:$0xff] %v10205_v36 }
 0xf8c   :  { %v10207_v42 = vpop.f32.mrf.mxu0 }
 0xf8d   :  { %12005 = vst [vmem:[#allocation137_spill] sm:$0xff] %v10207_v42 }
 0xf8e   :  { %v10209_v35 = vpop.f32.mrf.mxu0 }
 0xf8f   :  { %12006 = vst [vmem:[#allocation138_spill] sm:$0xff] %v10209_v35 }
 0xf90   :  { %v10211_v51 = vpop.f32.mrf.mxu0 }
 0xf91   :  { %12007 = vst [vmem:[#allocation139_spill] sm:$0xff] %v10211_v51 }
 0xfc4   :  { %v10213_v8 = vpop.f32.mrf.mxu0 }
 0xfc5   :  { %12008 = vst [vmem:[#allocation140_spill] sm:$0xff] %v10213_v8 }
 0xfc6   :  { %v10215_v59 = vpop.f32.mrf.mxu0 }
 0xfc7   :  { %12009 = vst [vmem:[#allocation141_spill] sm:$0xff] %v10215_v59 }
 0xfc8   :  { %v10217_v62 = vpop.f32.mrf.mxu0 }
 0xfc9   :  { %12010 = vst [vmem:[#allocation142_spill] sm:$0xff] %v10217_v62 }
 0xfca   :  { %v10219_v24 = vpop.f32.mrf.mxu0 }
 0xfcb   :  { %12011 = vst [vmem:[#allocation143_spill] sm:$0xff] %v10219_v24 }
 0xfcc   :  { %v8029_v33 = vpop.f32.mrf.mxu0 }
 0xfcd   :  { %v4495_v16 = vsel %vm668_vm1, %v8029_v33, -inf }
 0xfce   :  { %4496 = vmax.xlane.f32.xlu0 %v4495_v16  ;;  %v4458_v37 = vpop.f32.mrf.mxu0 }
 0xfcf   :  { %v4489_v58 = vsel %vm668_vm1, %v4458_v37, -inf }
 0xfd0   :  { %v8030_v63 = vpop.f32.mrf.mxu0 }
 0xfd1   :  { %v4498_v8 = vsel %vm668_vm1, %v8030_v63, -inf }
 0xfd2   :  { %4490 = vmax.xlane.f32.xlu0 %v4489_v58  ;;  %v4461_v50 = vpop.f32.mrf.mxu0 }
 0xfd3   :  { %v4492_v40 = vsel %vm668_vm1, %v4461_v50, -inf }
 0xfd4   :  { %4493 = vmax.xlane.f32.xlu1 %v4492_v40  ;;  %v10229_v59 = vpop.f32.mrf.mxu0 }
 0xfd5   :  { %v4507_v58 = vsel %vm668_vm1, %v10229_v59, -inf }
 0xfd6   :  { %4499 = vmax.xlane.f32.xlu0 %v4498_v8  ;;  %v10231_v16 = vpop.f32.mrf.mxu0 }
 0xfd7   :  { %v4501_v8 = vsel %vm668_vm1, %v10231_v16, -inf }
 0xfd8   :  { %v8034_v62 = vpop.f32.mrf.mxu0 }
 0xfd9   :  { %v4510_v40 = vsel %vm668_vm1, %v8034_v62, -inf }
 0xfda   :  { %v10236_v24 = vpop.f32.mrf.mxu0 }
 0xfdb   :  { %v4504_v36 = vsel %vm668_vm1, %v10236_v24, -inf }
 0xfe5   :  { %4786 = vrot.lane.b32.xlu1 %v9958_v13, %s9004_s7 }
 0xfec   :  { %4569 = vrot.lane.b32.xlu0 %v9903_v55, %s9003_s2 }
0x1009   :  { %4508 = vmax.xlane.f32.xlu1 %v4507_v58  ;;  %v4789_v58 = vpop.permute.xlu1 %4788 }
0x100b   :  { %4511 = vmax.xlane.f32.xlu0 %v4510_v40 }
0x100d   :  { %4502 = vmax.xlane.f32.xlu1 %v4501_v8 }
0x100f   :  { %4505 = vmax.xlane.f32.xlu0 %v4504_v36 }
0x101e   :  { %4782 = vrot.lane.b32.xlu1 %v9991_v2, %s9004_s7 }
0x1022   :  { %4772 = vrot.lane.b32.xlu1 %v9125_v4, %s9004_s7 }
0x1025   :  { %4784 = vrot.lane.b32.xlu0 %v9977_v11, %s9004_s7 }
0x1026   :  { %4776 = vrot.lane.b32.xlu1 %v11972_v22, %s9004_s7 }
0x1029   :  { %4770 = vrot.lane.b32.xlu0 %v9105_v61, %s9004_s7 }
0x102a   :  { %4965 = vrot.lane.b32.xlu1 %v9191_v38, %s9004_s7 }
0x102d   :  { %4774 = vrot.lane.b32.xlu0 %v11971_v20, %s9004_s7 }
0x102e   :  { %4961 = vrot.lane.b32.xlu1 %v9180_v32, %s9004_s7 }
0x1031   :  { %4963 = vrot.lane.b32.xlu0 %v9893_v26, %s9004_s7 }
0x1032   :  { %5178 = vrot.lane.b32.xlu1 %v9941_v29, %s8998_s25 }
0x1057   :  { %v4497_v36 = vpop.xlane.xlu0 %4496 }
0x1058   :  { %v4515_v40 = vsub.f32 %v8029_v33, %v4497_v36 }
0x105a   :  { %v4525_v30 = vmul.f32 1.442695, %v4515_v40 }
0x105b   :  { %v4491_v8 = vpop.xlane.xlu0 %4490 }
0x105c   :  { %v4513_v42 = vsub.f32 %v4458_v37, %v4491_v8 }
0x105d   :  { %v4494_v35 = vpop.xlane.xlu1 %4493 }
0x105e   :  { %v4521_v51 = vmul.f32 1.442695, %v4513_v42  ;;  %v4514_v47 = vsub.f32 %v4461_v50, %v4494_v35 }
0x105f   :  { %v4500_v34 = vpop.xlane.xlu0 %4499 }
0x1060   :  { %v4523_v45 = vmul.f32 1.442695, %v4514_v47  ;;  %v4516_v5 = vsub.f32 %v8030_v63, %v4500_v34  ;;  %8556 = vpow2.f32 %v4521_v51 }
0x1062   :  { %8558 = vpow2.f32 %v4523_v45  ;;  %v4527_v1 = vmul.f32 1.442695, %v4516_v5 }
0x1063   :  { %8560 = vpow2.f32 %v4525_v30  ;;  %v4570_v21 = vpop.permute.xlu0 %4569 }
0x1064   :  { %8562 = vpow2.f32 %v4527_v1  ;;  %8041 = vmatprep.subr.bf16.mxu1 %v4570_v21  ;;  %v4812_v1 = vsel %vm578_vm0, %v4789_v58, 0 }
0x1065   :  { %8042 = vmatpush3.bf16.msra.mxu1 %v4570_v21  ;;  %v4787_v21 = vpop.permute.xlu1 %4786 }
0x1066   :  { %8303 = vmatprep.subr.msk.bf16.mxu1 %vm578_vm0, %v4789_v58  ;;  %v4809_v30 = vsel %vm578_vm0, %v4787_v21, 0 }
0x106d   :  { %v10263_v33 = vpop.eup %8556 }
0x106e   :  { %12012 = vst [vmem:[#allocation144_spill] sm:$0xff] %v10263_v33 }
0x106f   :  { %v10265_v37 = vpop.eup %8558 }
0x1070   :  { %12013 = vst [vmem:[#allocation145_spill] sm:$0xff] %v10265_v37  ;;  %v10267_v42 = vpop.eup %8560  ;;  %v4561_v47 = vpack.c.bf16 %v10265_v37, %v10263_v33 }
0x1071   :  { %12014 = vst [vmem:[#allocation146_spill] sm:$0xff] %v10267_v42  ;;  %v10271_v34 = vpop.eup %8562 }
0x1072   :  { %12015 = vst [vmem:[#allocation147_spill] sm:$0xff] %v10271_v34  ;;  %v4562_v45 = vpack.c.bf16 %v10271_v34, %v10267_v42  ;;  %8043 = vmatprep.mubr.msk.bf16.mxu1 %vm668_vm1, %v4561_v47 }
0x1074   :  { %8044 = vmatmul.mubr.msk.bf16.vlgmr.msra.gmra.mxu1 %vm668_vm1, %v4562_v45 }
0x1075   :  { %8052 = vmatpush3.bf16.xpose.msra.mxu1 %v4812_v1 }
0x1076   :  { %8304 = vmatprep.subr.msk.bf16.mxu1 %vm578_vm0, %v4787_v21 }
0x107d   :  { %8054 = vmatpush3.bf16.xpose.msra.mxu1 %v4809_v30 }
0x1092   :  { %v4509_v5 = vpop.xlane.xlu1 %4508 }
0x1093   :  { %v4519_v63 = vsub.f32 %v10229_v59, %v4509_v5 }
0x1094   :  { %v4512_v35 = vpop.xlane.xlu0 %4511 }
0x1095   :  { %v4520_v51 = vsub.f32 %v8034_v62, %v4512_v35  ;;  %v4533_v45 = vmul.f32 1.442695, %v4519_v63 }
0x1096   :  { %v4503_v50 = vpop.xlane.xlu1 %4502 }
0x1097   :  { %v4535_v36 = vmul.f32 1.442695, %v4520_v51  ;;  %v4517_v40 = vsub.f32 %v10231_v16, %v4503_v50 }
0x1098   :  { %v4506_v8 = vpop.xlane.xlu0 %4505 }
0x1099   :  { %v4529_v47 = vmul.f32 1.442695, %v4517_v40  ;;  %v4518_v58 = vsub.f32 %v10236_v24, %v4506_v8  ;;  %8564 = vpow2.f32 %v4535_v36 }
0x109a   :  { %v4783_v1 = vpop.permute.xlu1 %4782 }
0x109b   :  { %v4531_v42 = vmul.f32 1.442695, %v4518_v58  ;;  %8566 = vpow2.f32 %v4529_v47  ;;  %v4803_v24 = vsel %vm578_vm0, %v4783_v1, 0 }
0x109c   :  { %v4785_v21 = vpop.permute.xlu0 %4784 }
0x109d   :  { %8568 = vpow2.f32 %v4531_v42  ;;  %8305 = vmatprep.subr.msk.bf16.mxu1 %vm578_vm0, %v4785_v21  ;;  %v4806_v62 = vsel %vm578_vm0, %v4785_v21, 0 }
0x109e   :  { %8570 = vpow2.f32 %v4533_v45  ;;  %v4773_v59 = vpop.permute.xlu1 %4772  ;;  %8056 = vmatpush3.bf16.xpose.msra.mxu1 %v4806_v62 }
0x109f   :  { %8306 = vmatprep.subr.msk.bf16.mxu1 %vm578_vm0, %v4783_v1 }
0x10a0   :  { %v4771_v16 = vpop.permute.xlu0 %4770 }
0x10a2   :  { %v4777_v30 = vpop.permute.xlu1 %4776 }
0x10a4   :  { %v4775_v5 = vpop.permute.xlu0 %4774 }
0x10a6   :  { %v4966_v35 = vpop.permute.xlu1 %4965  ;;  %8058 = vmatpush3.bf16.xpose.msra.mxu1 %v4803_v24  ;;  %v10287_v51 = vpop.eup %8564 }
0x10a7   :  { %8067 = vmatprep.subr.bf16.mxu0 %v4966_v35  ;;  %12016 = vst [vmem:[#allocation148_spill] sm:$0xff] %v10287_v51 }
0x10a8   :  { %8068 = vmatpush3.bf16.msra.mxu0 %v4966_v35  ;;  %v4964_v42 = vpop.permute.xlu0 %4963  ;;  %v10289_v63 = vpop.eup %8566 }
0x10a9   :  { %12017 = vst [vmem:[#allocation149_spill] sm:$0xff] %v10289_v63  ;;  %8069 = vmatprep.subr.bf16.mxu0 %v4964_v42 }
0x10aa   :  { %v10291_v50 = vpop.eup %8568  ;;  %v4962_v8 = vpop.permute.xlu1 %4961 }
0x10ab   :  { %12018 = vst [vmem:[#allocation150_spill] sm:$0xff] %v10291_v50  ;;  %v10293_v36 = vpop.eup %8570  ;;  %v4563_v40 = vpack.c.bf16 %v10291_v50, %v10289_v63 }
0x10ac   :  { %12019 = vst [vmem:[#allocation151_spill] sm:$0xff] %v10293_v36  ;;  %8070 = vmatpush3.bf16.msra.mxu0 %v4964_v42  ;;  %v4564_v47 = vpack.c.bf16 %v10287_v51, %v10293_v36 }
0x10ad   :  { %8047 = vmatprep.mubr.msk.bf16.mxu1 %vm668_vm1, %v4563_v40  ;;  %8071 = vmatprep.subr.bf16.mxu0 %v4962_v8 }
0x10ae   :  { %8048 = vmatmul.mubr.msk.bf16.gmra.mxu1 %vm668_vm1, %v4564_v47 }
0x10af   :  { %8059 = vmatprep.mubr.msk.bf16.mxu1 %vm578_vm0, %v4771_v16 }
0x10b0   :  { %8072 = vmatpush3.bf16.msra.mxu0 %v4962_v8 }
0x10b6   :  { %8060 = vmatmul.mubr.msk.bf16.vlgmr.msra.gmra.mxu1 %vm578_vm0, %v4773_v59 }
0x10b7   :  { %8063 = vmatprep.mubr.msk.bf16.mxu1 %vm578_vm0, %v4775_v5 }
0x10be   :  { %8064 = vmatmul.mubr.msk.bf16.gmra.mxu1 %vm578_vm0, %v4777_v30 }
0x1134   :  { %v10305_v58 = vpop.f32.mrf.mxu1 }
0x1135   :  { %12020 = vst [vmem:[#allocation152_spill] sm:$0xff] %v10305_v58 }
0x1136   :  { %v10307_v45 = vpop.f32.mrf.mxu1 }
0x1137   :  { %12021 = vst [vmem:[#allocation153_spill] sm:$0xff] %v10307_v45 }
0x1138   :  { %v10309_v1 = vpop.f32.mrf.mxu1 }
0x1139   :  { %12022 = vst [vmem:[#allocation154_spill] sm:$0xff] %v10309_v1 }
0x113a   :  { %v10311_v21 = vpop.f32.mrf.mxu1 }
0x113b   :  { %12023 = vst [vmem:[#allocation155_spill] sm:$0xff] %v10311_v21 }
0x116e   :  { %v10313_v62 = vpop.f32.mrf.mxu1 }
0x116f   :  { %12024 = vst [vmem:[#allocation156_spill] sm:$0xff] %v10313_v62 }
0x1170   :  { %v10315_v24 = vpop.f32.mrf.mxu1 }
0x1171   :  { %12025 = vst [vmem:[#allocation157_spill] sm:$0xff] %v10315_v24 }
0x1172   :  { %v10317_v16 = vpop.f32.mrf.mxu1 }
0x1173   :  { %12026 = vst [vmem:[#allocation158_spill] sm:$0xff] %v10317_v16 }
0x1174   :  { %v10319_v35 = vpop.f32.mrf.mxu1 }
0x1175   :  { %12027 = vst [vmem:[#allocation159_spill] sm:$0xff] %v10319_v35 }
0x1176   :  { %v8061_v59 = vpop.f32.mrf.mxu1 }
0x1177   :  { %v4885_v5 = vsel %vm668_vm1, %v8061_v59, -inf }
0x1178   :  { %4886 = vmax.xlane.f32.xlu0 %v4885_v5  ;;  %v4848_v30 = vpop.f32.mrf.mxu1 }
0x1179   :  { %v4879_v40 = vsel %vm668_vm1, %v4848_v30, -inf }
0x117a   :  { %v8062_v42 = vpop.f32.mrf.mxu1 }
0x117b   :  { %v4888_v62 = vsel %vm668_vm1, %v8062_v42, -inf }
0x117c   :  { %4880 = vmax.xlane.f32.xlu0 %v4879_v40  ;;  %v4851_v8 = vpop.f32.mrf.mxu1 }
0x117d   :  { %v4882_v47 = vsel %vm668_vm1, %v4851_v8, -inf }
0x117e   :  { %4883 = vmax.xlane.f32.xlu1 %v4882_v47  ;;  %v10329_v24 = vpop.f32.mrf.mxu1 }
0x117f   :  { %v4897_v40 = vsel %vm668_vm1, %v10329_v24, -inf }
0x1180   :  { %4889 = vmax.xlane.f32.xlu0 %v4888_v62  ;;  %v10331_v5 = vpop.f32.mrf.mxu1 }
0x1181   :  { %v4891_v62 = vsel %vm668_vm1, %v10331_v5, -inf }
0x1182   :  { %v8066_v16 = vpop.f32.mrf.mxu1 }
0x1183   :  { %v4900_v47 = vsel %vm668_vm1, %v8066_v16, -inf }
0x1184   :  { %v10336_v35 = vpop.f32.mrf.mxu1 }
0x1185   :  { %v4894_v58 = vsel %vm668_vm1, %v10336_v35, -inf }
0x118f   :  { %5176 = vrot.lane.b32.xlu1 %v9958_v13, %s8998_s25 }
0x1196   :  { %4959 = vrot.lane.b32.xlu0 %v9903_v55, %s9004_s7 }
0x11b3   :  { %4898 = vmax.xlane.f32.xlu1 %v4897_v40  ;;  %v5179_v40 = vpop.permute.xlu1 %5178 }
0x11b5   :  { %4901 = vmax.xlane.f32.xlu0 %v4900_v47 }
0x11b7   :  { %4892 = vmax.xlane.f32.xlu1 %v4891_v62 }
0x11b9   :  { %4895 = vmax.xlane.f32.xlu0 %v4894_v58 }
0x11c8   :  { %5172 = vrot.lane.b32.xlu1 %v9991_v2, %s8998_s25 }
0x11cc   :  { %5162 = vrot.lane.b32.xlu1 %v9125_v4, %s8998_s25 }
0x11cf   :  { %5174 = vrot.lane.b32.xlu0 %v9977_v11, %s8998_s25 }
0x11d0   :  { %5166 = vrot.lane.b32.xlu1 %v11972_v22, %s8998_s25 }
0x11d3   :  { %5160 = vrot.lane.b32.xlu0 %v9105_v61, %s8998_s25 }
0x11d4   :  { %5355 = vrot.lane.b32.xlu1 %v9191_v38, %s8998_s25 }
0x11d7   :  { %5164 = vrot.lane.b32.xlu0 %v11971_v20, %s8998_s25 }
0x11d8   :  { %5351 = vrot.lane.b32.xlu1 %v9180_v32, %s8998_s25 }
0x11db   :  { %5353 = vrot.lane.b32.xlu0 %v9893_v26, %s8998_s25 }
0x11dc   :  { %5568 = vrot.lane.b32.xlu1 %v9941_v29, %s9005_s8 }
0x1201   :  { %v4887_v58 = vpop.xlane.xlu0 %4886 }
0x1202   :  { %v4905_v47 = vsub.f32 %v8061_v59, %v4887_v58 }
0x1204   :  { %v4915_v63 = vmul.f32 1.442695, %v4905_v47 }
0x1205   :  { %v4881_v62 = vpop.xlane.xlu0 %4880 }
0x1206   :  { %v4903_v45 = vsub.f32 %v4848_v30, %v4881_v62 }
0x1207   :  { %v4884_v1 = vpop.xlane.xlu1 %4883 }
0x1208   :  { %v4911_v21 = vmul.f32 1.442695, %v4903_v45  ;;  %v4904_v36 = vsub.f32 %v4851_v8, %v4884_v1 }
0x1209   :  { %v4890_v51 = vpop.xlane.xlu0 %4889 }
0x120a   :  { %v4913_v50 = vmul.f32 1.442695, %v4904_v36  ;;  %v4906_v33 = vsub.f32 %v8062_v42, %v4890_v51  ;;  %8572 = vpow2.f32 %v4911_v21 }
0x120c   :  { %8574 = vpow2.f32 %v4913_v50  ;;  %v4917_v34 = vmul.f32 1.442695, %v4906_v33 }
0x120d   :  { %8576 = vpow2.f32 %v4915_v63  ;;  %v4960_v37 = vpop.permute.xlu0 %4959 }
0x120e   :  { %8578 = vpow2.f32 %v4917_v34  ;;  %8073 = vmatprep.subr.bf16.mxu0 %v4960_v37  ;;  %v5177_v34 = vpop.permute.xlu1 %5176 }
0x120f   :  { %8074 = vmatpush3.bf16.msra.mxu0 %v4960_v37  ;;  %v5202_v37 = vsel %vm578_vm0, %v5179_v40, 0  ;;  %v5199_v63 = vsel %vm578_vm0, %v5177_v34, 0 }
0x1210   :  { %8307 = vmatprep.subr.msk.bf16.mxu0 %vm578_vm0, %v5179_v40 }
0x1217   :  { %v10363_v59 = vpop.eup %8572 }
0x1218   :  { %12028 = vst [vmem:[#allocation160_spill] sm:$0xff] %v10363_v59 }
0x1219   :  { %v10365_v30 = vpop.eup %8574 }
0x121a   :  { %12029 = vst [vmem:[#allocation161_spill] sm:$0xff] %v10365_v30  ;;  %v10367_v45 = vpop.eup %8576  ;;  %v4951_v36 = vpack.c.bf16 %v10365_v30, %v10363_v59 }
0x121b   :  { %12030 = vst [vmem:[#allocation162_spill] sm:$0xff] %v10367_v45  ;;  %v10371_v51 = vpop.eup %8578 }
0x121c   :  { %12031 = vst [vmem:[#allocation163_spill] sm:$0xff] %v10371_v51  ;;  %v4952_v33 = vpack.c.bf16 %v10371_v51, %v10367_v45  ;;  %8075 = vmatprep.mubr.msk.bf16.mxu0 %vm668_vm1, %v4951_v36 }
0x121e   :  { %8076 = vmatmul.mubr.msk.bf16.vlgmr.msra.gmra.mxu0 %vm668_vm1, %v4952_v33 }
0x121f   :  { %8084 = vmatpush3.bf16.xpose.msra.mxu0 %v5202_v37 }
0x1220   :  { %8308 = vmatprep.subr.msk.bf16.mxu0 %vm578_vm0, %v5177_v34 }
0x1227   :  { %8086 = vmatpush3.bf16.xpose.msra.mxu0 %v5199_v63 }
0x123c   :  { %v4899_v50 = vpop.xlane.xlu1 %4898 }
0x123d   :  { %v4909_v42 = vsub.f32 %v10329_v24, %v4899_v50 }
0x123e   :  { %v4902_v1 = vpop.xlane.xlu0 %4901 }
0x123f   :  { %v4910_v21 = vsub.f32 %v8066_v16, %v4902_v1  ;;  %v4923_v33 = vmul.f32 1.442695, %v4909_v42 }
0x1240   :  { %v4893_v8 = vpop.xlane.xlu1 %4892 }
0x1241   :  { %v4925_v58 = vmul.f32 1.442695, %v4910_v21  ;;  %v4907_v47 = vsub.f32 %v10331_v5, %v4893_v8 }
0x1242   :  { %v4896_v62 = vpop.xlane.xlu0 %4895 }
0x1243   :  { %v4919_v36 = vmul.f32 1.442695, %v4907_v47  ;;  %v4908_v40 = vsub.f32 %v10336_v35, %v4896_v62  ;;  %8580 = vpow2.f32 %v4925_v58 }
0x1244   :  { %v5173_v37 = vpop.permute.xlu1 %5172 }
0x1245   :  { %v4921_v45 = vmul.f32 1.442695, %v4908_v40  ;;  %8582 = vpow2.f32 %v4919_v36  ;;  %v5193_v35 = vsel %vm578_vm0, %v5173_v37, 0 }
0x1246   :  { %v5175_v34 = vpop.permute.xlu0 %5174 }
0x1247   :  { %8584 = vpow2.f32 %v4921_v45  ;;  %8309 = vmatprep.subr.msk.bf16.mxu0 %vm578_vm0, %v5175_v34  ;;  %v5196_v16 = vsel %vm578_vm0, %v5175_v34, 0 }
0x1248   :  { %8586 = vpow2.f32 %v4923_v33  ;;  %v5163_v24 = vpop.permute.xlu1 %5162  ;;  %8088 = vmatpush3.bf16.xpose.msra.mxu0 %v5196_v16 }
0x1249   :  { %8310 = vmatprep.subr.msk.bf16.mxu0 %vm578_vm0, %v5173_v37 }
0x124a   :  { %v5161_v5 = vpop.permute.xlu0 %5160 }
0x124c   :  { %v5167_v63 = vpop.permute.xlu1 %5166 }
0x124e   :  { %v5165_v50 = vpop.permute.xlu0 %5164 }
0x1250   :  { %v5356_v1 = vpop.permute.xlu1 %5355  ;;  %8090 = vmatpush3.bf16.xpose.msra.mxu0 %v5193_v35  ;;  %v10387_v21 = vpop.eup %8580 }
0x1251   :  { %8099 = vmatprep.subr.bf16.mxu1 %v5356_v1  ;;  %12032 = vst [vmem:[#allocation164_spill] sm:$0xff] %v10387_v21 }
0x1252   :  { %8100 = vmatpush3.bf16.msra.mxu1 %v5356_v1  ;;  %v5354_v45 = vpop.permute.xlu0 %5353  ;;  %v10389_v42 = vpop.eup %8582 }
0x1253   :  { %12033 = vst [vmem:[#allocation165_spill] sm:$0xff] %v10389_v42  ;;  %8101 = vmatprep.subr.bf16.mxu1 %v5354_v45 }
0x1254   :  { %v10391_v8 = vpop.eup %8584  ;;  %v5352_v62 = vpop.permute.xlu1 %5351 }
0x1255   :  { %12034 = vst [vmem:[#allocation166_spill] sm:$0xff] %v10391_v8  ;;  %v10393_v58 = vpop.eup %8586  ;;  %v4953_v47 = vpack.c.bf16 %v10391_v8, %v10389_v42 }
0x1256   :  { %12035 = vst [vmem:[#allocation167_spill] sm:$0xff] %v10393_v58  ;;  %8102 = vmatpush3.bf16.msra.mxu1 %v5354_v45  ;;  %v4954_v36 = vpack.c.bf16 %v10387_v21, %v10393_v58 }
0x1257   :  { %8079 = vmatprep.mubr.msk.bf16.mxu0 %vm668_vm1, %v4953_v47  ;;  %8103 = vmatprep.subr.bf16.mxu1 %v5352_v62 }
0x1258   :  { %8080 = vmatmul.mubr.msk.bf16.gmra.mxu0 %vm668_vm1, %v4954_v36 }
0x1259   :  { %8091 = vmatprep.mubr.msk.bf16.mxu0 %vm578_vm0, %v5161_v5 }
0x125a   :  { %8104 = vmatpush3.bf16.msra.mxu1 %v5352_v62 }
0x1260   :  { %8092 = vmatmul.mubr.msk.bf16.vlgmr.msra.gmra.mxu0 %vm578_vm0, %v5163_v24 }
0x1261   :  { %8095 = vmatprep.mubr.msk.bf16.mxu0 %vm578_vm0, %v5165_v50 }
0x1268   :  { %8096 = vmatmul.mubr.msk.bf16.gmra.mxu0 %vm578_vm0, %v5167_v63 }
0x12de   :  { %v10405_v40 = vpop.f32.mrf.mxu0 }
0x12df   :  { %12036 = vst [vmem:[#allocation168_spill] sm:$0xff] %v10405_v40 }
0x12e0   :  { %v10407_v33 = vpop.f32.mrf.mxu0 }
0x12e1   :  { %12037 = vst [vmem:[#allocation169_spill] sm:$0xff] %v10407_v33 }
0x12e2   :  { %v10409_v37 = vpop.f32.mrf.mxu0 }
0x12e3   :  { %12038 = vst [vmem:[#allocation170_spill] sm:$0xff] %v10409_v37 }
0x12e4   :  { %v10411_v34 = vpop.f32.mrf.mxu0 }
0x12e5   :  { %12039 = vst [vmem:[#allocation171_spill] sm:$0xff] %v10411_v34 }
0x1318   :  { %v10413_v16 = vpop.f32.mrf.mxu0 }
0x1319   :  { %12040 = vst [vmem:[#allocation172_spill] sm:$0xff] %v10413_v16 }
0x131a   :  { %v10415_v35 = vpop.f32.mrf.mxu0 }
0x131b   :  { %12041 = vst [vmem:[#allocation173_spill] sm:$0xff] %v10415_v35 }
0x131c   :  { %v10417_v5 = vpop.f32.mrf.mxu0 }
0x131d   :  { %12042 = vst [vmem:[#allocation174_spill] sm:$0xff] %v10417_v5 }
0x131e   :  { %v10419_v1 = vpop.f32.mrf.mxu0 }
0x131f   :  { %12043 = vst [vmem:[#allocation175_spill] sm:$0xff] %v10419_v1 }
0x1320   :  { %v8093_v24 = vpop.f32.mrf.mxu0 }
0x1321   :  { %v5275_v50 = vsel %vm668_vm1, %v8093_v24, -inf }
0x1322   :  { %5276 = vmax.xlane.f32.xlu0 %v5275_v50  ;;  %v5238_v63 = vpop.f32.mrf.mxu0 }
0x1323   :  { %v5269_v47 = vsel %vm668_vm1, %v5238_v63, -inf }
0x1324   :  { %v8094_v45 = vpop.f32.mrf.mxu0 }
0x1325   :  { %v5278_v16 = vsel %vm668_vm1, %v8094_v45, -inf }
0x1326   :  { %5270 = vmax.xlane.f32.xlu0 %v5269_v47  ;;  %v5241_v62 = vpop.f32.mrf.mxu0 }
0x1327   :  { %v5272_v36 = vsel %vm668_vm1, %v5241_v62, -inf }
0x1328   :  { %5273 = vmax.xlane.f32.xlu1 %v5272_v36  ;;  %v10429_v35 = vpop.f32.mrf.mxu0 }
0x1329   :  { %v5287_v47 = vsel %vm668_vm1, %v10429_v35, -inf }
0x132a   :  { %5279 = vmax.xlane.f32.xlu0 %v5278_v16  ;;  %v10431_v50 = vpop.f32.mrf.mxu0 }
0x132b   :  { %v5281_v16 = vsel %vm668_vm1, %v10431_v50, -inf }
0x132c   :  { %v8098_v5 = vpop.f32.mrf.mxu0 }
0x132d   :  { %v5290_v36 = vsel %vm668_vm1, %v8098_v5, -inf }
0x132e   :  { %v10436_v1 = vpop.f32.mrf.mxu0 }
0x132f   :  { %v5284_v40 = vsel %vm668_vm1, %v10436_v1, -inf }
0x1339   :  { %5566 = vrot.lane.b32.xlu1 %v9958_v13, %s9005_s8 }
0x1340   :  { %5349 = vrot.lane.b32.xlu0 %v9903_v55, %s8998_s25 }
0x135d   :  { %5288 = vmax.xlane.f32.xlu1 %v5287_v47  ;;  %v5569_v47 = vpop.permute.xlu1 %5568 }
0x135f   :  { %5291 = vmax.xlane.f32.xlu0 %v5290_v36 }
0x1361   :  { %5282 = vmax.xlane.f32.xlu1 %v5281_v16 }
0x1363   :  { %5285 = vmax.xlane.f32.xlu0 %v5284_v40 }
0x1372   :  { %5562 = vrot.lane.b32.xlu1 %v9991_v2, %s9005_s8 }
0x1376   :  { %5552 = vrot.lane.b32.xlu1 %v9125_v4, %s9005_s8 }
0x1379   :  { %5564 = vrot.lane.b32.xlu0 %v9977_v11, %s9005_s8 }
0x137a   :  { %5556 = vrot.lane.b32.xlu1 %v11972_v22, %s9005_s8 }
0x137d   :  { %5550 = vrot.lane.b32.xlu0 %v9105_v61, %s9005_s8 }
0x137e   :  { %5745 = vrot.lane.b32.xlu1 %v9191_v38, %s9005_s8 }
0x1381   :  { %5554 = vrot.lane.b32.xlu0 %v11971_v20, %s9005_s8 }
0x1382   :  { %5741 = vrot.lane.b32.xlu1 %v9180_v32, %s9005_s8 }
0x1385   :  { %5743 = vrot.lane.b32.xlu0 %v9893_v26, %s9005_s8 }
0x1386   :  { %5958 = vrot.lane.b32.xlu1 %v9941_v29, %s9006_s9 }
0x13ab   :  { %v5277_v40 = vpop.xlane.xlu0 %5276 }
0x13ac   :  { %v5295_v36 = vsub.f32 %v8093_v24, %v5277_v40 }
0x13ae   :  { %v5305_v42 = vmul.f32 1.442695, %v5295_v36 }
0x13af   :  { %v5271_v16 = vpop.xlane.xlu0 %5270 }
0x13b0   :  { %v5293_v33 = vsub.f32 %v5238_v63, %v5271_v16 }
0x13b1   :  { %v5274_v37 = vpop.xlane.xlu1 %5273 }
0x13b2   :  { %v5301_v34 = vmul.f32 1.442695, %v5293_v33  ;;  %v5294_v58 = vsub.f32 %v5241_v62, %v5274_v37 }
0x13b3   :  { %v5280_v21 = vpop.xlane.xlu0 %5279 }
0x13b4   :  { %v5303_v8 = vmul.f32 1.442695, %v5294_v58  ;;  %v5296_v59 = vsub.f32 %v8094_v45, %v5280_v21  ;;  %8588 = vpow2.f32 %v5301_v34 }
0x13b6   :  { %8590 = vpow2.f32 %v5303_v8  ;;  %v5307_v51 = vmul.f32 1.442695, %v5296_v59 }
0x13b7   :  { %8592 = vpow2.f32 %v5305_v42  ;;  %v5350_v30 = vpop.permute.xlu0 %5349 }
0x13b8   :  { %8594 = vpow2.f32 %v5307_v51  ;;  %8105 = vmatprep.subr.bf16.mxu1 %v5350_v30  ;;  %v5567_v51 = vpop.permute.xlu1 %5566 }
0x13b9   :  { %8106 = vmatpush3.bf16.msra.mxu1 %v5350_v30  ;;  %v5592_v30 = vsel %vm578_vm0, %v5569_v47, 0  ;;  %v5589_v42 = vsel %vm578_vm0, %v5567_v51, 0 }
0x13ba   :  { %8311 = vmatprep.subr.msk.bf16.mxu1 %vm578_vm0, %v5569_v47 }
0x13c1   :  { %v10463_v24 = vpop.eup %8588 }
0x13c3   :  { %v10465_v63 = vpop.eup %8590 }
0x13c4   :  { %v10467_v33 = vpop.eup %8592  ;;  %v5341_v58 = vpack.c.bf16 %v10465_v63, %v10463_v24 }
0x13c5   :  { %12044 = vst [vmem:[#allocation176_spill] sm:$0xff] %v10467_v33  ;;  %v10471_v21 = vpop.eup %8594 }
0x13c6   :  { %v5342_v59 = vpack.c.bf16 %v10471_v21, %v10467_v33  ;;  %8107 = vmatprep.mubr.msk.bf16.mxu1 %vm668_vm1, %v5341_v58 }
0x13c8   :  { %8108 = vmatmul.mubr.msk.bf16.vlgmr.msra.gmra.mxu1 %vm668_vm1, %v5342_v59 }
0x13c9   :  { %8116 = vmatpush3.bf16.xpose.msra.mxu1 %v5592_v30 }
0x13ca   :  { %8312 = vmatprep.subr.msk.bf16.mxu1 %vm578_vm0, %v5567_v51 }
0x13d1   :  { %8118 = vmatpush3.bf16.xpose.msra.mxu1 %v5589_v42 }
0x13e6   :  { %v5289_v8 = vpop.xlane.xlu1 %5288 }
0x13e7   :  { %v5299_v45 = vsub.f32 %v10429_v35, %v5289_v8 }
0x13e8   :  { %v5292_v37 = vpop.xlane.xlu0 %5291 }
0x13e9   :  { %v5300_v34 = vsub.f32 %v8098_v5, %v5292_v37  ;;  %v5313_v59 = vmul.f32 1.442695, %v5299_v45 }
0x13ea   :  { %v5283_v62 = vpop.xlane.xlu1 %5282 }
0x13eb   :  { %v5315_v40 = vmul.f32 1.442695, %v5300_v34  ;;  %v5297_v36 = vsub.f32 %v10431_v50, %v5283_v62 }
0x13ec   :  { %v5286_v16 = vpop.xlane.xlu0 %5285 }
0x13ed   :  { %v5309_v58 = vmul.f32 1.442695, %v5297_v36  ;;  %v5298_v47 = vsub.f32 %v10436_v1, %v5286_v16  ;;  %8596 = vpow2.f32 %v5315_v40 }
0x13ee   :  { %v5563_v30 = vpop.permute.xlu1 %5562 }
0x13ef   :  { %v5311_v33 = vmul.f32 1.442695, %v5298_v47  ;;  %8598 = vpow2.f32 %v5309_v58  ;;  %v5583_v1 = vsel %vm578_vm0, %v5563_v30, 0 }
0x13f0   :  { %v5565_v51 = vpop.permute.xlu0 %5564 }
0x13f1   :  { %8600 = vpow2.f32 %v5311_v33  ;;  %8313 = vmatprep.subr.msk.bf16.mxu1 %vm578_vm0, %v5565_v51  ;;  %v5586_v5 = vsel %vm578_vm0, %v5565_v51, 0 }
0x13f2   :  { %8602 = vpow2.f32 %v5313_v59  ;;  %v5553_v35 = vpop.permute.xlu1 %5552  ;;  %8120 = vmatpush3.bf16.xpose.msra.mxu1 %v5586_v5 }
0x13f3   :  { %8314 = vmatprep.subr.msk.bf16.mxu1 %vm578_vm0, %v5563_v30 }
0x13f4   :  { %v5551_v50 = vpop.permute.xlu0 %5550 }
0x13f6   :  { %v5557_v42 = vpop.permute.xlu1 %5556 }
0x13f8   :  { %v5555_v8 = vpop.permute.xlu0 %5554 }
0x13fa   :  { %v5746_v37 = vpop.permute.xlu1 %5745  ;;  %8122 = vmatpush3.bf16.xpose.msra.mxu1 %v5583_v1  ;;  %v10487_v34 = vpop.eup %8596 }
0x13fb   :  { %8131 = vmatprep.subr.bf16.mxu0 %v5746_v37 }
0x13fc   :  { %8132 = vmatpush3.bf16.msra.mxu0 %v5746_v37  ;;  %v5744_v33 = vpop.permute.xlu0 %5743  ;;  %v10489_v45 = vpop.eup %8598 }
0x13fd   :  { %8133 = vmatprep.subr.bf16.mxu0 %v5744_v33 }
0x13fe   :  { %v10491_v62 = vpop.eup %8600  ;;  %v5742_v16 = vpop.permute.xlu1 %5741 }
0x13ff   :  { %v10493_v40 = vpop.eup %8602  ;;  %v5343_v36 = vpack.c.bf16 %v10491_v62, %v10489_v45 }
0x1400   :  { %8134 = vmatpush3.bf16.msra.mxu0 %v5744_v33  ;;  %v5344_v58 = vpack.c.bf16 %v10487_v34, %v10493_v40 }
0x1401   :  { %8111 = vmatprep.mubr.msk.bf16.mxu1 %vm668_vm1, %v5343_v36  ;;  %8135 = vmatprep.subr.bf16.mxu0 %v5742_v16 }
0x1402   :  { %8112 = vmatmul.mubr.msk.bf16.gmra.mxu1 %vm668_vm1, %v5344_v58 }
0x1403   :  { %8123 = vmatprep.mubr.msk.bf16.mxu1 %vm578_vm0, %v5551_v50 }
0x1404   :  { %8136 = vmatpush3.bf16.msra.mxu0 %v5742_v16 }
0x140a   :  { %8124 = vmatmul.mubr.msk.bf16.vlgmr.msra.gmra.mxu1 %vm578_vm0, %v5553_v35 }
0x140b   :  { %8127 = vmatprep.mubr.msk.bf16.mxu1 %vm578_vm0, %v5555_v8 }
0x1412   :  { %8128 = vmatmul.mubr.msk.bf16.gmra.mxu1 %vm578_vm0, %v5557_v42 }
0x1488   :  { %v10505_v47 = vpop.f32.mrf.mxu1 }
0x1489   :  { %12045 = vst [vmem:[#allocation177_spill] sm:$0xff] %v10505_v47 }
0x148a   :  { %v10507_v59 = vpop.f32.mrf.mxu1 }
0x148b   :  { %12046 = vst [vmem:[#allocation178_spill] sm:$0xff] %v10507_v59 }
0x148c   :  { %v10509_v30 = vpop.f32.mrf.mxu1 }
0x148d   :  { %12047 = vst [vmem:[#allocation179_spill] sm:$0xff] %v10509_v30 }
0x148e   :  { %v10511_v51 = vpop.f32.mrf.mxu1 }
0x148f   :  { %12048 = vst [vmem:[#allocation180_spill] sm:$0xff] %v10511_v51 }
0x14c2   :  { %v10513_v5 = vpop.f32.mrf.mxu1 }
0x14c3   :  { %12049 = vst [vmem:[#allocation181_spill] sm:$0xff] %v10513_v5 }
0x14c4   :  { %v10515_v1 = vpop.f32.mrf.mxu1 }
0x14c5   :  { %12050 = vst [vmem:[#allocation182_spill] sm:$0xff] %v10515_v1 }
0x14c6   :  { %v10517_v50 = vpop.f32.mrf.mxu1 }
0x14c7   :  { %12051 = vst [vmem:[#allocation183_spill] sm:$0xff] %v10517_v50 }
0x14c8   :  { %v10519_v37 = vpop.f32.mrf.mxu1 }
0x14c9   :  { %12052 = vst [vmem:[#allocation184_spill] sm:$0xff] %v10519_v37 }
0x14ca   :  { %v8125_v35 = vpop.f32.mrf.mxu1 }
0x14cb   :  { %v5665_v8 = vsel %vm668_vm1, %v8125_v35, -inf }
0x14cc   :  { %5666 = vmax.xlane.f32.xlu0 %v5665_v8  ;;  %v5628_v42 = vpop.f32.mrf.mxu1 }
0x14cd   :  { %v5659_v36 = vsel %vm668_vm1, %v5628_v42, -inf }
0x14ce   :  { %v8126_v33 = vpop.f32.mrf.mxu1 }
0x14cf   :  { %v5668_v5 = vsel %vm668_vm1, %v8126_v33, -inf }
0x14d0   :  { %5660 = vmax.xlane.f32.xlu0 %v5659_v36  ;;  %v5631_v16 = vpop.f32.mrf.mxu1 }
0x14d1   :  { %v5662_v58 = vsel %vm668_vm1, %v5631_v16, -inf }
0x14d2   :  { %5663 = vmax.xlane.f32.xlu1 %v5662_v58  ;;  %v10529_v1 = vpop.f32.mrf.mxu1 }
0x14d3   :  { %v5677_v36 = vsel %vm668_vm1, %v10529_v1, -inf }
0x14d4   :  { %5669 = vmax.xlane.f32.xlu0 %v5668_v5  ;;  %v10531_v8 = vpop.f32.mrf.mxu1 }
0x14d5   :  { %v5671_v37 = vsel %vm668_vm1, %v10531_v8, -inf }
0x14d6   :  { %v10533_v50 = vpop.f32.mrf.mxu1 }
0x14d7   :  { %v5680_v58 = vsel %vm668_vm1, %v10533_v50, -inf }
0x14d8   :  { %v10539_v5 = vpop.f32.mrf.mxu1 }
0x14d9   :  { %v5674_v47 = vsel %vm668_vm1, %v10539_v5, -inf }
0x14e3   :  { %5956 = vrot.lane.b32.xlu1 %v9958_v13, %s9006_s9 }
0x14ea   :  { %5739 = vrot.lane.b32.xlu0 %v9903_v55, %s9005_s8 }
0x1507   :  { %5678 = vmax.xlane.f32.xlu1 %v5677_v36 }
0x1509   :  { %5681 = vmax.xlane.f32.xlu0 %v5680_v58 }
0x150b   :  { %5672 = vmax.xlane.f32.xlu1 %v5671_v37 }
0x150d   :  { %5675 = vmax.xlane.f32.xlu0 %v5674_v47 }
0x151c   :  { %5952 = vrot.lane.b32.xlu1 %v9991_v2, %s9006_s9 }
0x1520   :  { %5942 = vrot.lane.b32.xlu1 %v9125_v4, %s9006_s9 }
0x1523   :  { %5954 = vrot.lane.b32.xlu0 %v9977_v11, %s9006_s9 }
0x1524   :  { %5946 = vrot.lane.b32.xlu1 %v11972_v22, %s9006_s9 }
0x1527   :  { %5940 = vrot.lane.b32.xlu0 %v9105_v61, %s9006_s9 }
0x1528   :  { %6135 = vrot.lane.b32.xlu1 %v9191_v38, %s9006_s9 }
0x152b   :  { %5944 = vrot.lane.b32.xlu0 %v11971_v20, %s9006_s9 }
0x152c   :  { %6131 = vrot.lane.b32.xlu1 %v9180_v32, %s9006_s9 }
0x152f   :  { %6133 = vrot.lane.b32.xlu0 %v9893_v26, %s9006_s9 }
0x1530   :  { %6348 = vrot.lane.b32.xlu1 %v9941_v29, %s9007_s10 }
0x1533   :  { %6129 = vrot.lane.b32.xlu0 %v9903_v55, %s9006_s9 }
0x1534   :  { %6346 = vrot.lane.b32.xlu1 %v9958_v13, %s9007_s10 }
0x1537   :  { %6344 = vrot.lane.b32.xlu0 %v9977_v11, %s9007_s10 }
0x1538   :  { %6342 = vrot.lane.b32.xlu1 %v9991_v2, %s9007_s10 }
0x153b   :  { %6330 = vrot.lane.b32.xlu0 %v9105_v61, %s9007_s10  ;;  %v5959_v61 = vpop.permute.xlu1 %5958 }
0x153c   :  { %6332 = vrot.lane.b32.xlu1 %v9125_v4, %s9007_s10 }
0x153f   :  { %6334 = vrot.lane.b32.xlu0 %v11971_v20, %s9007_s10 }
0x1540   :  { %6336 = vrot.lane.b32.xlu1 %v11972_v22, %s9007_s10 }
0x1543   :  { %6523 = vrot.lane.b32.xlu0 %v9893_v26, %s9007_s10 }
0x1544   :  { %6525 = vrot.lane.b32.xlu1 %v9191_v38, %s9007_s10 }
0x1548   :  { %6521 = vrot.lane.b32.xlu1 %v9180_v32, %s9007_s10 }
0x1555   :  { %v5667_v29 = vpop.xlane.xlu0 %5666 }
0x1556   :  { %v5685_v13 = vsub.f32 %v8125_v35, %v5667_v29 }
0x1558   :  { %v5695_v37 = vmul.f32 1.442695, %v5685_v13  ;;  %v5982_v13 = vsel %vm578_vm0, %v5959_v61, 0 }
0x1559   :  { %v5661_v11 = vpop.xlane.xlu0 %5660 }
0x155a   :  { %v5683_v4 = vsub.f32 %v5628_v42, %v5661_v11 }
0x155b   :  { %v5664_v2 = vpop.xlane.xlu1 %5663 }
0x155c   :  { %v5691_v47 = vmul.f32 1.442695, %v5683_v4  ;;  %v5684_v20 = vsub.f32 %v5631_v16, %v5664_v2 }
0x155d   :  { %v5670_v36 = vpop.xlane.xlu0 %5669 }
0x155e   :  { %v5693_v22 = vmul.f32 1.442695, %v5684_v20  ;;  %v5686_v58 = vsub.f32 %v8126_v33, %v5670_v36  ;;  %8604 = vpow2.f32 %v5691_v47 }
0x155f   :  { %v5957_v11 = vpop.permute.xlu1 %5956 }
0x1560   :  { %8606 = vpow2.f32 %v5693_v22  ;;  %v5697_v26 = vmul.f32 1.442695, %v5686_v58  ;;  %v5979_v4 = vsel %vm578_vm0, %v5957_v11, 0 }
0x1561   :  { %8608 = vpow2.f32 %v5695_v37  ;;  %v5740_v38 = vpop.permute.xlu0 %5739 }
0x1562   :  { %8610 = vpow2.f32 %v5697_v26  ;;  %8137 = vmatprep.subr.bf16.mxu0 %v5740_v38 }
0x1563   :  { %8138 = vmatpush3.bf16.msra.mxu0 %v5740_v38 }
0x1564   :  { %8315 = vmatprep.subr.msk.bf16.mxu0 %vm578_vm0, %v5959_v61 }
0x156b   :  { %v10588_v32 = vpop.eup %8604 }
0x156d   :  { %v10590_v35 = vpop.eup %8606 }
0x156e   :  { %v10592_v42 = vpop.eup %8608  ;;  %v5731_v16 = vpack.c.bf16 %v10590_v35, %v10588_v32 }
0x156f   :  { %v10596_v33 = vpop.eup %8610 }
0x1570   :  { %v5732_v29 = vpack.c.bf16 %v10596_v33, %v10592_v42  ;;  %8139 = vmatprep.mubr.msk.bf16.mxu0 %vm668_vm1, %v5731_v16 }
0x1572   :  { %8140 = vmatmul.mubr.msk.bf16.vlgmr.msra.gmra.mxu0 %vm668_vm1, %v5732_v29 }
0x1573   :  { %8148 = vmatpush3.bf16.xpose.msra.mxu0 %v5982_v13 }
0x1574   :  { %8316 = vmatprep.subr.msk.bf16.mxu0 %vm578_vm0, %v5957_v11 }
0x157b   :  { %8150 = vmatpush3.bf16.xpose.msra.mxu0 %v5979_v4 }
0x1590   :  { %v5679_v2 = vpop.xlane.xlu1 %5678 }
0x1591   :  { %v5689_v37 = vsub.f32 %v10529_v1, %v5679_v2 }
0x1592   :  { %v5682_v47 = vpop.xlane.xlu0 %5681 }
0x1593   :  { %v5690_v20 = vsub.f32 %v10533_v50, %v5682_v47  ;;  %v5703_v16 = vmul.f32 1.442695, %v5689_v37 }
0x1594   :  { %v5673_v36 = vpop.xlane.xlu1 %5672 }
0x1595   :  { %v5705_v22 = vmul.f32 1.442695, %v5690_v20  ;;  %v5687_v58 = vsub.f32 %v10531_v8, %v5673_v36 }
0x1596   :  { %v5676_v26 = vpop.xlane.xlu0 %5675 }
0x1597   :  { %v5699_v38 = vmul.f32 1.442695, %v5687_v58  ;;  %v5688_v61 = vsub.f32 %v10539_v5, %v5676_v26  ;;  %8612 = vpow2.f32 %v5705_v22 }
0x1598   :  { %v5953_v29 = vpop.permute.xlu1 %5952 }
0x1599   :  { %v5701_v13 = vmul.f32 1.442695, %v5688_v61  ;;  %8614 = vpow2.f32 %v5699_v38  ;;  %v5973_v5 = vsel %vm578_vm0, %v5953_v29, 0 }
0x159a   :  { %v5955_v11 = vpop.permute.xlu0 %5954 }
0x159b   :  { %8616 = vpow2.f32 %v5701_v13  ;;  %8317 = vmatprep.subr.msk.bf16.mxu0 %vm578_vm0, %v5955_v11  ;;  %v5976_v50 = vsel %vm578_vm0, %v5955_v11, 0 }
0x159c   :  { %8618 = vpow2.f32 %v5703_v16  ;;  %v5943_v1 = vpop.permute.xlu1 %5942  ;;  %8152 = vmatpush3.bf16.xpose.msra.mxu0 %v5976_v50 }
0x159d   :  { %8318 = vmatprep.subr.msk.bf16.mxu0 %vm578_vm0, %v5953_v29 }
0x159e   :  { %v5941_v8 = vpop.permute.xlu0 %5940 }
0x15a0   :  { %v5947_v4 = vpop.permute.xlu1 %5946 }
0x15a2   :  { %v5945_v2 = vpop.permute.xlu0 %5944 }
0x15a4   :  { %v6136_v47 = vpop.permute.xlu1 %6135  ;;  %8154 = vmatpush3.bf16.xpose.msra.mxu0 %v5973_v5  ;;  %v10613_v20 = vpop.eup %8612 }
0x15a5   :  { %8163 = vmatprep.subr.bf16.mxu1 %v6136_v47 }
0x15a6   :  { %8164 = vmatpush3.bf16.msra.mxu1 %v6136_v47  ;;  %v6134_v37 = vpop.permute.xlu0 %6133  ;;  %v10615_v36 = vpop.eup %8614 }
0x15a7   :  { %8165 = vmatprep.subr.bf16.mxu1 %v6134_v37 }
0x15a8   :  { %v10617_v22 = vpop.eup %8616  ;;  %v6132_v58 = vpop.permute.xlu1 %6131 }
0x15a9   :  { %v10619_v26 = vpop.eup %8618  ;;  %v5733_v38 = vpack.c.bf16 %v10617_v22, %v10615_v36 }
0x15aa   :  { %12053 = vst [vmem:[#allocation185_spill] sm:$0xff] %v10619_v26  ;;  %8166 = vmatpush3.bf16.msra.mxu1 %v6134_v37  ;;  %v6130_v61 = vpop.permute.xlu0 %6129  ;;  %v5734_v16 = vpack.c.bf16 %v10613_v20, %v10619_v26 }
0x15ab   :  { %8143 = vmatprep.mubr.msk.bf16.mxu0 %vm668_vm1, %v5733_v38  ;;  %8167 = vmatprep.subr.bf16.mxu1 %v6132_v58 }
0x15ac   :  { %v10626_v29 = vpop.permute.xlu1 %6348  ;;  %8144 = vmatmul.mubr.msk.bf16.gmra.mxu0 %vm668_vm1, %v5734_v16 }
0x15ad   :  { %8155 = vmatprep.mubr.msk.bf16.mxu0 %vm578_vm0, %v5941_v8 }
0x15ae   :  { %8168 = vmatpush3.bf16.msra.mxu1 %v6132_v58  ;;  %v10630_v13 = vpop.permute.xlu0 %6344 }
0x15af   :  { %8169 = vmatprep.subr.bf16.mxu1 %v6130_v61 }
0x15b0   :  { %v10632_v11 = vpop.permute.xlu1 %6346 }
0x15b2   :  { %8170 = vmatpush3.bf16.msra.mxu1 %v6130_v61  ;;  %v10640_v5 = vpop.permute.xlu0 %6330 }
0x15b3   :  { %8319 = vmatprep.subr.msk.bf16.mxu1 %vm578_vm0, %v10626_v29 }
0x15b4   :  { %v10636_v50 = vpop.permute.xlu1 %6342  ;;  %8156 = vmatmul.mubr.msk.bf16.vlgmr.msra.gmra.mxu0 %vm578_vm0, %v5943_v1 }
0x15b5   :  { %8159 = vmatprep.mubr.msk.bf16.mxu0 %vm578_vm0, %v5945_v2 }
0x15b6   :  { %v10644_v8 = vpop.permute.xlu0 %6334 }
0x15b8   :  { %v10642_v47 = vpop.permute.xlu1 %6332 }
0x15ba   :  { %v6524_v38 = vpop.permute.xlu0 %6523 }
0x15bc   :  { %v10646_v37 = vpop.permute.xlu1 %6336  ;;  %8160 = vmatmul.mubr.msk.bf16.gmra.mxu0 %vm578_vm0, %v5947_v4 }
0x15c0   :  { %v6526_v58 = vpop.permute.xlu1 %6525 }
0x15c1   :  { %8195 = vmatprep.subr.bf16.mxu0 %v6526_v58 }
0x15c2   :  { %8196 = vmatpush3.bf16.msra.mxu0 %v6526_v58 }
0x15c3   :  { %8197 = vmatprep.subr.bf16.mxu0 %v6524_v38 }
0x15c4   :  { %v6522_v61 = vpop.permute.xlu1 %6521 }
0x15c6   :  { %8198 = vmatpush3.bf16.msra.mxu0 %v6524_v38 }
0x15c7   :  { %8199 = vmatprep.subr.bf16.mxu0 %v6522_v61 }
0x15ca   :  { %8200 = vmatpush3.bf16.msra.mxu0 %v6522_v61 }
0x1632   :  { %v10649_v1 = vpop.f32.mrf.mxu0 }
0x1633   :  { %12054 = vst [vmem:[#allocation186_spill] sm:$0xff] %v10649_v1 }
0x1634   :  { %v10651_v2 = vpop.f32.mrf.mxu0 }
0x1635   :  { %12055 = vst [vmem:[#allocation187_spill] sm:$0xff] %v10651_v2 }
0x1636   :  { %v10653_v16 = vpop.f32.mrf.mxu0 }
0x1637   :  { %12056 = vst [vmem:[#allocation188_spill] sm:$0xff] %v10653_v16  ;;  %v1082_v16 = vsel %vm668_vm1, %v9398_v41, 0.0 }
0x1638   :  { %v10655_v59 = vpop.f32.mrf.mxu0 }
0x1639   :  { %12057 = vst [vmem:[#allocation189_spill] sm:$0xff] %v10655_v59  ;;  %v1085_v59 = vsel %vm668_vm1, %v9394_v7, 0.0  ;;  %v1476_v7 = vsel %vm668_vm1, %v9432_v6, 0.0  ;;  %v2643_v6 = vsel %vm668_vm1, %v9765_v23, 0.0 }
0x166c   :  { %v10657_v30 = vpop.f32.mrf.mxu0 }
0x166d   :  { %12058 = vst [vmem:[#allocation190_spill] sm:$0xff] %v10657_v30 }
0x166e   :  { %v10659_v4 = vpop.f32.mrf.mxu0 }
0x166f   :  { %12059 = vst [vmem:[#allocation191_spill] sm:$0xff] %v10659_v4 }
0x1670   :  { %v10661_v51 = vpop.f32.mrf.mxu0 }
0x1671   :  { %12060 = vst [vmem:[#allocation192_spill] sm:$0xff] %v10661_v51 }
0x1672   :  { %v10663_v58 = vpop.f32.mrf.mxu0 }
0x1673   :  { %12061 = vst [vmem:[#allocation193_spill] sm:$0xff] %v10663_v58 }
0x1674   :  { %v10665_v26 = vpop.f32.mrf.mxu0 }
0x1675   :  { %v6055_v38 = vsel %vm668_vm1, %v10665_v26, -inf }
0x1676   :  { %6056 = vmax.xlane.f32.xlu0 %v6055_v38  ;;  %v10669_v61 = vpop.f32.mrf.mxu0  ;;  %v1076_v38 = vsel %vm668_vm1, %v9392_v3, 0.0 }
0x1677   :  { %v6049_v2 = vsel %vm668_vm1, %v10669_v61, -inf }
0x1678   :  { %v10671_v1 = vpop.f32.mrf.mxu0 }
0x1679   :  { %v6058_v51 = vsel %vm668_vm1, %v10671_v1, -inf }
0x167a   :  { %6050 = vmax.xlane.f32.xlu0 %v6049_v2  ;;  %v10675_v30 = vpop.f32.mrf.mxu0 }
0x167b   :  { %v6052_v4 = vsel %vm668_vm1, %v10675_v30, -inf }
0x167c   :  { %6053 = vmax.xlane.f32.xlu1 %v6052_v4  ;;  %v10683_v58 = vpop.f32.mrf.mxu0 }
0x167d   :  { %v6067_v23 = vsel %vm668_vm1, %v10683_v58, -inf }
0x167e   :  { %6059 = vmax.xlane.f32.xlu0 %v6058_v51  ;;  %v10687_v2 = vpop.f32.mrf.mxu0 }
0x1680   :  { %v10691_v4 = vpop.f32.mrf.mxu0 }
0x1681   :  { %v6070_v3 = vsel %vm668_vm1, %v10691_v4, -inf }
0x1682   :  { %1077 = vadd.xlane.f32.xlu0 %v1076_v38  ;;  %v10697_v51 = vpop.f32.mrf.mxu0  ;;  %v2252_v38 = vsel %vm668_vm1, %v9665_v19, 0.0  ;;  %v1467_v19 = vsel %vm668_vm1, %v9430_v18, 0.0  ;;  %v3425_v18 = vsel %vm668_vm1, %v9943_v27, 0.0 }
0x1683   :  { %v6064_v41 = vsel %vm668_vm1, %v10697_v51, -inf }
0x1686   :  { %1083 = vadd.xlane.f32.xlu0 %v1082_v16  ;;  %v1470_v16 = vsel %vm668_vm1, %v9434_v49, 0.0  ;;  %v2258_v49 = vsel %vm668_vm1, %v9671_v43, 0.0  ;;  %v3034_v43 = vsel %vm668_vm1, %v9855_v44, 0.0  ;;  %v1473_v44 = vsel %vm668_vm1, %v9436_v57, 0.0 }
0x168a   :  { %1086 = vadd.xlane.f32.xlu0 %v1085_v59  ;;  %v1867_v59 = vsel %vm668_vm1, %v9571_v15, 0.0  ;;  %v2649_v15 = vsel %vm668_vm1, %v9771_v46, 0.0  ;;  %v6061_v46 = vsel %vm668_vm1, %v10687_v2, -inf }
0x168d   :  { %6519 = vrot.lane.b32.xlu1 %v9903_v55, %s9007_s10  ;;  %v1861_v55 = vsel %vm668_vm1, %v9565_v14, 0.0  ;;  %v1079_v14 = vsel %vm668_vm1, %v9396_v9, 0.0  ;;  %v3040_v9 = vsel %vm668_vm1, %v9861_v56, 0.0  ;;  %v1858_v56 = vsel %vm668_vm1, %v9563_v31, 0.0 }
0x168e   :  { %6071 = vmax.xlane.f32.xlu0 %v6070_v3  ;;  %v3431_v3 = vsel %vm668_vm1, %v9951_v0, 0.0 }
0x1692   :  { %6065 = vmax.xlane.f32.xlu0 %v6064_v41  ;;  %v1091_v41 = vsel %vm668_vm1, %v9412_v60, 0.0 }
0x1696   :  { %1471 = vadd.xlane.f32.xlu0 %v1470_v16  ;;  %v12062_v16 = vld [vmem:[#allocation55_spill] sm:$0xff] }
0x1697   :  { %v1864_v27 = vsel %vm668_vm1, %v12062_v16, 0.0  ;;  %v12072_v16 = vld [vmem:[#allocation24_spill] sm:$0xff] }
0x169a   :  { %1477 = vadd.xlane.f32.xlu0 %v1476_v7  ;;  %v12063_v7 = vld [vmem:[#allocation25_spill] sm:$0xff] }
0x169b   :  { %v1097_v57 = vsel %vm668_vm1, %v12063_v7, 0.0  ;;  %v12073_v7 = vld [vmem:[#allocation26_spill] sm:$0xff] }
0x169e   :  { %1862 = vadd.xlane.f32.xlu0 %v1861_v55  ;;  %v12064_v55 = vld [vmem:[#allocation68_spill] sm:$0xff] }
0x169f   :  { %v2249_v0 = vsel %vm668_vm1, %v12064_v55, 0.0  ;;  %v12075_v55 = vld [vmem:[#allocation27_spill] sm:$0xff] }
0x16a2   :  { %1868 = vadd.xlane.f32.xlu0 %v1867_v59  ;;  %v12065_v59 = vld [vmem:[#allocation29_spill] sm:$0xff] }
0x16a3   :  { %v1482_v31 = vsel %vm668_vm1, %v12065_v59, 0.0 }
0x16a6   :  { %2253 = vadd.xlane.f32.xlu0 %v2252_v38  ;;  %v12066_v38 = vld [vmem:[#allocation69_spill] sm:$0xff] }
0x16a7   :  { %v2255_v60 = vsel %vm668_vm1, %v12066_v38, 0.0  ;;  %v12078_v38 = vld [vmem:[#allocation103_spill] sm:$0xff] }
0x16aa   :  { %2259 = vadd.xlane.f32.xlu0 %v2258_v49  ;;  %v12067_v49 = vld [vmem:[#allocation28_spill] sm:$0xff] }
0x16ae   :  { %2644 = vadd.xlane.f32.xlu0 %v2643_v6  ;;  %v1488_v6 = vsel %vm668_vm1, %v12067_v49, 0.0  ;;  %v12079_v49 = vld [vmem:[#allocation57_spill] sm:$0xff] }
0x16b1   :  { %1080 = vadd.xlane.f32.xlu1 %v1079_v14  ;;  %v2640_v14 = vsel %vm668_vm1, %v9763_v52, 0.0 }
0x16b2   :  { %2650 = vadd.xlane.f32.xlu0 %v2649_v15  ;;  %v12068_v15 = vld [vmem:[#allocation58_spill] sm:$0xff] }
0x16b5   :  { %1468 = vadd.xlane.f32.xlu1 %v1467_v19  ;;  %v1873_v19 = vsel %vm668_vm1, %v12068_v15, 0.0 }
0x16b6   :  { %3035 = vadd.xlane.f32.xlu0 %v3034_v43  ;;  %v2646_v43 = vsel %vm668_vm1, %v9767_v12, 0.0 }
0x16b9   :  { %6068 = vmax.xlane.f32.xlu1 %v6067_v23  ;;  %v12069_v23 = vld [vmem:[#allocation56_spill] sm:$0xff] }
0x16ba   :  { %3041 = vadd.xlane.f32.xlu0 %v3040_v9  ;;  %v1879_v9 = vsel %vm668_vm1, %v12069_v23, 0.0  ;;  %v12081_v23 = vld [vmem:[#allocation131_spill] sm:$0xff] }
0x16bd   :  { %6062 = vmax.xlane.f32.xlu1 %v6061_v46  ;;  %v3031_v46 = vsel %vm668_vm1, %v9853_v28, 0.0  ;;  %v2655_v28 = vsel %vm668_vm1, %v9791_v39, 0.0  ;;  %v1094_v39 = vsel %vm668_vm1, %v12073_v7, 0.0 }
0x16be   :  { %3426 = vadd.xlane.f32.xlu0 %v3425_v18  ;;  %v12070_v18 = vld [vmem:[#allocation72_spill] sm:$0xff] }
0x16bf   :  { %v2264_v52 = vsel %vm668_vm1, %v12070_v18, 0.0 }
0x16c1   :  { %1474 = vadd.xlane.f32.xlu1 %v1473_v44  ;;  %v3037_v44 = vsel %vm668_vm1, %v9857_v10, 0.0  ;;  %v2661_v10 = vsel %vm668_vm1, %v9787_v17, 0.0  ;;  %v1479_v17 = vsel %vm668_vm1, %v12075_v55, 0.0  ;;  %v12086_v55 = vld [vmem:[#allocation82_spill] sm:$0xff] }
0x16c2   :  { %3432 = vadd.xlane.f32.xlu0 %v3431_v3  ;;  %v12071_v3 = vld [vmem:[#allocation70_spill] sm:$0xff] }
0x16c3   :  { %v2270_v12 = vsel %vm668_vm1, %v12071_v3, 0.0 }
0x16c5   :  { %1859 = vadd.xlane.f32.xlu1 %v1858_v56  ;;  %v3422_v56 = vsel %vm668_vm1, %v9937_v54, 0.0  ;;  %v3046_v54 = vsel %vm668_vm1, %v9880_v25, 0.0 }
0x16c6   :  { %1092 = vadd.xlane.f32.xlu0 %v1091_v41  ;;  %v3428_v41 = vsel %vm668_vm1, %v9945_v48, 0.0 }
0x16c9   :  { %1865 = vadd.xlane.f32.xlu1 %v1864_v27  ;;  %v1088_v27 = vsel %vm668_vm1, %v12072_v16, 0.0 }
0x16ca   :  { %1098 = vadd.xlane.f32.xlu0 %v1097_v57  ;;  %v12074_v57 = vld [vmem:[#allocation92_spill] sm:$0xff] }
0x16cb   :  { %v3052_v48 = vsel %vm668_vm1, %v12074_v57, 0.0 }
0x16cd   :  { %2250 = vadd.xlane.f32.xlu1 %v2249_v0  ;;  %v12076_v0 = vld [vmem:[#allocation105_spill] sm:$0xff] }
0x16ce   :  { %1483 = vadd.xlane.f32.xlu0 %v1482_v31  ;;  %v3437_v59 = vsel %vm668_vm1, %v12076_v0, 0.0  ;;  %v12077_v31 = vld [vmem:[#allocation30_spill] sm:$0xff] }
0x16cf   :  { %v1485_v25 = vsel %vm668_vm1, %v12077_v31, 0.0  ;;  %v12088_v31 = vld [vmem:[#allocation83_spill] sm:$0xff] }
0x16d1   :  { %2256 = vadd.xlane.f32.xlu1 %v2255_v60  ;;  %v3443_v60 = vsel %vm668_vm1, %v12078_v38, 0.0  ;;  %v12089_v38 = vld [vmem:[#allocation163_spill] sm:$0xff] }
0x16d2   :  { %1489 = vadd.xlane.f32.xlu0 %v1488_v6  ;;  %v1870_v6 = vsel %vm668_vm1, %v12079_v49, 0.0 }
0x16d5   :  { %2641 = vadd.xlane.f32.xlu1 %v2640_v14  ;;  %v4150_v14 = vsel %vm668_vm1, %v10165_v53, 0.0  ;;  %v12083_v53 = vld [vmem:[#allocation145_spill] sm:$0xff] }
0x16d6   :  { %1874 = vadd.xlane.f32.xlu0 %v1873_v19  ;;  %v12080_v19 = vld [vmem:[#allocation59_spill] sm:$0xff] }
0x16d9   :  { %2647 = vadd.xlane.f32.xlu1 %v2646_v43  ;;  %v1876_v43 = vsel %vm668_vm1, %v12080_v19, 0.0 }
0x16da   :  { %1880 = vadd.xlane.f32.xlu0 %v1879_v9  ;;  %v4156_v9 = vsel %vm668_vm1, %v12081_v23, 0.0 }
0x16dd   :  { %3032 = vadd.xlane.f32.xlu1 %v3031_v46 }
0x16de   :  { %2265 = vadd.xlane.f32.xlu0 %v2264_v52 }
0x16e1   :  { %3038 = vadd.xlane.f32.xlu1 %v3037_v44  ;;  %v12082_v44 = vld [vmem:[#allocation71_spill] sm:$0xff] }
0x16e2   :  { %2271 = vadd.xlane.f32.xlu0 %v2270_v12  ;;  %v2261_v3 = vsel %vm668_vm1, %v12082_v44, 0.0 }
0x16e5   :  { %3423 = vadd.xlane.f32.xlu1 %v3422_v56  ;;  %v4540_v56 = vsel %vm668_vm1, %v12083_v53, 0.0  ;;  %v6372_v53 = vsel %vm578_vm0, %v10626_v29, 0  ;;  %v5716_v29 = vsel %vm668_vm1, %v10596_v33, 0.0  ;;  %v12096_v33 = vld [vmem:[#allocation130_spill] sm:$0xff] }
0x16e6   :  { %2656 = vadd.xlane.f32.xlu0 %v2655_v28 }
0x16e9   :  { %3429 = vadd.xlane.f32.xlu1 %v3428_v41 }
0x16ea   :  { %2662 = vadd.xlane.f32.xlu0 %v2661_v10 }
0x16ed   :  { %1089 = vadd.xlane.f32.xlu1 %v1088_v27 }
0x16ee   :  { %3047 = vadd.xlane.f32.xlu0 %v3046_v54  ;;  %v12084_v54 = vld [vmem:[#allocation73_spill] sm:$0xff] }
0x16f1   :  { %1095 = vadd.xlane.f32.xlu1 %v1094_v39  ;;  %v12085_v39 = vld [vmem:[#allocation147_spill] sm:$0xff] }
0x16f2   :  { %3053 = vadd.xlane.f32.xlu0 %v3052_v48  ;;  %v4546_v57 = vsel %vm668_vm1, %v12085_v39, 0.0 }
0x16f5   :  { %1480 = vadd.xlane.f32.xlu1 %v1479_v17  ;;  %v12087_v17 = vld [vmem:[#allocation161_spill] sm:$0xff] }
0x16f6   :  { %3438 = vadd.xlane.f32.xlu0 %v3437_v59  ;;  %v4930_v0 = vsel %vm668_vm1, %v12087_v17, 0.0  ;;  %v12098_v17 = vld [vmem:[#allocation144_spill] sm:$0xff] }
0x16f9   :  { %1486 = vadd.xlane.f32.xlu1 %v1485_v25  ;;  %v2658_v25 = vsel %vm668_vm1, %v12088_v31, 0.0  ;;  %v12099_v31 = vld [vmem:[#allocation150_spill] sm:$0xff] }
0x16fa   :  { %3444 = vadd.xlane.f32.xlu0 %v3443_v60  ;;  %v4936_v60 = vsel %vm668_vm1, %v12089_v38, 0.0 }
0x16fd   :  { %1871 = vadd.xlane.f32.xlu1 %v1870_v6  ;;  %v12090_v6 = vld [vmem:[#allocation93_spill] sm:$0xff] }
0x16fe   :  { %4151 = vadd.xlane.f32.xlu0 %v4150_v14  ;;  %v3043_v14 = vsel %vm668_vm1, %v12090_v6, 0.0 }
0x16ff   :  { %v6057_v15 = vpop.xlane.xlu0 %6056 }
0x1700   :  { %v6075_v46 = vsub.f32 %v10665_v26, %v6057_v15  ;;  %v5320_v15 = vsel %vm668_vm1, %v10465_v63, 0.0  ;;  %v5326_v63 = vsel %vm668_vm1, %v10471_v21, 0.0  ;;  %v5710_v21 = vsel %vm668_vm1, %v10590_v35, 0.0  ;;  %v12094_v35 = vld [vmem:[#allocation129_spill] sm:$0xff] }
0x1701   :  { %1877 = vadd.xlane.f32.xlu1 %v1876_v43 }
0x1702   :  { %4157 = vadd.xlane.f32.xlu0 %v4156_v9  ;;  %v6085_v10 = vmul.f32 1.442695, %v6075_v46  ;;  %v12091_v46 = vld [vmem:[#allocation94_spill] sm:$0xff] }
0x1703   :  { %v6051_v18 = vpop.xlane.xlu0 %6050 }
0x1704   :  { %v6073_v52 = vsub.f32 %v10669_v61, %v6051_v18  ;;  %v2267_v61 = vsel %vm668_vm1, %v12084_v54, 0.0  ;;  %v3049_v18 = vsel %vm668_vm1, %v12091_v46, 0.0  ;;  %v4147_v54 = vsel %vm668_vm1, %v12094_v35, 0.0 }
0x1705   :  { %v6054_v12 = vpop.xlane.xlu1 %6053  ;;  %2262 = vadd.xlane.f32.xlu1 %v2261_v3  ;;  %v6363_v46 = vsel %vm578_vm0, %v10636_v50, 0 }
0x1706   :  { %v6081_v28 = vmul.f32 1.442695, %v6073_v52  ;;  %v6074_v41 = vsub.f32 %v10675_v30, %v6054_v12  ;;  %4541 = vadd.xlane.f32.xlu0 %v4540_v56  ;;  %v12092_v56 = vld [vmem:[#allocation104_spill] sm:$0xff] }
0x1707   :  { %v6060_v16 = vpop.xlane.xlu0 %6059 }
0x1708   :  { %v6083_v27 = vmul.f32 1.442695, %v6074_v41  ;;  %v6076_v26 = vsub.f32 %v10671_v1, %v6060_v16  ;;  %8620 = vpow2.f32 %v6081_v28  ;;  %v2652_v1 = vsel %vm668_vm1, %v12086_v55, 0.0 }
0x1709   :  { %v6520_v7 = vpop.permute.xlu1 %6519  ;;  %2268 = vadd.xlane.f32.xlu1 %v2267_v61  ;;  %v3434_v28 = vsel %vm668_vm1, %v12092_v56, 0.0  ;;  %v12095_v61 = vld [vmem:[#allocation134_spill] sm:$0xff] }
0x170a   :  { %8622 = vpow2.f32 %v6083_v27  ;;  %v6087_v48 = vmul.f32 1.442695, %v6076_v26  ;;  %4547 = vadd.xlane.f32.xlu0 %v4546_v57  ;;  %8201 = vmatprep.subr.bf16.mxu0 %v6520_v7  ;;  %v6369_v26 = vsel %vm578_vm0, %v10632_v11, 0  ;;  %v4153_v57 = vsel %vm668_vm1, %v12096_v33, 0.0  ;;  %v12104_v56 = vld [vmem:[#allocation162_spill] sm:$0xff] }
0x170b   :  { %8624 = vpow2.f32 %v6085_v10  ;;  %8202 = vmatpush3.bf16.msra.mxu0 %v6520_v7  ;;  %v10811_v30 = vpop.xlane.xlu0 %1077  ;;  %v12093_v10 = vld [vmem:[#allocation106_spill] sm:$0xff]  ;;  %v4162_v7 = vsel %vm668_vm1, %v12095_v61, 0.0  ;;  %v12106_v61 = vld [vmem:[#allocation176_spill] sm:$0xff] }
0x170c   :  { %8626 = vpow2.f32 %v6087_v48  ;;  %v3440_v16 = vsel %vm668_vm1, %v12093_v10, 0.0  ;;  %v12097_v48 = vld [vmem:[#allocation132_spill] sm:$0xff] }
0x170d   :  { %2653 = vadd.xlane.f32.xlu1 %v2652_v1  ;;  %v6366_v1 = vsel %vm578_vm0, %v10630_v13, 0 }
0x170e   :  { %4931 = vadd.xlane.f32.xlu0 %v4930_v0  ;;  %v4537_v0 = vsel %vm668_vm1, %v12098_v17, 0.0 }
0x170f   :  { %v10817_v59 = vpop.xlane.xlu0 %1083 }
0x1711   :  { %2659 = vadd.xlane.f32.xlu1 %v2658_v25  ;;  %v4552_v25 = vsel %vm668_vm1, %v12099_v31, 0.0 }
0x1712   :  { %4937 = vadd.xlane.f32.xlu0 %v4936_v60  ;;  %v12100_v60 = vld [vmem:[#allocation146_spill] sm:$0xff] }
0x1713   :  { %v10823_v49 = vpop.xlane.xlu0 %1086  ;;  %v4543_v6 = vsel %vm668_vm1, %v12100_v60, 0.0 }
0x1715   :  { %3044 = vadd.xlane.f32.xlu1 %v3043_v14  ;;  %v10829_v19 = vpop.eup %8620  ;;  %v12101_v14 = vld [vmem:[#allocation148_spill] sm:$0xff] }
0x1716   :  { %5321 = vadd.xlane.f32.xlu0 %v5320_v15 }
0x1717   :  { %v10831_v43 = vpop.eup %8622  ;;  %v10833_v23 = vpop.xlane.xlu0 %6071 }
0x1718   :  { %v10835_v9 = vpop.eup %8624  ;;  %v6121_v52 = vpack.c.bf16 %v10831_v43, %v10829_v19 }
0x1719   :  { %v10841_v44 = vpop.eup %8626  ;;  %3050 = vadd.xlane.f32.xlu1 %v3049_v18  ;;  %v12102_v18 = vld [vmem:[#allocation160_spill] sm:$0xff] }
0x171a   :  { %v6122_v3 = vpack.c.bf16 %v10841_v44, %v10835_v9  ;;  %5327 = vadd.xlane.f32.xlu0 %v5326_v63  ;;  %8171 = vmatprep.mubr.msk.bf16.mxu1 %vm668_vm1, %v6121_v52  ;;  %v4927_v52 = vsel %vm668_vm1, %v12102_v18, 0.0  ;;  %v12103_v63 = vld [vmem:[#allocation166_spill] sm:$0xff]  ;;  %v12110_v18 = vld [vmem:[#allocation19_spill] sm:$0xff] }
0x171b   :  { %v10848_v12 = vpop.xlane.xlu0 %6065 }
0x171c   :  { %8172 = vmatmul.mubr.msk.bf16.vlgmr.msra.gmra.mxu1 %vm668_vm1, %v6122_v3  ;;  %v4942_v3 = vsel %vm668_vm1, %v12103_v63, 0.0  ;;  %v6078_v33 = vsub.f32 %v10697_v51, %v10848_v12  ;;  %v5722_v51 = vsel %vm668_vm1, %v10617_v22, 0.0 }
0x171d   :  { %8180 = vmatpush3.bf16.xpose.msra.mxu1 %v6372_v53  ;;  %3435 = vadd.xlane.f32.xlu1 %v3434_v28  ;;  %v4933_v28 = vsel %vm668_vm1, %v12104_v56, 0.0  ;;  %v12111_v56 = vld [vmem:[#allocation149_spill] sm:$0xff] }
0x171e   :  { %8320 = vmatprep.subr.msk.bf16.mxu1 %vm578_vm0, %v10632_v11  ;;  %5711 = vadd.xlane.f32.xlu0 %v5710_v21  ;;  %v4168_v11 = vsel %vm668_vm1, %v12097_v48, 0.0  ;;  %v12105_v21 = vld [vmem:[#allocation164_spill] sm:$0xff]  ;;  %v6091_v17 = vmul.f32 1.442695, %v6078_v33 }
0x171f   :  { %v10859_v41 = vpop.xlane.xlu0 %1471  ;;  %v4948_v10 = vsel %vm668_vm1, %v12105_v21, 0.0  ;;  %v12112_v21 = vld [vmem:[#allocation22_spill] sm:$0xff] }
0x1720   :  { %8628 = vpow2.f32 %v6091_v17 }
0x1721   :  { %3441 = vadd.xlane.f32.xlu1 %v3440_v16 }
0x1722   :  { %5717 = vadd.xlane.f32.xlu0 %v5716_v29  ;;  %v5317_v29 = vsel %vm668_vm1, %v10463_v24, 0.0 }
0x1723   :  { %v10865_v27 = vpop.xlane.xlu0 %1477 }
0x1725   :  { %8182 = vmatpush3.bf16.xpose.msra.mxu1 %v6369_v26  ;;  %4148 = vadd.xlane.f32.xlu1 %v4147_v54  ;;  %v5332_v26 = vsel %vm668_vm1, %v10491_v62, 0.0 }
0x1726   :  { %8321 = vmatprep.subr.msk.bf16.mxu1 %vm578_vm0, %v10630_v13  ;;  %4163 = vadd.xlane.f32.xlu0 %v4162_v7  ;;  %v4558_v13 = vsel %vm668_vm1, %v12101_v14, 0.0  ;;  %v5323_v7 = vsel %vm668_vm1, %v12106_v61, 0.0 }
0x1727   :  { %v10875_v39 = vpop.xlane.xlu0 %1862 }
0x1729   :  { %4154 = vadd.xlane.f32.xlu1 %v4153_v57  ;;  %v5338_v57 = vsel %vm668_vm1, %v10487_v34, 0.0 }
0x172a   :  { %4169 = vadd.xlane.f32.xlu0 %v4168_v11  ;;  %v6080_v11 = vsub.f32 %v10691_v4, %v10833_v23 }
0x172b   :  { %v10881_v55 = vpop.xlane.xlu0 %1868 }
0x172d   :  { %8184 = vmatpush3.bf16.xpose.msra.mxu1 %v6366_v1  ;;  %4538 = vadd.xlane.f32.xlu1 %v4537_v0  ;;  %v5707_v1 = vsel %vm668_vm1, %v10588_v32, 0.0  ;;  %v5728_v32 = vsel %vm668_vm1, %v10613_v20, 0.0  ;;  %v12109_v20 = vld [vmem:[#allocation135_spill] sm:$0xff] }
0x172e   :  { %8322 = vmatprep.subr.msk.bf16.mxu1 %vm578_vm0, %v10636_v50  ;;  %4553 = vadd.xlane.f32.xlu0 %v4552_v25  ;;  %v5713_v25 = vsel %vm668_vm1, %v10592_v42, 0.0 }
0x172f   :  { %v10891_v38 = vpop.xlane.xlu0 %2253 }
0x1731   :  { %4544 = vadd.xlane.f32.xlu1 %v4543_v6  ;;  %v12108_v6 = vld [vmem:[#allocation17_spill] sm:$0xff] }
0x1732   :  { %4559 = vadd.xlane.f32.xlu0 %v4558_v13  ;;  %v720_v42 = vsel %vm668_vm1, %v12108_v6, 0.0 }
0x1733   :  { %v10897_v15 = vpop.xlane.xlu0 %2259 }
0x1735   :  { %8186 = vmatpush3.bf16.xpose.msra.mxu1 %v6363_v46  ;;  %4928 = vadd.xlane.f32.xlu1 %v4927_v52  ;;  %v4165_v46 = vsel %vm668_vm1, %v12109_v20, 0.0  ;;  %v726_v52 = vsel %vm668_vm1, %v12110_v18, 0.0 }
0x1736   :  { %4943 = vadd.xlane.f32.xlu0 %v4942_v3 }
0x1737   :  { %v10905_v53 = vpop.xlane.xlu0 %2644 }
0x1739   :  { %4934 = vadd.xlane.f32.xlu1 %v4933_v28  ;;  %v4549_v28 = vsel %vm668_vm1, %v12111_v56, 0.0 }
0x173a   :  { %v10911_v16 = vpop.xlane.xlu1 %1080  ;;  %4949 = vadd.xlane.f32.xlu0 %v4948_v10  ;;  %v732_v10 = vsel %vm668_vm1, %v12112_v21, 0.0 }
0x173b   :  { %v10913_v50 = vpop.xlane.xlu0 %2650 }
0x173d   :  { %5318 = vadd.xlane.f32.xlu1 %v5317_v29  ;;  %v10969_v29 = vpop.eup %8628 }
0x173e   :  { %v10919_v35 = vpop.xlane.xlu1 %1468  ;;  %5333 = vadd.xlane.f32.xlu0 %v5332_v26 }
0x173f   :  { %v10921_v54 = vpop.xlane.xlu0 %3035 }
0x1741   :  { %5324 = vadd.xlane.f32.xlu1 %v5323_v7 }
0x1742   :  { %v6069_v24 = vpop.xlane.xlu1 %6068  ;;  %5339 = vadd.xlane.f32.xlu0 %v5338_v57  ;;  %v12113_v57 = vld [vmem:[#allocation151_spill] sm:$0xff] }
0x1743   :  { %v6079_v48 = vsub.f32 %v10683_v58, %v6069_v24  ;;  %v10930_v62 = vpop.xlane.xlu0 %3041  ;;  %v6095_v58 = vmul.f32 1.442695, %v6080_v11  ;;  %v4555_v24 = vsel %vm668_vm1, %v12113_v57, 0.0  ;;  %v12114_v11 = vld [vmem:[#allocation20_spill] sm:$0xff] }
0x1745   :  { %5708 = vadd.xlane.f32.xlu1 %v5707_v1  ;;  %v6093_v12 = vmul.f32 1.442695, %v6079_v48  ;;  %v738_v1 = vsel %vm668_vm1, %v12114_v11, 0.0 }
0x1746   :  { %v6063_v0 = vpop.xlane.xlu1 %6062  ;;  %5723 = vadd.xlane.f32.xlu0 %v5722_v51 }
0x1747   :  { %v6077_v34 = vsub.f32 %v10687_v2, %v6063_v0  ;;  %v10939_v31 = vpop.xlane.xlu0 %3426  ;;  %8630 = vpow2.f32 %v6093_v12  ;;  %v12107_v2 = vld [vmem:[#allocation133_spill] sm:$0xff] }
0x1748   :  { %v4159_v60 = vsel %vm668_vm1, %v12107_v2, 0.0 }
0x1749   :  { %v6089_v4 = vmul.f32 1.442695, %v6077_v34  ;;  %5714 = vadd.xlane.f32.xlu1 %v5713_v25  ;;  %v12115_v34 = vld [vmem:[#allocation165_spill] sm:$0xff]  ;;  %v12116_v25 = vld [vmem:[#allocation114_spill] sm:$0xff] }
0x174a   :  { %v10945_v23 = vpop.xlane.xlu1 %1474  ;;  %5729 = vadd.xlane.f32.xlu0 %v5728_v32 }
0x174b   :  { %8632 = vpow2.f32 %v6089_v4  ;;  %v10947_v22 = vpop.xlane.xlu0 %3432  ;;  %v3792_v4 = vsel %vm668_vm1, %v12116_v25, 0.0  ;;  %v12123_v25 = vld [vmem:[#allocation18_spill] sm:$0xff] }
0x174c   :  { %8634 = vpow2.f32 %v6095_v58  ;;  %v4939_v58 = vsel %vm668_vm1, %v12115_v34, 0.0 }
0x174d   :  { %4160 = vadd.xlane.f32.xlu1 %v4159_v60  ;;  %v12117_v60 = vld [vmem:[#allocation167_spill] sm:$0xff]  ;;  %8636 = vrcp.f32 %v10911_v16 }
0x174e   :  { %v10953_v14 = vpop.xlane.xlu1 %1859  ;;  %721 = vadd.xlane.f32.xlu0 %v720_v42  ;;  %v4945_v6 = vsel %vm668_vm1, %v12117_v60, 0.0  ;;  %v12118_v42 = vld [vmem:[#allocation116_spill] sm:$0xff]  ;;  %8638 = vrcp.f32 %v10919_v35 }
0x174f   :  { %v10955_v13 = vpop.xlane.xlu0 %1092  ;;  %v3798_v20 = vsel %vm668_vm1, %v12118_v42, 0.0  ;;  %8640 = vrcp.f32 %v10945_v23  ;;  %v12124_v23 = vld [vmem:[#allocation42_spill] sm:$0xff] }
0x1750   :  { %8642 = vrcp.f32 %v10811_v30 }
0x1751   :  { %4166 = vadd.xlane.f32.xlu1 %v4165_v46  ;;  %8644 = vrcp.f32 %v10817_v59 }
0x1752   :  { %v10961_v63 = vpop.xlane.xlu1 %1865  ;;  %727 = vadd.xlane.f32.xlu0 %v726_v52  ;;  %v12119_v52 = vld [vmem:[#allocation117_spill] sm:$0xff]  ;;  %8646 = vrcp.f32 %v10823_v49 }
0x1753   :  { %v10963_v3 = vpop.xlane.xlu0 %1098  ;;  %v3804_v56 = vsel %vm668_vm1, %v12119_v52, 0.0  ;;  %8648 = vrcp.f32 %v10859_v41 }
0x1754   :  { %v10973_v61 = vpop.eup %8630  ;;  %8650 = vrcp.f32 %v10865_v27 }
0x1755   :  { %4550 = vadd.xlane.f32.xlu1 %v4549_v28 }
0x1756   :  { %v10971_v26 = vpop.xlane.xlu1 %2250  ;;  %733 = vadd.xlane.f32.xlu0 %v732_v10  ;;  %v5335_v10 = vsel %vm668_vm1, %v10493_v40, 0.0 }
0x1757   :  { %v10975_v7 = vpop.xlane.xlu0 %1483 }
0x1758   :  { %v10977_v33 = vpop.eup %8632 }
0x1759   :  { %v10981_v48 = vpop.eup %8634  ;;  %4556 = vadd.xlane.f32.xlu1 %v4555_v24  ;;  %v6123_v17 = vpack.c.bf16 %v10969_v29, %v10977_v33  ;;  %v5719_v24 = vsel %vm668_vm1, %v10615_v36, 0.0 }
0x175a   :  { %v10987_v51 = vpop.xlane.xlu1 %2256  ;;  %739 = vadd.xlane.f32.xlu0 %v738_v1  ;;  %v6124_v12 = vpack.c.bf16 %v10981_v48, %v10973_v61  ;;  %v12121_v1 = vld [vmem:[#allocation185_spill] sm:$0xff]  ;;  %v8637_v35 = vpop.eup %8636 }
0x175b   :  { %8175 = vmatprep.mubr.msk.bf16.mxu1 %vm668_vm1, %v6123_v17  ;;  %v10992_v0 = vpop.xlane.xlu0 %1489  ;;  %v5725_v16 = vsel %vm668_vm1, %v12121_v1, 0.0  ;;  %v8639_v42 = vpop.eup %8638 }
0x175c   :  { %8176 = vmatmul.mubr.msk.bf16.gmra.mxu1 %vm668_vm1, %v6124_v12 }
0x175d   :  { %4940 = vadd.xlane.f32.xlu1 %v4939_v58  ;;  %8187 = vmatprep.mubr.msk.bf16.mxu1 %vm578_vm0, %v10640_v5  ;;  %v5329_v5 = vsel %vm668_vm1, %v10489_v45, 0.0 }
0x175e   :  { %v11001_v32 = vpop.xlane.xlu1 %2641  ;;  %3793 = vadd.xlane.f32.xlu0 %v3792_v4  ;;  %v723_v4 = vsel %vm668_vm1, %v12123_v25, 0.0  ;;  %v12130_v25 = vld [vmem:[#allocation47_spill] sm:$0xff] }
0x175f   :  { %v11003_v2 = vpop.xlane.xlu0 %1874 }
0x1761   :  { %4946 = vadd.xlane.f32.xlu1 %v4945_v6  ;;  %v1206_v6 = vmul.f32 %v8637_v35, %v12124_v23 }
0x1762   :  { %v11009_v46 = vpop.xlane.xlu1 %2647  ;;  %3799 = vadd.xlane.f32.xlu0 %v3798_v20 }
0x1763   :  { %v11011_v18 = vpop.xlane.xlu0 %1880 }
0x1764   :  { %8188 = vmatmul.mubr.msk.bf16.vlgmr.msra.gmra.mxu1 %vm578_vm0, %v10642_v47  ;;  %v12120_v47 = vld [vmem:[#allocation120_spill] sm:$0xff] }
0x1765   :  { %5330 = vadd.xlane.f32.xlu1 %v5329_v5  ;;  %8191 = vmatprep.mubr.msk.bf16.mxu1 %vm578_vm0, %v10644_v8  ;;  %v3810_v57 = vsel %vm668_vm1, %v12120_v47, 0.0  ;;  %v12126_v5 = vld [vmem:[#allocation21_spill] sm:$0xff]  ;;  %v12127_v47 = vld [vmem:[#allocation48_spill] sm:$0xff] }
0x1766   :  { %v11021_v28 = vpop.xlane.xlu1 %3032  ;;  %3805 = vadd.xlane.f32.xlu0 %v3804_v56  ;;  %v729_v52 = vsel %vm668_vm1, %v12126_v5, 0.0 }
0x1767   :  { %v11023_v21 = vpop.xlane.xlu0 %2265 }
0x1769   :  { %5336 = vadd.xlane.f32.xlu1 %v5335_v10  ;;  %v7260_v10 = vpack.c.bf16 %v1206_v6, %v1206_v6  ;;  %v12132_v6 = vld [vmem:[#allocation113_spill] sm:$0xff] }
0x176a   :  { %v11030_v45 = vpop.xlane.xlu1 %3038  ;;  %3811 = vadd.xlane.f32.xlu0 %v3810_v57  ;;  %v1596_v57 = vmul.f32 %v8639_v42, %v12127_v47  ;;  %v3789_v42 = vsel %vm668_vm1, %v12132_v6, 0.0  ;;  %v12134_v47 = vld [vmem:[#allocation115_spill] sm:$0xff]  ;;  %v12138_v6 = vld [vmem:[#allocation118_spill] sm:$0xff] }
0x176b   :  { %v11032_v8 = vpop.xlane.xlu0 %2271 }
0x176c   :  { %8192 = vmatmul.mubr.msk.bf16.gmra.mxu1 %vm578_vm0, %v10646_v37  ;;  %v12122_v37 = vld [vmem:[#allocation16_spill] sm:$0xff]  ;;  %v7267_v35 = vpack.c.bf16 %v1596_v57, %v1596_v57  ;;  %v3795_v57 = vsel %vm668_vm1, %v12134_v47, 0.0 }
0x176d   :  { %5720 = vadd.xlane.f32.xlu1 %v5719_v24  ;;  %v717_v36 = vsel %vm668_vm1, %v12122_v37, 0.0  ;;  %v8641_v24 = vpop.eup %8640 }
0x176e   :  { %v11039_v40 = vpop.xlane.xlu1 %3423 }
0x176f   :  { %v11041_v11 = vpop.xlane.xlu0 %2656 }
0x1771   :  { %5726 = vadd.xlane.f32.xlu1 %v5725_v16  ;;  %v12129_v16 = vld [vmem:[#allocation23_spill] sm:$0xff] }
0x1772   :  { %v11046_v17 = vpop.xlane.xlu1 %3429  ;;  %v735_v37 = vsel %vm668_vm1, %v12129_v16, 0.0 }
0x1773   :  { %v11048_v12 = vpop.xlane.xlu0 %2662 }
0x1775   :  { %718 = vadd.xlane.f32.xlu1 %v717_v36 }
0x1776   :  { %v11052_v34 = vpop.xlane.xlu1 %1089 }
0x1777   :  { %v11054_v58 = vpop.xlane.xlu0 %3047 }
0x1779   :  { %724 = vadd.xlane.f32.xlu1 %v723_v4  ;;  %v1598_v4 = vmul.f32 %v8641_v24, %v12130_v25 }
0x177a   :  { %v11058_v60 = vpop.xlane.xlu1 %1095 }
0x177b   :  { %v11061_v20 = vpop.xlane.xlu0 %3053 }
0x177c   :  { %12125 = vst [vmem:[#allocation55_spill] sm:$0xff] %v11061_v20  ;;  %v12148_v20 = vld [vmem:[#allocation41_spill] sm:$0xff] }
0x177d   :  { %730 = vadd.xlane.f32.xlu1 %v729_v52  ;;  %v7269_v52 = vpack.c.bf16 %v1598_v4, %v1598_v4 }
0x177e   :  { %v11065_v56 = vpop.xlane.xlu1 %1480 }
0x177f   :  { %v11068_v1 = vpop.xlane.xlu0 %3438 }
0x1780   :  { %12128 = vst [vmem:[#allocation25_spill] sm:$0xff] %v11068_v1  ;;  %1239 = vrot.lane.b32.xlu0 %v7260_v10, %s9007_s10 }
0x1781   :  { %736 = vadd.xlane.f32.xlu1 %v735_v37  ;;  %v12136_v37 = vld [vmem:[#allocation119_spill] sm:$0xff] }
0x1782   :  { %v11073_v36 = vpop.xlane.xlu1 %1486 }
0x1783   :  { %v11076_v23 = vpop.xlane.xlu0 %3444 }
0x1784   :  { %12131 = vst [vmem:[#allocation68_spill] sm:$0xff] %v11076_v23  ;;  %1628 = vrot.lane.b32.xlu0 %v7267_v35, %s9006_s9  ;;  %v3801_v35 = vsel %vm668_vm1, %v12136_v37, 0.0  ;;  %v8643_v37 = vpop.eup %8642 }
0x1785   :  { %3790 = vadd.xlane.f32.xlu1 %v3789_v42  ;;  %v3807_v42 = vsel %vm668_vm1, %v12138_v6, 0.0  ;;  %v12143_v6 = vld [vmem:[#allocation40_spill] sm:$0xff] }
0x1786   :  { %v11081_v5 = vpop.xlane.xlu1 %1871 }
0x1787   :  { %v11083_v10 = vpop.xlane.xlu0 %4151 }
0x1788   :  { %12133 = vst [vmem:[#allocation29_spill] sm:$0xff] %v11083_v10  ;;  %1632 = vrot.lane.b32.xlu0 %v7269_v52, %s9006_s9  ;;  %v12145_v10 = vld [vmem:[#allocation39_spill] sm:$0xff] }
0x1789   :  { %3796 = vadd.xlane.f32.xlu1 %v3795_v57 }
0x178a   :  { %v11088_v24 = vpop.xlane.xlu1 %1877 }
0x178b   :  { %v11090_v16 = vpop.xlane.xlu0 %4157 }
0x178c   :  { %12135 = vst [vmem:[#allocation69_spill] sm:$0xff] %v11090_v16 }
0x178d   :  { %3802 = vadd.xlane.f32.xlu1 %v3801_v35 }
0x178e   :  { %v11095_v25 = vpop.xlane.xlu1 %2262 }
0x178f   :  { %v11097_v4 = vpop.xlane.xlu0 %4541 }
0x1790   :  { %12137 = vst [vmem:[#allocation28_spill] sm:$0xff] %v11097_v4  ;;  %v8645_v4 = vpop.eup %8644 }
0x1791   :  { %3808 = vadd.xlane.f32.xlu1 %v3807_v42  ;;  %v1205_v42 = vmul.f32 %v8643_v37, %v12143_v6  ;;  %v1207_v23 = vmul.f32 %v8645_v4, %v12145_v10  ;;  %v6106_v6 = vsel %vm668_vm1, %v10841_v44, 0.0 }
0x1792   :  { %v11102_v52 = vpop.xlane.xlu1 %2268 }
0x1793   :  { %v11104_v47 = vpop.xlane.xlu0 %4547  ;;  %v7259_v49 = vpack.c.bf16 %v1205_v42, %v1205_v42  ;;  %v12150_v42 = vld [vmem:[#allocation50_spill] sm:$0xff] }
0x1794   :  { %12139 = vst [vmem:[#allocation58_spill] sm:$0xff] %v11104_v47 }
0x1796   :  { %v11107_v30 = vpop.xlane.xlu1 %2653 }
0x1797   :  { %v11109_v57 = vpop.xlane.xlu0 %4931 }
0x1798   :  { %12140 = vst [vmem:[#allocation56_spill] sm:$0xff] %v11109_v57  ;;  %v8647_v57 = vpop.eup %8646 }
0x1799   :  { %v1208_v27 = vmul.f32 %v8647_v57, %v12148_v20  ;;  %v6100_v20 = vsel %vm668_vm1, %v10831_v43, 0.0  ;;  %v6112_v43 = vsel %vm668_vm1, %v10969_v29, 0.0 }
0x179a   :  { %v11112_v35 = vpop.xlane.xlu1 %2659 }
0x179b   :  { %12141 = vst [vmem:[#allocation72_spill] sm:$0xff] %v11112_v35  ;;  %v11114_v59 = vpop.xlane.xlu0 %4937  ;;  %v8649_v35 = vpop.eup %8648  ;;  %v7262_v4 = vpack.c.bf16 %v1208_v27, %v1208_v27 }
0x179c   :  { %12142 = vst [vmem:[#allocation70_spill] sm:$0xff] %v11114_v59  ;;  %v7261_v59 = vpack.c.bf16 %v1207_v23, %v1207_v23 }
0x179e   :  { %v11118_v16 = vpop.xlane.xlu1 %3044 }
0x179f   :  { %v11120_v47 = vpop.xlane.xlu0 %5321 }
0x17a0   :  { %12144 = vst [vmem:[#allocation24_spill] sm:$0xff] %v11120_v47  ;;  %v1597_v47 = vmul.f32 %v8649_v35, %v12150_v42  ;;  %v6118_v35 = vsel %vm668_vm1, %v10981_v48, 0.0 }
0x17a2   :  { %v11123_v1 = vpop.xlane.xlu1 %3050  ;;  %1237 = vrot.lane.b32.xlu1 %v7259_v49, %s9007_s10  ;;  %v8651_v49 = vpop.eup %8650  ;;  %v7268_v57 = vpack.c.bf16 %v1597_v47, %v1597_v47 }
0x17a3   :  { %12146 = vst [vmem:[#allocation26_spill] sm:$0xff] %v11123_v1  ;;  %v11126_v41 = vpop.xlane.xlu0 %5327 }
0x17a4   :  { %12147 = vst [vmem:[#allocation92_spill] sm:$0xff] %v11126_v41 }
0x17a6   :  { %v11129_v37 = vpop.xlane.xlu1 %3435  ;;  %1241 = vrot.lane.b32.xlu1 %v7261_v59, %s9007_s10  ;;  %v12152_v59 = vld [vmem:[#allocation49_spill] sm:$0xff] }
0x17a7   :  { %6107 = vadd.xlane.f32.xlu0 %v6106_v6  ;;  %v11134_v10 = vpop.xlane.xlu0 %5711  ;;  %v1599_v44 = vmul.f32 %v8651_v49, %v12152_v59 }
0x17a8   :  { %12149 = vst [vmem:[#allocation27_spill] sm:$0xff] %v11134_v10 }
0x17aa   :  { %v11137_v1 = vpop.xlane.xlu1 %3441  ;;  %1243 = vrot.lane.b32.xlu1 %v7262_v4, %s9007_s10  ;;  %v7270_v4 = vpack.c.bf16 %v1599_v44, %v1599_v44 }
0x17ab   :  { %6101 = vadd.xlane.f32.xlu0 %v6100_v20  ;;  %v11142_v23 = vpop.xlane.xlu0 %5717 }
0x17ac   :  { %12151 = vst [vmem:[#allocation105_spill] sm:$0xff] %v11142_v23 }
0x17ae   :  { %v11145_v6 = vpop.xlane.xlu1 %4148  ;;  %1630 = vrot.lane.b32.xlu1 %v7268_v57, %s9006_s9 }
0x17af   :  { %6119 = vadd.xlane.f32.xlu0 %v6118_v35  ;;  %v11150_v27 = vpop.xlane.xlu0 %4163 }
0x17b0   :  { %12153 = vst [vmem:[#allocation30_spill] sm:$0xff] %v11150_v27 }
0x17b2   :  { %v11152_v42 = vpop.xlane.xlu1 %4154  ;;  %1634 = vrot.lane.b32.xlu1 %v7270_v4, %s9006_s9 }
0x17b3   :  { %6113 = vadd.xlane.f32.xlu0 %v6112_v43  ;;  %v11157_v47 = vpop.xlane.xlu0 %4169 }
0x17b4   :  { %12154 = vst [vmem:[#allocation103_spill] sm:$0xff] %v11157_v47 }
0x17b6   :  { %v11159_v49 = vpop.xlane.xlu1 %4538 }
0x17b7   :  { %v11161_v20 = vpop.xlane.xlu0 %4553 }
0x17b8   :  { %12155 = vst [vmem:[#allocation57_spill] sm:$0xff] %v11161_v20 }
0x17ba   :  { %v11163_v57 = vpop.xlane.xlu1 %4544 }
0x17bb   :  { %v11165_v48 = vpop.xlane.xlu0 %4559 }
0x17bc   :  { %12156 = vst [vmem:[#allocation59_spill] sm:$0xff] %v11165_v48 }
0x17be   :  { %v11167_v59 = vpop.xlane.xlu1 %4928 }
0x17bf   :  { %v11169_v44 = vpop.xlane.xlu0 %4943 }
0x17c0   :  { %12157 = vst [vmem:[#allocation131_spill] sm:$0xff] %v11169_v44  ;;  %v6103_v44 = vsel %vm668_vm1, %v10835_v9, 0.0 }
0x17c2   :  { %v11171_v35 = vpop.xlane.xlu1 %4934 }
0x17c3   :  { %v11173_v4 = vpop.xlane.xlu0 %4949 }
0x17c4   :  { %12158 = vst [vmem:[#allocation71_spill] sm:$0xff] %v11173_v4 }
0x17c6   :  { %v11175_v29 = vpop.xlane.xlu1 %5318 }
0x17c7   :  { %12159 = vst [vmem:[#allocation145_spill] sm:$0xff] %v11175_v29  ;;  %v11177_v43 = vpop.xlane.xlu0 %5333 }
0x17c8   :  { %12160 = vst [vmem:[#allocation73_spill] sm:$0xff] %v11177_v43  ;;  %v6097_v43 = vsel %vm668_vm1, %v10829_v19, 0.0 }
0x17ca   :  { %v11179_v47 = vpop.xlane.xlu1 %5324 }
0x17cb   :  { %12161 = vst [vmem:[#allocation147_spill] sm:$0xff] %v11179_v47  ;;  %v11181_v27 = vpop.xlane.xlu0 %5339 }
0x17cc   :  { %12162 = vst [vmem:[#allocation82_spill] sm:$0xff] %v11181_v27 }
0x17ce   :  { %v11183_v20 = vpop.xlane.xlu1 %5708 }
0x17cf   :  { %12163 = vst [vmem:[#allocation161_spill] sm:$0xff] %v11183_v20  ;;  %v11185_v23 = vpop.xlane.xlu0 %5723 }
0x17d0   :  { %12164 = vst [vmem:[#allocation83_spill] sm:$0xff] %v11185_v23  ;;  %v6115_v23 = vsel %vm668_vm1, %v10973_v61, 0.0 }
0x17d2   :  { %v11187_v48 = vpop.xlane.xlu1 %5714 }
0x17d3   :  { %12165 = vst [vmem:[#allocation163_spill] sm:$0xff] %v11187_v48  ;;  %v11189_v10 = vpop.xlane.xlu0 %5729 }
0x17d4   :  { %12166 = vst [vmem:[#allocation93_spill] sm:$0xff] %v11189_v10 }
0x17d6   :  { %v11193_v4 = vpop.xlane.xlu1 %4160  ;;  %6104 = vadd.xlane.f32.xlu1 %v6103_v44  ;;  %v6109_v44 = vsel %vm668_vm1, %v10977_v33, 0.0  ;;  %v12174_v33 = vld [vmem:[#allocation33_spill] sm:$0xff] }
0x17d7   :  { %12167 = vst [vmem:[#allocation94_spill] sm:$0xff] %v11193_v4  ;;  %v722_v29 = vpop.xlane.xlu0 %721 }
0x17d8   :  { %8652 = vrcp.f32 %v722_v29 }
0x17da   :  { %v11197_v27 = vpop.xlane.xlu1 %4166  ;;  %6098 = vadd.xlane.f32.xlu1 %v6097_v43 }
0x17db   :  { %12168 = vst [vmem:[#allocation104_spill] sm:$0xff] %v11197_v27  ;;  %v728_v20 = vpop.xlane.xlu0 %727 }
0x17dc   :  { %8654 = vrcp.f32 %v728_v20  ;;  %v12172_v20 = vld [vmem:[#allocation34_spill] sm:$0xff] }
0x17de   :  { %v11201_v10 = vpop.xlane.xlu1 %4550  ;;  %6116 = vadd.xlane.f32.xlu1 %v6115_v23 }
0x17df   :  { %12169 = vst [vmem:[#allocation106_spill] sm:$0xff] %v11201_v10  ;;  %v734_v9 = vpop.xlane.xlu0 %733 }
0x17e0   :  { %8656 = vrcp.f32 %v734_v9 }
0x17e2   :  { %v11205_v29 = vpop.xlane.xlu1 %4556  ;;  %6110 = vadd.xlane.f32.xlu1 %v6109_v44 }
0x17e3   :  { %12170 = vst [vmem:[#allocation129_spill] sm:$0xff] %v11205_v29  ;;  %v740_v19 = vpop.xlane.xlu0 %739 }
0x17e4   :  { %8658 = vrcp.f32 %v740_v19 }
0x17e5   :  { %v8653_v27 = vpop.eup %8652 }
0x17e6   :  { %v11207_v43 = vpop.xlane.xlu1 %4940  ;;  %v831_v4 = vmul.f32 %v8653_v27, %v12172_v20  ;;  %v12176_v27 = vld [vmem:[#allocation38_spill] sm:$0xff] }
0x17e7   :  { %12171 = vst [vmem:[#allocation134_spill] sm:$0xff] %v11207_v43  ;;  %v3794_v48 = vpop.xlane.xlu0 %3793 }
0x17e8   :  { %8660 = vrcp.f32 %v3794_v48  ;;  %v7252_v61 = vpack.c.bf16 %v831_v4, %v831_v4 }
0x17e9   :  { %v8655_v23 = vpop.eup %8654 }
0x17ea   :  { %v11210_v10 = vpop.xlane.xlu1 %4946  ;;  %872 = vst.msk [vmem:[#allocation3 + $0x4] sm:$0xf] %vm870_vm2, %v7252_v61  ;;  %v833_v9 = vmul.f32 %v8655_v23, %v12174_v33  ;;  %v12178_v61 = vld [vmem:[#allocation37_spill] sm:$0xff] }
0x17eb   :  { %12173 = vst [vmem:[#allocation130_spill] sm:$0xff] %v11210_v10  ;;  %v3800_v29 = vpop.xlane.xlu0 %3799 }
0x17ec   :  { %8662 = vrcp.f32 %v3800_v29  ;;  %v7254_v44 = vpack.c.bf16 %v833_v9, %v833_v9 }
0x17ed   :  { %v8657_v19 = vpop.eup %8656 }
0x17ee   :  { %v11214_v47 = vpop.xlane.xlu1 %5330  ;;  %874 = vst.msk [vmem:[#allocation3 + $0xc] sm:$0xf] %vm870_vm2, %v7254_v44  ;;  %v835_v20 = vmul.f32 %v8657_v19, %v12176_v27  ;;  %v12180_v44 = vld [vmem:[#allocation124_spill] sm:$0xff] }
0x17ef   :  { %12175 = vst [vmem:[#allocation132_spill] sm:$0xff] %v11214_v47  ;;  %v3806_v43 = vpop.xlane.xlu0 %3805 }
0x17f0   :  { %8664 = vrcp.f32 %v3806_v43  ;;  %v7256_v48 = vpack.c.bf16 %v835_v20, %v835_v20 }
0x17f1   :  { %v8659_v4 = vpop.eup %8658 }
0x17f2   :  { %v11218_v41 = vpop.xlane.xlu1 %5336  ;;  %876 = vst.msk [vmem:[#allocation3 + $0x14] sm:$0xf] %vm870_vm2, %v7256_v48  ;;  %v837_v23 = vmul.f32 %v8659_v4, %v12178_v61  ;;  %v12182_v48 = vld [vmem:[#allocation123_spill] sm:$0xff] }
0x17f3   :  { %12177 = vst [vmem:[#allocation144_spill] sm:$0xff] %v11218_v41  ;;  %v3812_v33 = vpop.xlane.xlu0 %3811 }
0x17f4   :  { %8666 = vrcp.f32 %v3812_v33  ;;  %v7258_v29 = vpack.c.bf16 %v837_v23, %v837_v23 }
0x17f5   :  { %v8661_v9 = vpop.eup %8660 }
0x17f6   :  { %v11222_v47 = vpop.xlane.xlu1 %5720  ;;  %878 = vst.msk [vmem:[#allocation3 + $0x1c] sm:$0xf] %vm870_vm2, %v7258_v29  ;;  %v3903_v19 = vmul.f32 %v8661_v9, %v12180_v44 }
0x17f7   :  { %12179 = vst [vmem:[#allocation150_spill] sm:$0xff] %v11222_v47  ;;  %v1240_v43 = vpop.permute.xlu0 %1239  ;;  %v12183_v47 = vld [vmem:[#allocation128_spill] sm:$0xff] }
0x17f8   :  { %1263 = vst.msk [vmem:[#allocation3 + $0x4] sm:$0xf] %vm1261_vm3, %v1240_v43  ;;  %v7316_v27 = vpack.c.bf16 %v3903_v19, %v3903_v19  ;;  %v12184_v19 = vld [vmem:[#allocation127_spill] sm:$0xff] }
0x17f9   :  { %v8663_v20 = vpop.eup %8662 }
0x17fa   :  { %v11227_v41 = vpop.xlane.xlu1 %5726  ;;  %3943 = vst.msk [vmem:[#allocation3 + $0x24] sm:$0xf] %vm870_vm2, %v7316_v27  ;;  %v3905_v4 = vmul.f32 %v8663_v20, %v12182_v48 }
0x17fb   :  { %12181 = vst [vmem:[#allocation146_spill] sm:$0xff] %v11227_v41 }
0x17fc   :  { %v7318_v61 = vpack.c.bf16 %v3905_v4, %v3905_v4  ;;  %v12185_v4 = vld [vmem:[#allocation32_spill] sm:$0xff] }
0x17fd   :  { %v8665_v23 = vpop.eup %8664 }
0x17fe   :  { %v719_v33 = vpop.xlane.xlu1 %718  ;;  %3945 = vst.msk [vmem:[#allocation3 + $0x2c] sm:$0xf] %vm870_vm2, %v7318_v61  ;;  %v3907_v29 = vmul.f32 %v8665_v23, %v12183_v47  ;;  %v11237_v47 = vpop.f32.mrf.mxu1 }
0x17ff   :  { %8668 = vrcp.f32 %v719_v33  ;;  %12186 = vst [vmem:[#allocation148_spill] sm:$0xff] %v11237_v47 }
0x1800   :  { %v7320_v9 = vpack.c.bf16 %v3907_v29, %v3907_v29 }
0x1801   :  { %v8667_v44 = vpop.eup %8666 }
0x1802   :  { %v725_v10 = vpop.xlane.xlu1 %724  ;;  %3947 = vst.msk [vmem:[#allocation3 + $0x34] sm:$0xf] %vm870_vm2, %v7320_v9  ;;  %v3909_v43 = vmul.f32 %v8667_v44, %v12184_v19  ;;  %v12187_v9 = vld [vmem:[#allocation31_spill] sm:$0xff]  ;;  %v11241_v44 = vpop.f32.mrf.mxu1 }
0x1803   :  { %8670 = vrcp.f32 %v725_v10  ;;  %12188 = vst [vmem:[#allocation160_spill] sm:$0xff] %v11241_v44 }
0x1804   :  { %v7322_v41 = vpack.c.bf16 %v3909_v43, %v3909_v43 }
0x1806   :  { %v731_v27 = vpop.xlane.xlu1 %730  ;;  %3949 = vst.msk [vmem:[#allocation3 + $0x3c] sm:$0xf] %vm870_vm2, %v7322_v41 }
0x1807   :  { %8672 = vrcp.f32 %v731_v27  ;;  %v12189_v27 = vld [vmem:[#allocation36_spill] sm:$0xff] }
0x180a   :  { %v737_v20 = vpop.xlane.xlu1 %736 }
0x180b   :  { %8674 = vrcp.f32 %v737_v20 }
0x180c   :  { %v8669_v48 = vpop.eup %8668 }
0x180d   :  { %v830_v61 = vmul.f32 %v8669_v48, %v12185_v4  ;;  %v11245_v48 = vpop.f32.mrf.mxu1 }
0x180e   :  { %v3791_v23 = vpop.xlane.xlu1 %3790  ;;  %12190 = vst [vmem:[#allocation166_spill] sm:$0xff] %v11245_v48 }
0x180f   :  { %8676 = vrcp.f32 %v3791_v23  ;;  %v7251_v33 = vpack.c.bf16 %v830_v61, %v830_v61 }
0x1810   :  { %v8671_v29 = vpop.eup %8670 }
0x1811   :  { %871 = vst.msk [vmem:[#allocation3] sm:$0xf] %vm870_vm2, %v7251_v33  ;;  %v832_v10 = vmul.f32 %v8671_v29, %v12187_v9  ;;  %v12191_v33 = vld [vmem:[#allocation35_spill] sm:$0xff]  ;;  %v11249_v9 = vpop.f32.mrf.mxu1 }
0x1812   :  { %v3797_v19 = vpop.xlane.xlu1 %3796 }
0x1813   :  { %8678 = vrcp.f32 %v3797_v19  ;;  %v7253_v41 = vpack.c.bf16 %v832_v10, %v832_v10 }
0x1814   :  { %v8673_v43 = vpop.eup %8672 }
0x1815   :  { %873 = vst.msk [vmem:[#allocation3 + $0x8] sm:$0xf] %vm870_vm2, %v7253_v41  ;;  %v834_v20 = vmul.f32 %v8673_v43, %v12189_v27  ;;  %v1629_v41 = vpop.permute.xlu0 %1628  ;;  %v12193_v43 = vld [vmem:[#allocation122_spill] sm:$0xff] }
0x1816   :  { %v3803_v4 = vpop.xlane.xlu1 %3802 }
0x1817   :  { %8680 = vrcp.f32 %v3803_v4  ;;  %v7255_v61 = vpack.c.bf16 %v834_v20, %v834_v20 }
0x1818   :  { %v8675_v23 = vpop.eup %8674 }
0x1819   :  { %875 = vst.msk [vmem:[#allocation3 + $0x10] sm:$0xf] %vm870_vm2, %v7255_v61  ;;  %v836_v29 = vmul.f32 %v8675_v23, %v12191_v33 }
0x181a   :  { %v3809_v47 = vpop.xlane.xlu1 %3808 }
0x181b   :  { %8682 = vrcp.f32 %v3809_v47  ;;  %v7257_v10 = vpack.c.bf16 %v836_v29, %v836_v29  ;;  %v12196_v47 = vld [vmem:[#allocation121_spill] sm:$0xff] }
0x181c   :  { %v8677_v19 = vpop.eup %8676  ;;  %v11251_v44 = vpop.f32.mrf.mxu1  ;;  %8684 = vrcp.f32 %v10875_v39 }
0x181d   :  { %12192 = vst [vmem:[#allocation162_spill] sm:$0xff] %v11251_v44  ;;  %877 = vst.msk [vmem:[#allocation3 + $0x18] sm:$0xf] %vm870_vm2, %v7257_v10  ;;  %v3902_v27 = vmul.f32 %v8677_v19, %v12193_v43  ;;  %v1633_v10 = vpop.permute.xlu0 %1632  ;;  %8686 = vrcp.f32 %v10881_v55  ;;  %v12200_v55 = vld [vmem:[#allocation63_spill] sm:$0xff] }
0x181e   :  { %v1238_v20 = vpop.permute.xlu1 %1237  ;;  %v11255_v4 = vpop.f32.mrf.mxu1  ;;  %8688 = vrcp.f32 %v10953_v14 }
0x181f   :  { %12194 = vst [vmem:[#allocation164_spill] sm:$0xff] %v11255_v4  ;;  %1262 = vst.msk [vmem:[#allocation3] sm:$0xf] %vm1261_vm3, %v1238_v20  ;;  %v7315_v61 = vpack.c.bf16 %v3902_v27, %v3902_v27  ;;  %8690 = vrcp.f32 %v10891_v38 }
0x1820   :  { %v8679_v23 = vpop.eup %8678  ;;  %v11258_v33 = vpop.f32.mrf.mxu1  ;;  %1653 = vst.msk [vmem:[#allocation3] sm:$0xf] %vm1652_vm4, %v1629_v41  ;;  %v12198_v41 = vld [vmem:[#allocation126_spill] sm:$0xff]  ;;  %8692 = vrcp.f32 %v10961_v63 }
0x1821   :  { %12195 = vst [vmem:[#allocation176_spill] sm:$0xff] %v11258_v33  ;;  %3942 = vst.msk [vmem:[#allocation3 + $0x20] sm:$0xf] %vm870_vm2, %v7315_v61  ;;  %v3904_v29 = vmul.f32 %v8679_v23, %v12196_v47  ;;  %v12199_v33 = vld [vmem:[#allocation125_spill] sm:$0xff]  ;;  %8694 = vrcp.f32 %v10897_v15 }
0x1822   :  { %v1242_v44 = vpop.permute.xlu1 %1241  ;;  %v11263_v48 = vpop.f32.mrf.mxu1  ;;  %8696 = vrcp.f32 %v10971_v26  ;;  %v12202_v15 = vld [vmem:[#allocation61_spill] sm:$0xff] }
0x1823   :  { %12197 = vst [vmem:[#allocation133_spill] sm:$0xff] %v11263_v48  ;;  %1264 = vst.msk [vmem:[#allocation3 + $0x8] sm:$0xf] %vm1261_vm3, %v1242_v44  ;;  %v7317_v19 = vpack.c.bf16 %v3904_v29, %v3904_v29  ;;  %8698 = vrcp.f32 %v10905_v53 }
0x1824   :  { %v8681_v43 = vpop.eup %8680  ;;  %v11266_v4 = vpop.f32.mrf.mxu1  ;;  %1655 = vst.msk [vmem:[#allocation3 + $0x8] sm:$0xf] %vm1652_vm4, %v1633_v10  ;;  %8700 = vrcp.f32 %v10987_v51 }
0x1825   :  { %v6445_v27 = vsel %vm668_vm1, %v11266_v4, -inf  ;;  %3944 = vst.msk [vmem:[#allocation3 + $0x28] sm:$0xf] %vm870_vm2, %v7317_v19  ;;  %v3906_v20 = vmul.f32 %v8681_v43, %v12198_v41  ;;  %8702 = vrcp.f32 %v10913_v50 }
0x1826   :  { %v1244_v61 = vpop.permute.xlu1 %1243  ;;  %v11273_v23 = vpop.f32.mrf.mxu1  ;;  %6446 = vmax.xlane.f32.xlu0 %v6445_v27  ;;  %8704 = vrcp.f32 %v11001_v32 }
0x1827   :  { %1265 = vst.msk [vmem:[#allocation3 + $0xc] sm:$0xf] %vm1261_vm3, %v1244_v61  ;;  %v7319_v44 = vpack.c.bf16 %v3906_v20, %v3906_v20  ;;  %v6439_v10 = vsel %vm668_vm1, %v11273_v23, -inf  ;;  %8706 = vrcp.f32 %v10921_v54 }
0x1828   :  { %v8683_v47 = vpop.eup %8682  ;;  %v11276_v29 = vpop.f32.mrf.mxu1  ;;  %8708 = vrcp.f32 %v11009_v46 }
0x1829   :  { %3946 = vst.msk [vmem:[#allocation3 + $0x30] sm:$0xf] %vm870_vm2, %v7319_v44  ;;  %v3908_v48 = vmul.f32 %v8683_v47, %v12199_v33  ;;  %v6448_v61 = vsel %vm668_vm1, %v11276_v29, -inf  ;;  %8710 = vrcp.f32 %v10930_v62 }
0x182a   :  { %v11282_v19 = vpop.f32.mrf.mxu1  ;;  %v1631_v43 = vpop.permute.xlu1 %1630  ;;  %6440 = vmax.xlane.f32.xlu0 %v6439_v10  ;;  %8712 = vrcp.f32 %v11021_v28  ;;  %v12208_v28 = vld [vmem:[#allocation74_spill] sm:$0xff] }
0x182b   :  { %1654 = vst.msk [vmem:[#allocation3 + $0x4] sm:$0xf] %vm1652_vm4, %v1631_v43  ;;  %v6442_v27 = vsel %vm668_vm1, %v11282_v19, -inf  ;;  %v7321_v41 = vpack.c.bf16 %v3908_v48, %v3908_v48  ;;  %8714 = vrcp.f32 %v10939_v31 }
0x182c   :  { %v11287_v20 = vpop.f32.mrf.mxu1  ;;  %6443 = vmax.xlane.f32.xlu1 %v6442_v27 }
0x182d   :  { %3948 = vst.msk [vmem:[#allocation3 + $0x38] sm:$0xf] %vm870_vm2, %v7321_v41  ;;  %v6457_v47 = vsel %vm668_vm1, %v11287_v20, -inf  ;;  %v8685_v41 = vpop.eup %8684  ;;  %8716 = vrcp.f32 %v11030_v45  ;;  %v12210_v45 = vld [vmem:[#allocation85_spill] sm:$0xff] }
0x182e   :  { %v11292_v44 = vpop.f32.mrf.mxu1  ;;  %v1635_v33 = vpop.permute.xlu1 %1634  ;;  %6449 = vmax.xlane.f32.xlu0 %v6448_v61  ;;  %v1988_v61 = vmul.f32 %v8685_v41, %v12200_v55  ;;  %v12204_v55 = vld [vmem:[#allocation60_spill] sm:$0xff] }
0x182f   :  { %1656 = vst.msk [vmem:[#allocation3 + $0xc] sm:$0xf] %vm1652_vm4, %v1635_v33  ;;  %v6451_v27 = vsel %vm668_vm1, %v11292_v44, -inf  ;;  %v8687_v33 = vpop.eup %8686  ;;  %8718 = vrcp.f32 %v10947_v22 }
0x1830   :  { %v11298_v48 = vpop.f32.mrf.mxu1  ;;  %6458 = vmax.xlane.f32.xlu1 %v6457_v47  ;;  %v8689_v47 = vpop.eup %8688  ;;  %v7276_v14 = vpack.c.bf16 %v1988_v61, %v1988_v61  ;;  %8720 = vrcp.f32 %v11039_v40 }
0x1831   :  { %v6460_v10 = vsel %vm668_vm1, %v11298_v48, -inf  ;;  %v1987_v63 = vmul.f32 %v8689_v47, %v12202_v15 }
0x1832   :  { %v11302_v43 = vpop.f32.mrf.mxu1  ;;  %6461 = vmax.xlane.f32.xlu0 %v6460_v10  ;;  %v12201_v10 = vld [vmem:[#allocation62_spill] sm:$0xff] }
0x1833   :  { %v6454_v39 = vsel %vm668_vm1, %v11302_v43, -inf  ;;  %v1990_v38 = vmul.f32 %v8687_v33, %v12201_v10  ;;  %v7275_v50 = vpack.c.bf16 %v1987_v63, %v1987_v63  ;;  %v12207_v63 = vld [vmem:[#allocation87_spill] sm:$0xff] }
0x1834   :  { %6452 = vmax.xlane.f32.xlu1 %v6451_v27  ;;  %v8691_v27 = vpop.eup %8690  ;;  %8722 = vrcp.f32 %v10955_v13 }
0x1835   :  { %v8693_v26 = vpop.eup %8692  ;;  %v7278_v53 = vpack.c.bf16 %v1990_v38, %v1990_v38  ;;  %v12206_v38 = vld [vmem:[#allocation75_spill] sm:$0xff]  ;;  %8724 = vrcp.f32 %v11046_v17 }
0x1836   :  { %6455 = vmax.xlane.f32.xlu0 %v6454_v39  ;;  %v12203_v39 = vld [vmem:[#allocation77_spill] sm:$0xff]  ;;  %v8695_v51 = vpop.eup %8694  ;;  %v1989_v61 = vmul.f32 %v8693_v26, %v12204_v55  ;;  %8726 = vrcp.f32 %v10963_v3 }
0x1837   :  { %v2379_v41 = vmul.f32 %v8691_v27, %v12203_v39  ;;  %v8697_v33 = vpop.eup %8696  ;;  %8728 = vrcp.f32 %v11052_v34 }
0x1838   :  { %v8699_v10 = vpop.eup %8698  ;;  %v7277_v54 = vpack.c.bf16 %v1989_v61, %v1989_v61  ;;  %v2378_v27 = vmul.f32 %v8697_v33, %v12206_v38  ;;  %8730 = vrcp.f32 %v10975_v7 }
0x1839   :  { %v7284_v32 = vpack.c.bf16 %v2379_v41, %v2379_v41  ;;  %v8701_v46 = vpop.eup %8700  ;;  %v2770_v26 = vmul.f32 %v8699_v10, %v12207_v63  ;;  %v12211_v10 = vld [vmem:[#allocation98_spill] sm:$0xff]  ;;  %v12213_v63 = vld [vmem:[#allocation97_spill] sm:$0xff]  ;;  %8732 = vrcp.f32 %v11058_v60 }
0x183a   :  { %v8703_v62 = vpop.eup %8702  ;;  %v7283_v39 = vpack.c.bf16 %v2378_v27, %v2378_v27  ;;  %v2380_v41 = vmul.f32 %v8701_v46, %v12208_v28  ;;  %v12212_v27 = vld [vmem:[#allocation84_spill] sm:$0xff]  ;;  %8734 = vrcp.f32 %v10992_v0 }
0x183b   :  { %v7292_v31 = vpack.c.bf16 %v2770_v26, %v2770_v26 }
0x183c   :  { %v7285_v33 = vpack.c.bf16 %v2380_v41, %v2380_v41 }
0x1845   :  { %2021 = vrot.lane.b32.xlu1 %v7276_v14, %s9005_s8  ;;  %v12205_v14 = vld [vmem:[#allocation76_spill] sm:$0xff] }
0x1846   :  { %v2381_v47 = vmul.f32 %v8695_v51, %v12205_v14  ;;  %v8705_v51 = vpop.eup %8704  ;;  %8736 = vrcp.f32 %v11065_v56 }
0x1847   :  { %v8707_v61 = vpop.eup %8706  ;;  %8738 = vrcp.f32 %v11003_v2 }
0x1848   :  { %v7286_v15 = vpack.c.bf16 %v2381_v47, %v2381_v47  ;;  %v8709_v14 = vpop.eup %8708  ;;  %8740 = vrcp.f32 %v11073_v36 }
0x1849   :  { %2025 = vrot.lane.b32.xlu1 %v7278_v53, %s9005_s8  ;;  %v11336_v53 = vld [vmem:[#allocation9 + $0x38] sm:$0xff]   ;;  %v8711_v22 = vpop.eup %8710  ;;  %v2771_v46 = vmul.f32 %v8709_v14, %v12212_v27  ;;  %8742 = vrcp.f32 %v11011_v18 }
0x184a   :  { %8211 = vmatprep.subr.bf16.mxu0 %v11336_v53  ;;  %v8713_v40 = vpop.eup %8712  ;;  %v3163_v26 = vmul.f32 %v8711_v22, %v12213_v63  ;;  %v12219_v22 = vld [vmem:[#allocation46_spill] sm:$0xff]  ;;  %v12221_v63 = vld [vmem:[#allocation45_spill] sm:$0xff]  ;;  %8744 = vrcp.f32 %v11081_v5 }
0x184b   :  { %v8715_v13 = vpop.eup %8714  ;;  %8746 = vrcp.f32 %v11023_v21 }
0x184c   :  { %2019 = vrot.lane.b32.xlu0 %v7275_v50, %s9005_s8  ;;  %v12209_v50 = vld [vmem:[#allocation86_spill] sm:$0xff]  ;;  %v8717_v17 = vpop.eup %8716  ;;  %v7302_v41 = vpack.c.bf16 %v3163_v26, %v3163_v26  ;;  %8748 = vrcp.f32 %v11088_v24 }
0x184d   :  { %2412 = vrot.lane.b32.xlu1 %v7284_v32, %s8998_s25  ;;  %v2772_v55 = vmul.f32 %v8703_v62, %v12209_v50  ;;  %v2769_v32 = vmul.f32 %v8705_v51, %v12210_v45  ;;  %v7293_v62 = vpack.c.bf16 %v2771_v46, %v2771_v46  ;;  %v12215_v51 = vld [vmem:[#allocation108_spill] sm:$0xff]  ;;  %v8719_v3 = vpop.eup %8718  ;;  %v12217_v45 = vld [vmem:[#allocation107_spill] sm:$0xff]  ;;  %v12220_v46 = vld [vmem:[#allocation14_spill] sm:$0xff]  ;;  %8750 = vrcp.f32 %v11032_v8 }
0x184e   :  { %v8721_v34 = vpop.eup %8720  ;;  %8752 = vrcp.f32 %v11095_v25 }
0x184f   :  { %v7294_v47 = vpack.c.bf16 %v2772_v55, %v2772_v55  ;;  %v7291_v38 = vpack.c.bf16 %v2769_v32, %v2769_v32  ;;  %v12216_v55 = vld [vmem:[#allocation95_spill] sm:$0xff]  ;;  %v3554_v32 = vmul.f32 %v8719_v3, %v12217_v45  ;;  %v8723_v7 = vpop.eup %8722  ;;  %8754 = vrcp.f32 %v11041_v11 }
0x1850   :  { %2023 = vrot.lane.b32.xlu0 %v7277_v54, %s9005_s8  ;;  %v3161_v54 = vmul.f32 %v8707_v61, %v12211_v10  ;;  %v3162_v61 = vmul.f32 %v8717_v17, %v12216_v55  ;;  %v8725_v60 = vpop.eup %8724  ;;  %v12223_v17 = vld [vmem:[#allocation54_spill] sm:$0xff]  ;;  %v12225_v55 = vld [vmem:[#allocation53_spill] sm:$0xff]  ;;  %8756 = vrcp.f32 %v11102_v52 }
0x1851   :  { %2416 = vrot.lane.b32.xlu1 %v7286_v15, %s8998_s25  ;;  %v8727_v0 = vpop.eup %8726  ;;  %8758 = vrcp.f32 %v11048_v12 }
0x1852   :  { %v7300_v15 = vpack.c.bf16 %v3161_v54, %v3161_v54  ;;  %v7301_v14 = vpack.c.bf16 %v3162_v61, %v3162_v61  ;;  %v7310_v54 = vpack.c.bf16 %v3554_v32, %v3554_v32  ;;  %v8729_v56 = vpop.eup %8728  ;;  %v1212_v26 = vmul.f32 %v8727_v0, %v12221_v63  ;;  %v12232_v63 = vld [vmem:[#allocation72_spill] sm:$0xff] }
0x1853   :  { %v8731_v2 = vpop.eup %8730  ;;  %8760 = vrcp.f32 %v11107_v30 }
0x1854   :  { %2410 = vrot.lane.b32.xlu0 %v7283_v39, %s8998_s25  ;;  %v12214_v39 = vld [vmem:[#allocation96_spill] sm:$0xff]  ;;  %v8733_v36 = vpop.eup %8732  ;;  %8762 = vrcp.f32 %v11054_v58 }
0x1855   :  { %2803 = vrot.lane.b32.xlu1 %v7292_v31, %s9004_s7  ;;  %v3160_v28 = vmul.f32 %v8713_v40, %v12214_v39  ;;  %v3552_v31 = vmul.f32 %v8715_v13, %v12215_v51  ;;  %v3553_v40 = vmul.f32 %v8725_v60, %v12220_v46  ;;  %v8735_v18 = vpop.eup %8734  ;;  %8764 = vrcp.f32 %v12232_v63 }
0x1856   :  { %v8737_v5 = vpop.eup %8736  ;;  %v1603_v61 = vmul.f32 %v8735_v18, %v12225_v55 }
0x1857   :  { %v7299_v50 = vpack.c.bf16 %v3160_v28, %v3160_v28  ;;  %v7309_v13 = vpack.c.bf16 %v3553_v40, %v3553_v40  ;;  %v7266_v28 = vpack.c.bf16 %v1212_v26, %v1212_v26  ;;  %v8739_v21 = vpop.eup %8738 }
0x1858   :  { %2414 = vrot.lane.b32.xlu0 %v7285_v33, %s8998_s25  ;;  %v7308_v33 = vpack.c.bf16 %v3552_v31, %v3552_v31  ;;  %v12224_v31 = vld [vmem:[#allocation43_spill] sm:$0xff]  ;;  %v8741_v24 = vpop.eup %8740  ;;  %v7274_v32 = vpack.c.bf16 %v1603_v61, %v1603_v61  ;;  %v12239_v61 = vld [vmem:[#allocation26_spill] sm:$0xff] }
0x1859   :  { %2807 = vrot.lane.b32.xlu1 %v7294_v47, %s9004_s7  ;;  %v12218_v47 = vld [vmem:[#allocation15_spill] sm:$0xff]  ;;  %v1211_v3 = vmul.f32 %v8733_v36, %v12224_v31  ;;  %v8743_v8 = vpop.eup %8742  ;;  %v12235_v36 = vld [vmem:[#allocation80_spill] sm:$0xff]  ;;  %v12237_v31 = vld [vmem:[#allocation25_spill] sm:$0xff] }
0x185a   :  { %v3551_v10 = vmul.f32 %v8721_v34, %v12218_v47  ;;  %v8745_v25 = vpop.eup %8744 }
0x185b   :  { %v7265_v34 = vpack.c.bf16 %v1211_v3, %v1211_v3  ;;  %v8747_v11 = vpop.eup %8746 }
0x185c   :  { %2801 = vrot.lane.b32.xlu0 %v7291_v38, %s9004_s7  ;;  %v1210_v38 = vmul.f32 %v8723_v7, %v12219_v22  ;;  %v7307_v27 = vpack.c.bf16 %v3551_v10, %v3551_v10  ;;  %v12227_v7 = vld [vmem:[#allocation67_spill] sm:$0xff]  ;;  %v12229_v22 = vld [vmem:[#allocation66_spill] sm:$0xff]  ;;  %v8749_v52 = vpop.eup %8748 }
0x185d   :  { %3194 = vrot.lane.b32.xlu1 %v7300_v15, %s9003_s2  ;;  %v12228_v10 = vld [vmem:[#allocation51_spill] sm:$0xff]  ;;  %v8751_v12 = vpop.eup %8750 }
0x185e   :  { %v7264_v15 = vpack.c.bf16 %v1210_v38, %v1210_v38  ;;  %v1602_v60 = vmul.f32 %v8741_v24, %v12228_v10  ;;  %v1994_v38 = vmul.f32 %v8743_v8, %v12229_v22  ;;  %v8753_v30 = vpop.eup %8752  ;;  %v12245_v22 = vld [vmem:[#allocation102_spill] sm:$0xff] }
0x185f   :  { %v8755_v58 = vpop.eup %8754 }
0x1860   :  { %2805 = vrot.lane.b32.xlu0 %v7293_v62, %s9004_s7  ;;  %v12222_v62 = vld [vmem:[#allocation44_spill] sm:$0xff]  ;;  %v7273_v0 = vpack.c.bf16 %v1602_v60, %v1602_v60  ;;  %v7282_v40 = vpack.c.bf16 %v1994_v38, %v1994_v38 }
0x1861   :  { %3198 = vrot.lane.b32.xlu1 %v7302_v41, %s9003_s2  ;;  %v1209_v39 = vmul.f32 %v8729_v56, %v12222_v62  ;;  %v1601_v41 = vmul.f32 %v8731_v2, %v12223_v17  ;;  %v12231_v56 = vld [vmem:[#allocation81_spill] sm:$0xff]  ;;  %v12233_v2 = vld [vmem:[#allocation64_spill] sm:$0xff]  ;;  %v12234_v62 = vld [vmem:[#allocation55_spill] sm:$0xff] }
0x1862   :  { %8766 = vrcp.f32 %v12234_v62  ;;  %v12251_v62 = vld [vmem:[#allocation112_spill] sm:$0xff] }
0x1863   :  { %v7263_v51 = vpack.c.bf16 %v1209_v39, %v1209_v39  ;;  %8768 = vrcp.f32 %v11118_v16 }
0x1864   :  { %3192 = vrot.lane.b32.xlu0 %v7299_v50, %s9003_s2  ;;  %v7272_v50 = vpack.c.bf16 %v1601_v41, %v1601_v41  ;;  %v12236_v41 = vld [vmem:[#allocation79_spill] sm:$0xff]  ;;  %8770 = vrcp.f32 %v12237_v31 }
0x1865   :  { %3585 = vrot.lane.b32.xlu1 %v7308_v33, %s9002_s0  ;;  %v12226_v33 = vld [vmem:[#allocation52_spill] sm:$0xff]  ;;  %v2382_v18 = vmul.f32 %v8753_v30, %v12236_v41  ;;  %8772 = vrcp.f32 %v12239_v61  ;;  %v12254_v31 = vld [vmem:[#allocation111_spill] sm:$0xff] }
0x1866   :  { %v1600_v45 = vmul.f32 %v8737_v5, %v12226_v33  ;;  %v12238_v5 = vld [vmem:[#allocation91_spill] sm:$0xff] }
0x1868   :  { %3196 = vrot.lane.b32.xlu0 %v7301_v14, %s9003_s2  ;;  %v1992_v14 = vmul.f32 %v8739_v21, %v12227_v7  ;;  %v7271_v47 = vpack.c.bf16 %v1600_v45, %v1600_v45  ;;  %v7287_v21 = vpack.c.bf16 %v2382_v18, %v2382_v18  ;;  %v12241_v45 = vld [vmem:[#allocation68_spill] sm:$0xff]  ;;  %v12253_v18 = vld [vmem:[#allocation58_spill] sm:$0xff] }
0x1869   :  { %3589 = vrot.lane.b32.xlu1 %v7310_v54, %s9002_s0  ;;  %8774 = vrcp.f32 %v12241_v45  ;;  %v12257_v45 = vld [vmem:[#allocation139_spill] sm:$0xff] }
0x186a   :  { %v7280_v54 = vpack.c.bf16 %v1992_v14, %v1992_v14  ;;  %8776 = vrcp.f32 %v11129_v37 }
0x186c   :  { %3583 = vrot.lane.b32.xlu0 %v7307_v27, %s9002_s0  ;;  %v12230_v27 = vld [vmem:[#allocation65_spill] sm:$0xff] }
0x186d   :  { %1247 = vrot.lane.b32.xlu1 %v7264_v15, %s9007_s10  ;;  %v1991_v46 = vmul.f32 %v8745_v25, %v12230_v27  ;;  %v2383_v15 = vmul.f32 %v8747_v11, %v12231_v56  ;;  %v12244_v25 = vld [vmem:[#allocation29_spill] sm:$0xff]  ;;  %v12246_v27 = vld [vmem:[#allocation88_spill] sm:$0xff] }
0x186e   :  { %8778 = vrcp.f32 %v12244_v25  ;;  %v12248_v56 = vld [vmem:[#allocation101_spill] sm:$0xff] }
0x186f   :  { %v7279_v26 = vpack.c.bf16 %v1991_v46, %v1991_v46  ;;  %v7288_v39 = vpack.c.bf16 %v2383_v15, %v2383_v15  ;;  %8780 = vrcp.f32 %v11137_v1 }
0x1870   :  { %3587 = vrot.lane.b32.xlu0 %v7309_v13, %s9002_s0  ;;  %v1993_v13 = vmul.f32 %v8749_v52, %v12233_v2  ;;  %v12247_v52 = vld [vmem:[#allocation69_spill] sm:$0xff] }
0x1871   :  { %1251 = vrot.lane.b32.xlu1 %v7266_v28, %s9007_s10  ;;  %v2385_v28 = vmul.f32 %v8751_v12, %v12235_v36  ;;  %8782 = vrcp.f32 %v12247_v52  ;;  %v12263_v52 = vld [vmem:[#allocation155_spill] sm:$0xff] }
0x1872   :  { %v7281_v17 = vpack.c.bf16 %v1993_v13, %v1993_v13  ;;  %8784 = vrcp.f32 %v11145_v6  ;;  %v12250_v13 = vld [vmem:[#allocation28_spill] sm:$0xff]  ;;  %v12252_v6 = vld [vmem:[#allocation99_spill] sm:$0xff] }
0x1873   :  { %v7290_v3 = vpack.c.bf16 %v2385_v28, %v2385_v28  ;;  %8786 = vrcp.f32 %v12250_v13  ;;  %v11447_v28 = vpop.xlane.xlu0 %6107 }
0x1874   :  { %1245 = vrot.lane.b32.xlu0 %v7263_v51, %s9007_s10  ;;  %v8757_v51 = vpop.eup %8756  ;;  %8788 = vrcp.f32 %v11152_v42 }
0x1875   :  { %1638 = vrot.lane.b32.xlu1 %v7272_v50, %s9006_s9  ;;  %v2774_v50 = vmul.f32 %v8755_v58, %v12238_v5  ;;  %v8759_v55 = vpop.eup %8758  ;;  %8790 = vrcp.f32 %v12253_v18 }
0x1876   :  { %v8761_v16 = vpop.eup %8760  ;;  %8792 = vrcp.f32 %v11159_v49 }
0x1877   :  { %v7296_v24 = vpack.c.bf16 %v2774_v50, %v2774_v50  ;;  %v8763_v14 = vpop.eup %8762 }
0x1878   :  { %1249 = vrot.lane.b32.xlu0 %v7265_v34, %s9007_s10  ;;  %v12240_v34 = vld [vmem:[#allocation78_spill] sm:$0xff]  ;;  %v8765_v60 = vpop.eup %8764  ;;  %v3165_v38 = vmul.f32 %v8763_v14, %v12245_v22 }
0x1879   :  { %1642 = vrot.lane.b32.xlu1 %v7274_v32, %s9006_s9  ;;  %v2384_v33 = vmul.f32 %v8757_v51, %v12240_v34  ;;  %v12242_v32 = vld [vmem:[#allocation90_spill] sm:$0xff]  ;;  %v8767_v11 = vpop.eup %8766  ;;  %v2775_v46 = vmul.f32 %v8765_v60, %v12246_v27  ;;  %v11459_v34 = vpop.xlane.xlu0 %6101 }
0x187a   :  { %v2776_v7 = vmul.f32 %v8759_v55, %v12242_v32  ;;  %v8769_v37 = vpop.eup %8768  ;;  %v3167_v15 = vmul.f32 %v8767_v11, %v12248_v56  ;;  %v12255_v55 = vld [vmem:[#allocation110_spill] sm:$0xff]  ;;  %v12261_v11 = vld [vmem:[#allocation137_spill] sm:$0xff] }
0x187b   :  { %v7289_v8 = vpack.c.bf16 %v2384_v33, %v2384_v33  ;;  %v8771_v12 = vpop.eup %8770  ;;  %v7297_v63 = vpack.c.bf16 %v2775_v46, %v2775_v46  ;;  %v11461_v33 = vpop.xlane.xlu1 %6104  ;;  %v12260_v60 = vld [vmem:[#allocation138_spill] sm:$0xff]  ;;  %v12262_v46 = vld [vmem:[#allocation24_spill] sm:$0xff] }
0x187c   :  { %1636 = vrot.lane.b32.xlu0 %v7271_v47, %s9006_s9  ;;  %v12243_v47 = vld [vmem:[#allocation89_spill] sm:$0xff]  ;;  %v8773_v1 = vpop.eup %8772  ;;  %v7306_v30 = vpack.c.bf16 %v3167_v15, %v3167_v15 }
0x187d   :  { %2029 = vrot.lane.b32.xlu1 %v7280_v54, %s9005_s8  ;;  %v2773_v10 = vmul.f32 %v8761_v16, %v12243_v47  ;;  %v7298_v54 = vpack.c.bf16 %v2776_v7, %v2776_v7  ;;  %v8775_v36 = vpop.eup %8774  ;;  %v12258_v7 = vld [vmem:[#allocation109_spill] sm:$0xff]  ;;  %v12259_v47 = vld [vmem:[#allocation70_spill] sm:$0xff]  ;;  %v11471_v22 = vpop.xlane.xlu0 %6119 }
0x187e   :  { %v8777_v41 = vpop.eup %8776 }
0x187f   :  { %v8779_v5 = vpop.eup %8778  ;;  %v3555_v61 = vmul.f32 %v8777_v41, %v12255_v55  ;;  %v12269_v41 = vld [vmem:[#allocation27_spill] sm:$0xff]  ;;  %v12271_v55 = vld [vmem:[#allocation152_spill] sm:$0xff] }
0x1880   :  { %1640 = vrot.lane.b32.xlu0 %v7273_v0, %s9006_s9  ;;  %v7295_v0 = vpack.c.bf16 %v2773_v10, %v2773_v10  ;;  %v8781_v42 = vpop.eup %8780 }
0x1881   :  { %2033 = vrot.lane.b32.xlu1 %v7282_v40, %s9005_s8  ;;  %v7304_v40 = vpack.c.bf16 %v3165_v38, %v3165_v38  ;;  %v8783_v32 = vpop.eup %8782  ;;  %v7311_v49 = vpack.c.bf16 %v3555_v61, %v3555_v61  ;;  %v3557_v14 = vmul.f32 %v8781_v42, %v12258_v7  ;;  %v11473_v38 = vpop.xlane.xlu1 %6098  ;;  %v12272_v42 = vld [vmem:[#allocation147_spill] sm:$0xff]  ;;  %v12274_v7 = vld [vmem:[#allocation170_spill] sm:$0xff] }
0x1882   :  { %v4279_v25 = vmul.f32 %v8783_v32, %v12260_v60 }
0x1884   :  { %2027 = vrot.lane.b32.xlu0 %v7279_v26, %s9005_s8  ;;  %v12249_v26 = vld [vmem:[#allocation100_spill] sm:$0xff] }
0x1885   :  { %2420 = vrot.lane.b32.xlu1 %v7288_v39, %s8998_s25  ;;  %v3164_v2 = vmul.f32 %v8769_v37, %v12249_v26  ;;  %v3556_v39 = vmul.f32 %v8771_v12, %v12251_v62  ;;  %v7326_v37 = vpack.c.bf16 %v4279_v25, %v4279_v25  ;;  %v12264_v12 = vld [vmem:[#allocation136_spill] sm:$0xff] }
0x1886   :  { %v12265_v26 = vld [vmem:[#allocation92_spill] sm:$0xff] }
0x1887   :  { %v7303_v58 = vpack.c.bf16 %v3164_v2, %v3164_v2  ;;  %v7312_v51 = vpack.c.bf16 %v3556_v39, %v3556_v39  ;;  %v11485_v2 = vpop.xlane.xlu0 %6113 }
0x1888   :  { %2031 = vrot.lane.b32.xlu0 %v7281_v17, %s9005_s8  ;;  %v3166_v17 = vmul.f32 %v8773_v1, %v12252_v6  ;;  %v11487_v1 = vpop.xlane.xlu1 %6116  ;;  %v12268_v6 = vld [vmem:[#allocation153_spill] sm:$0xff] }
0x1889   :  { %2424 = vrot.lane.b32.xlu1 %v7290_v3, %s8998_s25  ;;  %v3558_v3 = vmul.f32 %v8775_v36, %v12254_v31  ;;  %v12267_v36 = vld [vmem:[#allocation145_spill] sm:$0xff]  ;;  %v12270_v31 = vld [vmem:[#allocation171_spill] sm:$0xff] }
0x188a   :  { %v7305_v50 = vpack.c.bf16 %v3166_v17, %v3166_v17 }
0x188b   :  { %v7314_v16 = vpack.c.bf16 %v3558_v3, %v3558_v3 }
0x188c   :  { %2418 = vrot.lane.b32.xlu0 %v7287_v21, %s8998_s25  ;;  %v12256_v21 = vld [vmem:[#allocation56_spill] sm:$0xff] }
0x188d   :  { %2811 = vrot.lane.b32.xlu1 %v7296_v24, %s9004_s7  ;;  %8794 = vrcp.f32 %v12256_v21  ;;  %v4277_v24 = vmul.f32 %v8779_v5, %v12257_v45  ;;  %v12273_v45 = vld [vmem:[#allocation105_spill] sm:$0xff] }
0x188e   :  { %8796 = vrcp.f32 %v11163_v57  ;;  %v7313_v57 = vpack.c.bf16 %v3557_v14, %v3557_v14 }
0x188f   :  { %8798 = vrcp.f32 %v12259_v47  ;;  %v7324_v10 = vpack.c.bf16 %v4277_v24, %v4277_v24 }
0x1890   :  { %2422 = vrot.lane.b32.xlu0 %v7289_v8, %s8998_s25  ;;  %v8785_v8 = vpop.eup %8784  ;;  %8800 = vrcp.f32 %v11167_v59 }
0x1891   :  { %2815 = vrot.lane.b32.xlu1 %v7298_v54, %s9004_s7  ;;  %v8787_v54 = vpop.eup %8786  ;;  %8802 = vrcp.f32 %v12262_v46 }
0x1892   :  { %v8789_v27 = vpop.eup %8788  ;;  %8804 = vrcp.f32 %v11171_v35 }
0x1893   :  { %v8791_v56 = vpop.eup %8790  ;;  %8806 = vrcp.f32 %v12265_v26 }
0x1894   :  { %2809 = vrot.lane.b32.xlu0 %v7295_v0, %s9004_s7  ;;  %v4276_v0 = vmul.f32 %v8785_v8, %v12261_v11  ;;  %v8793_v59 = vpop.eup %8792  ;;  %8808 = vrcp.f32 %v12267_v36 }
0x1895   :  { %3202 = vrot.lane.b32.xlu1 %v7304_v40, %s9003_s2  ;;  %v4667_v40 = vmul.f32 %v8787_v54, %v12263_v52  ;;  %v4666_v17 = vmul.f32 %v8793_v59, %v12268_v6  ;;  %8810 = vrcp.f32 %v12269_v41  ;;  %v12278_v52 = vld [vmem:[#allocation180_spill] sm:$0xff] }
0x1896   :  { %v7323_v15 = vpack.c.bf16 %v4276_v0, %v4276_v0  ;;  %8812 = vrcp.f32 %v12272_v42  ;;  %v12277_v0 = vld [vmem:[#allocation169_spill] sm:$0xff] }
0x1897   :  { %v7332_v13 = vpack.c.bf16 %v4667_v40, %v4667_v40  ;;  %v7331_v21 = vpack.c.bf16 %v4666_v17, %v4666_v17  ;;  %8814 = vrcp.f32 %v12273_v45 }
0x1898   :  { %2813 = vrot.lane.b32.xlu0 %v7297_v63, %s9004_s7  ;;  %v4278_v63 = vmul.f32 %v8789_v27, %v12264_v12 }
0x1899   :  { %3206 = vrot.lane.b32.xlu1 %v7306_v30, %s9003_s2  ;;  %v12266_v30 = vld [vmem:[#allocation154_spill] sm:$0xff] }
0x189a   :  { %v4669_v62 = vmul.f32 %v8791_v56, %v12266_v30  ;;  %v8795_v39 = vpop.eup %8794 }
0x189b   :  { %v8797_v35 = vpop.eup %8796  ;;  %v5057_v3 = vmul.f32 %v8795_v39, %v12270_v31  ;;  %v12280_v39 = vld [vmem:[#allocation179_spill] sm:$0xff] }
0x189c   :  { %3200 = vrot.lane.b32.xlu0 %v7303_v58, %s9003_s2  ;;  %v7325_v58 = vpack.c.bf16 %v4278_v63, %v4278_v63  ;;  %v8799_v5 = vpop.eup %8798  ;;  %v4668_v61 = vmul.f32 %v8797_v35, %v12271_v55 }
0x189d   :  { %3593 = vrot.lane.b32.xlu1 %v7312_v51, %s9002_s0  ;;  %v7334_v51 = vpack.c.bf16 %v4669_v62, %v4669_v62  ;;  %v5059_v14 = vmul.f32 %v8799_v5, %v12274_v7 }
0x189e   :  { %v7333_v25 = vpack.c.bf16 %v4668_v61, %v4668_v61 }
0x18a0   :  { %3204 = vrot.lane.b32.xlu0 %v7305_v50, %s9003_s2  ;;  %v11497_v50 = vpop.xlane.xlu1 %6110 }
0x18a1   :  { %3597 = vrot.lane.b32.xlu1 %v7314_v16, %s9002_s0  ;;  %v8801_v16 = vpop.eup %8800 }
0x18a2   :  { %v8803_v8 = vpop.eup %8802  ;;  %v5056_v27 = vmul.f32 %v8801_v16, %v12277_v0 }
0x18a3   :  { %v8805_v54 = vpop.eup %8804  ;;  %v5447_v40 = vmul.f32 %v8803_v8, %v12278_v52 }
0x18a4   :  { %3591 = vrot.lane.b32.xlu0 %v7311_v49, %s9002_s0  ;;  %v7340_v49 = vpack.c.bf16 %v5057_v3, %v5057_v3  ;;  %v8807_v56 = vpop.eup %8806  ;;  %v7339_v26 = vpack.c.bf16 %v5056_v27, %v5056_v27 }
0x18a5   :  { %4310 = vrot.lane.b32.xlu1 %v7324_v10, %s9007_s10  ;;  %v12275_v10 = vld [vmem:[#allocation161_spill] sm:$0xff]  ;;  %v7348_v62 = vpack.c.bf16 %v5447_v40, %v5447_v40 }
0x18a6   :  { %8816 = vrcp.f32 %v12275_v10 }
0x18a8   :  { %3595 = vrot.lane.b32.xlu0 %v7313_v57, %s9002_s0  ;;  %v12276_v57 = vld [vmem:[#allocation163_spill] sm:$0xff] }
0x18a9   :  { %4314 = vrot.lane.b32.xlu1 %v7326_v37, %s9007_s10  ;;  %8818 = vrcp.f32 %v12276_v57  ;;  %v7342_v37 = vpack.c.bf16 %v5059_v14, %v5059_v14  ;;  %v12284_v14 = vld [vmem:[#allocation188_spill] sm:$0xff] }
0x18aa   :  { %8820 = vrcp.f32 %v11459_v34 }
0x18ab   :  { %8822 = vrcp.f32 %v11447_v28  ;;  %v5449_v28 = vmul.f32 %v8807_v56, %v12280_v39  ;;  %v12286_v56 = vld [vmem:[#allocation186_spill] sm:$0xff]  ;;  %v12288_v39 = vld [vmem:[#allocation160_spill] sm:$0xff] }
0x18ac   :  { %4308 = vrot.lane.b32.xlu0 %v7323_v15, %s9007_s10 }
0x18ad   :  { %4700 = vrot.lane.b32.xlu1 %v7332_v13, %s9006_s9  ;;  %v8809_v13 = vpop.eup %8808  ;;  %v7350_v5 = vpack.c.bf16 %v5449_v28, %v5449_v28 }
0x18ae   :  { %v8811_v35 = vpop.eup %8810 }
0x18af   :  { %v6447_v18 = vpop.xlane.xlu0 %6446  ;;  %v8813_v31 = vpop.eup %8812 }
0x18b0   :  { %4312 = vrot.lane.b32.xlu0 %v7325_v58, %s9007_s10  ;;  %v6465_v24 = vsub.f32 %v11266_v4, %v6447_v18  ;;  %v12281_v18 = vld [vmem:[#allocation178_spill] sm:$0xff]  ;;  %v8815_v61 = vpop.eup %8814 }
0x18b1   :  { %4704 = vrot.lane.b32.xlu1 %v7334_v51, %s9006_s9  ;;  %v5446_v51 = vmul.f32 %v8809_v13, %v12281_v18  ;;  %v5839_v8 = vmul.f32 %v8815_v61, %v12284_v14 }
0x18b2   :  { %v6475_v46 = vmul.f32 1.442695, %v6465_v24  ;;  %v12283_v24 = vld [vmem:[#allocation177_spill] sm:$0xff] }
0x18b3   :  { %v6441_v32 = vpop.xlane.xlu0 %6440  ;;  %v7347_v45 = vpack.c.bf16 %v5446_v51, %v5446_v51  ;;  %v7358_v0 = vpack.c.bf16 %v5839_v8, %v5839_v8 }
0x18b4   :  { %v6463_v47 = vsub.f32 %v11273_v23, %v6441_v32  ;;  %4698 = vrot.lane.b32.xlu0 %v7331_v21, %s9006_s9  ;;  %v5448_v32 = vmul.f32 %v8813_v31, %v12283_v24  ;;  %v12289_v31 = vld [vmem:[#allocation148_spill] sm:$0xff] }
0x18b5   :  { %v6444_v60 = vpop.xlane.xlu1 %6443  ;;  %5090 = vrot.lane.b32.xlu1 %v7340_v49, %s9005_s8 }
0x18b6   :  { %v6471_v11 = vmul.f32 1.442695, %v6463_v47  ;;  %v6464_v4 = vsub.f32 %v11282_v19, %v6444_v60  ;;  %v12279_v19 = vld [vmem:[#allocation168_spill] sm:$0xff] }
0x18b7   :  { %v6450_v23 = vpop.xlane.xlu0 %6449  ;;  %v5058_v59 = vmul.f32 %v8805_v54, %v12279_v19  ;;  %v12285_v54 = vld [vmem:[#allocation187_spill] sm:$0xff] }
0x18b8   :  { %v6473_v15 = vmul.f32 1.442695, %v6464_v4  ;;  %v6466_v12 = vsub.f32 %v11276_v29, %v6450_v23  ;;  %4702 = vrot.lane.b32.xlu0 %v7333_v25, %s9006_s9  ;;  %8824 = vpow2.f32 %v6471_v11  ;;  %v7349_v25 = vpack.c.bf16 %v5448_v32, %v5448_v32  ;;  %v8386_v32 = vld [vmem:[#allocation9 + $0x8] sm:$0xff]  }
0x18b9   :  { %v6459_v63 = vpop.xlane.xlu1 %6458  ;;  %5094 = vrot.lane.b32.xlu1 %v7342_v37, %s9005_s8  ;;  %v7341_v6 = vpack.c.bf16 %v5058_v59, %v5058_v59 }
0x18ba   :  { %8826 = vpow2.f32 %v6473_v15  ;;  %v6477_v34 = vmul.f32 1.442695, %v6466_v12  ;;  %v6469_v36 = vsub.f32 %v11287_v20, %v6459_v63  ;;  %v8381_v12 = vld [vmem:[#allocation9 + $0x30] sm:$0xff]  }
0x18bb   :  { %8828 = vpow2.f32 %v6475_v46  ;;  %v6462_v30 = vpop.xlane.xlu0 %6461 }
0x18bc   :  { %8830 = vpow2.f32 %v6477_v34  ;;  %v6470_v29 = vsub.f32 %v11298_v48, %v6462_v30  ;;  %5088 = vrot.lane.b32.xlu0 %v7339_v26, %s9005_s8  ;;  %v12282_v48 = vld [vmem:[#allocation189_spill] sm:$0xff]  ;;  %v12287_v34 = vld [vmem:[#allocation166_spill] sm:$0xff] }
0x18bd   :  { %v6453_v58 = vpop.xlane.xlu1 %6452  ;;  %5480 = vrot.lane.b32.xlu1 %v7348_v62, %s8998_s25  ;;  %8832 = vrcp.f32 %v11473_v38  ;;  %v5837_v55 = vmul.f32 %v8811_v35, %v12282_v48  ;;  %v6483_v38 = vmul.f32 1.442695, %v6469_v36  ;;  %v8382_v35 = vld [vmem:[#allocation9 + $0x28] sm:$0xff]  }
0x18be   :  { %v6485_v17 = vmul.f32 1.442695, %v6470_v29  ;;  %v6467_v41 = vsub.f32 %v11292_v44, %v6453_v58  ;;  %8834 = vrcp.f32 %v11461_v33  ;;  %v8817_v44 = vpop.eup %8816 }
0x18bf   :  { %v6456_v3 = vpop.xlane.xlu0 %6455  ;;  %v8819_v49 = vpop.eup %8818  ;;  %v5836_v57 = vmul.f32 %v8817_v44, %v12285_v54 }
0x18c0   :  { %v6479_v42 = vmul.f32 1.442695, %v6467_v41  ;;  %v6468_v20 = vsub.f32 %v11302_v43, %v6456_v3  ;;  %5092 = vrot.lane.b32.xlu0 %v7341_v6, %s9005_s8  ;;  %8836 = vpow2.f32 %v6485_v17  ;;  %v7356_v43 = vpack.c.bf16 %v5837_v55, %v5837_v55  ;;  %v8821_v47 = vpop.eup %8820  ;;  %v8383_v55 = vld [vmem:[#allocation9 + $0x20] sm:$0xff]  }
0x18c1   :  { %v2022_v21 = vpop.permute.xlu1 %2021  ;;  %5484 = vrot.lane.b32.xlu1 %v7350_v5, %s8998_s25  ;;  %v8823_v33 = vpop.eup %8822  ;;  %v6227_v27 = vmul.f32 %v8821_v47, %v11249_v9  ;;  %v7355_v9 = vpack.c.bf16 %v5836_v57, %v5836_v57  ;;  %v5838_v15 = vmul.f32 %v8819_v49, %v12286_v56 }
0x18c2   :  { %v6481_v16 = vmul.f32 1.442695, %v6468_v20  ;;  %2045 = vst.msk [vmem:[#allocation3 + $0x4] sm:$0xf] %vm2043_vm5, %v2022_v21  ;;  %8838 = vpow2.f32 %v6479_v42  ;;  %v6229_v26 = vmul.f32 %v8823_v33, %v12287_v34 }
0x18c3   :  { %v2020_v7 = vpop.permute.xlu0 %2019  ;;  %v7364_v59 = vpack.c.bf16 %v6227_v27, %v6227_v27  ;;  %v7357_v62 = vpack.c.bf16 %v5838_v15, %v5838_v15 }
0x18c4   :  { %8840 = vpow2.f32 %v6481_v16  ;;  %2044 = vst.msk [vmem:[#allocation3] sm:$0xf] %vm2043_vm5, %v2020_v7  ;;  %5478 = vrot.lane.b32.xlu0 %v7347_v45, %s8998_s25  ;;  %v7366_v58 = vpack.c.bf16 %v6229_v26, %v6229_v26  ;;  %v8385_v16 = vld [vmem:[#allocation9 + $0x10] sm:$0xff]  }
0x18c5   :  { %8842 = vpow2.f32 %v6483_v38  ;;  %v2026_v10 = vpop.permute.xlu1 %2025  ;;  %5870 = vrot.lane.b32.xlu1 %v7356_v43, %s9004_s7  ;;  %v11538_v60 = vpop.eup %8824  ;;  %v8384_v38 = vld [vmem:[#allocation9 + $0x18] sm:$0xff]   ;;  %v8387_v43 = vld [vmem:[#allocation9] sm:$0xff]  }
0x18c6   :  { %2047 = vst.msk [vmem:[#allocation3 + $0xc] sm:$0xf] %vm2043_vm5, %v2026_v10 }
0x18c7   :  { %v11542_v11 = vpop.eup %8826  ;;  %v2024_v4 = vpop.permute.xlu0 %2023 }
0x18c8   :  { %v11545_v46 = vpop.eup %8828  ;;  %2046 = vst.msk [vmem:[#allocation3 + $0x8] sm:$0xf] %vm2043_vm5, %v2024_v4  ;;  %5482 = vrot.lane.b32.xlu0 %v7349_v25, %s8998_s25  ;;  %v6511_v23 = vpack.c.bf16 %v11542_v11, %v11538_v60 }
0x18c9   :  { %v11551_v37 = vpop.eup %8830  ;;  %v2413_v52 = vpop.permute.xlu1 %2412  ;;  %5874 = vrot.lane.b32.xlu1 %v7358_v0, %s9004_s7  ;;  %v6493_v27 = vsel %vm668_vm1, %v11545_v46, 0.0 }
0x18ca   :  { %v6512_v40 = vpack.c.bf16 %v11551_v37, %v11545_v46  ;;  %2436 = vst.msk [vmem:[#allocation3 + $0x4] sm:$0xf] %vm2434_vm6, %v2413_v52  ;;  %8203 = vmatprep.mubr.msk.bf16.mxu0 %vm668_vm1, %v6511_v23  ;;  %v8833_v63 = vpop.eup %8832  ;;  %v6496_v52 = vsel %vm668_vm1, %v11551_v37, 0.0  ;;  %v6490_v46 = vsel %vm668_vm1, %v11542_v11, 0.0 }
0x18cb   :  { %v2411_v19 = vpop.permute.xlu0 %2410  ;;  %v8835_v30 = vpop.eup %8834  ;;  %v6226_v28 = vmul.f32 %v8833_v63, %v12288_v39 }
0x18cc   :  { %2435 = vst.msk [vmem:[#allocation3] sm:$0xf] %vm2434_vm6, %v2411_v19  ;;  %5868 = vrot.lane.b32.xlu0 %v7355_v9, %s9004_s7  ;;  %8204 = vmatmul.mubr.msk.bf16.vlgmr.msra.gmra.mxu0 %vm668_vm1, %v6512_v40  ;;  %v6228_v3 = vmul.f32 %v8835_v30, %v12289_v31  ;;  %v6487_v9 = vsel %vm668_vm1, %v11538_v60, 0.0 }
0x18cd   :  { %v2417_v13 = vpop.permute.xlu1 %2416  ;;  %6260 = vrot.lane.b32.xlu1 %v7364_v59, %s9003_s2  ;;  %8212 = vmatpush3.bf16.msra.mxu0 %v11336_v53  ;;  %v11567_v29 = vpop.eup %8836  ;;  %v7363_v18 = vpack.c.bf16 %v6226_v28, %v6226_v28  ;;  %v12291_v59 = vld [vmem:[#allocation103_spill] sm:$0xff]  ;;  %v12294_v28 = vld [vmem:[#allocation104_spill] sm:$0xff] }
0x18ce   :  { %2438 = vst.msk [vmem:[#allocation3 + $0xc] sm:$0xf] %vm2434_vm6, %v2417_v13  ;;  %8213 = vmatprep.subr.bf16.mxu0 %v8381_v12  ;;  %v7365_v42 = vpack.c.bf16 %v6228_v3, %v6228_v3  ;;  %v6508_v60 = vsel %vm668_vm1, %v11567_v29, 0.0  ;;  %v12292_v13 = vld [vmem:[#allocation94_spill] sm:$0xff]  ;;  %v12299_v3 = vld [vmem:[#allocation129_spill] sm:$0xff] }
0x18cf   :  { %v2415_v36 = vpop.permute.xlu0 %2414  ;;  %v11569_v6 = vpop.eup %8838 }
0x18d0   :  { %2437 = vst.msk [vmem:[#allocation3 + $0x8] sm:$0xf] %vm2434_vm6, %v2415_v36  ;;  %5872 = vrot.lane.b32.xlu0 %v7357_v62, %s9004_s7  ;;  %v6499_v11 = vsel %vm668_vm1, %v11569_v6, 0.0  ;;  %v12293_v62 = vld [vmem:[#allocation57_spill] sm:$0xff] }
0x18d1   :  { %v11573_v53 = vpop.eup %8840  ;;  %v2804_v17 = vpop.permute.xlu1 %2803  ;;  %6264 = vrot.lane.b32.xlu1 %v7366_v58, %s9003_s2  ;;  %8214 = vmatpush3.bf16.msra.mxu0 %v8381_v12  ;;  %v12290_v12 = vld [vmem:[#allocation30_spill] sm:$0xff] }
0x18d2   :  { %v11576_v41 = vpop.eup %8842  ;;  %2827 = vst.msk [vmem:[#allocation3 + $0x4] sm:$0xf] %vm2825_vm7, %v2804_v17  ;;  %v6513_v51 = vpack.c.bf16 %v11573_v53, %v11569_v6  ;;  %8215 = vmatprep.subr.bf16.mxu0 %v8382_v35  ;;  %8844 = vrcp.f32 %v12290_v12  ;;  %v6502_v26 = vsel %vm668_vm1, %v11573_v53, 0.0  ;;  %v12296_v6 = vld [vmem:[#allocation106_spill] sm:$0xff]  ;;  %v12297_v17 = vld [vmem:[#allocation131_spill] sm:$0xff]  ;;  %v12311_v12 = vld [vmem:[#allocation157_spill] sm:$0xff] }
0x18d3   :  { %v2802_v5 = vpop.permute.xlu0 %2801  ;;  %v6514_v48 = vpack.c.bf16 %v11567_v29, %v11576_v41  ;;  %v6505_v37 = vsel %vm668_vm1, %v11576_v41, 0.0  ;;  %8846 = vrcp.f32 %v12291_v59  ;;  %v12295_v29 = vld [vmem:[#allocation59_spill] sm:$0xff] }
0x18d4   :  { %2826 = vst.msk [vmem:[#allocation3] sm:$0xf] %vm2825_vm7, %v2802_v5  ;;  %6258 = vrot.lane.b32.xlu0 %v7363_v18, %s9003_s2  ;;  %8207 = vmatprep.mubr.msk.bf16.mxu0 %vm668_vm1, %v6513_v51  ;;  %8848 = vrcp.f32 %v12292_v13  ;;  %v12298_v41 = vld [vmem:[#allocation143_spill] sm:$0xff]  ;;  %v12314_v13 = vld [vmem:[#allocation144_spill] sm:$0xff] }
0x18d5   :  { %v2808_v61 = vpop.permute.xlu1 %2807  ;;  %8208 = vmatmul.mubr.msk.bf16.gmra.mxu0 %vm668_vm1, %v6514_v48  ;;  %8850 = vrcp.f32 %v12293_v62  ;;  %v12313_v59 = vld [vmem:[#allocation175_spill] sm:$0xff] }
0x18d6   :  { %2829 = vst.msk [vmem:[#allocation3 + $0xc] sm:$0xf] %vm2825_vm7, %v2808_v61  ;;  %8216 = vmatpush3.bf16.msra.mxu0 %v8382_v35  ;;  %8852 = vrcp.f32 %v12294_v28 }
0x18d7   :  { %v2806_v20 = vpop.permute.xlu0 %2805  ;;  %8217 = vmatprep.subr.bf16.mxu0 %v8383_v55  ;;  %8854 = vrcp.f32 %v12295_v29  ;;  %v12316_v29 = vld [vmem:[#allocation93_spill] sm:$0xff] }
0x18d8   :  { %2828 = vst.msk [vmem:[#allocation3 + $0x8] sm:$0xf] %vm2825_vm7, %v2806_v20  ;;  %6262 = vrot.lane.b32.xlu0 %v7365_v42, %s9003_s2  ;;  %8856 = vrcp.f32 %v12296_v6  ;;  %v12301_v42 = vld [vmem:[#allocation142_spill] sm:$0xff] }
0x18d9   :  { %v3195_v21 = vpop.permute.xlu1 %3194  ;;  %8858 = vrcp.f32 %v12297_v17 }
0x18da   :  { %3218 = vst.msk [vmem:[#allocation3 + $0x4] sm:$0xf] %vm3216_vm8, %v3195_v21  ;;  %8218 = vmatpush3.bf16.msra.mxu0 %v8383_v55  ;;  %8860 = vrcp.f32 %v12299_v3  ;;  %v12300_v55 = vld [vmem:[#allocation71_spill] sm:$0xff]  ;;  %v12319_v3 = vld [vmem:[#allocation173_spill] sm:$0xff] }
0x18db   :  { %v3193_v44 = vpop.permute.xlu0 %3192  ;;  %8219 = vmatprep.subr.bf16.mxu0 %v8384_v38  ;;  %8862 = vrcp.f32 %v12300_v55 }
0x18dc   :  { %3217 = vst.msk [vmem:[#allocation3] sm:$0xf] %vm3216_vm8, %v3193_v44  ;;  %v12302_v44 = vld [vmem:[#allocation134_spill] sm:$0xff] }
0x18dd   :  { %v3199_v45 = vpop.permute.xlu1 %3198  ;;  %8864 = vrcp.f32 %v12302_v44 }
0x18de   :  { %3220 = vst.msk [vmem:[#allocation3 + $0xc] sm:$0xf] %vm3216_vm8, %v3199_v45  ;;  %8220 = vmatpush3.bf16.msra.mxu0 %v8384_v38  ;;  %v12303_v45 = vld [vmem:[#allocation141_spill] sm:$0xff] }
0x18df   :  { %v3197_v24 = vpop.permute.xlu0 %3196  ;;  %8221 = vmatprep.subr.bf16.mxu0 %v8385_v16  ;;  %v8845_v36 = vpop.eup %8844 }
0x18e0   :  { %3219 = vst.msk [vmem:[#allocation3 + $0x8] sm:$0xf] %vm3216_vm8, %v3197_v24  ;;  %v4281_v18 = vmul.f32 %v8845_v36, %v12298_v41  ;;  %v8847_v51 = vpop.eup %8846  ;;  %v12318_v41 = vld [vmem:[#allocation150_spill] sm:$0xff] }
0x18e1   :  { %v3586_v49 = vpop.permute.xlu1 %3585  ;;  %v8849_v48 = vpop.eup %8848  ;;  %v4283_v20 = vmul.f32 %v8847_v51, %v12301_v42 }
0x18e2   :  { %3609 = vst.msk [vmem:[#allocation3 + $0x4] sm:$0xf] %vm3607_vm9, %v3586_v49  ;;  %8222 = vmatpush3.bf16.msra.mxu0 %v8385_v16  ;;  %v7328_v61 = vpack.c.bf16 %v4281_v18, %v4281_v18  ;;  %v8851_v38 = vpop.eup %8850  ;;  %v4280_v24 = vmul.f32 %v8849_v48, %v12303_v45  ;;  %v12304_v49 = vld [vmem:[#allocation73_spill] sm:$0xff] }
0x18e3   :  { %v3584_v7 = vpop.permute.xlu0 %3583  ;;  %8223 = vmatprep.subr.bf16.mxu0 %v8386_v32  ;;  %8866 = vrcp.f32 %v12304_v49 }
0x18e4   :  { %3608 = vst.msk [vmem:[#allocation3] sm:$0xf] %vm3607_vm9, %v3584_v7  ;;  %v7330_v7 = vpack.c.bf16 %v4283_v20, %v4283_v20 }
0x18e5   :  { %v3590_v14 = vpop.permute.xlu1 %3589 }
0x18e6   :  { %3611 = vst.msk [vmem:[#allocation3 + $0xc] sm:$0xf] %vm3607_vm9, %v3590_v14  ;;  %8224 = vmatpush3.bf16.msra.mxu0 %v8386_v32  ;;  %v8853_v32 = vpop.eup %8852 }
0x18e7   :  { %v3588_v8 = vpop.permute.xlu0 %3587  ;;  %8225 = vmatprep.subr.bf16.mxu0 %v8387_v43 }
0x18e8   :  { %3610 = vst.msk [vmem:[#allocation3 + $0x8] sm:$0xf] %vm3607_vm9, %v3588_v8  ;;  %v8855_v8 = vpop.eup %8854 }
0x18e9   :  { %v1248_v47 = vpop.permute.xlu1 %1247 }
0x18ea   :  { %1267 = vst.msk [vmem:[#allocation3 + $0x14] sm:$0xf] %vm1261_vm3, %v1248_v47  ;;  %8226 = vmatpush3.bf16.msra.mxu0 %v8387_v43  ;;  %v12305_v43 = vld [vmem:[#allocation159_spill] sm:$0xff] }
0x18eb   :  { %v1246_v33 = vpop.permute.xlu0 %1245  ;;  %v8388_v10 = vld [vmem:[#allocation3] sm:$0xff]   ;;  %v4671_v14 = vmul.f32 %v8851_v38, %v12305_v43 }
0x18ec   :  { %1266 = vst.msk [vmem:[#allocation3 + $0x10] sm:$0xf] %vm1261_vm3, %v1246_v33  ;;  %8227 = vmatprep.mubr.bf16.mxu0 %v8388_v10  ;;  %v12306_v33 = vld [vmem:[#allocation130_spill] sm:$0xff] }
0x18ed   :  { %v1252_v25 = vpop.permute.xlu1 %1251  ;;  %8868 = vrcp.f32 %v12306_v33 }
0x18ee   :  { %1269 = vst.msk [vmem:[#allocation3 + $0x1c] sm:$0xf] %vm1261_vm3, %v1252_v25  ;;  %v7327_v25 = vpack.c.bf16 %v4280_v24, %v4280_v24 }
0x18ef   :  { %v1250_v54 = vpop.permute.xlu0 %1249  ;;  %v8389_v57 = vld [vmem:[#allocation3 + $0x8] sm:$0xff]  }
0x18f0   :  { %1268 = vst.msk [vmem:[#allocation3 + $0x18] sm:$0xf] %vm1261_vm3, %v1250_v54  ;;  %8228 = vmatmul.mubr.bf16.vlgmr.msra.gmra.mxu0 %v8389_v57  ;;  %v12307_v54 = vld [vmem:[#allocation140_spill] sm:$0xff] }
0x18f1   :  { %v1639_v4 = vpop.permute.xlu1 %1638  ;;  %v4282_v57 = vmul.f32 %v8853_v32, %v12307_v54 }
0x18f2   :  { %1658 = vst.msk [vmem:[#allocation3 + $0x14] sm:$0xf] %vm1652_vm4, %v1639_v4  ;;  %v8857_v4 = vpop.eup %8856 }
0x18f3   :  { %v1637_v0 = vpop.permute.xlu0 %1636 }
0x18f4   :  { %1657 = vst.msk [vmem:[#allocation3 + $0x10] sm:$0xf] %vm1652_vm4, %v1637_v0  ;;  %v12308_v0 = vld [vmem:[#allocation82_spill] sm:$0xff] }
0x18f5   :  { %v1643_v23 = vpop.permute.xlu1 %1642  ;;  %6494 = vadd.xlane.f32.xlu1 %v6493_v27  ;;  %8870 = vrcp.f32 %v12308_v0  ;;  %v7336_v27 = vpack.c.bf16 %v4671_v14, %v4671_v14 }
0x18f6   :  { %1660 = vst.msk [vmem:[#allocation3 + $0x1c] sm:$0xf] %vm1652_vm4, %v1643_v23  ;;  %v12309_v23 = vld [vmem:[#allocation158_spill] sm:$0xff] }
0x18f7   :  { %6497 = vadd.xlane.f32.xlu0 %v6496_v52  ;;  %v1641_v40 = vpop.permute.xlu0 %1640  ;;  %v4673_v52 = vmul.f32 %v8855_v8, %v12309_v23 }
0x18f8   :  { %1659 = vst.msk [vmem:[#allocation3 + $0x18] sm:$0xf] %vm1652_vm4, %v1641_v40  ;;  %v8859_v40 = vpop.eup %8858 }
0x18f9   :  { %v2030_v56 = vpop.permute.xlu1 %2029  ;;  %6488 = vadd.xlane.f32.xlu1 %v6487_v9 }
0x18fa   :  { %2049 = vst.msk [vmem:[#allocation3 + $0x14] sm:$0xf] %vm2043_vm5, %v2030_v56  ;;  %v12310_v56 = vld [vmem:[#allocation132_spill] sm:$0xff] }
0x18fb   :  { %6491 = vadd.xlane.f32.xlu0 %v6490_v46  ;;  %v2028_v15 = vpop.permute.xlu0 %2027  ;;  %8872 = vrcp.f32 %v12310_v56 }
0x18fc   :  { %2048 = vst.msk [vmem:[#allocation3 + $0x10] sm:$0xf] %vm2043_vm5, %v2028_v15  ;;  %v7329_v15 = vpack.c.bf16 %v4282_v57, %v4282_v57 }
0x18fd   :  { %v2034_v63 = vpop.permute.xlu1 %2033  ;;  %6506 = vadd.xlane.f32.xlu1 %v6505_v37  ;;  %v4670_v37 = vmul.f32 %v8857_v4, %v12311_v12  ;;  %v12325_v4 = vld [vmem:[#allocation193_spill] sm:$0xff] }
0x18fe   :  { %2051 = vst.msk [vmem:[#allocation3 + $0x1c] sm:$0xf] %vm2043_vm5, %v2034_v63  ;;  %v8861_v63 = vpop.eup %8860 }
0x18ff   :  { %6509 = vadd.xlane.f32.xlu0 %v6508_v60  ;;  %v2032_v19 = vpop.permute.xlu0 %2031  ;;  %v12312_v60 = vld [vmem:[#allocation83_spill] sm:$0xff]  ;;  %v7335_v62 = vpack.c.bf16 %v4670_v37, %v4670_v37 }
0x1900   :  { %2050 = vst.msk [vmem:[#allocation3 + $0x18] sm:$0xf] %vm2043_vm5, %v2032_v19  ;;  %8874 = vrcp.f32 %v12312_v60  ;;  %v7338_v19 = vpack.c.bf16 %v4673_v52, %v4673_v52 }
0x1901   :  { %v2421_v34 = vpop.permute.xlu1 %2420  ;;  %6500 = vadd.xlane.f32.xlu1 %v6499_v11  ;;  %v5061_v11 = vmul.f32 %v8859_v40, %v12313_v59  ;;  %8876 = vrcp.f32 %v12314_v13  ;;  %v12326_v40 = vld [vmem:[#allocation181_spill] sm:$0xff]  ;;  %v12328_v59 = vld [vmem:[#allocation191_spill] sm:$0xff] }
0x1902   :  { %2440 = vst.msk [vmem:[#allocation3 + $0x14] sm:$0xf] %vm2434_vm6, %v2421_v34  ;;  %v8863_v34 = vpop.eup %8862  ;;  %8878 = vrcp.f32 %v12316_v29  ;;  %v12329_v13 = vld [vmem:[#allocation133_spill] sm:$0xff] }
0x1903   :  { %6503 = vadd.xlane.f32.xlu0 %v6502_v26  ;;  %v2419_v30 = vpop.permute.xlu0 %2418  ;;  %v7344_v36 = vpack.c.bf16 %v5061_v11, %v5061_v11  ;;  %8880 = vrcp.f32 %v12318_v41  ;;  %v12331_v41 = vld [vmem:[#allocation164_spill] sm:$0xff] }
0x1904   :  { %2439 = vst.msk [vmem:[#allocation3 + $0x10] sm:$0xf] %vm2434_vm6, %v2419_v30  ;;  %8882 = vrcp.f32 %v11485_v2  ;;  %v12322_v2 = vld [vmem:[#allocation172_spill] sm:$0xff] }
0x1905   :  { %v2425_v39 = vpop.permute.xlu1 %2424 }
0x1906   :  { %2442 = vst.msk [vmem:[#allocation3 + $0x1c] sm:$0xf] %vm2434_vm6, %v2425_v39  ;;  %v12315_v39 = vld [vmem:[#allocation156_spill] sm:$0xff] }
0x1907   :  { %v2423_v35 = vpop.permute.xlu0 %2422  ;;  %v4672_v28 = vmul.f32 %v8861_v63, %v12315_v39 }
0x1908   :  { %2441 = vst.msk [vmem:[#allocation3 + $0x18] sm:$0xf] %vm2434_vm6, %v2423_v35  ;;  %v8865_v35 = vpop.eup %8864 }
0x1909   :  { %v2812_v58 = vpop.permute.xlu1 %2811  ;;  %v7337_v51 = vpack.c.bf16 %v4672_v28, %v4672_v28 }
0x190a   :  { %2831 = vst.msk [vmem:[#allocation3 + $0x14] sm:$0xf] %vm2825_vm7, %v2812_v58  ;;  %v12317_v58 = vld [vmem:[#allocation174_spill] sm:$0xff] }
0x190b   :  { %v2810_v53 = vpop.permute.xlu0 %2809  ;;  %v5063_v6 = vmul.f32 %v8863_v34, %v12317_v58 }
0x190c   :  { %2830 = vst.msk [vmem:[#allocation3 + $0x10] sm:$0xf] %vm2825_vm7, %v2810_v53  ;;  %v8867_v53 = vpop.eup %8866 }
0x190d   :  { %v2816_v31 = vpop.permute.xlu1 %2815  ;;  %v8869_v48 = vpop.eup %8868  ;;  %v7346_v55 = vpack.c.bf16 %v5063_v6, %v5063_v6 }
0x190e   :  { %2833 = vst.msk [vmem:[#allocation3 + $0x1c] sm:$0xf] %vm2825_vm7, %v2816_v31  ;;  %v8871_v20 = vpop.eup %8870  ;;  %v5062_v24 = vmul.f32 %v8869_v48, %v12322_v2 }
0x190f   :  { %v2814_v5 = vpop.permute.xlu0 %2813  ;;  %v8873_v32 = vpop.eup %8872 }
0x1910   :  { %2832 = vst.msk [vmem:[#allocation3 + $0x18] sm:$0xf] %vm2825_vm7, %v2814_v5  ;;  %v5060_v5 = vmul.f32 %v8865_v35, %v12319_v3  ;;  %v8875_v14 = vpop.eup %8874  ;;  %v7345_v33 = vpack.c.bf16 %v5062_v24, %v5062_v24  ;;  %v12330_v35 = vld [vmem:[#allocation190_spill] sm:$0xff] }
0x1911   :  { %v3203_v21 = vpop.permute.xlu1 %3202  ;;  %v8877_v54 = vpop.eup %8876  ;;  %v5841_v0 = vmul.f32 %v8875_v14, %v12325_v4 }
0x1912   :  { %3222 = vst.msk [vmem:[#allocation3 + $0x14] sm:$0xf] %vm3216_vm8, %v3203_v21  ;;  %4318 = vrot.lane.b32.xlu1 %v7328_v61, %s9007_s10  ;;  %v12320_v61 = vld [vmem:[#allocation184_spill] sm:$0xff]  ;;  %v12321_v21 = vld [vmem:[#allocation146_spill] sm:$0xff] }
0x1913   :  { %v3201_v16 = vpop.permute.xlu0 %3200  ;;  %v5451_v42 = vmul.f32 %v8867_v53, %v12320_v61  ;;  %8884 = vrcp.f32 %v12321_v21 }
0x1914   :  { %3221 = vst.msk [vmem:[#allocation3 + $0x10] sm:$0xf] %vm3216_vm8, %v3201_v16  ;;  %v7343_v16 = vpack.c.bf16 %v5060_v5, %v5060_v5  ;;  %8886 = vrcp.f32 %v11497_v50 }
0x1915   :  { %v3207_v47 = vpop.permute.xlu1 %3206  ;;  %v7352_v49 = vpack.c.bf16 %v5451_v42, %v5451_v42 }
0x1916   :  { %3224 = vst.msk [vmem:[#allocation3 + $0x1c] sm:$0xf] %vm3216_vm8, %v3207_v47  ;;  %4322 = vrot.lane.b32.xlu1 %v7330_v7, %s9007_s10  ;;  %v12323_v7 = vld [vmem:[#allocation183_spill] sm:$0xff] }
0x1917   :  { %v3205_v10 = vpop.permute.xlu0 %3204  ;;  %v5453_v43 = vmul.f32 %v8871_v20, %v12323_v7 }
0x1918   :  { %3223 = vst.msk [vmem:[#allocation3 + $0x18] sm:$0xf] %vm3216_vm8, %v3205_v10  ;;  %v12324_v10 = vld [vmem:[#allocation182_spill] sm:$0xff] }
0x1919   :  { %v3594_v9 = vpop.permute.xlu1 %3593  ;;  %4316 = vrot.lane.b32.xlu0 %v7327_v25, %s9007_s10  ;;  %v5450_v25 = vmul.f32 %v8873_v32, %v12324_v10  ;;  %v7354_v57 = vpack.c.bf16 %v5453_v43, %v5453_v43 }
0x191a   :  { %3613 = vst.msk [vmem:[#allocation3 + $0x14] sm:$0xf] %vm3607_vm9, %v3594_v9  ;;  %4708 = vrot.lane.b32.xlu1 %v7336_v27, %s9006_s9  ;;  %v8879_v27 = vpop.eup %8878  ;;  %v5452_v9 = vmul.f32 %v8877_v54, %v12326_v40 }
0x191b   :  { %v3592_v46 = vpop.permute.xlu0 %3591  ;;  %v7351_v50 = vpack.c.bf16 %v5450_v25, %v5450_v25  ;;  %v8881_v56 = vpop.eup %8880 }
0x191c   :  { %3612 = vst.msk [vmem:[#allocation3 + $0x10] sm:$0xf] %vm3607_vm9, %v3592_v46  ;;  %v7360_v46 = vpack.c.bf16 %v5841_v0, %v5841_v0  ;;  %v8883_v37 = vpop.eup %8882  ;;  %v5840_v11 = vmul.f32 %v8881_v56, %v12328_v59  ;;  %v12332_v56 = vld [vmem:[#allocation162_spill] sm:$0xff] }
0x191d   :  { %v3598_v26 = vpop.permute.xlu1 %3597  ;;  %4320 = vrot.lane.b32.xlu0 %v7329_v15, %s9007_s10  ;;  %v12327_v15 = vld [vmem:[#allocation192_spill] sm:$0xff] }
0x191e   :  { %3615 = vst.msk [vmem:[#allocation3 + $0x1c] sm:$0xf] %vm3607_vm9, %v3598_v26  ;;  %4712 = vrot.lane.b32.xlu1 %v7338_v19, %s9006_s9  ;;  %v5843_v12 = vmul.f32 %v8879_v27, %v12327_v15  ;;  %v7353_v19 = vpack.c.bf16 %v5452_v9, %v5452_v9  ;;  %v7359_v28 = vpack.c.bf16 %v5840_v11, %v5840_v11 }
0x191f   :  { %v3596_v30 = vpop.permute.xlu0 %3595 }
0x1920   :  { %3614 = vst.msk [vmem:[#allocation3 + $0x18] sm:$0xf] %vm3607_vm9, %v3596_v30  ;;  %v8885_v34 = vpop.eup %8884  ;;  %v7362_v26 = vpack.c.bf16 %v5843_v12, %v5843_v12  ;;  %v6231_v30 = vmul.f32 %v8883_v37, %v12329_v13 }
0x1921   :  { %v4311_v17 = vpop.permute.xlu1 %4310  ;;  %4706 = vrot.lane.b32.xlu0 %v7335_v62, %s9006_s9  ;;  %v5842_v29 = vmul.f32 %v8885_v34, %v12330_v35  ;;  %v12333_v34 = vld [vmem:[#allocation176_spill] sm:$0xff] }
0x1922   :  { %4333 = vst.msk [vmem:[#allocation3 + $0x24] sm:$0xf] %vm1261_vm3, %v4311_v17  ;;  %5098 = vrot.lane.b32.xlu1 %v7344_v36, %s9005_s8  ;;  %v8887_v36 = vpop.eup %8886  ;;  %v7368_v58 = vpack.c.bf16 %v6231_v30, %v6231_v30 }
0x1923   :  { %v4309_v18 = vpop.permute.xlu0 %4308  ;;  %v8390_v31 = vld [vmem:[#allocation3 + $0x10] sm:$0xff]   ;;  %v7361_v17 = vpack.c.bf16 %v5842_v29, %v5842_v29 }
0x1924   :  { %4332 = vst.msk [vmem:[#allocation3 + $0x20] sm:$0xf] %vm1261_vm3, %v4309_v18  ;;  %8231 = vmatprep.mubr.bf16.mxu0 %v8390_v31  ;;  %v6230_v18 = vmul.f32 %v8887_v36, %v12331_v41 }
0x1925   :  { %v4315_v38 = vpop.permute.xlu1 %4314  ;;  %4710 = vrot.lane.b32.xlu0 %v7337_v51, %s9006_s9 }
0x1926   :  { %4335 = vst.msk [vmem:[#allocation3 + $0x2c] sm:$0xf] %vm1261_vm3, %v4315_v38  ;;  %5102 = vrot.lane.b32.xlu1 %v7346_v55, %s9005_s8  ;;  %v7367_v3 = vpack.c.bf16 %v6230_v18, %v6230_v18 }
0x1927   :  { %v4313_v44 = vpop.permute.xlu0 %4312  ;;  %v8391_v45 = vld [vmem:[#allocation3 + $0x18] sm:$0xff]  }
0x1928   :  { %4334 = vst.msk [vmem:[#allocation3 + $0x28] sm:$0xf] %vm1261_vm3, %v4313_v44  ;;  %8232 = vmatmul.mubr.bf16.gmra.mxu0 %v8391_v45 }
0x1929   :  { %v4701_v8 = vpop.permute.xlu1 %4700  ;;  %5096 = vrot.lane.b32.xlu0 %v7343_v16, %s9005_s8 }
0x192a   :  { %4723 = vst.msk [vmem:[#allocation3 + $0x24] sm:$0xf] %vm1652_vm4, %v4701_v8  ;;  %5488 = vrot.lane.b32.xlu1 %v7352_v49, %s8998_s25 }
0x192b   :  { %v4699_v47 = vpop.permute.xlu0 %4698 }
0x192c   :  { %4722 = vst.msk [vmem:[#allocation3 + $0x20] sm:$0xf] %vm1652_vm4, %v4699_v47 }
0x192d   :  { %v4705_v23 = vpop.permute.xlu1 %4704  ;;  %5100 = vrot.lane.b32.xlu0 %v7345_v33, %s9005_s8 }
0x192e   :  { %4725 = vst.msk [vmem:[#allocation3 + $0x2c] sm:$0xf] %vm1652_vm4, %v4705_v23  ;;  %5492 = vrot.lane.b32.xlu1 %v7354_v57, %s8998_s25 }
0x192f   :  { %v4703_v52 = vpop.permute.xlu0 %4702 }
0x1930   :  { %4724 = vst.msk [vmem:[#allocation3 + $0x28] sm:$0xf] %vm1652_vm4, %v4703_v52 }
0x1931   :  { %v5091_v63 = vpop.permute.xlu1 %5090  ;;  %5486 = vrot.lane.b32.xlu0 %v7351_v50, %s8998_s25 }
0x1932   :  { %5113 = vst.msk [vmem:[#allocation3 + $0x24] sm:$0xf] %vm2043_vm5, %v5091_v63  ;;  %5878 = vrot.lane.b32.xlu1 %v7360_v46, %s9004_s7 }
0x1933   :  { %v5089_v60 = vpop.permute.xlu0 %5088 }
0x1934   :  { %5112 = vst.msk [vmem:[#allocation3 + $0x20] sm:$0xf] %vm2043_vm5, %v5089_v60 }
0x1935   :  { %v5095_v62 = vpop.permute.xlu1 %5094  ;;  %5490 = vrot.lane.b32.xlu0 %v7353_v19, %s8998_s25 }
0x1936   :  { %5115 = vst.msk [vmem:[#allocation3 + $0x2c] sm:$0xf] %vm2043_vm5, %v5095_v62  ;;  %5882 = vrot.lane.b32.xlu1 %v7362_v26, %s9004_s7 }
0x1937   :  { %v5093_v39 = vpop.permute.xlu0 %5092 }
0x1938   :  { %5114 = vst.msk [vmem:[#allocation3 + $0x28] sm:$0xf] %vm2043_vm5, %v5093_v39 }
0x1939   :  { %v5481_v6 = vpop.permute.xlu1 %5480  ;;  %5876 = vrot.lane.b32.xlu0 %v7359_v28, %s9004_s7 }
0x193a   :  { %5503 = vst.msk [vmem:[#allocation3 + $0x24] sm:$0xf] %vm2434_vm6, %v5481_v6  ;;  %6268 = vrot.lane.b32.xlu1 %v7368_v58, %s9003_s2 }
0x193b   :  { %v5479_v53 = vpop.permute.xlu0 %5478 }
0x193c   :  { %5502 = vst.msk [vmem:[#allocation3 + $0x20] sm:$0xf] %vm2434_vm6, %v5479_v53 }
0x193d   :  { %v5485_v51 = vpop.permute.xlu1 %5484  ;;  %5880 = vrot.lane.b32.xlu0 %v7361_v17, %s9004_s7 }
0x193e   :  { %5505 = vst.msk [vmem:[#allocation3 + $0x2c] sm:$0xf] %vm2434_vm6, %v5485_v51 }
0x193f   :  { %v5483_v31 = vpop.permute.xlu0 %5482 }
0x1940   :  { %5504 = vst.msk [vmem:[#allocation3 + $0x28] sm:$0xf] %vm2434_vm6, %v5483_v31 }
0x1941   :  { %v5871_v5 = vpop.permute.xlu1 %5870  ;;  %6266 = vrot.lane.b32.xlu0 %v7367_v3, %s9003_s2 }
0x1942   :  { %5893 = vst.msk [vmem:[#allocation3 + $0x24] sm:$0xf] %vm2825_vm7, %v5871_v5 }
0x1943   :  { %v5869_v48 = vpop.permute.xlu0 %5868 }
0x1944   :  { %5892 = vst.msk [vmem:[#allocation3 + $0x20] sm:$0xf] %vm2825_vm7, %v5869_v48 }
0x1945   :  { %v5875_v55 = vpop.permute.xlu1 %5874 }
0x1946   :  { %5895 = vst.msk [vmem:[#allocation3 + $0x2c] sm:$0xf] %vm2825_vm7, %v5875_v55 }
0x1947   :  { %v5873_v61 = vpop.permute.xlu0 %5872 }
0x1948   :  { %5894 = vst.msk [vmem:[#allocation3 + $0x28] sm:$0xf] %vm2825_vm7, %v5873_v61 }
0x1949   :  { %v6261_v42 = vpop.permute.xlu1 %6260 }
0x194a   :  { %6283 = vst.msk [vmem:[#allocation3 + $0x24] sm:$0xf] %vm3216_vm8, %v6261_v42 }
0x194b   :  { %v6259_v20 = vpop.permute.xlu0 %6258 }
0x194c   :  { %6282 = vst.msk [vmem:[#allocation3 + $0x20] sm:$0xf] %vm3216_vm8, %v6259_v20 }
0x194d   :  { %v6265_v38 = vpop.permute.xlu1 %6264 }
0x194e   :  { %6285 = vst.msk [vmem:[#allocation3 + $0x2c] sm:$0xf] %vm3216_vm8, %v6265_v38 }
0x194f   :  { %v6263_v21 = vpop.permute.xlu0 %6262 }
0x1950   :  { %6284 = vst.msk [vmem:[#allocation3 + $0x28] sm:$0xf] %vm3216_vm8, %v6263_v21 }
0x197e   :  { %v6495_v44 = vpop.xlane.xlu1 %6494 }
0x197f   :  { %8888 = vrcp.f32 %v6495_v44 }
0x1980   :  { %v6498_v16 = vpop.xlane.xlu0 %6497  ;;  %8890 = vrcp.f32 %v11487_v1 }
0x1981   :  { %8892 = vrcp.f32 %v6498_v16  ;;  %v11767_v16 = vld [vmem:[%s11806_s3] ss:$0 sm:$0xff]  ;;  %s9008_s3 = smov [#allocation10]  }
0x1982   :  { %v6489_v45 = vpop.xlane.xlu1 %6488  ;;  %s6933_s13 = sshll.u32 %s9008_s3, 4  ;;  %s6934_s13 = int_to_ptr.vmem [resolvable:$true] %s6933_s13 }
0x1983   :  { %8894 = vrcp.f32 %v6489_v45  ;;  %s8968_s14 = scalar_lea.vmem %s6934_s13, 2048  ;;  %p8973_p2 = scmp.lt.s32.totalorder %s6934_s13, %s6934_s13 }
0x1984   :  { %v6492_v2 = vpop.xlane.xlu0 %6491  ;;  %p8969_p1 = scmp.ne.s32.totalorder %s6934_s13, %s8968_s14  ;;  %p8974_p3 = scmp.lt.s32.totalorder %s8968_s14, %s8968_s14 }
0x1985   :  { %8896 = vrcp.f32 %v6492_v2 }
0x1986   :  { %v6507_v24 = vpop.xlane.xlu1 %6506  ;;  %8898 = vrcp.f32 %v11471_v22  ;;  %p8975_p4 = por %p8974_p3, %p8973_p2 }
0x1987   :  { %8900 = vrcp.f32 %v6507_v24 }
0x1988   :  { %v6510_v32 = vpop.xlane.xlu0 %6509  ;;  %p8976_p5 = pnand %p8975_p4, %p8969_p1 }
0x198a   :  { %v6501_v49 = vpop.xlane.xlu1 %6500 }
0x198b   :  { %8902 = vrcp.f32 %v6501_v49 }
0x198c   :  { %v8889_v7 = vpop.eup %8888  ;;  %v8205_v43 = vpop.f32.mrf.mxu0 }
0x198d   :  { %v6504_v14 = vpop.xlane.xlu0 %6503  ;;  %v6618_v8 = vmul.f32 %v8889_v7, %v8205_v43  ;;  %v8891_v47 = vpop.eup %8890 }
0x198e   :  { %8904 = vrcp.f32 %v6504_v14  ;;  %v4319_v33 = vpop.permute.xlu1 %4318  ;;  %v6577_v1 = vpop.f32.mrf.mxu0  ;;  %v6232_v46 = vmul.f32 %v8891_v47, %v12332_v56 }
0x198f   :  { %v8893_v10 = vpop.eup %8892  ;;  %v7373_v25 = vpack.c.bf16 %v6618_v8, %v6618_v8  ;;  %4337 = vst.msk [vmem:[#allocation3 + $0x34] sm:$0xf] %vm1261_vm3, %v4319_v33  ;;  %8906 = vrcp.f32 %v6510_v32 }
0x1990   :  { %v8895_v54 = vpop.eup %8894  ;;  %v8206_v57 = vpop.f32.mrf.mxu0  ;;  %v7369_v11 = vpack.c.bf16 %v6232_v46, %v6232_v46 }
0x1991   :  { %v4317_v4 = vpop.permute.xlu0 %4316  ;;  %v6616_v22 = vmul.f32 %v8895_v54, %v6577_v1  ;;  %v6619_v0 = vmul.f32 %v8893_v10, %v8206_v57  ;;  %6652 = vrot.lane.b32.xlu0 %v7373_v25, %s9002_s0 }
0x1992   :  { %4336 = vst.msk [vmem:[#allocation3 + $0x30] sm:$0xf] %vm1261_vm3, %v4317_v4  ;;  %v8897_v27 = vpop.eup %8896  ;;  %v4323_v23 = vpop.permute.xlu1 %4322 }
0x1993   :  { %v6580_v52 = vpop.f32.mrf.mxu0  ;;  %v7371_v50 = vpack.c.bf16 %v6616_v22, %v6616_v22  ;;  %v7374_v40 = vpack.c.bf16 %v6619_v0, %v6619_v0  ;;  %4339 = vst.msk [vmem:[#allocation3 + $0x3c] sm:$0xf] %vm1261_vm3, %v4323_v23  ;;  %v8899_v15 = vpop.eup %8898 }
0x1994   :  { %v6617_v9 = vmul.f32 %v8897_v27, %v6580_v52  ;;  %v8901_v60 = vpop.eup %8900  ;;  %v6233_v26 = vmul.f32 %v8899_v15, %v12333_v34 }
0x1995   :  { %v4321_v12 = vpop.permute.xlu0 %4320  ;;  %v8209_v37 = vpop.f32.mrf.mxu0  ;;  %6648 = vrot.lane.b32.xlu0 %v7371_v50, %s9002_s0  ;;  %6654 = vrot.lane.b32.xlu1 %v7374_v40, %s9002_s0 }
0x1996   :  { %4338 = vst.msk [vmem:[#allocation3 + $0x38] sm:$0xf] %vm1261_vm3, %v4321_v12  ;;  %v4709_v63 = vpop.permute.xlu1 %4708  ;;  %v7372_v19 = vpack.c.bf16 %v6617_v9, %v6617_v9  ;;  %v6622_v29 = vmul.f32 %v8901_v60, %v8209_v37  ;;  %v7370_v6 = vpack.c.bf16 %v6233_v26, %v6233_v26 }
0x1997   :  { %4727 = vst.msk [vmem:[#allocation3 + $0x34] sm:$0xf] %vm1652_vm4, %v4709_v63  ;;  %v6593_v59 = vpop.f32.mrf.mxu0 }
0x1998   :  { %v8903_v13 = vpop.eup %8902  ;;  %v7377_v31 = vpack.c.bf16 %v6622_v29, %v6622_v29 }
0x1999   :  { %v4707_v30 = vpop.permute.xlu0 %4706  ;;  %v6620_v62 = vmul.f32 %v8903_v13, %v6593_v59  ;;  %v8210_v39 = vpop.f32.mrf.mxu0  ;;  %6270 = vrot.lane.b32.xlu0 %v7369_v11, %s9003_s2  ;;  %6650 = vrot.lane.b32.xlu1 %v7372_v19, %s9002_s0 }
0x199a   :  { %4726 = vst.msk [vmem:[#allocation3 + $0x30] sm:$0xf] %vm1652_vm4, %v4707_v30  ;;  %v4713_v35 = vpop.permute.xlu1 %4712 }
0x199b   :  { %v8905_v28 = vpop.eup %8904  ;;  %v7375_v36 = vpack.c.bf16 %v6620_v62, %v6620_v62  ;;  %4729 = vst.msk [vmem:[#allocation3 + $0x3c] sm:$0xf] %vm1652_vm4, %v4713_v35  ;;  %v6596_v58 = vpop.f32.mrf.mxu0 }
0x199c   :  { %v6621_v53 = vmul.f32 %v8905_v28, %v6596_v58  ;;  %v8907_v41 = vpop.eup %8906 }
0x199d   :  { %v4711_v17 = vpop.permute.xlu0 %4710  ;;  %6656 = vrot.lane.b32.xlu0 %v7375_v36, %s9002_s0  ;;  %6272 = vrot.lane.b32.xlu1 %v7370_v6, %s9003_s2  ;;  %v6623_v3 = vmul.f32 %v8907_v41, %v8210_v39 }
0x199e   :  { %4728 = vst.msk [vmem:[#allocation3 + $0x38] sm:$0xf] %vm1652_vm4, %v4711_v17  ;;  %v7376_v18 = vpack.c.bf16 %v6621_v53, %v6621_v53  ;;  %v5099_v51 = vpop.permute.xlu1 %5098 }
0x199f   :  { %5117 = vst.msk [vmem:[#allocation3 + $0x34] sm:$0xf] %vm2043_vm5, %v5099_v51  ;;  %v7378_v55 = vpack.c.bf16 %v6623_v3, %v6623_v3 }
0x19a1   :  { %v5097_v5 = vpop.permute.xlu0 %5096  ;;  %6660 = vrot.lane.b32.xlu0 %v7377_v31, %s9002_s0  ;;  %6658 = vrot.lane.b32.xlu1 %v7376_v18, %s9002_s0 }
0x19a2   :  { %5116 = vst.msk [vmem:[#allocation3 + $0x30] sm:$0xf] %vm2043_vm5, %v5097_v5  ;;  %v5103_v48 = vpop.permute.xlu1 %5102 }
0x19a3   :  { %5119 = vst.msk [vmem:[#allocation3 + $0x3c] sm:$0xf] %vm2043_vm5, %v5103_v48 }
0x19a5   :  { %v5101_v61 = vpop.permute.xlu0 %5100  ;;  %6662 = vrot.lane.b32.xlu1 %v7378_v55, %s9002_s0 }
0x19a6   :  { %5118 = vst.msk [vmem:[#allocation3 + $0x38] sm:$0xf] %vm2043_vm5, %v5101_v61  ;;  %v5489_v42 = vpop.permute.xlu1 %5488 }
0x19a7   :  { %5507 = vst.msk [vmem:[#allocation3 + $0x34] sm:$0xf] %vm2434_vm6, %v5489_v42 }
0x19a9   :  { %v5487_v20 = vpop.permute.xlu0 %5486 }
0x19aa   :  { %5506 = vst.msk [vmem:[#allocation3 + $0x30] sm:$0xf] %vm2434_vm6, %v5487_v20  ;;  %v5493_v38 = vpop.permute.xlu1 %5492 }
0x19ab   :  { %5509 = vst.msk [vmem:[#allocation3 + $0x3c] sm:$0xf] %vm2434_vm6, %v5493_v38 }
0x19ad   :  { %v5491_v21 = vpop.permute.xlu0 %5490 }
0x19ae   :  { %5508 = vst.msk [vmem:[#allocation3 + $0x38] sm:$0xf] %vm2434_vm6, %v5491_v21  ;;  %v5879_v44 = vpop.permute.xlu1 %5878 }
0x19af   :  { %5897 = vst.msk [vmem:[#allocation3 + $0x34] sm:$0xf] %vm2825_vm7, %v5879_v44 }
0x19b0   :  { %v8229_v2 = vpop.f32.mrf.mxu0 }
0x19b1   :  { %v5877_v45 = vpop.permute.xlu0 %5876  ;;  %v6858_v32 = vadd.f32 %v8229_v2, %v11767_v16 }
0x19b2   :  { %5896 = vst.msk [vmem:[#allocation3 + $0x30] sm:$0xf] %vm2825_vm7, %v5877_v45  ;;  %v5883_v24 = vpop.permute.xlu1 %5882  ;;  %v6849_v49 = vpop.f32.mrf.mxu0 }
0x19b3   :  { %5899 = vst.msk [vmem:[#allocation3 + $0x3c] sm:$0xf] %vm2825_vm7, %v5883_v24  ;;  %6914 = vst [vmem:[#allocation10 + $0x10] sm:$0xff] %v6858_v32  ;;  %v6850_v7 = vadd.f32 %v11767_v16, %v6849_v49 }
0x19b4   :  { %v8230_v14 = vpop.f32.mrf.mxu0 }
0x19b5   :  { %v5881_v43 = vpop.permute.xlu0 %5880  ;;  %6912 = vst [vmem:[#allocation10] sm:$0xff] %v6850_v7  ;;  %v6861_v47 = vadd.f32 %v8230_v14, %v11767_v16 }
0x19b6   :  { %5898 = vst.msk [vmem:[#allocation3 + $0x38] sm:$0xf] %vm2825_vm7, %v5881_v43  ;;  %v6269_v8 = vpop.permute.xlu1 %6268  ;;  %v6852_v33 = vpop.f32.mrf.mxu0 }
0x19b7   :  { %6287 = vst.msk [vmem:[#allocation3 + $0x34] sm:$0xf] %vm3216_vm8, %v6269_v8  ;;  %6915 = vst [vmem:[#allocation10 + $0x18] sm:$0xff] %v6861_v47  ;;  %v6853_v1 = vadd.f32 %v11767_v16, %v6852_v33 }
0x19b9   :  { %v6267_v10 = vpop.permute.xlu0 %6266  ;;  %6913 = vst [vmem:[#allocation10 + $0x8] sm:$0xff] %v6853_v1 }
0x19ba   :  { %6286 = vst.msk [vmem:[#allocation3 + $0x30] sm:$0xf] %vm3216_vm8, %v6267_v10 }
0x19e8   :  { %v8233_v25 = vpop.f32.mrf.mxu0 }
0x19e9   :  { %v6874_v54 = vadd.f32 %v8233_v25, %v11767_v16 }
0x19ea   :  { %v6865_v57 = vpop.f32.mrf.mxu0 }
0x19eb   :  { %6918 = vst [vmem:[#allocation10 + $0x30] sm:$0xff] %v6874_v54  ;;  %v6866_v4 = vadd.f32 %v11767_v16, %v6865_v57 }
0x19ec   :  { %v8234_v22 = vpop.f32.mrf.mxu0 }
0x19ed   :  { %6916 = vst [vmem:[#allocation10 + $0x20] sm:$0xff] %v6866_v4  ;;  %v6877_v0 = vadd.f32 %v8234_v22, %v11767_v16 }
0x19ee   :  { %v6868_v27 = vpop.f32.mrf.mxu0 }
0x19ef   :  { %6919 = vst [vmem:[#allocation10 + $0x38] sm:$0xff] %v6877_v0  ;;  %v6869_v23 = vadd.f32 %v11767_v16, %v6868_v27 }
0x19f1   :  { %6917 = vst [vmem:[#allocation10 + $0x28] sm:$0xff] %v6869_v23 }
0x1a03   :  { %v6653_v52 = vpop.permute.xlu0 %6652 }
0x1a04   :  { %6674 = vst.msk [vmem:[#allocation3 + $0x28] sm:$0xf] %vm3607_vm9, %v6653_v52 }
0x1a07   :  { %v6655_v50 = vpop.permute.xlu1 %6654  ;;  %v6649_v40 = vpop.permute.xlu0 %6648 }
0x1a08   :  { %6675 = vst.msk [vmem:[#allocation3 + $0x2c] sm:$0xf] %vm3607_vm9, %v6655_v50  ;;  %6672 = vst.msk [vmem:[#allocation3 + $0x20] sm:$0xf] %vm3607_vm9, %v6649_v40 }
0x1a0b   :  { %v6651_v9 = vpop.permute.xlu1 %6650  ;;  %v6271_v56 = vpop.permute.xlu0 %6270 }
0x1a0c   :  { %6673 = vst.msk [vmem:[#allocation3 + $0x24] sm:$0xf] %vm3607_vm9, %v6651_v9 }
0x1a0d   :  { %6288 = vst.msk [vmem:[#allocation3 + $0x38] sm:$0xf] %vm3216_vm8, %v6271_v56 }
0x1a0f   :  { %v6273_v46 = vpop.permute.xlu1 %6272  ;;  %v6657_v15 = vpop.permute.xlu0 %6656  ;;  %v8393_v60 = vld [vmem:[#allocation3 + $0x28] sm:$0xff]  }
0x1a10   :  { %6289 = vst.msk [vmem:[#allocation3 + $0x3c] sm:$0xf] %vm3216_vm8, %v6273_v46 }
0x1a11   :  { %6676 = vst.msk [vmem:[#allocation3 + $0x30] sm:$0xf] %vm3607_vm9, %v6657_v15 }
0x1a13   :  { %v6659_v12 = vpop.permute.xlu1 %6658  ;;  %v6661_v37 = vpop.permute.xlu0 %6660  ;;  %v8392_v63 = vld [vmem:[#allocation3 + $0x20] sm:$0xff]  }
0x1a14   :  { %6677 = vst.msk [vmem:[#allocation3 + $0x34] sm:$0xf] %vm3607_vm9, %v6659_v12  ;;  %6678 = vst.msk [vmem:[#allocation3 + $0x38] sm:$0xf] %vm3607_vm9, %v6661_v37  ;;  %8235 = vmatprep.mubr.bf16.mxu0 %v8392_v63 }
0x1a15   :  { %8236 = vmatmul.mubr.bf16.gmra.mxu0 %v8393_v60 }
0x1a17   :  { %v6663_v19 = vpop.permute.xlu1 %6662 }
0x1a18   :  { %6679 = vst.msk [vmem:[#allocation3 + $0x3c] sm:$0xf] %vm3607_vm9, %v6663_v19 }
0x1a1b   :  { %v8394_v59 = vld [vmem:[#allocation3 + $0x30] sm:$0xff]  }
0x1a1c   :  { %8239 = vmatprep.mubr.bf16.mxu0 %v8394_v59 }
0x1a1f   :  { %v8395_v11 = vld [vmem:[#allocation3 + $0x38] sm:$0xff]  }
0x1a20   :  { %8240 = vmatmul.mubr.bf16.gmra.mxu0 %v8395_v11 }
0x1ad5   :  { %v8237_v34 = vpop.f32.mrf.mxu0 }
0x1ad6   :  { %v6890_v26 = vadd.f32 %v8237_v34, %v11767_v16 }
0x1ad7   :  { %v6881_v13 = vpop.f32.mrf.mxu0 }
0x1ad8   :  { %6922 = vst [vmem:[#allocation10 + $0x50] sm:$0xff] %v6890_v26  ;;  %v6882_v30 = vadd.f32 %v11767_v16, %v6881_v13 }
0x1ad9   :  { %v8238_v62 = vpop.f32.mrf.mxu0 }
0x1ada   :  { %6920 = vst [vmem:[#allocation10 + $0x40] sm:$0xff] %v6882_v30  ;;  %v6893_v39 = vadd.f32 %v8238_v62, %v11767_v16 }
0x1adb   :  { %v6884_v28 = vpop.f32.mrf.mxu0 }
0x1adc   :  { %6923 = vst [vmem:[#allocation10 + $0x58] sm:$0xff] %v6893_v39  ;;  %v6885_v35 = vadd.f32 %v11767_v16, %v6884_v28 }
0x1ade   :  { %6921 = vst [vmem:[#allocation10 + $0x48] sm:$0xff] %v6885_v35 }
0x1ae0   :  { %v8241_v29 = vpop.f32.mrf.mxu0 }
0x1ae1   :  { %v6906_v36 = vadd.f32 %v8241_v29, %v11767_v16 }
0x1ae2   :  { %v6897_v58 = vpop.f32.mrf.mxu0 }
0x1ae3   :  { %6926 = vst [vmem:[#allocation10 + $0x70] sm:$0xff] %v6906_v36  ;;  %v6898_v6 = vadd.f32 %v11767_v16, %v6897_v58 }
0x1ae4   :  { %v8242_v53 = vpop.f32.mrf.mxu0 }
0x1ae5   :  { %6924 = vst [vmem:[#allocation10 + $0x60] sm:$0xff] %v6898_v6  ;;  %v6909_v17 = vadd.f32 %v8242_v53, %v11767_v16 }
0x1ae6   :  { %v6900_v41 = vpop.f32.mrf.mxu0 }
0x1ae7   :  { %6927 = vst [vmem:[#allocation10 + $0x78] sm:$0xff] %v6909_v17  ;;  %v6901_v18 = vadd.f32 %v11767_v16, %v6900_v41 }
0x1ae9   :  { %6925 = vst [vmem:[#allocation10 + $0x68] sm:$0xff] %v6901_v18 }
0x1aea   :  { %8979 = shalt.err (!%p8976_p5)
}
0x1aeb   :  { %s9009_s15 = smov 128   ;;  %s9010_s16 = smov 8  }
0x1aec   :  { %6939 = dma.vmem_to_hbm [thread:$0]  %s6934_s13, 2048, %s11807_s4, [#allocation6], %s9009_s15, %s9009_s15, %s9010_s16  }
0x1aed   :  { %8992 = dma.done.wait [#allocation6], 2048  }
0x1aee   :  { %8993 = vsyncadd [#allocation6], 4294965248 }
0x1aef   :  { %6943 = vsyncpa [#allocation5], 1 }
0x1af0   :  { %6944 = vsyncpa [#allocation8], 1 }
0x1af1   :  { %6945 = vsyncpa [#allocation6], 1 }

</bundles_post_ra>
